<compile_context>
chip_gen: v5e
topology: v5e:2x2
jax: 0.10.0
libtpu: 0.0.40
codegen_flags: <defaults>
</compile_context>

<pallas_src>
import jax
import jax.numpy as jnp
from jax import lax
from jax.experimental import pallas as pl
from jax.experimental.pallas import tpu as pltpu


# ---------------------------------------------------------------------------
# Small helpers
# ---------------------------------------------------------------------------
def _round_up(x, m):
    return (x + m - 1) // m * m


def _pad_axis(a, axis, new_size):
    pad = [(0, 0)] * a.ndim
    pad[axis] = (0, new_size - a.shape[axis])
    return jnp.pad(a, pad)


def _pad_gates(a, H, Hp):
    """Last axis is the fused 4H gate axis (i|f|g|o); pad each gate block H -> Hp."""
    lead = a.shape[:-1]
    a4 = a.reshape(*lead, 4, H)
    a4 = jnp.pad(a4, [(0, 0)] * (a4.ndim - 1) + [(0, Hp - H)])
    return a4.reshape(*lead, 4 * Hp)


def _pick_chunk(T, target):
    c = min(T, max(1, target))
    while T % c != 0:
        c -= 1
    return max(c, 1)


_VMEM_LIMIT_CACHE = None


def _vmem_limit_bytes():
    """~85% of physical VMEM (128 MiB v5e/v6e, 64 MiB v7x), with a safe fallback."""
    global _VMEM_LIMIT_CACHE
    if _VMEM_LIMIT_CACHE is None:
        try:
            cap = int(pltpu.get_tpu_info().vmem_capacity_bytes)
        except Exception:
            cap = 64 * 1024 * 1024
        _VMEM_LIMIT_CACHE = int(min(cap * 0.85, 112 * 1024 * 1024))
    return _VMEM_LIMIT_CACHE


# ---------------------------------------------------------------------------
# Fused bidirectional-LSTM layer kernel (projection + recurrence [+ final FC])
# ---------------------------------------------------------------------------
def _make_layer_kernel(P, chunk, Bp, Dp, Hp, Gp, Hout, fuse_fc, cdt, out_dtype):
    """Kernel ref order:
      inputs : x_fwd parts (P)          each (chunk, Bp, Dp)   [chunk c]
               x_bwd parts (P)          each (chunk, Bp, Dp)   [chunk nchunks-1-c]
               wih (2, P, Dp, Gp), whh (2, Hp, Gp), bias (2, 1, Gp)
               [fuse_fc] wo (2, Hp, Hout), bo (1, Hout)
      outputs: out_f (chunk, Bp, Hout)  [chunk c]
               out_b (chunk, Bp, Hout)  [chunk nchunks-1-c]
      scratch: h_f, c_f, h_b, c_b (Bp, Hp) f32
               xp_f, xp_b (chunk, Bp, Gp) f32
               [fuse_fc] hb_f, hb_b (chunk, Bp, Hp) f32
    """
    # Adaptive unroll: keep live (B, 4H) gate intermediates inside the 64x4KiB vreg file.
    unroll = 4 if Bp * Gp <= 8192 else 2

    def kernel(*refs):
        idx = 0
        xf = refs[idx:idx + P]; idx += P
        xb = refs[idx:idx + P]; idx += P
        wih_ref = refs[idx]; idx += 1
        whh_ref = refs[idx]; idx += 1
        b_ref = refs[idx]; idx += 1
        if fuse_fc:
            wo_ref = refs[idx]; idx += 1
            bo_ref = refs[idx]; idx += 1
        out_f_ref = refs[idx]; idx += 1
        out_b_ref = refs[idx]; idx += 1
        h_f, c_f, h_b, c_b = refs[idx:idx + 4]; idx += 4
        xp_f, xp_b = refs[idx:idx + 2]; idx += 2
        if fuse_fc:
            hb_f, hb_b = refs[idx:idx + 2]; idx += 2

        # Zero the carries once, at the first time chunk.
        @pl.when(pl.program_id(0) == 0)
        def _():
            h_f[...] = jnp.zeros_like(h_f)
            c_f[...] = jnp.zeros_like(c_f)
            h_b[...] = jnp.zeros_like(h_b)
            c_b[...] = jnp.zeros_like(c_b)

        # --- chunk-wide fused input projection, kept in VMEM (no HBM round trip) ---
        def project(x_refs, d, xp_scr):
            acc = jnp.dot(x_refs[0][...].reshape(chunk * Bp, Dp), wih_ref[d, 0],
                          preferred_element_type=jnp.float32)
            for p in range(1, P):
                acc = acc + jnp.dot(x_refs[p][...].reshape(chunk * Bp, Dp), wih_ref[d, p],
                                    preferred_element_type=jnp.float32)
            xp_scr[...] = (acc + b_ref[d]).reshape(chunk, Bp, Gp)

        project(xf, 0, xp_f)
        project(xb, 1, xp_b)

        whh_f = whh_ref[0]          # hoist recurrent-weight loads out of the loop
        whh_b = whh_ref[1]

        def sig(v):                 # sigmoid(x) = 0.5*tanh(0.5*x)+0.5 : 1 EUP op + VPU
            return 0.5 * jnp.tanh(0.5 * v) + 0.5

        def step(s, carry):
            tf = s
            tb = chunk - 1 - s
            # Two independent small matmuls / gate chains per iteration -> ILP.
            g_f = xp_f[tf] + jnp.dot(h_f[...].astype(cdt), whh_f,
                                     preferred_element_type=jnp.float32)
            g_b = xp_b[tb] + jnp.dot(h_b[...].astype(cdt), whh_b,
                                     preferred_element_type=jnp.float32)
            i_f = sig(g_f[:, 0 * Hp:1 * Hp]); i_b = sig(g_b[:, 0 * Hp:1 * Hp])
            f_f = sig(g_f[:, 1 * Hp:2 * Hp]); f_b = sig(g_b[:, 1 * Hp:2 * Hp])
            gg_f = jnp.tanh(g_f[:, 2 * Hp:3 * Hp]); gg_b = jnp.tanh(g_b[:, 2 * Hp:3 * Hp])
            o_f = sig(g_f[:, 3 * Hp:4 * Hp]); o_b = sig(g_b[:, 3 * Hp:4 * Hp])
            cf_new = f_f * c_f[...] + i_f * gg_f
            cb_new = f_b * c_b[...] + i_b * gg_b
            hf_new = o_f * jnp.tanh(cf_new)
            hb_new = o_b * jnp.tanh(cb_new)
            c_f[...] = cf_new
            c_b[...] = cb_new
            h_f[...] = hf_new
            h_b[...] = hb_new
            if fuse_fc:
                hb_f[tf] = hf_new
                hb_b[tb] = hb_new
            else:
                out_f_ref[tf] = hf_new.astype(out_dtype)
                out_b_ref[tb] = hb_new.astype(out_dtype)
            return carry

        if chunk <= 16:
            # Full static unroll: maximum LLO visibility for the latency-bound loop.
            for s in range(chunk):
                step(s, 0)
        else:
            lax.fori_loop(0, chunk, step, 0, unroll=unroll)

        if fuse_fc:
            # Fused final Linear: per-direction partial logits for the whole chunk
            # (one well-shaped MXU matmul outside the serial loop; the last layer's
            # hidden states never touch HBM).
            pf = jnp.dot(hb_f[...].reshape(chunk * Bp, Hp).astype(cdt), wo_ref[0],
                         preferred_element_type=jnp.float32)
            pb = jnp.dot(hb_b[...].reshape(chunk * Bp, Hp).astype(cdt), wo_ref[1],
                         preferred_element_type=jnp.float32)
            out_f_ref[...] = (pf + bo_ref[...]).reshape(chunk, Bp, Hout).astype(out_dtype)
            out_b_ref[...] = pb.reshape(chunk, Bp, Hout).astype(out_dtype)

    return kernel


def bilstm_layer(x_parts, wih, whh, b, *, fc_w=None, fc_b=None,
                 time_chunk=64, compute_dtype=jnp.float32):
    """One bidirectional LSTM layer (optionally fused with the final Linear).

    x_parts: list of (T, Bp, Dp) arrays (1 part for layer 0, 2 dir-halves for deeper
             layers; the 2H concat is never materialized).
    wih (2, P, Dp, Gp), whh (2, Hp, Gp), b (2, 1, Gp) — padded, fused-gate weights.
    fc_w (2, Hp, Op) / fc_b (1, Op): if given, the layer emits per-direction partial
    logits instead of hidden states.
    Returns (out_fwd, out_bwd), each (T, Bp, Hout).
    """
    cdt = jnp.dtype(compute_dtype)
    T, Bp, Dp = x_parts[0].shape
    P = len(x_parts)
    Hp, Gp = whh.shape[1], whh.shape[2]
    fuse_fc = fc_w is not None
    Hout = fc_w.shape[-1] if fuse_fc else Hp
    out_dtype = jnp.float32 if fuse_fc else cdt

    chunk = _pick_chunk(T, time_chunk)
    nchunks = T // chunk

    xs = [x.astype(cdt) for x in x_parts]
    wih_c = wih.astype(cdt)          # bf16 MXU inputs when compute_dtype=bf16
    whh_c = whh.astype(cdt)

    kernel = _make_layer_kernel(P, chunk, Bp, Dp, Hp, Gp, Hout, fuse_fc, cdt, out_dtype)

    x_spec_f = pl.BlockSpec((chunk, Bp, Dp), lambda c: (c, 0, 0))
    x_spec_b = pl.BlockSpec((chunk, Bp, Dp), lambda c, n=nchunks: (n - 1 - c, 0, 0))
    in_specs = [x_spec_f] * P + [x_spec_b] * P + [
        pl.BlockSpec((2, P, Dp, Gp), lambda c: (0, 0, 0, 0)),   # resident weights
        pl.BlockSpec((2, Hp, Gp), lambda c: (0, 0, 0)),
        pl.BlockSpec((2, 1, Gp), lambda c: (0, 0, 0)),
    ]
    args = xs + xs + [wih_c, whh_c, b]
    if fuse_fc:
        in_specs += [pl.BlockSpec((2, Hp, Hout), lambda c: (0, 0, 0)),
                     pl.BlockSpec((1, Hout), lambda c: (0, 0))]
        args += [fc_w.astype(cdt), fc_b]

    out_shape = (jax.ShapeDtypeStruct((T, Bp, Hout), out_dtype),
                 jax.ShapeDtypeStruct((T, Bp, Hout), out_dtype))
    out_specs = (pl.BlockSpec((chunk, Bp, Hout), lambda c: (c, 0, 0)),
                 pl.BlockSpec((chunk, Bp, Hout), lambda c, n=nchunks: (n - 1 - c, 0, 0)))

    scratch = [pltpu.VMEM((Bp, Hp), jnp.float32)] * 4 \
            + [pltpu.VMEM((chunk, Bp, Gp), jnp.float32)] * 2
    if fuse_fc:
        scratch += [pltpu.VMEM((chunk, Bp, Hp), jnp.float32)] * 2

    flops = 2 * (2 * T * Bp * P * Dp * Gp + 2 * T * Bp * Hp * Gp)
    if fuse_fc:
        flops += 2 * 2 * T * Bp * Hp * Hout
    bytes_accessed = int(
        2 * sum(int(x.size) * cdt.itemsize for x in xs)                 # x read per dir
        + (int(wih_c.size) + int(whh_c.size)) * cdt.itemsize + int(b.size) * 4
        + 2 * T * Bp * Hout * jnp.dtype(out_dtype).itemsize)

    return pl.pallas_call(
        kernel,
        out_shape=out_shape,
        grid=(nchunks,),
        in_specs=in_specs,
        out_specs=out_specs,
        scratch_shapes=scratch,
        compiler_params=pltpu.CompilerParams(
            dimension_semantics=("arbitrary",),          # serial carry across chunks
            vmem_limit_bytes=_vmem_limit_bytes()),
        cost_estimate=pl.CostEstimate(
            flops=int(flops),
            transcendentals=int(2 * T * Bp * 5 * Hp),
            bytes_accessed=bytes_accessed),
    )(*args)


# ---------------------------------------------------------------------------
# Parameters (PyTorch-equivalent layout) + TPU-padded copies
# ---------------------------------------------------------------------------
def init_params(key, vocab_size, output_size, embedding_dim, hidden_dim, n_layers):
    H = hidden_dim
    G = 4 * H
    k = 1.0 / (H ** 0.5)
    keys = iter(jax.random.split(key, 3 + 4 * n_layers))

    def unif(shape, scale):
        return jax.random.uniform(next(keys), shape, jnp.float32, -scale, scale)

    params = {
        "embedding": jax.random.normal(next(keys), (vocab_size, embedding_dim),
                                       jnp.float32) * 0.1,
        "lstm_layers": [],
    }
    for layer in range(n_layers):
        P, Dp = (1, embedding_dim) if layer == 0 else (2, H)
        wih = unif((2, P, Dp, G), k)               # (dir, part, Dp, 4H), gates i|f|g|o
        whh = unif((2, H, G), k)
        b = unif((2, 1, G), k) + unif((2, 1, G), k)   # b_ih + b_hh folded
        params["lstm_layers"].append((wih, whh, b))
    kf = 1.0 / ((2 * H) ** 0.5)
    params["fc_w"] = unif((2 * H, output_size), kf)
    params["fc_b"] = unif((output_size,), kf)
    return params


def prepare_pallas_params(params):
    """Zero-pad to lane/sublane-friendly dims (H, E, O -> multiples of 128).

    Padded lanes stay exactly zero through the recurrence (zero weights / bias rows),
    so the kernel math on the real lanes is bit-identical to the unpadded model.
    """
    E = params["embedding"].shape[1]
    H = params["lstm_layers"][0][1].shape[1]
    O = params["fc_w"].shape[1]
    Ep, Hp, Op = _round_up(E, 128), _round_up(H, 128), _round_up(O, 128)

    pp = {"output_size": O,
          "embedding": _pad_axis(params["embedding"], 1, Ep),
          "lstm_layers": []}
    for li, (wih, whh, b) in enumerate(params["lstm_layers"]):
        Dpp = Ep if li == 0 else Hp
        wih_p = _pad_axis(_pad_gates(wih, H, Hp), 2, Dpp)       # (2, P, Dpp, 4Hp)
        whh_p = _pad_axis(_pad_gates(whh, H, Hp), 1, Hp)        # (2, Hp, 4Hp)
        b_p = _pad_gates(b, H, Hp)                              # (2, 1, 4Hp)
        pp["lstm_layers"].append((wih_p, whh_p, b_p))
    fc = params["fc_w"].reshape(2, H, O)
    pp["fc_w"] = _pad_axis(_pad_axis(fc, 1, Hp), 2, Op)         # (2, Hp, Op)
    pp["fc_b"] = _pad_axis(params["fc_b"].reshape(1, O), 1, Op)  # (1, Op)
    return pp


# ---------------------------------------------------------------------------
# Forward pass
# ---------------------------------------------------------------------------
def bidirect_lstm_forward(tokens, pparams, *, compute_dtype=jnp.float32, time_chunk=64):
    cdt = jnp.dtype(compute_dtype)
    T, B = tokens.shape
    sub = 8 if cdt == jnp.dtype(jnp.float32) else 16     # sublane tile per dtype
    Bp = _round_up(B, sub)
    tok = jnp.pad(tokens, ((0, 0), (0, Bp - B)))

    # Embedding lookup: plain-JAX glue (HBM gather); table columns are pre-padded.
    x = pparams["embedding"][tok]                        # (T, Bp, Ep) f32
    x_parts = [x.astype(cdt)]

    n_layers = len(pparams["lstm_layers"])
    out = None
    for li, (wih, whh, b) in enumerate(pparams["lstm_layers"]):
        last = li == n_layers - 1
        of, ob = bilstm_layer(
            x_parts, wih, whh, b,
            fc_w=pparams["fc_w"] if last else None,
            fc_b=pparams["fc_b"] if last else None,
            time_chunk=time_chunk, compute_dtype=cdt)
        if last:
            # Final Linear was fused into the last layer; combine per-dir partials.
            logits = of + ob                             # tiny (T, Bp, Op) f32 add
            out = logits[:, :B, :pparams["output_size"]]
        else:
            x_parts = [of, ob]                           # dir-split halves, no concat
            # TODO(synk): nn.LSTM inter-layer dropout (p=0.2) is training-only; identity at eval.
    # TODO(synk): the trailing nn.Dropout is identity in eval/inference mode.
    return out


# ---------------------------------------------------------------------------
# Pure-JAX reference (correctness check, unpadded params)
# ---------------------------------------------------------------------------
def _lstm_dir_ref(x, wih_cat, whh, b):
    H = whh.shape[0]
    B = x.shape[1]

    def step(carry, x_t):
        h, c = carry
        g = (jnp.dot(x_t, wih_cat, precision=lax.Precision.HIGHEST)
             + jnp.dot(h, whh, precision=lax.Precision.HIGHEST) + b)
        i = jax.nn.sigmoid(g[:, 0 * H:1 * H])
        f = jax.nn.sigmoid(g[:, 1 * H:2 * H])
        gg = jnp.tanh(g[:, 2 * H:3 * H])
        o = jax.nn.sigmoid(g[:, 3 * H:4 * H])
        c = f * c + i * gg
        h = o * jnp.tanh(c)
        return (h, c), h

    init = (jnp.zeros((B, H), jnp.float32), jnp.zeros((B, H), jnp.float32))
    _, hs = lax.scan(step, init, x)
    return hs


def _forward_ref(tokens, params):
    x = params["embedding"][tokens]
    for (wih, whh, b) in params["lstm_layers"]:
        P, Dp, G = wih.shape[1], wih.shape[2], wih.shape[3]
        fwd = _lstm_dir_ref(x, wih[0].reshape(P * Dp, G), whh[0], b[0])
        bwd = _lstm_dir_ref(x[::-1], wih[1].reshape(P * Dp, G), whh[1], b[1])[::-1]
        x = jnp.concatenate([fwd, bwd], axis=-1)
    return (jnp.dot(x, params["fc_w"], precision=lax.Precision.HIGHEST)
            + params["fc_b"])


# ---------------------------------------------------------------------------
if __name__ == "__main__":
    vocab_size, output_size = 50, 5
    embedding_dim, hidden_dim, n_layers = 32, 32, 2
    seq_len, batch = 8, 2

    root = jax.random.PRNGKey(0)
    k_tok, k_par = jax.random.split(root)
    tokens = jax.random.randint(k_tok, (seq_len, batch), 0, vocab_size, jnp.int32)
    params = init_params(k_par, vocab_size, output_size,
                         embedding_dim, hidden_dim, n_layers)
    pparams = prepare_pallas_params(params)

    ref = _forward_ref(tokens, params)

    # f32 path: strict check of the kernel logic.
    out32 = jax.block_until_ready(
        bidirect_lstm_forward(tokens, pparams, compute_dtype=jnp.float32))
    assert out32.shape == (seq_len, batch, output_size), out32.shape
    if not jnp.allclose(out32, ref, atol=1e-3, rtol=1e-3):
        raise AssertionError("Pallas f32 output does not match JAX reference")

    # bf16-MXU / f32-accumulation path: the performance configuration.
    out16 = jax.block_until_ready(
        bidirect_lstm_forward(tokens, pparams, compute_dtype=jnp.bfloat16))
    assert out16.shape == (seq_len, batch, output_size), out16.shape
    if not jnp.allclose(out16, ref, atol=5e-2, rtol=5e-2):
        raise AssertionError("Pallas bf16 output drifted too far from JAX reference")

    print("KERNEL_OK")
</pallas_src>

<mosaic_0001>
module attributes {stable_mosaic.version = 11 : i64} {
  func.func @kernel(%arg0: i32, %arg1: memref<8x8x128xf32, #tpu.memory_space<vmem>>, %arg2: memref<8x8x128xf32, #tpu.memory_space<vmem>>, %arg3: memref<2x1x128x512xf32, #tpu.memory_space<vmem>>, %arg4: memref<2x128x512xf32, #tpu.memory_space<vmem>>, %arg5: memref<2x1x512xf32, #tpu.memory_space<vmem>>, %arg6: memref<8x8x128xf32, #tpu.memory_space<vmem>>, %arg7: memref<8x8x128xf32, #tpu.memory_space<vmem>>, %arg8: memref<8x128xf32, #tpu.memory_space<vmem>>, %arg9: memref<8x128xf32, #tpu.memory_space<vmem>>, %arg10: memref<8x128xf32, #tpu.memory_space<vmem>>, %arg11: memref<8x128xf32, #tpu.memory_space<vmem>>, %arg12: memref<8x8x512xf32, #tpu.memory_space<vmem>>, %arg13: memref<8x8x512xf32, #tpu.memory_space<vmem>>) attributes {dimension_semantics = [#tpu.dimension_semantics<arbitrary>], iteration_bounds = array<i64: 1>, scalar_prefetch = 0 : i64, scratch_operands = 6 : i64, tpu.core_type = #tpu.core_type<tc>, window_params = [{transform_indices = @transform_0, window_bounds = array<i64: 8, 8, 128>}, {transform_indices = @transform_1, window_bounds = array<i64: 8, 8, 128>}, {pipeline_mode = #tpu.pipeline_mode<synchronous>, transform_indices = @transform_2, window_bounds = array<i64: 2, 1, 128, 512>}, {pipeline_mode = #tpu.pipeline_mode<synchronous>, transform_indices = @transform_3, window_bounds = array<i64: 2, 128, 512>}, {pipeline_mode = #tpu.pipeline_mode<synchronous>, transform_indices = @transform_4, window_bounds = array<i64: 2, 1, 512>}, {transform_indices = @transform_5, window_bounds = array<i64: 8, 8, 128>}, {transform_indices = @transform_6, window_bounds = array<i64: 8, 8, 128>}]} {
    %c0_i32 = arith.constant 0 : i32
    %0 = arith.cmpi eq, %arg0, %c0_i32 : i32
    %1 = arith.extui %0 : i1 to i32
    %c0_i32_0 = arith.constant 0 : i32
    %2 = arith.cmpi ne, %1, %c0_i32_0 : i32
    scf.if %2 {
      %cst_410 = arith.constant 0.000000e+00 : f32
      %701 = vector.broadcast %cst_410 : f32 to vector<8x128xf32>
      %c0_411 = arith.constant 0 : index
      %c0_412 = arith.constant 0 : index
      %702 = vector.load %arg8[%c0_411, %c0_412] : memref<8x128xf32, #tpu.memory_space<vmem>>, vector<8x128xf32>
      tpu.vector_store %arg8[%c0_411, %c0_412], %701 {strides = array<i32>} : memref<8x128xf32, #tpu.memory_space<vmem>>, vector<8x128xf32>,
      %cst_413 = arith.constant 0.000000e+00 : f32
      %703 = vector.broadcast %cst_413 : f32 to vector<8x128xf32>
      %c0_414 = arith.constant 0 : index
      %c0_415 = arith.constant 0 : index
      %704 = vector.load %arg9[%c0_414, %c0_415] : memref<8x128xf32, #tpu.memory_space<vmem>>, vector<8x128xf32>
      tpu.vector_store %arg9[%c0_414, %c0_415], %703 {strides = array<i32>} : memref<8x128xf32, #tpu.memory_space<vmem>>, vector<8x128xf32>,
      %cst_416 = arith.constant 0.000000e+00 : f32
      %705 = vector.broadcast %cst_416 : f32 to vector<8x128xf32>
      %c0_417 = arith.constant 0 : index
      %c0_418 = arith.constant 0 : index
      %706 = vector.load %arg10[%c0_417, %c0_418] : memref<8x128xf32, #tpu.memory_space<vmem>>, vector<8x128xf32>
      tpu.vector_store %arg10[%c0_417, %c0_418], %705 {strides = array<i32>} : memref<8x128xf32, #tpu.memory_space<vmem>>, vector<8x128xf32>,
      %cst_419 = arith.constant 0.000000e+00 : f32
      %707 = vector.broadcast %cst_419 : f32 to vector<8x128xf32>
      %c0_420 = arith.constant 0 : index
      %c0_421 = arith.constant 0 : index
      %708 = vector.load %arg11[%c0_420, %c0_421] : memref<8x128xf32, #tpu.memory_space<vmem>>, vector<8x128xf32>
      tpu.vector_store %arg11[%c0_420, %c0_421], %707 {strides = array<i32>} : memref<8x128xf32, #tpu.memory_space<vmem>>, vector<8x128xf32>,
    } else {
    }
    %c0 = arith.constant 0 : index
    %c0_1 = arith.constant 0 : index
    %c0_2 = arith.constant 0 : index
    %3 = vector.load %arg1[%c0, %c0_1, %c0_2] : memref<8x8x128xf32, #tpu.memory_space<vmem>>, vector<8x8x128xf32>
    %4 = vector.shape_cast %3 : vector<8x8x128xf32> to vector<64x128xf32>
    %c0_3 = arith.constant 0 : index
    %c0_4 = arith.constant 0 : index
    %c0_5 = arith.constant 0 : index
    %c0_6 = arith.constant 0 : index
    %5 = vector.load %arg3[%c0_3, %c0_4, %c0_5, %c0_6] : memref<2x1x128x512xf32, #tpu.memory_space<vmem>>, vector<1x1x128x512xf32>
    %6 = vector.shape_cast %5 : vector<1x1x128x512xf32> to vector<128x512xf32>
    %cst = arith.constant dense<0.000000e+00> : vector<64x512xf32>
    %7 = tpu.matmul %4, %6, %cst {dimension_numbers = #tpu.dot_dimension_numbers<[1], [0], [0], [1], [0, 0, 1, 1], [], []>} : vector<64x128xf32>, vector<128x512xf32>, vector<64x512xf32> -> vector<64x512xf32>
    %c0_7 = arith.constant 0 : index
    %c0_8 = arith.constant 0 : index
    %c0_9 = arith.constant 0 : index
    %8 = vector.load %arg5[%c0_7, %c0_8, %c0_9] : memref<2x1x512xf32, #tpu.memory_space<vmem>>, vector<1x1x512xf32>
    %9 = vector.shape_cast %8 : vector<1x1x512xf32> to vector<1x512xf32>
    %10 = vector.broadcast %9 : vector<1x512xf32> to vector<64x512xf32>
    %11 = arith.addf %7, %10 : vector<64x512xf32>
    %12 = vector.shape_cast %11 : vector<64x512xf32> to vector<8x8x512xf32>
    %c0_10 = arith.constant 0 : index
    %c0_11 = arith.constant 0 : index
    %c0_12 = arith.constant 0 : index
    %13 = vector.load %arg12[%c0_10, %c0_11, %c0_12] : memref<8x8x512xf32, #tpu.memory_space<vmem>>, vector<8x8x512xf32>
    tpu.vector_store %arg12[%c0_10, %c0_11, %c0_12], %12 {strides = array<i32>} : memref<8x8x512xf32, #tpu.memory_space<vmem>>, vector<8x8x512xf32>,
    %c0_13 = arith.constant 0 : index
    %c0_14 = arith.constant 0 : index
    %c0_15 = arith.constant 0 : index
    %14 = vector.load %arg2[%c0_13, %c0_14, %c0_15] : memref<8x8x128xf32, #tpu.memory_space<vmem>>, vector<8x8x128xf32>
    %15 = vector.shape_cast %14 : vector<8x8x128xf32> to vector<64x128xf32>
    %c1 = arith.constant 1 : index
    %c0_16 = arith.constant 0 : index
    %c0_17 = arith.constant 0 : index
    %c0_18 = arith.constant 0 : index
    %16 = vector.load %arg3[%c1, %c0_16, %c0_17, %c0_18] : memref<2x1x128x512xf32, #tpu.memory_space<vmem>>, vector<1x1x128x512xf32>
    %17 = vector.shape_cast %16 : vector<1x1x128x512xf32> to vector<128x512xf32>
    %cst_19 = arith.constant dense<0.000000e+00> : vector<64x512xf32>
    %18 = tpu.matmul %15, %17, %cst_19 {dimension_numbers = #tpu.dot_dimension_numbers<[1], [0], [0], [1], [0, 0, 1, 1], [], []>} : vector<64x128xf32>, vector<128x512xf32>, vector<64x512xf32> -> vector<64x512xf32>
    %c1_20 = arith.constant 1 : index
    %c0_21 = arith.constant 0 : index
    %c0_22 = arith.constant 0 : index
    %19 = vector.load %arg5[%c1_20, %c0_21, %c0_22] : memref<2x1x512xf32, #tpu.memory_space<vmem>>, vector<1x1x512xf32>
    %20 = vector.shape_cast %19 : vector<1x1x512xf32> to vector<1x512xf32>
    %21 = vector.broadcast %20 : vector<1x512xf32> to vector<64x512xf32>
    %22 = arith.addf %18, %21 : vector<64x512xf32>
    %23 = vector.shape_cast %22 : vector<64x512xf32> to vector<8x8x512xf32>
    %c0_23 = arith.constant 0 : index
    %c0_24 = arith.constant 0 : index
    %c0_25 = arith.constant 0 : index
    %24 = vector.load %arg13[%c0_23, %c0_24, %c0_25] : memref<8x8x512xf32, #tpu.memory_space<vmem>>, vector<8x8x512xf32>
    tpu.vector_store %arg13[%c0_23, %c0_24, %c0_25], %23 {strides = array<i32>} : memref<8x8x512xf32, #tpu.memory_space<vmem>>, vector<8x8x512xf32>,
    %c0_26 = arith.constant 0 : index
    %c0_27 = arith.constant 0 : index
    %c0_28 = arith.constant 0 : index
    %25 = vector.load %arg4[%c0_26, %c0_27, %c0_28] : memref<2x128x512xf32, #tpu.memory_space<vmem>>, vector<1x128x512xf32>
    %26 = vector.shape_cast %25 : vector<1x128x512xf32> to vector<128x512xf32>
    %c1_29 = arith.constant 1 : index
    %c0_30 = arith.constant 0 : index
    %c0_31 = arith.constant 0 : index
    %27 = vector.load %arg4[%c1_29, %c0_30, %c0_31] : memref<2x128x512xf32, #tpu.memory_space<vmem>>, vector<1x128x512xf32>
    %28 = vector.shape_cast %27 : vector<1x128x512xf32> to vector<128x512xf32>
    %c0_32 = arith.constant 0 : index
    %c0_33 = arith.constant 0 : index
    %c0_34 = arith.constant 0 : index
    %29 = vector.load %arg12[%c0_32, %c0_33, %c0_34] : memref<8x8x512xf32, #tpu.memory_space<vmem>>, vector<1x8x512xf32>
    %30 = vector.shape_cast %29 : vector<1x8x512xf32> to vector<8x512xf32>
    %c0_35 = arith.constant 0 : index
    %c0_36 = arith.constant 0 : index
    %31 = vector.load %arg8[%c0_35, %c0_36] : memref<8x128xf32, #tpu.memory_space<vmem>>, vector<8x128xf32>
    %cst_37 = arith.constant dense<0.000000e+00> : vector<8x512xf32>
    %32 = tpu.matmul %31, %26, %cst_37 {dimension_numbers = #tpu.dot_dimension_numbers<[1], [0], [0], [1], [0, 0, 1, 1], [], []>} : vector<8x128xf32>, vector<128x512xf32>, vector<8x512xf32> -> vector<8x512xf32>
    %33 = arith.addf %30, %32 : vector<8x512xf32>
    %c7 = arith.constant 7 : index
    %c0_38 = arith.constant 0 : index
    %c0_39 = arith.constant 0 : index
    %34 = vector.load %arg13[%c7, %c0_38, %c0_39] : memref<8x8x512xf32, #tpu.memory_space<vmem>>, vector<1x8x512xf32>
    %35 = vector.shape_cast %34 : vector<1x8x512xf32> to vector<8x512xf32>
    %c0_40 = arith.constant 0 : index
    %c0_41 = arith.constant 0 : index
    %36 = vector.load %arg10[%c0_40, %c0_41] : memref<8x128xf32, #tpu.memory_space<vmem>>, vector<8x128xf32>
    %cst_42 = arith.constant dense<0.000000e+00> : vector<8x512xf32>
    %37 = tpu.matmul %36, %28, %cst_42 {dimension_numbers = #tpu.dot_dimension_numbers<[1], [0], [0], [1], [0, 0, 1, 1], [], []>} : vector<8x128xf32>, vector<128x512xf32>, vector<8x512xf32> -> vector<8x512xf32>
    %38 = arith.addf %35, %37 : vector<8x512xf32>
    %39 = vector.extract_strided_slice %33 {offsets = [0, 0], sizes = [8, 128], strides = [1, 1]} : vector<8x512xf32> to vector<8x128xf32>
    %cst_43 = arith.constant 5.000000e-01 : f32
    %40 = vector.broadcast %cst_43 : f32 to vector<8x128xf32>
    %41 = arith.mulf %40, %39 : vector<8x128xf32>
    %42 = math.tanh %41 : vector<8x128xf32>
    %cst_44 = arith.constant 5.000000e-01 : f32
    %43 = vector.broadcast %cst_44 : f32 to vector<8x128xf32>
    %44 = arith.mulf %43, %42 : vector<8x128xf32>
    %cst_45 = arith.constant 5.000000e-01 : f32
    %45 = vector.broadcast %cst_45 : f32 to vector<8x128xf32>
    %46 = arith.addf %44, %45 : vector<8x128xf32>
    %47 = vector.extract_strided_slice %38 {offsets = [0, 0], sizes = [8, 128], strides = [1, 1]} : vector<8x512xf32> to vector<8x128xf32>
    %cst_46 = arith.constant 5.000000e-01 : f32
    %48 = vector.broadcast %cst_46 : f32 to vector<8x128xf32>
    %49 = arith.mulf %48, %47 : vector<8x128xf32>
    %50 = math.tanh %49 : vector<8x128xf32>
    %cst_47 = arith.constant 5.000000e-01 : f32
    %51 = vector.broadcast %cst_47 : f32 to vector<8x128xf32>
    %52 = arith.mulf %51, %50 : vector<8x128xf32>
    %cst_48 = arith.constant 5.000000e-01 : f32
    %53 = vector.broadcast %cst_48 : f32 to vector<8x128xf32>
    %54 = arith.addf %52, %53 : vector<8x128xf32>
    %55 = vector.extract_strided_slice %33 {offsets = [0, 128], sizes = [8, 128], strides = [1, 1]} : vector<8x512xf32> to vector<8x128xf32>
    %cst_49 = arith.constant 5.000000e-01 : f32
    %56 = vector.broadcast %cst_49 : f32 to vector<8x128xf32>
    %57 = arith.mulf %56, %55 : vector<8x128xf32>
    %58 = math.tanh %57 : vector<8x128xf32>
    %cst_50 = arith.constant 5.000000e-01 : f32
    %59 = vector.broadcast %cst_50 : f32 to vector<8x128xf32>
    %60 = arith.mulf %59, %58 : vector<8x128xf32>
    %cst_51 = arith.constant 5.000000e-01 : f32
    %61 = vector.broadcast %cst_51 : f32 to vector<8x128xf32>
    %62 = arith.addf %60, %61 : vector<8x128xf32>
    %63 = vector.extract_strided_slice %38 {offsets = [0, 128], sizes = [8, 128], strides = [1, 1]} : vector<8x512xf32> to vector<8x128xf32>
    %cst_52 = arith.constant 5.000000e-01 : f32
    %64 = vector.broadcast %cst_52 : f32 to vector<8x128xf32>
    %65 = arith.mulf %64, %63 : vector<8x128xf32>
    %66 = math.tanh %65 : vector<8x128xf32>
    %cst_53 = arith.constant 5.000000e-01 : f32
    %67 = vector.broadcast %cst_53 : f32 to vector<8x128xf32>
    %68 = arith.mulf %67, %66 : vector<8x128xf32>
    %cst_54 = arith.constant 5.000000e-01 : f32
    %69 = vector.broadcast %cst_54 : f32 to vector<8x128xf32>
    %70 = arith.addf %68, %69 : vector<8x128xf32>
    %71 = vector.extract_strided_slice %33 {offsets = [0, 256], sizes = [8, 128], strides = [1, 1]} : vector<8x512xf32> to vector<8x128xf32>
    %72 = math.tanh %71 : vector<8x128xf32>
    %73 = vector.extract_strided_slice %38 {offsets = [0, 256], sizes = [8, 128], strides = [1, 1]} : vector<8x512xf32> to vector<8x128xf32>
    %74 = math.tanh %73 : vector<8x128xf32>
    %75 = vector.extract_strided_slice %33 {offsets = [0, 384], sizes = [8, 128], strides = [1, 1]} : vector<8x512xf32> to vector<8x128xf32>
    %cst_55 = arith.constant 5.000000e-01 : f32
    %76 = vector.broadcast %cst_55 : f32 to vector<8x128xf32>
    %77 = arith.mulf %76, %75 : vector<8x128xf32>
    %78 = math.tanh %77 : vector<8x128xf32>
    %cst_56 = arith.constant 5.000000e-01 : f32
    %79 = vector.broadcast %cst_56 : f32 to vector<8x128xf32>
    %80 = arith.mulf %79, %78 : vector<8x128xf32>
    %cst_57 = arith.constant 5.000000e-01 : f32
    %81 = vector.broadcast %cst_57 : f32 to vector<8x128xf32>
    %82 = arith.addf %80, %81 : vector<8x128xf32>
    %83 = vector.extract_strided_slice %38 {offsets = [0, 384], sizes = [8, 128], strides = [1, 1]} : vector<8x512xf32> to vector<8x128xf32>
    %cst_58 = arith.constant 5.000000e-01 : f32
    %84 = vector.broadcast %cst_58 : f32 to vector<8x128xf32>
    %85 = arith.mulf %84, %83 : vector<8x128xf32>
    %86 = math.tanh %85 : vector<8x128xf32>
    %cst_59 = arith.constant 5.000000e-01 : f32
    %87 = vector.broadcast %cst_59 : f32 to vector<8x128xf32>
    %88 = arith.mulf %87, %86 : vector<8x128xf32>
    %cst_60 = arith.constant 5.000000e-01 : f32
    %89 = vector.broadcast %cst_60 : f32 to vector<8x128xf32>
    %90 = arith.addf %88, %89 : vector<8x128xf32>
    %c0_61 = arith.constant 0 : index
    %c0_62 = arith.constant 0 : index
    %91 = vector.load %arg9[%c0_61, %c0_62] : memref<8x128xf32, #tpu.memory_space<vmem>>, vector<8x128xf32>
    %92 = arith.mulf %62, %91 : vector<8x128xf32>
    %93 = arith.mulf %46, %72 : vector<8x128xf32>
    %94 = arith.addf %92, %93 : vector<8x128xf32>
    %c0_63 = arith.constant 0 : index
    %c0_64 = arith.constant 0 : index
    %95 = vector.load %arg11[%c0_63, %c0_64] : memref<8x128xf32, #tpu.memory_space<vmem>>, vector<8x128xf32>
    %96 = arith.mulf %70, %95 : vector<8x128xf32>
    %97 = arith.mulf %54, %74 : vector<8x128xf32>
    %98 = arith.addf %96, %97 : vector<8x128xf32>
    %99 = math.tanh %94 : vector<8x128xf32>
    %100 = arith.mulf %82, %99 : vector<8x128xf32>
    %101 = math.tanh %98 : vector<8x128xf32>
    %102 = arith.mulf %90, %101 : vector<8x128xf32>
    %c0_65 = arith.constant 0 : index
    %c0_66 = arith.constant 0 : index
    %103 = vector.load %arg9[%c0_65, %c0_66] : memref<8x128xf32, #tpu.memory_space<vmem>>, vector<8x128xf32>
    tpu.vector_store %arg9[%c0_65, %c0_66], %94 {strides = array<i32>} : memref<8x128xf32, #tpu.memory_space<vmem>>, vector<8x128xf32>,
    %c0_67 = arith.constant 0 : index
    %c0_68 = arith.constant 0 : index
    %104 = vector.load %arg11[%c0_67, %c0_68] : memref<8x128xf32, #tpu.memory_space<vmem>>, vector<8x128xf32>
    tpu.vector_store %arg11[%c0_67, %c0_68], %98 {strides = array<i32>} : memref<8x128xf32, #tpu.memory_space<vmem>>, vector<8x128xf32>,
    %c0_69 = arith.constant 0 : index
    %c0_70 = arith.constant 0 : index
    %105 = vector.load %arg8[%c0_69, %c0_70] : memref<8x128xf32, #tpu.memory_space<vmem>>, vector<8x128xf32>
    tpu.vector_store %arg8[%c0_69, %c0_70], %100 {strides = array<i32>} : memref<8x128xf32, #tpu.memory_space<vmem>>, vector<8x128xf32>,
    %c0_71 = arith.constant 0 : index
    %c0_72 = arith.constant 0 : index
    %106 = vector.load %arg10[%c0_71, %c0_72] : memref<8x128xf32, #tpu.memory_space<vmem>>, vector<8x128xf32>
    tpu.vector_store %arg10[%c0_71, %c0_72], %102 {strides = array<i32>} : memref<8x128xf32, #tpu.memory_space<vmem>>, vector<8x128xf32>,
    %c0_73 = arith.constant 0 : index
    %c0_74 = arith.constant 0 : index
    %c0_75 = arith.constant 0 : index
    %107 = vector.load %arg6[%c0_73, %c0_74, %c0_75] : memref<8x8x128xf32, #tpu.memory_space<vmem>>, vector<1x8x128xf32>
    %108 = vector.shape_cast %107 : vector<1x8x128xf32> to vector<8x128xf32>
    %109 = vector.shape_cast %100 : vector<8x128xf32> to vector<1x8x128xf32>
    tpu.vector_store %arg6[%c0_73, %c0_74, %c0_75], %109 {strides = array<i32>} : memref<8x8x128xf32, #tpu.memory_space<vmem>>, vector<1x8x128xf32>,
    %c7_76 = arith.constant 7 : index
    %c0_77 = arith.constant 0 : index
    %c0_78 = arith.constant 0 : index
    %110 = vector.load %arg7[%c7_76, %c0_77, %c0_78] : memref<8x8x128xf32, #tpu.memory_space<vmem>>, vector<1x8x128xf32>
    %111 = vector.shape_cast %110 : vector<1x8x128xf32> to vector<8x128xf32>
    %112 = vector.shape_cast %102 : vector<8x128xf32> to vector<1x8x128xf32>
    tpu.vector_store %arg7[%c7_76, %c0_77, %c0_78], %112 {strides = array<i32>} : memref<8x8x128xf32, #tpu.memory_space<vmem>>, vector<1x8x128xf32>,
    %c1_79 = arith.constant 1 : index
    %c0_80 = arith.constant 0 : index
    %c0_81 = arith.constant 0 : index
    %113 = vector.load %arg12[%c1_79, %c0_80, %c0_81] : memref<8x8x512xf32, #tpu.memory_space<vmem>>, vector<1x8x512xf32>
    %114 = vector.shape_cast %113 : vector<1x8x512xf32> to vector<8x512xf32>
    %c0_82 = arith.constant 0 : index
    %c0_83 = arith.constant 0 : index
    %115 = vector.load %arg8[%c0_82, %c0_83] : memref<8x128xf32, #tpu.memory_space<vmem>>, vector<8x128xf32>
    %cst_84 = arith.constant dense<0.000000e+00> : vector<8x512xf32>
    %116 = tpu.matmul %115, %26, %cst_84 {dimension_numbers = #tpu.dot_dimension_numbers<[1], [0], [0], [1], [0, 0, 1, 1], [], []>} : vector<8x128xf32>, vector<128x512xf32>, vector<8x512xf32> -> vector<8x512xf32>
    %117 = arith.addf %114, %116 : vector<8x512xf32>
    %c6 = arith.constant 6 : index
    %c0_85 = arith.constant 0 : index
    %c0_86 = arith.constant 0 : index
    %118 = vector.load %arg13[%c6, %c0_85, %c0_86] : memref<8x8x512xf32, #tpu.memory_space<vmem>>, vector<1x8x512xf32>
    %119 = vector.shape_cast %118 : vector<1x8x512xf32> to vector<8x512xf32>
    %c0_87 = arith.constant 0 : index
    %c0_88 = arith.constant 0 : index
    %120 = vector.load %arg10[%c0_87, %c0_88] : memref<8x128xf32, #tpu.memory_space<vmem>>, vector<8x128xf32>
    %cst_89 = arith.constant dense<0.000000e+00> : vector<8x512xf32>
    %121 = tpu.matmul %120, %28, %cst_89 {dimension_numbers = #tpu.dot_dimension_numbers<[1], [0], [0], [1], [0, 0, 1, 1], [], []>} : vector<8x128xf32>, vector<128x512xf32>, vector<8x512xf32> -> vector<8x512xf32>
    %122 = arith.addf %119, %121 : vector<8x512xf32>
    %123 = vector.extract_strided_slice %117 {offsets = [0, 0], sizes = [8, 128], strides = [1, 1]} : vector<8x512xf32> to vector<8x128xf32>
    %cst_90 = arith.constant 5.000000e-01 : f32
    %124 = vector.broadcast %cst_90 : f32 to vector<8x128xf32>
    %125 = arith.mulf %124, %123 : vector<8x128xf32>
    %126 = math.tanh %125 : vector<8x128xf32>
    %cst_91 = arith.constant 5.000000e-01 : f32
    %127 = vector.broadcast %cst_91 : f32 to vector<8x128xf32>
    %128 = arith.mulf %127, %126 : vector<8x128xf32>
    %cst_92 = arith.constant 5.000000e-01 : f32
    %129 = vector.broadcast %cst_92 : f32 to vector<8x128xf32>
    %130 = arith.addf %128, %129 : vector<8x128xf32>
    %131 = vector.extract_strided_slice %122 {offsets = [0, 0], sizes = [8, 128], strides = [1, 1]} : vector<8x512xf32> to vector<8x128xf32>
    %cst_93 = arith.constant 5.000000e-01 : f32
    %132 = vector.broadcast %cst_93 : f32 to vector<8x128xf32>
    %133 = arith.mulf %132, %131 : vector<8x128xf32>
    %134 = math.tanh %133 : vector<8x128xf32>
    %cst_94 = arith.constant 5.000000e-01 : f32
    %135 = vector.broadcast %cst_94 : f32 to vector<8x128xf32>
    %136 = arith.mulf %135, %134 : vector<8x128xf32>
    %cst_95 = arith.constant 5.000000e-01 : f32
    %137 = vector.broadcast %cst_95 : f32 to vector<8x128xf32>
    %138 = arith.addf %136, %137 : vector<8x128xf32>
    %139 = vector.extract_strided_slice %117 {offsets = [0, 128], sizes = [8, 128], strides = [1, 1]} : vector<8x512xf32> to vector<8x128xf32>
    %cst_96 = arith.constant 5.000000e-01 : f32
    %140 = vector.broadcast %cst_96 : f32 to vector<8x128xf32>
    %141 = arith.mulf %140, %139 : vector<8x128xf32>
    %142 = math.tanh %141 : vector<8x128xf32>
    %cst_97 = arith.constant 5.000000e-01 : f32
    %143 = vector.broadcast %cst_97 : f32 to vector<8x128xf32>
    %144 = arith.mulf %143, %142 : vector<8x128xf32>
    %cst_98 = arith.constant 5.000000e-01 : f32
    %145 = vector.broadcast %cst_98 : f32 to vector<8x128xf32>
    %146 = arith.addf %144, %145 : vector<8x128xf32>
    %147 = vector.extract_strided_slice %122 {offsets = [0, 128], sizes = [8, 128], strides = [1, 1]} : vector<8x512xf32> to vector<8x128xf32>
    %cst_99 = arith.constant 5.000000e-01 : f32
    %148 = vector.broadcast %cst_99 : f32 to vector<8x128xf32>
    %149 = arith.mulf %148, %147 : vector<8x128xf32>
    %150 = math.tanh %149 : vector<8x128xf32>
    %cst_100 = arith.constant 5.000000e-01 : f32
    %151 = vector.broadcast %cst_100 : f32 to vector<8x128xf32>
    %152 = arith.mulf %151, %150 : vector<8x128xf32>
    %cst_101 = arith.constant 5.000000e-01 : f32
    %153 = vector.broadcast %cst_101 : f32 to vector<8x128xf32>
    %154 = arith.addf %152, %153 : vector<8x128xf32>
    %155 = vector.extract_strided_slice %117 {offsets = [0, 256], sizes = [8, 128], strides = [1, 1]} : vector<8x512xf32> to vector<8x128xf32>
    %156 = math.tanh %155 : vector<8x128xf32>
    %157 = vector.extract_strided_slice %122 {offsets = [0, 256], sizes = [8, 128], strides = [1, 1]} : vector<8x512xf32> to vector<8x128xf32>
    %158 = math.tanh %157 : vector<8x128xf32>
    %159 = vector.extract_strided_slice %117 {offsets = [0, 384], sizes = [8, 128], strides = [1, 1]} : vector<8x512xf32> to vector<8x128xf32>
    %cst_102 = arith.constant 5.000000e-01 : f32
    %160 = vector.broadcast %cst_102 : f32 to vector<8x128xf32>
    %161 = arith.mulf %160, %159 : vector<8x128xf32>
    %162 = math.tanh %161 : vector<8x128xf32>
    %cst_103 = arith.constant 5.000000e-01 : f32
    %163 = vector.broadcast %cst_103 : f32 to vector<8x128xf32>
    %164 = arith.mulf %163, %162 : vector<8x128xf32>
    %cst_104 = arith.constant 5.000000e-01 : f32
    %165 = vector.broadcast %cst_104 : f32 to vector<8x128xf32>
    %166 = arith.addf %164, %165 : vector<8x128xf32>
    %167 = vector.extract_strided_slice %122 {offsets = [0, 384], sizes = [8, 128], strides = [1, 1]} : vector<8x512xf32> to vector<8x128xf32>
    %cst_105 = arith.constant 5.000000e-01 : f32
    %168 = vector.broadcast %cst_105 : f32 to vector<8x128xf32>
    %169 = arith.mulf %168, %167 : vector<8x128xf32>
    %170 = math.tanh %169 : vector<8x128xf32>
    %cst_106 = arith.constant 5.000000e-01 : f32
    %171 = vector.broadcast %cst_106 : f32 to vector<8x128xf32>
    %172 = arith.mulf %171, %170 : vector<8x128xf32>
    %cst_107 = arith.constant 5.000000e-01 : f32
    %173 = vector.broadcast %cst_107 : f32 to vector<8x128xf32>
    %174 = arith.addf %172, %173 : vector<8x128xf32>
    %c0_108 = arith.constant 0 : index
    %c0_109 = arith.constant 0 : index
    %175 = vector.load %arg9[%c0_108, %c0_109] : memref<8x128xf32, #tpu.memory_space<vmem>>, vector<8x128xf32>
    %176 = arith.mulf %146, %175 : vector<8x128xf32>
    %177 = arith.mulf %130, %156 : vector<8x128xf32>
    %178 = arith.addf %176, %177 : vector<8x128xf32>
    %c0_110 = arith.constant 0 : index
    %c0_111 = arith.constant 0 : index
    %179 = vector.load %arg11[%c0_110, %c0_111] : memref<8x128xf32, #tpu.memory_space<vmem>>, vector<8x128xf32>
    %180 = arith.mulf %154, %179 : vector<8x128xf32>
    %181 = arith.mulf %138, %158 : vector<8x128xf32>
    %182 = arith.addf %180, %181 : vector<8x128xf32>
    %183 = math.tanh %178 : vector<8x128xf32>
    %184 = arith.mulf %166, %183 : vector<8x128xf32>
    %185 = math.tanh %182 : vector<8x128xf32>
    %186 = arith.mulf %174, %185 : vector<8x128xf32>
    %c0_112 = arith.constant 0 : index
    %c0_113 = arith.constant 0 : index
    %187 = vector.load %arg9[%c0_112, %c0_113] : memref<8x128xf32, #tpu.memory_space<vmem>>, vector<8x128xf32>
    tpu.vector_store %arg9[%c0_112, %c0_113], %178 {strides = array<i32>} : memref<8x128xf32, #tpu.memory_space<vmem>>, vector<8x128xf32>,
    %c0_114 = arith.constant 0 : index
    %c0_115 = arith.constant 0 : index
    %188 = vector.load %arg11[%c0_114, %c0_115] : memref<8x128xf32, #tpu.memory_space<vmem>>, vector<8x128xf32>
    tpu.vector_store %arg11[%c0_114, %c0_115], %182 {strides = array<i32>} : memref<8x128xf32, #tpu.memory_space<vmem>>, vector<8x128xf32>,
    %c0_116 = arith.constant 0 : index
    %c0_117 = arith.constant 0 : index
    %189 = vector.load %arg8[%c0_116, %c0_117] : memref<8x128xf32, #tpu.memory_space<vmem>>, vector<8x128xf32>
    tpu.vector_store %arg8[%c0_116, %c0_117], %184 {strides = array<i32>} : memref<8x128xf32, #tpu.memory_space<vmem>>, vector<8x128xf32>,
    %c0_118 = arith.constant 0 : index
    %c0_119 = arith.constant 0 : index
    %190 = vector.load %arg10[%c0_118, %c0_119] : memref<8x128xf32, #tpu.memory_space<vmem>>, vector<8x128xf32>
    tpu.vector_store %arg10[%c0_118, %c0_119], %186 {strides = array<i32>} : memref<8x128xf32, #tpu.memory_space<vmem>>, vector<8x128xf32>,
    %c1_120 = arith.constant 1 : index
    %c0_121 = arith.constant 0 : index
    %c0_122 = arith.constant 0 : index
    %191 = vector.load %arg6[%c1_120, %c0_121, %c0_122] : memref<8x8x128xf32, #tpu.memory_space<vmem>>, vector<1x8x128xf32>
    %192 = vector.shape_cast %191 : vector<1x8x128xf32> to vector<8x128xf32>
    %193 = vector.shape_cast %184 : vector<8x128xf32> to vector<1x8x128xf32>
    tpu.vector_store %arg6[%c1_120, %c0_121, %c0_122], %193 {strides = array<i32>} : memref<8x8x128xf32, #tpu.memory_space<vmem>>, vector<1x8x128xf32>,
    %c6_123 = arith.constant 6 : index
    %c0_124 = arith.constant 0 : index
    %c0_125 = arith.constant 0 : index
    %194 = vector.load %arg7[%c6_123, %c0_124, %c0_125] : memref<8x8x128xf32, #tpu.memory_space<vmem>>, vector<1x8x128xf32>
    %195 = vector.shape_cast %194 : vector<1x8x128xf32> to vector<8x128xf32>
    %196 = vector.shape_cast %186 : vector<8x128xf32> to vector<1x8x128xf32>
    tpu.vector_store %arg7[%c6_123, %c0_124, %c0_125], %196 {strides = array<i32>} : memref<8x8x128xf32, #tpu.memory_space<vmem>>, vector<1x8x128xf32>,
    %c2 = arith.constant 2 : index
    %c0_126 = arith.constant 0 : index
    %c0_127 = arith.constant 0 : index
    %197 = vector.load %arg12[%c2, %c0_126, %c0_127] : memref<8x8x512xf32, #tpu.memory_space<vmem>>, vector<1x8x512xf32>
    %198 = vector.shape_cast %197 : vector<1x8x512xf32> to vector<8x512xf32>
    %c0_128 = arith.constant 0 : index
    %c0_129 = arith.constant 0 : index
    %199 = vector.load %arg8[%c0_128, %c0_129] : memref<8x128xf32, #tpu.memory_space<vmem>>, vector<8x128xf32>
    %cst_130 = arith.constant dense<0.000000e+00> : vector<8x512xf32>
    %200 = tpu.matmul %199, %26, %cst_130 {dimension_numbers = #tpu.dot_dimension_numbers<[1], [0], [0], [1], [0, 0, 1, 1], [], []>} : vector<8x128xf32>, vector<128x512xf32>, vector<8x512xf32> -> vector<8x512xf32>
    %201 = arith.addf %198, %200 : vector<8x512xf32>
    %c5 = arith.constant 5 : index
    %c0_131 = arith.constant 0 : index
    %c0_132 = arith.constant 0 : index
    %202 = vector.load %arg13[%c5, %c0_131, %c0_132] : memref<8x8x512xf32, #tpu.memory_space<vmem>>, vector<1x8x512xf32>
    %203 = vector.shape_cast %202 : vector<1x8x512xf32> to vector<8x512xf32>
    %c0_133 = arith.constant 0 : index
    %c0_134 = arith.constant 0 : index
    %204 = vector.load %arg10[%c0_133, %c0_134] : memref<8x128xf32, #tpu.memory_space<vmem>>, vector<8x128xf32>
    %cst_135 = arith.constant dense<0.000000e+00> : vector<8x512xf32>
    %205 = tpu.matmul %204, %28, %cst_135 {dimension_numbers = #tpu.dot_dimension_numbers<[1], [0], [0], [1], [0, 0, 1, 1], [], []>} : vector<8x128xf32>, vector<128x512xf32>, vector<8x512xf32> -> vector<8x512xf32>
    %206 = arith.addf %203, %205 : vector<8x512xf32>
    %207 = vector.extract_strided_slice %201 {offsets = [0, 0], sizes = [8, 128], strides = [1, 1]} : vector<8x512xf32> to vector<8x128xf32>
    %cst_136 = arith.constant 5.000000e-01 : f32
    %208 = vector.broadcast %cst_136 : f32 to vector<8x128xf32>
    %209 = arith.mulf %208, %207 : vector<8x128xf32>
    %210 = math.tanh %209 : vector<8x128xf32>
    %cst_137 = arith.constant 5.000000e-01 : f32
    %211 = vector.broadcast %cst_137 : f32 to vector<8x128xf32>
    %212 = arith.mulf %211, %210 : vector<8x128xf32>
    %cst_138 = arith.constant 5.000000e-01 : f32
    %213 = vector.broadcast %cst_138 : f32 to vector<8x128xf32>
    %214 = arith.addf %212, %213 : vector<8x128xf32>
    %215 = vector.extract_strided_slice %206 {offsets = [0, 0], sizes = [8, 128], strides = [1, 1]} : vector<8x512xf32> to vector<8x128xf32>
    %cst_139 = arith.constant 5.000000e-01 : f32
    %216 = vector.broadcast %cst_139 : f32 to vector<8x128xf32>
    %217 = arith.mulf %216, %215 : vector<8x128xf32>
    %218 = math.tanh %217 : vector<8x128xf32>
    %cst_140 = arith.constant 5.000000e-01 : f32
    %219 = vector.broadcast %cst_140 : f32 to vector<8x128xf32>
    %220 = arith.mulf %219, %218 : vector<8x128xf32>
    %cst_141 = arith.constant 5.000000e-01 : f32
    %221 = vector.broadcast %cst_141 : f32 to vector<8x128xf32>
    %222 = arith.addf %220, %221 : vector<8x128xf32>
    %223 = vector.extract_strided_slice %201 {offsets = [0, 128], sizes = [8, 128], strides = [1, 1]} : vector<8x512xf32> to vector<8x128xf32>
    %cst_142 = arith.constant 5.000000e-01 : f32
    %224 = vector.broadcast %cst_142 : f32 to vector<8x128xf32>
    %225 = arith.mulf %224, %223 : vector<8x128xf32>
    %226 = math.tanh %225 : vector<8x128xf32>
    %cst_143 = arith.constant 5.000000e-01 : f32
    %227 = vector.broadcast %cst_143 : f32 to vector<8x128xf32>
    %228 = arith.mulf %227, %226 : vector<8x128xf32>
    %cst_144 = arith.constant 5.000000e-01 : f32
    %229 = vector.broadcast %cst_144 : f32 to vector<8x128xf32>
    %230 = arith.addf %228, %229 : vector<8x128xf32>
    %231 = vector.extract_strided_slice %206 {offsets = [0, 128], sizes = [8, 128], strides = [1, 1]} : vector<8x512xf32> to vector<8x128xf32>
    %cst_145 = arith.constant 5.000000e-01 : f32
    %232 = vector.broadcast %cst_145 : f32 to vector<8x128xf32>
    %233 = arith.mulf %232, %231 : vector<8x128xf32>
    %234 = math.tanh %233 : vector<8x128xf32>
    %cst_146 = arith.constant 5.000000e-01 : f32
    %235 = vector.broadcast %cst_146 : f32 to vector<8x128xf32>
    %236 = arith.mulf %235, %234 : vector<8x128xf32>
    %cst_147 = arith.constant 5.000000e-01 : f32
    %237 = vector.broadcast %cst_147 : f32 to vector<8x128xf32>
    %238 = arith.addf %236, %237 : vector<8x128xf32>
    %239 = vector.extract_strided_slice %201 {offsets = [0, 256], sizes = [8, 128], strides = [1, 1]} : vector<8x512xf32> to vector<8x128xf32>
    %240 = math.tanh %239 : vector<8x128xf32>
    %241 = vector.extract_strided_slice %206 {offsets = [0, 256], sizes = [8, 128], strides = [1, 1]} : vector<8x512xf32> to vector<8x128xf32>
    %242 = math.tanh %241 : vector<8x128xf32>
    %243 = vector.extract_strided_slice %201 {offsets = [0, 384], sizes = [8, 128], strides = [1, 1]} : vector<8x512xf32> to vector<8x128xf32>
    %cst_148 = arith.constant 5.000000e-01 : f32
    %244 = vector.broadcast %cst_148 : f32 to vector<8x128xf32>
    %245 = arith.mulf %244, %243 : vector<8x128xf32>
    %246 = math.tanh %245 : vector<8x128xf32>
    %cst_149 = arith.constant 5.000000e-01 : f32
    %247 = vector.broadcast %cst_149 : f32 to vector<8x128xf32>
    %248 = arith.mulf %247, %246 : vector<8x128xf32>
    %cst_150 = arith.constant 5.000000e-01 : f32
    %249 = vector.broadcast %cst_150 : f32 to vector<8x128xf32>
    %250 = arith.addf %248, %249 : vector<8x128xf32>
    %251 = vector.extract_strided_slice %206 {offsets = [0, 384], sizes = [8, 128], strides = [1, 1]} : vector<8x512xf32> to vector<8x128xf32>
    %cst_151 = arith.constant 5.000000e-01 : f32
    %252 = vector.broadcast %cst_151 : f32 to vector<8x128xf32>
    %253 = arith.mulf %252, %251 : vector<8x128xf32>
    %254 = math.tanh %253 : vector<8x128xf32>
    %cst_152 = arith.constant 5.000000e-01 : f32
    %255 = vector.broadcast %cst_152 : f32 to vector<8x128xf32>
    %256 = arith.mulf %255, %254 : vector<8x128xf32>
    %cst_153 = arith.constant 5.000000e-01 : f32
    %257 = vector.broadcast %cst_153 : f32 to vector<8x128xf32>
    %258 = arith.addf %256, %257 : vector<8x128xf32>
    %c0_154 = arith.constant 0 : index
    %c0_155 = arith.constant 0 : index
    %259 = vector.load %arg9[%c0_154, %c0_155] : memref<8x128xf32, #tpu.memory_space<vmem>>, vector<8x128xf32>
    %260 = arith.mulf %230, %259 : vector<8x128xf32>
    %261 = arith.mulf %214, %240 : vector<8x128xf32>
    %262 = arith.addf %260, %261 : vector<8x128xf32>
    %c0_156 = arith.constant 0 : index
    %c0_157 = arith.constant 0 : index
    %263 = vector.load %arg11[%c0_156, %c0_157] : memref<8x128xf32, #tpu.memory_space<vmem>>, vector<8x128xf32>
    %264 = arith.mulf %238, %263 : vector<8x128xf32>
    %265 = arith.mulf %222, %242 : vector<8x128xf32>
    %266 = arith.addf %264, %265 : vector<8x128xf32>
    %267 = math.tanh %262 : vector<8x128xf32>
    %268 = arith.mulf %250, %267 : vector<8x128xf32>
    %269 = math.tanh %266 : vector<8x128xf32>
    %270 = arith.mulf %258, %269 : vector<8x128xf32>
    %c0_158 = arith.constant 0 : index
    %c0_159 = arith.constant 0 : index
    %271 = vector.load %arg9[%c0_158, %c0_159] : memref<8x128xf32, #tpu.memory_space<vmem>>, vector<8x128xf32>
    tpu.vector_store %arg9[%c0_158, %c0_159], %262 {strides = array<i32>} : memref<8x128xf32, #tpu.memory_space<vmem>>, vector<8x128xf32>,
    %c0_160 = arith.constant 0 : index
    %c0_161 = arith.constant 0 : index
    %272 = vector.load %arg11[%c0_160, %c0_161] : memref<8x128xf32, #tpu.memory_space<vmem>>, vector<8x128xf32>
    tpu.vector_store %arg11[%c0_160, %c0_161], %266 {strides = array<i32>} : memref<8x128xf32, #tpu.memory_space<vmem>>, vector<8x128xf32>,
    %c0_162 = arith.constant 0 : index
    %c0_163 = arith.constant 0 : index
    %273 = vector.load %arg8[%c0_162, %c0_163] : memref<8x128xf32, #tpu.memory_space<vmem>>, vector<8x128xf32>
    tpu.vector_store %arg8[%c0_162, %c0_163], %268 {strides = array<i32>} : memref<8x128xf32, #tpu.memory_space<vmem>>, vector<8x128xf32>,
    %c0_164 = arith.constant 0 : index
    %c0_165 = arith.constant 0 : index
    %274 = vector.load %arg10[%c0_164, %c0_165] : memref<8x128xf32, #tpu.memory_space<vmem>>, vector<8x128xf32>
    tpu.vector_store %arg10[%c0_164, %c0_165], %270 {strides = array<i32>} : memref<8x128xf32, #tpu.memory_space<vmem>>, vector<8x128xf32>,
    %c2_166 = arith.constant 2 : index
    %c0_167 = arith.constant 0 : index
    %c0_168 = arith.constant 0 : index
    %275 = vector.load %arg6[%c2_166, %c0_167, %c0_168] : memref<8x8x128xf32, #tpu.memory_space<vmem>>, vector<1x8x128xf32>
    %276 = vector.shape_cast %275 : vector<1x8x128xf32> to vector<8x128xf32>
    %277 = vector.shape_cast %268 : vector<8x128xf32> to vector<1x8x128xf32>
    tpu.vector_store %arg6[%c2_166, %c0_167, %c0_168], %277 {strides = array<i32>} : memref<8x8x128xf32, #tpu.memory_space<vmem>>, vector<1x8x128xf32>,
    %c5_169 = arith.constant 5 : index
    %c0_170 = arith.constant 0 : index
    %c0_171 = arith.constant 0 : index
    %278 = vector.load %arg7[%c5_169, %c0_170, %c0_171] : memref<8x8x128xf32, #tpu.memory_space<vmem>>, vector<1x8x128xf32>
    %279 = vector.shape_cast %278 : vector<1x8x128xf32> to vector<8x128xf32>
    %280 = vector.shape_cast %270 : vector<8x128xf32> to vector<1x8x128xf32>
    tpu.vector_store %arg7[%c5_169, %c0_170, %c0_171], %280 {strides = array<i32>} : memref<8x8x128xf32, #tpu.memory_space<vmem>>, vector<1x8x128xf32>,
    %c3 = arith.constant 3 : index
    %c0_172 = arith.constant 0 : index
    %c0_173 = arith.constant 0 : index
    %281 = vector.load %arg12[%c3, %c0_172, %c0_173] : memref<8x8x512xf32, #tpu.memory_space<vmem>>, vector<1x8x512xf32>
    %282 = vector.shape_cast %281 : vector<1x8x512xf32> to vector<8x512xf32>
    %c0_174 = arith.constant 0 : index
    %c0_175 = arith.constant 0 : index
    %283 = vector.load %arg8[%c0_174, %c0_175] : memref<8x128xf32, #tpu.memory_space<vmem>>, vector<8x128xf32>
    %cst_176 = arith.constant dense<0.000000e+00> : vector<8x512xf32>
    %284 = tpu.matmul %283, %26, %cst_176 {dimension_numbers = #tpu.dot_dimension_numbers<[1], [0], [0], [1], [0, 0, 1, 1], [], []>} : vector<8x128xf32>, vector<128x512xf32>, vector<8x512xf32> -> vector<8x512xf32>
    %285 = arith.addf %282, %284 : vector<8x512xf32>
    %c4 = arith.constant 4 : index
    %c0_177 = arith.constant 0 : index
    %c0_178 = arith.constant 0 : index
    %286 = vector.load %arg13[%c4, %c0_177, %c0_178] : memref<8x8x512xf32, #tpu.memory_space<vmem>>, vector<1x8x512xf32>
    %287 = vector.shape_cast %286 : vector<1x8x512xf32> to vector<8x512xf32>
    %c0_179 = arith.constant 0 : index
    %c0_180 = arith.constant 0 : index
    %288 = vector.load %arg10[%c0_179, %c0_180] : memref<8x128xf32, #tpu.memory_space<vmem>>, vector<8x128xf32>
    %cst_181 = arith.constant dense<0.000000e+00> : vector<8x512xf32>
    %289 = tpu.matmul %288, %28, %cst_181 {dimension_numbers = #tpu.dot_dimension_numbers<[1], [0], [0], [1], [0, 0, 1, 1], [], []>} : vector<8x128xf32>, vector<128x512xf32>, vector<8x512xf32> -> vector<8x512xf32>
    %290 = arith.addf %287, %289 : vector<8x512xf32>
    %291 = vector.extract_strided_slice %285 {offsets = [0, 0], sizes = [8, 128], strides = [1, 1]} : vector<8x512xf32> to vector<8x128xf32>
    %cst_182 = arith.constant 5.000000e-01 : f32
    %292 = vector.broadcast %cst_182 : f32 to vector<8x128xf32>
    %293 = arith.mulf %292, %291 : vector<8x128xf32>
    %294 = math.tanh %293 : vector<8x128xf32>
    %cst_183 = arith.constant 5.000000e-01 : f32
    %295 = vector.broadcast %cst_183 : f32 to vector<8x128xf32>
    %296 = arith.mulf %295, %294 : vector<8x128xf32>
    %cst_184 = arith.constant 5.000000e-01 : f32
    %297 = vector.broadcast %cst_184 : f32 to vector<8x128xf32>
    %298 = arith.addf %296, %297 : vector<8x128xf32>
    %299 = vector.extract_strided_slice %290 {offsets = [0, 0], sizes = [8, 128], strides = [1, 1]} : vector<8x512xf32> to vector<8x128xf32>
    %cst_185 = arith.constant 5.000000e-01 : f32
    %300 = vector.broadcast %cst_185 : f32 to vector<8x128xf32>
    %301 = arith.mulf %300, %299 : vector<8x128xf32>
    %302 = math.tanh %301 : vector<8x128xf32>
    %cst_186 = arith.constant 5.000000e-01 : f32
    %303 = vector.broadcast %cst_186 : f32 to vector<8x128xf32>
    %304 = arith.mulf %303, %302 : vector<8x128xf32>
    %cst_187 = arith.constant 5.000000e-01 : f32
    %305 = vector.broadcast %cst_187 : f32 to vector<8x128xf32>
    %306 = arith.addf %304, %305 : vector<8x128xf32>
    %307 = vector.extract_strided_slice %285 {offsets = [0, 128], sizes = [8, 128], strides = [1, 1]} : vector<8x512xf32> to vector<8x128xf32>
    %cst_188 = arith.constant 5.000000e-01 : f32
    %308 = vector.broadcast %cst_188 : f32 to vector<8x128xf32>
    %309 = arith.mulf %308, %307 : vector<8x128xf32>
    %310 = math.tanh %309 : vector<8x128xf32>
    %cst_189 = arith.constant 5.000000e-01 : f32
    %311 = vector.broadcast %cst_189 : f32 to vector<8x128xf32>
    %312 = arith.mulf %311, %310 : vector<8x128xf32>
    %cst_190 = arith.constant 5.000000e-01 : f32
    %313 = vector.broadcast %cst_190 : f32 to vector<8x128xf32>
    %314 = arith.addf %312, %313 : vector<8x128xf32>
    %315 = vector.extract_strided_slice %290 {offsets = [0, 128], sizes = [8, 128], strides = [1, 1]} : vector<8x512xf32> to vector<8x128xf32>
    %cst_191 = arith.constant 5.000000e-01 : f32
    %316 = vector.broadcast %cst_191 : f32 to vector<8x128xf32>
    %317 = arith.mulf %316, %315 : vector<8x128xf32>
    %318 = math.tanh %317 : vector<8x128xf32>
    %cst_192 = arith.constant 5.000000e-01 : f32
    %319 = vector.broadcast %cst_192 : f32 to vector<8x128xf32>
    %320 = arith.mulf %319, %318 : vector<8x128xf32>
    %cst_193 = arith.constant 5.000000e-01 : f32
    %321 = vector.broadcast %cst_193 : f32 to vector<8x128xf32>
    %322 = arith.addf %320, %321 : vector<8x128xf32>
    %323 = vector.extract_strided_slice %285 {offsets = [0, 256], sizes = [8, 128], strides = [1, 1]} : vector<8x512xf32> to vector<8x128xf32>
    %324 = math.tanh %323 : vector<8x128xf32>
    %325 = vector.extract_strided_slice %290 {offsets = [0, 256], sizes = [8, 128], strides = [1, 1]} : vector<8x512xf32> to vector<8x128xf32>
    %326 = math.tanh %325 : vector<8x128xf32>
    %327 = vector.extract_strided_slice %285 {offsets = [0, 384], sizes = [8, 128], strides = [1, 1]} : vector<8x512xf32> to vector<8x128xf32>
    %cst_194 = arith.constant 5.000000e-01 : f32
    %328 = vector.broadcast %cst_194 : f32 to vector<8x128xf32>
    %329 = arith.mulf %328, %327 : vector<8x128xf32>
    %330 = math.tanh %329 : vector<8x128xf32>
    %cst_195 = arith.constant 5.000000e-01 : f32
    %331 = vector.broadcast %cst_195 : f32 to vector<8x128xf32>
    %332 = arith.mulf %331, %330 : vector<8x128xf32>
    %cst_196 = arith.constant 5.000000e-01 : f32
    %333 = vector.broadcast %cst_196 : f32 to vector<8x128xf32>
    %334 = arith.addf %332, %333 : vector<8x128xf32>
    %335 = vector.extract_strided_slice %290 {offsets = [0, 384], sizes = [8, 128], strides = [1, 1]} : vector<8x512xf32> to vector<8x128xf32>
    %cst_197 = arith.constant 5.000000e-01 : f32
    %336 = vector.broadcast %cst_197 : f32 to vector<8x128xf32>
    %337 = arith.mulf %336, %335 : vector<8x128xf32>
    %338 = math.tanh %337 : vector<8x128xf32>
    %cst_198 = arith.constant 5.000000e-01 : f32
    %339 = vector.broadcast %cst_198 : f32 to vector<8x128xf32>
    %340 = arith.mulf %339, %338 : vector<8x128xf32>
    %cst_199 = arith.constant 5.000000e-01 : f32
    %341 = vector.broadcast %cst_199 : f32 to vector<8x128xf32>
    %342 = arith.addf %340, %341 : vector<8x128xf32>
    %c0_200 = arith.constant 0 : index
    %c0_201 = arith.constant 0 : index
    %343 = vector.load %arg9[%c0_200, %c0_201] : memref<8x128xf32, #tpu.memory_space<vmem>>, vector<8x128xf32>
    %344 = arith.mulf %314, %343 : vector<8x128xf32>
    %345 = arith.mulf %298, %324 : vector<8x128xf32>
    %346 = arith.addf %344, %345 : vector<8x128xf32>
    %c0_202 = arith.constant 0 : index
    %c0_203 = arith.constant 0 : index
    %347 = vector.load %arg11[%c0_202, %c0_203] : memref<8x128xf32, #tpu.memory_space<vmem>>, vector<8x128xf32>
    %348 = arith.mulf %322, %347 : vector<8x128xf32>
    %349 = arith.mulf %306, %326 : vector<8x128xf32>
    %350 = arith.addf %348, %349 : vector<8x128xf32>
    %351 = math.tanh %346 : vector<8x128xf32>
    %352 = arith.mulf %334, %351 : vector<8x128xf32>
    %353 = math.tanh %350 : vector<8x128xf32>
    %354 = arith.mulf %342, %353 : vector<8x128xf32>
    %c0_204 = arith.constant 0 : index
    %c0_205 = arith.constant 0 : index
    %355 = vector.load %arg9[%c0_204, %c0_205] : memref<8x128xf32, #tpu.memory_space<vmem>>, vector<8x128xf32>
    tpu.vector_store %arg9[%c0_204, %c0_205], %346 {strides = array<i32>} : memref<8x128xf32, #tpu.memory_space<vmem>>, vector<8x128xf32>,
    %c0_206 = arith.constant 0 : index
    %c0_207 = arith.constant 0 : index
    %356 = vector.load %arg11[%c0_206, %c0_207] : memref<8x128xf32, #tpu.memory_space<vmem>>, vector<8x128xf32>
    tpu.vector_store %arg11[%c0_206, %c0_207], %350 {strides = array<i32>} : memref<8x128xf32, #tpu.memory_space<vmem>>, vector<8x128xf32>,
    %c0_208 = arith.constant 0 : index
    %c0_209 = arith.constant 0 : index
    %357 = vector.load %arg8[%c0_208, %c0_209] : memref<8x128xf32, #tpu.memory_space<vmem>>, vector<8x128xf32>
    tpu.vector_store %arg8[%c0_208, %c0_209], %352 {strides = array<i32>} : memref<8x128xf32, #tpu.memory_space<vmem>>, vector<8x128xf32>,
    %c0_210 = arith.constant 0 : index
    %c0_211 = arith.constant 0 : index
    %358 = vector.load %arg10[%c0_210, %c0_211] : memref<8x128xf32, #tpu.memory_space<vmem>>, vector<8x128xf32>
    tpu.vector_store %arg10[%c0_210, %c0_211], %354 {strides = array<i32>} : memref<8x128xf32, #tpu.memory_space<vmem>>, vector<8x128xf32>,
    %c3_212 = arith.constant 3 : index
    %c0_213 = arith.constant 0 : index
    %c0_214 = arith.constant 0 : index
    %359 = vector.load %arg6[%c3_212, %c0_213, %c0_214] : memref<8x8x128xf32, #tpu.memory_space<vmem>>, vector<1x8x128xf32>
    %360 = vector.shape_cast %359 : vector<1x8x128xf32> to vector<8x128xf32>
    %361 = vector.shape_cast %352 : vector<8x128xf32> to vector<1x8x128xf32>
    tpu.vector_store %arg6[%c3_212, %c0_213, %c0_214], %361 {strides = array<i32>} : memref<8x8x128xf32, #tpu.memory_space<vmem>>, vector<1x8x128xf32>,
    %c4_215 = arith.constant 4 : index
    %c0_216 = arith.constant 0 : index
    %c0_217 = arith.constant 0 : index
    %362 = vector.load %arg7[%c4_215, %c0_216, %c0_217] : memref<8x8x128xf32, #tpu.memory_space<vmem>>, vector<1x8x128xf32>
    %363 = vector.shape_cast %362 : vector<1x8x128xf32> to vector<8x128xf32>
    %364 = vector.shape_cast %354 : vector<8x128xf32> to vector<1x8x128xf32>
    tpu.vector_store %arg7[%c4_215, %c0_216, %c0_217], %364 {strides = array<i32>} : memref<8x8x128xf32, #tpu.memory_space<vmem>>, vector<1x8x128xf32>,
    %c4_218 = arith.constant 4 : index
    %c0_219 = arith.constant 0 : index
    %c0_220 = arith.constant 0 : index
    %365 = vector.load %arg12[%c4_218, %c0_219, %c0_220] : memref<8x8x512xf32, #tpu.memory_space<vmem>>, vector<1x8x512xf32>
    %366 = vector.shape_cast %365 : vector<1x8x512xf32> to vector<8x512xf32>
    %c0_221 = arith.constant 0 : index
    %c0_222 = arith.constant 0 : index
    %367 = vector.load %arg8[%c0_221, %c0_222] : memref<8x128xf32, #tpu.memory_space<vmem>>, vector<8x128xf32>
    %cst_223 = arith.constant dense<0.000000e+00> : vector<8x512xf32>
    %368 = tpu.matmul %367, %26, %cst_223 {dimension_numbers = #tpu.dot_dimension_numbers<[1], [0], [0], [1], [0, 0, 1, 1], [], []>} : vector<8x128xf32>, vector<128x512xf32>, vector<8x512xf32> -> vector<8x512xf32>
    %369 = arith.addf %366, %368 : vector<8x512xf32>
    %c3_224 = arith.constant 3 : index
    %c0_225 = arith.constant 0 : index
    %c0_226 = arith.constant 0 : index
    %370 = vector.load %arg13[%c3_224, %c0_225, %c0_226] : memref<8x8x512xf32, #tpu.memory_space<vmem>>, vector<1x8x512xf32>
    %371 = vector.shape_cast %370 : vector<1x8x512xf32> to vector<8x512xf32>
    %c0_227 = arith.constant 0 : index
    %c0_228 = arith.constant 0 : index
    %372 = vector.load %arg10[%c0_227, %c0_228] : memref<8x128xf32, #tpu.memory_space<vmem>>, vector<8x128xf32>
    %cst_229 = arith.constant dense<0.000000e+00> : vector<8x512xf32>
    %373 = tpu.matmul %372, %28, %cst_229 {dimension_numbers = #tpu.dot_dimension_numbers<[1], [0], [0], [1], [0, 0, 1, 1], [], []>} : vector<8x128xf32>, vector<128x512xf32>, vector<8x512xf32> -> vector<8x512xf32>
    %374 = arith.addf %371, %373 : vector<8x512xf32>
    %375 = vector.extract_strided_slice %369 {offsets = [0, 0], sizes = [8, 128], strides = [1, 1]} : vector<8x512xf32> to vector<8x128xf32>
    %cst_230 = arith.constant 5.000000e-01 : f32
    %376 = vector.broadcast %cst_230 : f32 to vector<8x128xf32>
    %377 = arith.mulf %376, %375 : vector<8x128xf32>
    %378 = math.tanh %377 : vector<8x128xf32>
    %cst_231 = arith.constant 5.000000e-01 : f32
    %379 = vector.broadcast %cst_231 : f32 to vector<8x128xf32>
    %380 = arith.mulf %379, %378 : vector<8x128xf32>
    %cst_232 = arith.constant 5.000000e-01 : f32
    %381 = vector.broadcast %cst_232 : f32 to vector<8x128xf32>
    %382 = arith.addf %380, %381 : vector<8x128xf32>
    %383 = vector.extract_strided_slice %374 {offsets = [0, 0], sizes = [8, 128], strides = [1, 1]} : vector<8x512xf32> to vector<8x128xf32>
    %cst_233 = arith.constant 5.000000e-01 : f32
    %384 = vector.broadcast %cst_233 : f32 to vector<8x128xf32>
    %385 = arith.mulf %384, %383 : vector<8x128xf32>
    %386 = math.tanh %385 : vector<8x128xf32>
    %cst_234 = arith.constant 5.000000e-01 : f32
    %387 = vector.broadcast %cst_234 : f32 to vector<8x128xf32>
    %388 = arith.mulf %387, %386 : vector<8x128xf32>
    %cst_235 = arith.constant 5.000000e-01 : f32
    %389 = vector.broadcast %cst_235 : f32 to vector<8x128xf32>
    %390 = arith.addf %388, %389 : vector<8x128xf32>
    %391 = vector.extract_strided_slice %369 {offsets = [0, 128], sizes = [8, 128], strides = [1, 1]} : vector<8x512xf32> to vector<8x128xf32>
    %cst_236 = arith.constant 5.000000e-01 : f32
    %392 = vector.broadcast %cst_236 : f32 to vector<8x128xf32>
    %393 = arith.mulf %392, %391 : vector<8x128xf32>
    %394 = math.tanh %393 : vector<8x128xf32>
    %cst_237 = arith.constant 5.000000e-01 : f32
    %395 = vector.broadcast %cst_237 : f32 to vector<8x128xf32>
    %396 = arith.mulf %395, %394 : vector<8x128xf32>
    %cst_238 = arith.constant 5.000000e-01 : f32
    %397 = vector.broadcast %cst_238 : f32 to vector<8x128xf32>
    %398 = arith.addf %396, %397 : vector<8x128xf32>
    %399 = vector.extract_strided_slice %374 {offsets = [0, 128], sizes = [8, 128], strides = [1, 1]} : vector<8x512xf32> to vector<8x128xf32>
    %cst_239 = arith.constant 5.000000e-01 : f32
    %400 = vector.broadcast %cst_239 : f32 to vector<8x128xf32>
    %401 = arith.mulf %400, %399 : vector<8x128xf32>
    %402 = math.tanh %401 : vector<8x128xf32>
    %cst_240 = arith.constant 5.000000e-01 : f32
    %403 = vector.broadcast %cst_240 : f32 to vector<8x128xf32>
    %404 = arith.mulf %403, %402 : vector<8x128xf32>
    %cst_241 = arith.constant 5.000000e-01 : f32
    %405 = vector.broadcast %cst_241 : f32 to vector<8x128xf32>
    %406 = arith.addf %404, %405 : vector<8x128xf32>
    %407 = vector.extract_strided_slice %369 {offsets = [0, 256], sizes = [8, 128], strides = [1, 1]} : vector<8x512xf32> to vector<8x128xf32>
    %408 = math.tanh %407 : vector<8x128xf32>
    %409 = vector.extract_strided_slice %374 {offsets = [0, 256], sizes = [8, 128], strides = [1, 1]} : vector<8x512xf32> to vector<8x128xf32>
    %410 = math.tanh %409 : vector<8x128xf32>
    %411 = vector.extract_strided_slice %369 {offsets = [0, 384], sizes = [8, 128], strides = [1, 1]} : vector<8x512xf32> to vector<8x128xf32>
    %cst_242 = arith.constant 5.000000e-01 : f32
    %412 = vector.broadcast %cst_242 : f32 to vector<8x128xf32>
    %413 = arith.mulf %412, %411 : vector<8x128xf32>
    %414 = math.tanh %413 : vector<8x128xf32>
    %cst_243 = arith.constant 5.000000e-01 : f32
    %415 = vector.broadcast %cst_243 : f32 to vector<8x128xf32>
    %416 = arith.mulf %415, %414 : vector<8x128xf32>
    %cst_244 = arith.constant 5.000000e-01 : f32
    %417 = vector.broadcast %cst_244 : f32 to vector<8x128xf32>
    %418 = arith.addf %416, %417 : vector<8x128xf32>
    %419 = vector.extract_strided_slice %374 {offsets = [0, 384], sizes = [8, 128], strides = [1, 1]} : vector<8x512xf32> to vector<8x128xf32>
    %cst_245 = arith.constant 5.000000e-01 : f32
    %420 = vector.broadcast %cst_245 : f32 to vector<8x128xf32>
    %421 = arith.mulf %420, %419 : vector<8x128xf32>
    %422 = math.tanh %421 : vector<8x128xf32>
    %cst_246 = arith.constant 5.000000e-01 : f32
    %423 = vector.broadcast %cst_246 : f32 to vector<8x128xf32>
    %424 = arith.mulf %423, %422 : vector<8x128xf32>
    %cst_247 = arith.constant 5.000000e-01 : f32
    %425 = vector.broadcast %cst_247 : f32 to vector<8x128xf32>
    %426 = arith.addf %424, %425 : vector<8x128xf32>
    %c0_248 = arith.constant 0 : index
    %c0_249 = arith.constant 0 : index
    %427 = vector.load %arg9[%c0_248, %c0_249] : memref<8x128xf32, #tpu.memory_space<vmem>>, vector<8x128xf32>
    %428 = arith.mulf %398, %427 : vector<8x128xf32>
    %429 = arith.mulf %382, %408 : vector<8x128xf32>
    %430 = arith.addf %428, %429 : vector<8x128xf32>
    %c0_250 = arith.constant 0 : index
    %c0_251 = arith.constant 0 : index
    %431 = vector.load %arg11[%c0_250, %c0_251] : memref<8x128xf32, #tpu.memory_space<vmem>>, vector<8x128xf32>
    %432 = arith.mulf %406, %431 : vector<8x128xf32>
    %433 = arith.mulf %390, %410 : vector<8x128xf32>
    %434 = arith.addf %432, %433 : vector<8x128xf32>
    %435 = math.tanh %430 : vector<8x128xf32>
    %436 = arith.mulf %418, %435 : vector<8x128xf32>
    %437 = math.tanh %434 : vector<8x128xf32>
    %438 = arith.mulf %426, %437 : vector<8x128xf32>
    %c0_252 = arith.constant 0 : index
    %c0_253 = arith.constant 0 : index
    %439 = vector.load %arg9[%c0_252, %c0_253] : memref<8x128xf32, #tpu.memory_space<vmem>>, vector<8x128xf32>
    tpu.vector_store %arg9[%c0_252, %c0_253], %430 {strides = array<i32>} : memref<8x128xf32, #tpu.memory_space<vmem>>, vector<8x128xf32>,
    %c0_254 = arith.constant 0 : index
    %c0_255 = arith.constant 0 : index
    %440 = vector.load %arg11[%c0_254, %c0_255] : memref<8x128xf32, #tpu.memory_space<vmem>>, vector<8x128xf32>
    tpu.vector_store %arg11[%c0_254, %c0_255], %434 {strides = array<i32>} : memref<8x128xf32, #tpu.memory_space<vmem>>, vector<8x128xf32>,
    %c0_256 = arith.constant 0 : index
    %c0_257 = arith.constant 0 : index
    %441 = vector.load %arg8[%c0_256, %c0_257] : memref<8x128xf32, #tpu.memory_space<vmem>>, vector<8x128xf32>
    tpu.vector_store %arg8[%c0_256, %c0_257], %436 {strides = array<i32>} : memref<8x128xf32, #tpu.memory_space<vmem>>, vector<8x128xf32>,
    %c0_258 = arith.constant 0 : index
    %c0_259 = arith.constant 0 : index
    %442 = vector.load %arg10[%c0_258, %c0_259] : memref<8x128xf32, #tpu.memory_space<vmem>>, vector<8x128xf32>
    tpu.vector_store %arg10[%c0_258, %c0_259], %438 {strides = array<i32>} : memref<8x128xf32, #tpu.memory_space<vmem>>, vector<8x128xf32>,
    %c4_260 = arith.constant 4 : index
    %c0_261 = arith.constant 0 : index
    %c0_262 = arith.constant 0 : index
    %443 = vector.load %arg6[%c4_260, %c0_261, %c0_262] : memref<8x8x128xf32, #tpu.memory_space<vmem>>, vector<1x8x128xf32>
    %444 = vector.shape_cast %443 : vector<1x8x128xf32> to vector<8x128xf32>
    %445 = vector.shape_cast %436 : vector<8x128xf32> to vector<1x8x128xf32>
    tpu.vector_store %arg6[%c4_260, %c0_261, %c0_262], %445 {strides = array<i32>} : memref<8x8x128xf32, #tpu.memory_space<vmem>>, vector<1x8x128xf32>,
    %c3_263 = arith.constant 3 : index
    %c0_264 = arith.constant 0 : index
    %c0_265 = arith.constant 0 : index
    %446 = vector.load %arg7[%c3_263, %c0_264, %c0_265] : memref<8x8x128xf32, #tpu.memory_space<vmem>>, vector<1x8x128xf32>
    %447 = vector.shape_cast %446 : vector<1x8x128xf32> to vector<8x128xf32>
    %448 = vector.shape_cast %438 : vector<8x128xf32> to vector<1x8x128xf32>
    tpu.vector_store %arg7[%c3_263, %c0_264, %c0_265], %448 {strides = array<i32>} : memref<8x8x128xf32, #tpu.memory_space<vmem>>, vector<1x8x128xf32>,
    %c5_266 = arith.constant 5 : index
    %c0_267 = arith.constant 0 : index
    %c0_268 = arith.constant 0 : index
    %449 = vector.load %arg12[%c5_266, %c0_267, %c0_268] : memref<8x8x512xf32, #tpu.memory_space<vmem>>, vector<1x8x512xf32>
    %450 = vector.shape_cast %449 : vector<1x8x512xf32> to vector<8x512xf32>
    %c0_269 = arith.constant 0 : index
    %c0_270 = arith.constant 0 : index
    %451 = vector.load %arg8[%c0_269, %c0_270] : memref<8x128xf32, #tpu.memory_space<vmem>>, vector<8x128xf32>
    %cst_271 = arith.constant dense<0.000000e+00> : vector<8x512xf32>
    %452 = tpu.matmul %451, %26, %cst_271 {dimension_numbers = #tpu.dot_dimension_numbers<[1], [0], [0], [1], [0, 0, 1, 1], [], []>} : vector<8x128xf32>, vector<128x512xf32>, vector<8x512xf32> -> vector<8x512xf32>
    %453 = arith.addf %450, %452 : vector<8x512xf32>
    %c2_272 = arith.constant 2 : index
    %c0_273 = arith.constant 0 : index
    %c0_274 = arith.constant 0 : index
    %454 = vector.load %arg13[%c2_272, %c0_273, %c0_274] : memref<8x8x512xf32, #tpu.memory_space<vmem>>, vector<1x8x512xf32>
    %455 = vector.shape_cast %454 : vector<1x8x512xf32> to vector<8x512xf32>
    %c0_275 = arith.constant 0 : index
    %c0_276 = arith.constant 0 : index
    %456 = vector.load %arg10[%c0_275, %c0_276] : memref<8x128xf32, #tpu.memory_space<vmem>>, vector<8x128xf32>
    %cst_277 = arith.constant dense<0.000000e+00> : vector<8x512xf32>
    %457 = tpu.matmul %456, %28, %cst_277 {dimension_numbers = #tpu.dot_dimension_numbers<[1], [0], [0], [1], [0, 0, 1, 1], [], []>} : vector<8x128xf32>, vector<128x512xf32>, vector<8x512xf32> -> vector<8x512xf32>
    %458 = arith.addf %455, %457 : vector<8x512xf32>
    %459 = vector.extract_strided_slice %453 {offsets = [0, 0], sizes = [8, 128], strides = [1, 1]} : vector<8x512xf32> to vector<8x128xf32>
    %cst_278 = arith.constant 5.000000e-01 : f32
    %460 = vector.broadcast %cst_278 : f32 to vector<8x128xf32>
    %461 = arith.mulf %460, %459 : vector<8x128xf32>
    %462 = math.tanh %461 : vector<8x128xf32>
    %cst_279 = arith.constant 5.000000e-01 : f32
    %463 = vector.broadcast %cst_279 : f32 to vector<8x128xf32>
    %464 = arith.mulf %463, %462 : vector<8x128xf32>
    %cst_280 = arith.constant 5.000000e-01 : f32
    %465 = vector.broadcast %cst_280 : f32 to vector<8x128xf32>
    %466 = arith.addf %464, %465 : vector<8x128xf32>
    %467 = vector.extract_strided_slice %458 {offsets = [0, 0], sizes = [8, 128], strides = [1, 1]} : vector<8x512xf32> to vector<8x128xf32>
    %cst_281 = arith.constant 5.000000e-01 : f32
    %468 = vector.broadcast %cst_281 : f32 to vector<8x128xf32>
    %469 = arith.mulf %468, %467 : vector<8x128xf32>
    %470 = math.tanh %469 : vector<8x128xf32>
    %cst_282 = arith.constant 5.000000e-01 : f32
    %471 = vector.broadcast %cst_282 : f32 to vector<8x128xf32>
    %472 = arith.mulf %471, %470 : vector<8x128xf32>
    %cst_283 = arith.constant 5.000000e-01 : f32
    %473 = vector.broadcast %cst_283 : f32 to vector<8x128xf32>
    %474 = arith.addf %472, %473 : vector<8x128xf32>
    %475 = vector.extract_strided_slice %453 {offsets = [0, 128], sizes = [8, 128], strides = [1, 1]} : vector<8x512xf32> to vector<8x128xf32>
    %cst_284 = arith.constant 5.000000e-01 : f32
    %476 = vector.broadcast %cst_284 : f32 to vector<8x128xf32>
    %477 = arith.mulf %476, %475 : vector<8x128xf32>
    %478 = math.tanh %477 : vector<8x128xf32>
    %cst_285 = arith.constant 5.000000e-01 : f32
    %479 = vector.broadcast %cst_285 : f32 to vector<8x128xf32>
    %480 = arith.mulf %479, %478 : vector<8x128xf32>
    %cst_286 = arith.constant 5.000000e-01 : f32
    %481 = vector.broadcast %cst_286 : f32 to vector<8x128xf32>
    %482 = arith.addf %480, %481 : vector<8x128xf32>
    %483 = vector.extract_strided_slice %458 {offsets = [0, 128], sizes = [8, 128], strides = [1, 1]} : vector<8x512xf32> to vector<8x128xf32>
    %cst_287 = arith.constant 5.000000e-01 : f32
    %484 = vector.broadcast %cst_287 : f32 to vector<8x128xf32>
    %485 = arith.mulf %484, %483 : vector<8x128xf32>
    %486 = math.tanh %485 : vector<8x128xf32>
    %cst_288 = arith.constant 5.000000e-01 : f32
    %487 = vector.broadcast %cst_288 : f32 to vector<8x128xf32>
    %488 = arith.mulf %487, %486 : vector<8x128xf32>
    %cst_289 = arith.constant 5.000000e-01 : f32
    %489 = vector.broadcast %cst_289 : f32 to vector<8x128xf32>
    %490 = arith.addf %488, %489 : vector<8x128xf32>
    %491 = vector.extract_strided_slice %453 {offsets = [0, 256], sizes = [8, 128], strides = [1, 1]} : vector<8x512xf32> to vector<8x128xf32>
    %492 = math.tanh %491 : vector<8x128xf32>
    %493 = vector.extract_strided_slice %458 {offsets = [0, 256], sizes = [8, 128], strides = [1, 1]} : vector<8x512xf32> to vector<8x128xf32>
    %494 = math.tanh %493 : vector<8x128xf32>
    %495 = vector.extract_strided_slice %453 {offsets = [0, 384], sizes = [8, 128], strides = [1, 1]} : vector<8x512xf32> to vector<8x128xf32>
    %cst_290 = arith.constant 5.000000e-01 : f32
    %496 = vector.broadcast %cst_290 : f32 to vector<8x128xf32>
    %497 = arith.mulf %496, %495 : vector<8x128xf32>
    %498 = math.tanh %497 : vector<8x128xf32>
    %cst_291 = arith.constant 5.000000e-01 : f32
    %499 = vector.broadcast %cst_291 : f32 to vector<8x128xf32>
    %500 = arith.mulf %499, %498 : vector<8x128xf32>
    %cst_292 = arith.constant 5.000000e-01 : f32
    %501 = vector.broadcast %cst_292 : f32 to vector<8x128xf32>
    %502 = arith.addf %500, %501 : vector<8x128xf32>
    %503 = vector.extract_strided_slice %458 {offsets = [0, 384], sizes = [8, 128], strides = [1, 1]} : vector<8x512xf32> to vector<8x128xf32>
    %cst_293 = arith.constant 5.000000e-01 : f32
    %504 = vector.broadcast %cst_293 : f32 to vector<8x128xf32>
    %505 = arith.mulf %504, %503 : vector<8x128xf32>
    %506 = math.tanh %505 : vector<8x128xf32>
    %cst_294 = arith.constant 5.000000e-01 : f32
    %507 = vector.broadcast %cst_294 : f32 to vector<8x128xf32>
    %508 = arith.mulf %507, %506 : vector<8x128xf32>
    %cst_295 = arith.constant 5.000000e-01 : f32
    %509 = vector.broadcast %cst_295 : f32 to vector<8x128xf32>
    %510 = arith.addf %508, %509 : vector<8x128xf32>
    %c0_296 = arith.constant 0 : index
    %c0_297 = arith.constant 0 : index
    %511 = vector.load %arg9[%c0_296, %c0_297] : memref<8x128xf32, #tpu.memory_space<vmem>>, vector<8x128xf32>
    %512 = arith.mulf %482, %511 : vector<8x128xf32>
    %513 = arith.mulf %466, %492 : vector<8x128xf32>
    %514 = arith.addf %512, %513 : vector<8x128xf32>
    %c0_298 = arith.constant 0 : index
    %c0_299 = arith.constant 0 : index
    %515 = vector.load %arg11[%c0_298, %c0_299] : memref<8x128xf32, #tpu.memory_space<vmem>>, vector<8x128xf32>
    %516 = arith.mulf %490, %515 : vector<8x128xf32>
    %517 = arith.mulf %474, %494 : vector<8x128xf32>
    %518 = arith.addf %516, %517 : vector<8x128xf32>
    %519 = math.tanh %514 : vector<8x128xf32>
    %520 = arith.mulf %502, %519 : vector<8x128xf32>
    %521 = math.tanh %518 : vector<8x128xf32>
    %522 = arith.mulf %510, %521 : vector<8x128xf32>
    %c0_300 = arith.constant 0 : index
    %c0_301 = arith.constant 0 : index
    %523 = vector.load %arg9[%c0_300, %c0_301] : memref<8x128xf32, #tpu.memory_space<vmem>>, vector<8x128xf32>
    tpu.vector_store %arg9[%c0_300, %c0_301], %514 {strides = array<i32>} : memref<8x128xf32, #tpu.memory_space<vmem>>, vector<8x128xf32>,
    %c0_302 = arith.constant 0 : index
    %c0_303 = arith.constant 0 : index
    %524 = vector.load %arg11[%c0_302, %c0_303] : memref<8x128xf32, #tpu.memory_space<vmem>>, vector<8x128xf32>
    tpu.vector_store %arg11[%c0_302, %c0_303], %518 {strides = array<i32>} : memref<8x128xf32, #tpu.memory_space<vmem>>, vector<8x128xf32>,
    %c0_304 = arith.constant 0 : index
    %c0_305 = arith.constant 0 : index
    %525 = vector.load %arg8[%c0_304, %c0_305] : memref<8x128xf32, #tpu.memory_space<vmem>>, vector<8x128xf32>
    tpu.vector_store %arg8[%c0_304, %c0_305], %520 {strides = array<i32>} : memref<8x128xf32, #tpu.memory_space<vmem>>, vector<8x128xf32>,
    %c0_306 = arith.constant 0 : index
    %c0_307 = arith.constant 0 : index
    %526 = vector.load %arg10[%c0_306, %c0_307] : memref<8x128xf32, #tpu.memory_space<vmem>>, vector<8x128xf32>
    tpu.vector_store %arg10[%c0_306, %c0_307], %522 {strides = array<i32>} : memref<8x128xf32, #tpu.memory_space<vmem>>, vector<8x128xf32>,
    %c5_308 = arith.constant 5 : index
    %c0_309 = arith.constant 0 : index
    %c0_310 = arith.constant 0 : index
    %527 = vector.load %arg6[%c5_308, %c0_309, %c0_310] : memref<8x8x128xf32, #tpu.memory_space<vmem>>, vector<1x8x128xf32>
    %528 = vector.shape_cast %527 : vector<1x8x128xf32> to vector<8x128xf32>
    %529 = vector.shape_cast %520 : vector<8x128xf32> to vector<1x8x128xf32>
    tpu.vector_store %arg6[%c5_308, %c0_309, %c0_310], %529 {strides = array<i32>} : memref<8x8x128xf32, #tpu.memory_space<vmem>>, vector<1x8x128xf32>,
    %c2_311 = arith.constant 2 : index
    %c0_312 = arith.constant 0 : index
    %c0_313 = arith.constant 0 : index
    %530 = vector.load %arg7[%c2_311, %c0_312, %c0_313] : memref<8x8x128xf32, #tpu.memory_space<vmem>>, vector<1x8x128xf32>
    %531 = vector.shape_cast %530 : vector<1x8x128xf32> to vector<8x128xf32>
    %532 = vector.shape_cast %522 : vector<8x128xf32> to vector<1x8x128xf32>
    tpu.vector_store %arg7[%c2_311, %c0_312, %c0_313], %532 {strides = array<i32>} : memref<8x8x128xf32, #tpu.memory_space<vmem>>, vector<1x8x128xf32>,
    %c6_314 = arith.constant 6 : index
    %c0_315 = arith.constant 0 : index
    %c0_316 = arith.constant 0 : index
    %533 = vector.load %arg12[%c6_314, %c0_315, %c0_316] : memref<8x8x512xf32, #tpu.memory_space<vmem>>, vector<1x8x512xf32>
    %534 = vector.shape_cast %533 : vector<1x8x512xf32> to vector<8x512xf32>
    %c0_317 = arith.constant 0 : index
    %c0_318 = arith.constant 0 : index
    %535 = vector.load %arg8[%c0_317, %c0_318] : memref<8x128xf32, #tpu.memory_space<vmem>>, vector<8x128xf32>
    %cst_319 = arith.constant dense<0.000000e+00> : vector<8x512xf32>
    %536 = tpu.matmul %535, %26, %cst_319 {dimension_numbers = #tpu.dot_dimension_numbers<[1], [0], [0], [1], [0, 0, 1, 1], [], []>} : vector<8x128xf32>, vector<128x512xf32>, vector<8x512xf32> -> vector<8x512xf32>
    %537 = arith.addf %534, %536 : vector<8x512xf32>
    %c1_320 = arith.constant 1 : index
    %c0_321 = arith.constant 0 : index
    %c0_322 = arith.constant 0 : index
    %538 = vector.load %arg13[%c1_320, %c0_321, %c0_322] : memref<8x8x512xf32, #tpu.memory_space<vmem>>, vector<1x8x512xf32>
    %539 = vector.shape_cast %538 : vector<1x8x512xf32> to vector<8x512xf32>
    %c0_323 = arith.constant 0 : index
    %c0_324 = arith.constant 0 : index
    %540 = vector.load %arg10[%c0_323, %c0_324] : memref<8x128xf32, #tpu.memory_space<vmem>>, vector<8x128xf32>
    %cst_325 = arith.constant dense<0.000000e+00> : vector<8x512xf32>
    %541 = tpu.matmul %540, %28, %cst_325 {dimension_numbers = #tpu.dot_dimension_numbers<[1], [0], [0], [1], [0, 0, 1, 1], [], []>} : vector<8x128xf32>, vector<128x512xf32>, vector<8x512xf32> -> vector<8x512xf32>
    %542 = arith.addf %539, %541 : vector<8x512xf32>
    %543 = vector.extract_strided_slice %537 {offsets = [0, 0], sizes = [8, 128], strides = [1, 1]} : vector<8x512xf32> to vector<8x128xf32>
    %cst_326 = arith.constant 5.000000e-01 : f32
    %544 = vector.broadcast %cst_326 : f32 to vector<8x128xf32>
    %545 = arith.mulf %544, %543 : vector<8x128xf32>
    %546 = math.tanh %545 : vector<8x128xf32>
    %cst_327 = arith.constant 5.000000e-01 : f32
    %547 = vector.broadcast %cst_327 : f32 to vector<8x128xf32>
    %548 = arith.mulf %547, %546 : vector<8x128xf32>
    %cst_328 = arith.constant 5.000000e-01 : f32
    %549 = vector.broadcast %cst_328 : f32 to vector<8x128xf32>
    %550 = arith.addf %548, %549 : vector<8x128xf32>
    %551 = vector.extract_strided_slice %542 {offsets = [0, 0], sizes = [8, 128], strides = [1, 1]} : vector<8x512xf32> to vector<8x128xf32>
    %cst_329 = arith.constant 5.000000e-01 : f32
    %552 = vector.broadcast %cst_329 : f32 to vector<8x128xf32>
    %553 = arith.mulf %552, %551 : vector<8x128xf32>
    %554 = math.tanh %553 : vector<8x128xf32>
    %cst_330 = arith.constant 5.000000e-01 : f32
    %555 = vector.broadcast %cst_330 : f32 to vector<8x128xf32>
    %556 = arith.mulf %555, %554 : vector<8x128xf32>
    %cst_331 = arith.constant 5.000000e-01 : f32
    %557 = vector.broadcast %cst_331 : f32 to vector<8x128xf32>
    %558 = arith.addf %556, %557 : vector<8x128xf32>
    %559 = vector.extract_strided_slice %537 {offsets = [0, 128], sizes = [8, 128], strides = [1, 1]} : vector<8x512xf32> to vector<8x128xf32>
    %cst_332 = arith.constant 5.000000e-01 : f32
    %560 = vector.broadcast %cst_332 : f32 to vector<8x128xf32>
    %561 = arith.mulf %560, %559 : vector<8x128xf32>
    %562 = math.tanh %561 : vector<8x128xf32>
    %cst_333 = arith.constant 5.000000e-01 : f32
    %563 = vector.broadcast %cst_333 : f32 to vector<8x128xf32>
    %564 = arith.mulf %563, %562 : vector<8x128xf32>
    %cst_334 = arith.constant 5.000000e-01 : f32
    %565 = vector.broadcast %cst_334 : f32 to vector<8x128xf32>
    %566 = arith.addf %564, %565 : vector<8x128xf32>
    %567 = vector.extract_strided_slice %542 {offsets = [0, 128], sizes = [8, 128], strides = [1, 1]} : vector<8x512xf32> to vector<8x128xf32>
    %cst_335 = arith.constant 5.000000e-01 : f32
    %568 = vector.broadcast %cst_335 : f32 to vector<8x128xf32>
    %569 = arith.mulf %568, %567 : vector<8x128xf32>
    %570 = math.tanh %569 : vector<8x128xf32>
    %cst_336 = arith.constant 5.000000e-01 : f32
    %571 = vector.broadcast %cst_336 : f32 to vector<8x128xf32>
    %572 = arith.mulf %571, %570 : vector<8x128xf32>
    %cst_337 = arith.constant 5.000000e-01 : f32
    %573 = vector.broadcast %cst_337 : f32 to vector<8x128xf32>
    %574 = arith.addf %572, %573 : vector<8x128xf32>
    %575 = vector.extract_strided_slice %537 {offsets = [0, 256], sizes = [8, 128], strides = [1, 1]} : vector<8x512xf32> to vector<8x128xf32>
    %576 = math.tanh %575 : vector<8x128xf32>
    %577 = vector.extract_strided_slice %542 {offsets = [0, 256], sizes = [8, 128], strides = [1, 1]} : vector<8x512xf32> to vector<8x128xf32>
    %578 = math.tanh %577 : vector<8x128xf32>
    %579 = vector.extract_strided_slice %537 {offsets = [0, 384], sizes = [8, 128], strides = [1, 1]} : vector<8x512xf32> to vector<8x128xf32>
    %cst_338 = arith.constant 5.000000e-01 : f32
    %580 = vector.broadcast %cst_338 : f32 to vector<8x128xf32>
    %581 = arith.mulf %580, %579 : vector<8x128xf32>
    %582 = math.tanh %581 : vector<8x128xf32>
    %cst_339 = arith.constant 5.000000e-01 : f32
    %583 = vector.broadcast %cst_339 : f32 to vector<8x128xf32>
    %584 = arith.mulf %583, %582 : vector<8x128xf32>
    %cst_340 = arith.constant 5.000000e-01 : f32
    %585 = vector.broadcast %cst_340 : f32 to vector<8x128xf32>
    %586 = arith.addf %584, %585 : vector<8x128xf32>
    %587 = vector.extract_strided_slice %542 {offsets = [0, 384], sizes = [8, 128], strides = [1, 1]} : vector<8x512xf32> to vector<8x128xf32>
    %cst_341 = arith.constant 5.000000e-01 : f32
    %588 = vector.broadcast %cst_341 : f32 to vector<8x128xf32>
    %589 = arith.mulf %588, %587 : vector<8x128xf32>
    %590 = math.tanh %589 : vector<8x128xf32>
    %cst_342 = arith.constant 5.000000e-01 : f32
    %591 = vector.broadcast %cst_342 : f32 to vector<8x128xf32>
    %592 = arith.mulf %591, %590 : vector<8x128xf32>
    %cst_343 = arith.constant 5.000000e-01 : f32
    %593 = vector.broadcast %cst_343 : f32 to vector<8x128xf32>
    %594 = arith.addf %592, %593 : vector<8x128xf32>
    %c0_344 = arith.constant 0 : index
    %c0_345 = arith.constant 0 : index
    %595 = vector.load %arg9[%c0_344, %c0_345] : memref<8x128xf32, #tpu.memory_space<vmem>>, vector<8x128xf32>
    %596 = arith.mulf %566, %595 : vector<8x128xf32>
    %597 = arith.mulf %550, %576 : vector<8x128xf32>
    %598 = arith.addf %596, %597 : vector<8x128xf32>
    %c0_346 = arith.constant 0 : index
    %c0_347 = arith.constant 0 : index
    %599 = vector.load %arg11[%c0_346, %c0_347] : memref<8x128xf32, #tpu.memory_space<vmem>>, vector<8x128xf32>
    %600 = arith.mulf %574, %599 : vector<8x128xf32>
    %601 = arith.mulf %558, %578 : vector<8x128xf32>
    %602 = arith.addf %600, %601 : vector<8x128xf32>
    %603 = math.tanh %598 : vector<8x128xf32>
    %604 = arith.mulf %586, %603 : vector<8x128xf32>
    %605 = math.tanh %602 : vector<8x128xf32>
    %606 = arith.mulf %594, %605 : vector<8x128xf32>
    %c0_348 = arith.constant 0 : index
    %c0_349 = arith.constant 0 : index
    %607 = vector.load %arg9[%c0_348, %c0_349] : memref<8x128xf32, #tpu.memory_space<vmem>>, vector<8x128xf32>
    tpu.vector_store %arg9[%c0_348, %c0_349], %598 {strides = array<i32>} : memref<8x128xf32, #tpu.memory_space<vmem>>, vector<8x128xf32>,
    %c0_350 = arith.constant 0 : index
    %c0_351 = arith.constant 0 : index
    %608 = vector.load %arg11[%c0_350, %c0_351] : memref<8x128xf32, #tpu.memory_space<vmem>>, vector<8x128xf32>
    tpu.vector_store %arg11[%c0_350, %c0_351], %602 {strides = array<i32>} : memref<8x128xf32, #tpu.memory_space<vmem>>, vector<8x128xf32>,
    %c0_352 = arith.constant 0 : index
    %c0_353 = arith.constant 0 : index
    %609 = vector.load %arg8[%c0_352, %c0_353] : memref<8x128xf32, #tpu.memory_space<vmem>>, vector<8x128xf32>
    tpu.vector_store %arg8[%c0_352, %c0_353], %604 {strides = array<i32>} : memref<8x128xf32, #tpu.memory_space<vmem>>, vector<8x128xf32>,
    %c0_354 = arith.constant 0 : index
    %c0_355 = arith.constant 0 : index
    %610 = vector.load %arg10[%c0_354, %c0_355] : memref<8x128xf32, #tpu.memory_space<vmem>>, vector<8x128xf32>
    tpu.vector_store %arg10[%c0_354, %c0_355], %606 {strides = array<i32>} : memref<8x128xf32, #tpu.memory_space<vmem>>, vector<8x128xf32>,
    %c6_356 = arith.constant 6 : index
    %c0_357 = arith.constant 0 : index
    %c0_358 = arith.constant 0 : index
    %611 = vector.load %arg6[%c6_356, %c0_357, %c0_358] : memref<8x8x128xf32, #tpu.memory_space<vmem>>, vector<1x8x128xf32>
    %612 = vector.shape_cast %611 : vector<1x8x128xf32> to vector<8x128xf32>
    %613 = vector.shape_cast %604 : vector<8x128xf32> to vector<1x8x128xf32>
    tpu.vector_store %arg6[%c6_356, %c0_357, %c0_358], %613 {strides = array<i32>} : memref<8x8x128xf32, #tpu.memory_space<vmem>>, vector<1x8x128xf32>,
    %c1_359 = arith.constant 1 : index
    %c0_360 = arith.constant 0 : index
    %c0_361 = arith.constant 0 : index
    %614 = vector.load %arg7[%c1_359, %c0_360, %c0_361] : memref<8x8x128xf32, #tpu.memory_space<vmem>>, vector<1x8x128xf32>
    %615 = vector.shape_cast %614 : vector<1x8x128xf32> to vector<8x128xf32>
    %616 = vector.shape_cast %606 : vector<8x128xf32> to vector<1x8x128xf32>
    tpu.vector_store %arg7[%c1_359, %c0_360, %c0_361], %616 {strides = array<i32>} : memref<8x8x128xf32, #tpu.memory_space<vmem>>, vector<1x8x128xf32>,
    %c7_362 = arith.constant 7 : index
    %c0_363 = arith.constant 0 : index
    %c0_364 = arith.constant 0 : index
    %617 = vector.load %arg12[%c7_362, %c0_363, %c0_364] : memref<8x8x512xf32, #tpu.memory_space<vmem>>, vector<1x8x512xf32>
    %618 = vector.shape_cast %617 : vector<1x8x512xf32> to vector<8x512xf32>
    %c0_365 = arith.constant 0 : index
    %c0_366 = arith.constant 0 : index
    %619 = vector.load %arg8[%c0_365, %c0_366] : memref<8x128xf32, #tpu.memory_space<vmem>>, vector<8x128xf32>
    %cst_367 = arith.constant dense<0.000000e+00> : vector<8x512xf32>
    %620 = tpu.matmul %619, %26, %cst_367 {dimension_numbers = #tpu.dot_dimension_numbers<[1], [0], [0], [1], [0, 0, 1, 1], [], []>} : vector<8x128xf32>, vector<128x512xf32>, vector<8x512xf32> -> vector<8x512xf32>
    %621 = arith.addf %618, %620 : vector<8x512xf32>
    %c0_368 = arith.constant 0 : index
    %c0_369 = arith.constant 0 : index
    %c0_370 = arith.constant 0 : index
    %622 = vector.load %arg13[%c0_368, %c0_369, %c0_370] : memref<8x8x512xf32, #tpu.memory_space<vmem>>, vector<1x8x512xf32>
    %623 = vector.shape_cast %622 : vector<1x8x512xf32> to vector<8x512xf32>
    %c0_371 = arith.constant 0 : index
    %c0_372 = arith.constant 0 : index
    %624 = vector.load %arg10[%c0_371, %c0_372] : memref<8x128xf32, #tpu.memory_space<vmem>>, vector<8x128xf32>
    %cst_373 = arith.constant dense<0.000000e+00> : vector<8x512xf32>
    %625 = tpu.matmul %624, %28, %cst_373 {dimension_numbers = #tpu.dot_dimension_numbers<[1], [0], [0], [1], [0, 0, 1, 1], [], []>} : vector<8x128xf32>, vector<128x512xf32>, vector<8x512xf32> -> vector<8x512xf32>
    %626 = arith.addf %623, %625 : vector<8x512xf32>
    %627 = vector.extract_strided_slice %621 {offsets = [0, 0], sizes = [8, 128], strides = [1, 1]} : vector<8x512xf32> to vector<8x128xf32>
    %cst_374 = arith.constant 5.000000e-01 : f32
    %628 = vector.broadcast %cst_374 : f32 to vector<8x128xf32>
    %629 = arith.mulf %628, %627 : vector<8x128xf32>
    %630 = math.tanh %629 : vector<8x128xf32>
    %cst_375 = arith.constant 5.000000e-01 : f32
    %631 = vector.broadcast %cst_375 : f32 to vector<8x128xf32>
    %632 = arith.mulf %631, %630 : vector<8x128xf32>
    %cst_376 = arith.constant 5.000000e-01 : f32
    %633 = vector.broadcast %cst_376 : f32 to vector<8x128xf32>
    %634 = arith.addf %632, %633 : vector<8x128xf32>
    %635 = vector.extract_strided_slice %626 {offsets = [0, 0], sizes = [8, 128], strides = [1, 1]} : vector<8x512xf32> to vector<8x128xf32>
    %cst_377 = arith.constant 5.000000e-01 : f32
    %636 = vector.broadcast %cst_377 : f32 to vector<8x128xf32>
    %637 = arith.mulf %636, %635 : vector<8x128xf32>
    %638 = math.tanh %637 : vector<8x128xf32>
    %cst_378 = arith.constant 5.000000e-01 : f32
    %639 = vector.broadcast %cst_378 : f32 to vector<8x128xf32>
    %640 = arith.mulf %639, %638 : vector<8x128xf32>
    %cst_379 = arith.constant 5.000000e-01 : f32
    %641 = vector.broadcast %cst_379 : f32 to vector<8x128xf32>
    %642 = arith.addf %640, %641 : vector<8x128xf32>
    %643 = vector.extract_strided_slice %621 {offsets = [0, 128], sizes = [8, 128], strides = [1, 1]} : vector<8x512xf32> to vector<8x128xf32>
    %cst_380 = arith.constant 5.000000e-01 : f32
    %644 = vector.broadcast %cst_380 : f32 to vector<8x128xf32>
    %645 = arith.mulf %644, %643 : vector<8x128xf32>
    %646 = math.tanh %645 : vector<8x128xf32>
    %cst_381 = arith.constant 5.000000e-01 : f32
    %647 = vector.broadcast %cst_381 : f32 to vector<8x128xf32>
    %648 = arith.mulf %647, %646 : vector<8x128xf32>
    %cst_382 = arith.constant 5.000000e-01 : f32
    %649 = vector.broadcast %cst_382 : f32 to vector<8x128xf32>
    %650 = arith.addf %648, %649 : vector<8x128xf32>
    %651 = vector.extract_strided_slice %626 {offsets = [0, 128], sizes = [8, 128], strides = [1, 1]} : vector<8x512xf32> to vector<8x128xf32>
    %cst_383 = arith.constant 5.000000e-01 : f32
    %652 = vector.broadcast %cst_383 : f32 to vector<8x128xf32>
    %653 = arith.mulf %652, %651 : vector<8x128xf32>
    %654 = math.tanh %653 : vector<8x128xf32>
    %cst_384 = arith.constant 5.000000e-01 : f32
    %655 = vector.broadcast %cst_384 : f32 to vector<8x128xf32>
    %656 = arith.mulf %655, %654 : vector<8x128xf32>
    %cst_385 = arith.constant 5.000000e-01 : f32
    %657 = vector.broadcast %cst_385 : f32 to vector<8x128xf32>
    %658 = arith.addf %656, %657 : vector<8x128xf32>
    %659 = vector.extract_strided_slice %621 {offsets = [0, 256], sizes = [8, 128], strides = [1, 1]} : vector<8x512xf32> to vector<8x128xf32>
    %660 = math.tanh %659 : vector<8x128xf32>
    %661 = vector.extract_strided_slice %626 {offsets = [0, 256], sizes = [8, 128], strides = [1, 1]} : vector<8x512xf32> to vector<8x128xf32>
    %662 = math.tanh %661 : vector<8x128xf32>
    %663 = vector.extract_strided_slice %621 {offsets = [0, 384], sizes = [8, 128], strides = [1, 1]} : vector<8x512xf32> to vector<8x128xf32>
    %cst_386 = arith.constant 5.000000e-01 : f32
    %664 = vector.broadcast %cst_386 : f32 to vector<8x128xf32>
    %665 = arith.mulf %664, %663 : vector<8x128xf32>
    %666 = math.tanh %665 : vector<8x128xf32>
    %cst_387 = arith.constant 5.000000e-01 : f32
    %667 = vector.broadcast %cst_387 : f32 to vector<8x128xf32>
    %668 = arith.mulf %667, %666 : vector<8x128xf32>
    %cst_388 = arith.constant 5.000000e-01 : f32
    %669 = vector.broadcast %cst_388 : f32 to vector<8x128xf32>
    %670 = arith.addf %668, %669 : vector<8x128xf32>
    %671 = vector.extract_strided_slice %626 {offsets = [0, 384], sizes = [8, 128], strides = [1, 1]} : vector<8x512xf32> to vector<8x128xf32>
    %cst_389 = arith.constant 5.000000e-01 : f32
    %672 = vector.broadcast %cst_389 : f32 to vector<8x128xf32>
    %673 = arith.mulf %672, %671 : vector<8x128xf32>
    %674 = math.tanh %673 : vector<8x128xf32>
    %cst_390 = arith.constant 5.000000e-01 : f32
    %675 = vector.broadcast %cst_390 : f32 to vector<8x128xf32>
    %676 = arith.mulf %675, %674 : vector<8x128xf32>
    %cst_391 = arith.constant 5.000000e-01 : f32
    %677 = vector.broadcast %cst_391 : f32 to vector<8x128xf32>
    %678 = arith.addf %676, %677 : vector<8x128xf32>
    %c0_392 = arith.constant 0 : index
    %c0_393 = arith.constant 0 : index
    %679 = vector.load %arg9[%c0_392, %c0_393] : memref<8x128xf32, #tpu.memory_space<vmem>>, vector<8x128xf32>
    %680 = arith.mulf %650, %679 : vector<8x128xf32>
    %681 = arith.mulf %634, %660 : vector<8x128xf32>
    %682 = arith.addf %680, %681 : vector<8x128xf32>
    %c0_394 = arith.constant 0 : index
    %c0_395 = arith.constant 0 : index
    %683 = vector.load %arg11[%c0_394, %c0_395] : memref<8x128xf32, #tpu.memory_space<vmem>>, vector<8x128xf32>
    %684 = arith.mulf %658, %683 : vector<8x128xf32>
    %685 = arith.mulf %642, %662 : vector<8x128xf32>
    %686 = arith.addf %684, %685 : vector<8x128xf32>
    %687 = math.tanh %682 : vector<8x128xf32>
    %688 = arith.mulf %670, %687 : vector<8x128xf32>
    %689 = math.tanh %686 : vector<8x128xf32>
    %690 = arith.mulf %678, %689 : vector<8x128xf32>
    %c0_396 = arith.constant 0 : index
    %c0_397 = arith.constant 0 : index
    %691 = vector.load %arg9[%c0_396, %c0_397] : memref<8x128xf32, #tpu.memory_space<vmem>>, vector<8x128xf32>
    tpu.vector_store %arg9[%c0_396, %c0_397], %682 {strides = array<i32>} : memref<8x128xf32, #tpu.memory_space<vmem>>, vector<8x128xf32>,
    %c0_398 = arith.constant 0 : index
    %c0_399 = arith.constant 0 : index
    %692 = vector.load %arg11[%c0_398, %c0_399] : memref<8x128xf32, #tpu.memory_space<vmem>>, vector<8x128xf32>
    tpu.vector_store %arg11[%c0_398, %c0_399], %686 {strides = array<i32>} : memref<8x128xf32, #tpu.memory_space<vmem>>, vector<8x128xf32>,
    %c0_400 = arith.constant 0 : index
    %c0_401 = arith.constant 0 : index
    %693 = vector.load %arg8[%c0_400, %c0_401] : memref<8x128xf32, #tpu.memory_space<vmem>>, vector<8x128xf32>
    tpu.vector_store %arg8[%c0_400, %c0_401], %688 {strides = array<i32>} : memref<8x128xf32, #tpu.memory_space<vmem>>, vector<8x128xf32>,
    %c0_402 = arith.constant 0 : index
    %c0_403 = arith.constant 0 : index
    %694 = vector.load %arg10[%c0_402, %c0_403] : memref<8x128xf32, #tpu.memory_space<vmem>>, vector<8x128xf32>
    tpu.vector_store %arg10[%c0_402, %c0_403], %690 {strides = array<i32>} : memref<8x128xf32, #tpu.memory_space<vmem>>, vector<8x128xf32>,
    %c7_404 = arith.constant 7 : index
    %c0_405 = arith.constant 0 : index
    %c0_406 = arith.constant 0 : index
    %695 = vector.load %arg6[%c7_404, %c0_405, %c0_406] : memref<8x8x128xf32, #tpu.memory_space<vmem>>, vector<1x8x128xf32>
    %696 = vector.shape_cast %695 : vector<1x8x128xf32> to vector<8x128xf32>
    %697 = vector.shape_cast %688 : vector<8x128xf32> to vector<1x8x128xf32>
    tpu.vector_store %arg6[%c7_404, %c0_405, %c0_406], %697 {strides = array<i32>} : memref<8x8x128xf32, #tpu.memory_space<vmem>>, vector<1x8x128xf32>,
    %c0_407 = arith.constant 0 : index
    %c0_408 = arith.constant 0 : index
    %c0_409 = arith.constant 0 : index
    %698 = vector.load %arg7[%c0_407, %c0_408, %c0_409] : memref<8x8x128xf32, #tpu.memory_space<vmem>>, vector<1x8x128xf32>
    %699 = vector.shape_cast %698 : vector<1x8x128xf32> to vector<8x128xf32>
    %700 = vector.shape_cast %690 : vector<8x128xf32> to vector<1x8x128xf32>
    tpu.vector_store %arg7[%c0_407, %c0_408, %c0_409], %700 {strides = array<i32>} : memref<8x8x128xf32, #tpu.memory_space<vmem>>, vector<1x8x128xf32>,
    return
  }
  func.func @transform_0(%arg0: i32) -> (i32, i32, i32) {
    %c0_i32 = arith.constant 0 : i32
    %c0_i32_0 = arith.constant 0 : i32
    %c0_i32_1 = arith.constant 0 : i32
    return %arg0, %c0_i32, %c0_i32_0 : i32, i32, i32
  }
  func.func @transform_1(%arg0: i32) -> (i32, i32, i32) {
    %c0_i32 = arith.constant 0 : i32
    %0 = arith.subi %c0_i32, %arg0 : i32
    %c0_i32_0 = arith.constant 0 : i32
    %c0_i32_1 = arith.constant 0 : i32
    %c0_i32_2 = arith.constant 0 : i32
    return %0, %c0_i32_0, %c0_i32_1 : i32, i32, i32
  }
  func.func @transform_2(%arg0: i32) -> (i32, i32, i32, i32) {
    %c0_i32 = arith.constant 0 : i32
    %c0_i32_0 = arith.constant 0 : i32
    %c0_i32_1 = arith.constant 0 : i32
    %c0_i32_2 = arith.constant 0 : i32
    %c0_i32_3 = arith.constant 0 : i32
    return %c0_i32, %c0_i32_0, %c0_i32_1, %c0_i32_2 : i32, i32, i32, i32
  }
  func.func @transform_3(%arg0: i32) -> (i32, i32, i32) {
    %c0_i32 = arith.constant 0 : i32
    %c0_i32_0 = arith.constant 0 : i32
    %c0_i32_1 = arith.constant 0 : i32
    %c0_i32_2 = arith.constant 0 : i32
    return %c0_i32, %c0_i32_0, %c0_i32_1 : i32, i32, i32
  }
  func.func @transform_4(%arg0: i32) -> (i32, i32, i32) {
    %c0_i32 = arith.constant 0 : i32
    %c0_i32_0 = arith.constant 0 : i32
    %c0_i32_1 = arith.constant 0 : i32
    %c0_i32_2 = arith.constant 0 : i32
    return %c0_i32, %c0_i32_0, %c0_i32_1 : i32, i32, i32
  }
  func.func @transform_5(%arg0: i32) -> (i32, i32, i32) {
    %c0_i32 = arith.constant 0 : i32
    %c0_i32_0 = arith.constant 0 : i32
    %c0_i32_1 = arith.constant 0 : i32
    return %arg0, %c0_i32, %c0_i32_0 : i32, i32, i32
  }
  func.func @transform_6(%arg0: i32) -> (i32, i32, i32) {
    %c0_i32 = arith.constant 0 : i32
    %0 = arith.subi %c0_i32, %arg0 : i32
    %c0_i32_0 = arith.constant 0 : i32
    %c0_i32_1 = arith.constant 0 : i32
    %c0_i32_2 = arith.constant 0 : i32
    return %0, %c0_i32_0, %c0_i32_1 : i32, i32, i32
  }
}

</mosaic_0001>

<bundles_post_ra>
// kernel: tpu_custom_call.1
= control target key start
LH: loop header
LB: loop body
LE: loop exit
PB: predicated region body
PF: predicated region fallthrough
CT: control target
= control target key end

     0   :  { %12 = vsyncpa [#allocation9], 0  ;;  %s5454_s0 = inlined_call_operand.hbm [shape: f32[8,8,128], index: 0, kind: input, shape index: {}]   ;;  %s5455_s1 = inlined_call_operand.hbm [shape: f32[8,8,128], index: 1, kind: input, shape index: {}]   ;;  %s5456_s2 = inlined_call_operand.hbm [shape: f32[2,1,128,512], index: 2, kind: input, shape index: {}]   ;;  %s5457_s3 = inlined_call_operand.hbm [shape: f32[2,128,512], index: 3, kind: input, shape index: {}]   ;;  %s5458_s4 = inlined_call_operand.hbm [shape: f32[2,1,512], index: 4, kind: input, shape index: {}]   ;;  %s5459_s5 = inlined_call_operand.hbm [shape: f32[8,8,128], index: 5, kind: output, shape index: {0}]   ;;  %s5460_s6 = inlined_call_operand.hbm [shape: f32[8,8,128], index: 6, kind: output, shape index: {1}]  }
   0x1   :  { %13 = vsyncpa [#allocation12], 0 }
   0x2   :  { %14 = vsyncpa [#allocation15], 0 }
   0x3   :  { %15 = vsyncpa [#allocation10], 0 }
   0x4   :  { %16 = vsyncpa [#allocation19], 0  ;;  %s38_s23 = sshll.u32 %s5455_s1, 4  ;;  %s3264_s24 = smov [#allocation11]   ;;  %s39_s23 = int_to_ptr.hbm [resolvable:$true] %s38_s23 }
   0x5   :  { %s40_s25 = sshll.u32 %s3264_s24, 4  ;;  %s3265_s26 = smov 128   ;;  %s41_s25 = int_to_ptr.vmem [resolvable:$true] %s40_s25 }
   0x6   :  { %s3266_s27 = smov 8   ;;  %s64_s30 = sshll.u32 %s5457_s3, 4  ;;  %s65_s30 = int_to_ptr.hbm [resolvable:$true] %s64_s30 }
   0x7   :  { %46 = dma.hbm_to_vmem [thread:$0]  %s39_s23, 1024, %s41_s25, [#allocation12], %s3265_s26, %s3265_s26, %s3266_s27  }
   0x8   :  { %s3267_s7 = smov [#allocation14]   ;;  %s21_s1 = sshll.u32 %s5454_s0, 4  ;;  %s22_s1 = int_to_ptr.hbm [resolvable:$true] %s21_s1 }
   0x9   :  { %s66_s8 = sshll.u32 %s3267_s7, 4  ;;  %s3268_s11 = smov 512   ;;  %s67_s8 = int_to_ptr.vmem [resolvable:$true] %s66_s8 }
   0xa   :  { %s3269_s12 = smov 32   ;;  %s51_s15 = sshll.u32 %s5456_s2, 4  ;;  %s52_s15 = int_to_ptr.hbm [resolvable:$true] %s51_s15 }
   0xb   :  { %72 = dma.hbm_to_vmem [thread:$0]  %s65_s30, 16384, %s67_s8, [#allocation15], %s3268_s11, %s3268_s11, %s3269_s12  }
   0xc   :  { %s3270_s16 = smov [#allocation8]   ;;  %s3271_s3 = smov [#allocation13]  }
   0xd   :  { %s23_s17 = sshll.u32 %s3270_s16, 4  ;;  %s53_s18 = sshll.u32 %s3271_s3, 4  ;;  %s24_s17 = int_to_ptr.vmem [resolvable:$true] %s23_s17  ;;  %s54_s18 = int_to_ptr.vmem [resolvable:$true] %s53_s18 }
   0xe   :  { %29 = dma.hbm_to_vmem [thread:$0]  %s22_s1, 1024, %s24_s17, [#allocation9], %s3265_s26, %s3265_s26, %s3266_s27  }
   0xf   :  { %s77_s20 = sshll.u32 %s5458_s4, 4  ;;  %s3272_s21 = smov [#allocation16]   ;;  %s78_s20 = int_to_ptr.hbm [resolvable:$true] %s77_s20 }
  0x10   :  { %59 = dma.hbm_to_vmem [thread:$0]  %s52_s15, 16384, %s54_s18, [#allocation12], %s3268_s11, %s3268_s11, %s3269_s12  }
  0x11   :  { %s79_s22 = sshll.u32 %s3272_s21, 4  ;;  %s3273_s2 = smov 64   ;;  %s80_s22 = int_to_ptr.vmem [resolvable:$true] %s79_s22 }
  0x12   :  { %s3274_s23 = smov 4  }
  0x13   :  { %85 = dma.hbm_to_vmem [thread:$0]  %s78_s20, 128, %s80_s22, [#allocation15], %s3273_s2, %s3273_s2, %s3274_s23  }
  0x14   :  { %3254 = dma.done.wait [#allocation9], 1024  }
  0x15   :  { %3255 = vsyncadd [#allocation9], 4294966272 }
  0x16   :  { %3256 = dma.done.wait [#allocation12], 17408  }
  0x17   :  { %3257 = vsyncadd [#allocation12], 4294949888 }
  0x18   :  { %3258 = dma.done.wait [#allocation15], 16512  }
  0x19   :  { %3259 = vsyncadd [#allocation15], 4294950784  ;;  %v186_v0 = vld [vmem:[#allocation13 + $0x1e0] sm:$0xff]  ;;  %v187_v1 = vld [vmem:[#allocation13 + $0x1e8] sm:$0xff]  ;;  %s3276_s4 = smov [#allocation17]   ;;  %s2615_s29 = sshll.u32 %s5459_s5, 4  ;;  %s2616_s29 = int_to_ptr.hbm [resolvable:$true] %s2615_s29 }
  0x1a   :  { %v188_v2 = vld [vmem:[#allocation13 + $0x1f0] sm:$0xff]  ;;  %200 = vmatpush.msra.mxu0 %v186_v0  ;;  %241 = vmatpush.msra.mxu1 %v187_v1  ;;  %v189_v3 = vld [vmem:[#allocation13 + $0x1f8] sm:$0xff]  ;;  %v182_v4 = vld [vmem:[#allocation13 + $0x1c0] sm:$0xff]  ;;  %s2613_s24 = sshll.u32 %s3276_s4, 4  ;;  %s3277_s30 = smov [#allocation18]   ;;  %s2614_s24 = int_to_ptr.vmem [resolvable:$true] %s2613_s24 }
  0x1b   :  { %v183_v5 = vld [vmem:[#allocation13 + $0x1c8] sm:$0xff]  ;;  %282 = vmatpush.msra.mxu2 %v188_v2  ;;  %323 = vmatpush.msra.mxu3 %v189_v3  ;;  %v184_v6 = vld [vmem:[#allocation13 + $0x1d0] sm:$0xff]  ;;  %v185_v7 = vld [vmem:[#allocation13 + $0x1d8] sm:$0xff]  ;;  %s2630_s7 = sshll.u32 %s3277_s30, 4  ;;  %s2632_s5 = sshll.u32 %s5460_s6, 4  ;;  %s2631_s7 = int_to_ptr.vmem [resolvable:$true] %s2630_s7  ;;  %s2633_s5 = int_to_ptr.hbm [resolvable:$true] %s2632_s5 }
  0x1c   :  { %v178_v8 = vld [vmem:[#allocation13 + $0x1a0] sm:$0xff]  ;;  %201 = vmatpush.msra.mxu0 %v182_v4  ;;  %242 = vmatpush.msra.mxu1 %v183_v5  ;;  %v179_v9 = vld [vmem:[#allocation13 + $0x1a8] sm:$0xff]  ;;  %v180_v10 = vld [vmem:[#allocation13 + $0x1b0] sm:$0xff] }
  0x1d   :  { %v181_v11 = vld [vmem:[#allocation13 + $0x1b8] sm:$0xff]  ;;  %283 = vmatpush.msra.mxu2 %v184_v6  ;;  %324 = vmatpush.msra.mxu3 %v185_v7  ;;  %v174_v12 = vld [vmem:[#allocation13 + $0x180] sm:$0xff]  ;;  %v175_v13 = vld [vmem:[#allocation13 + $0x188] sm:$0xff] }
  0x1e   :  { %202 = vmatpush.msra.mxu0 %v178_v8  ;;  %243 = vmatpush.msra.mxu1 %v179_v9  ;;  %v176_v14 = vld [vmem:[#allocation13 + $0x190] sm:$0xff]  ;;  %v177_v15 = vld [vmem:[#allocation13 + $0x198] sm:$0xff]  ;;  %v170_v16 = vld [vmem:[#allocation13 + $0x160] sm:$0xff] }
  0x1f   :  { %284 = vmatpush.msra.mxu2 %v180_v10  ;;  %325 = vmatpush.msra.mxu3 %v181_v11  ;;  %v171_v17 = vld [vmem:[#allocation13 + $0x168] sm:$0xff]  ;;  %v172_v18 = vld [vmem:[#allocation13 + $0x170] sm:$0xff]  ;;  %v173_v19 = vld [vmem:[#allocation13 + $0x178] sm:$0xff] }
  0x20   :  { %203 = vmatpush.msra.mxu0 %v174_v12  ;;  %244 = vmatpush.msra.mxu1 %v175_v13  ;;  %v166_v20 = vld [vmem:[#allocation13 + $0x140] sm:$0xff]  ;;  %v167_v21 = vld [vmem:[#allocation13 + $0x148] sm:$0xff]  ;;  %v168_v22 = vld [vmem:[#allocation13 + $0x150] sm:$0xff] }
  0x21   :  { %285 = vmatpush.msra.mxu2 %v176_v14  ;;  %326 = vmatpush.msra.mxu3 %v177_v15  ;;  %v169_v23 = vld [vmem:[#allocation13 + $0x158] sm:$0xff]  ;;  %v162_v24 = vld [vmem:[#allocation13 + $0x120] sm:$0xff]  ;;  %v163_v25 = vld [vmem:[#allocation13 + $0x128] sm:$0xff] }
  0x22   :  { %204 = vmatpush.msra.mxu0 %v170_v16  ;;  %245 = vmatpush.msra.mxu1 %v171_v17  ;;  %v164_v26 = vld [vmem:[#allocation13 + $0x130] sm:$0xff]  ;;  %v165_v27 = vld [vmem:[#allocation13 + $0x138] sm:$0xff]  ;;  %v158_v28 = vld [vmem:[#allocation13 + $0x100] sm:$0xff] }
  0x23   :  { %286 = vmatpush.msra.mxu2 %v172_v18  ;;  %327 = vmatpush.msra.mxu3 %v173_v19  ;;  %v159_v29 = vld [vmem:[#allocation13 + $0x108] sm:$0xff]  ;;  %v160_v30 = vld [vmem:[#allocation13 + $0x110] sm:$0xff]  ;;  %v161_v31 = vld [vmem:[#allocation13 + $0x118] sm:$0xff] }
  0x24   :  { %205 = vmatpush.msra.mxu0 %v166_v20  ;;  %246 = vmatpush.msra.mxu1 %v167_v21  ;;  %v154_v32 = vld [vmem:[#allocation13 + $0xe0] sm:$0xff]  ;;  %v155_v33 = vld [vmem:[#allocation13 + $0xe8] sm:$0xff]  ;;  %v156_v34 = vld [vmem:[#allocation13 + $0xf0] sm:$0xff] }
  0x25   :  { %287 = vmatpush.msra.mxu2 %v168_v22  ;;  %328 = vmatpush.msra.mxu3 %v169_v23  ;;  %v157_v35 = vld [vmem:[#allocation13 + $0xf8] sm:$0xff]  ;;  %v150_v36 = vld [vmem:[#allocation13 + $0xc0] sm:$0xff]  ;;  %v151_v37 = vld [vmem:[#allocation13 + $0xc8] sm:$0xff] }
  0x26   :  { %206 = vmatpush.msra.mxu0 %v162_v24  ;;  %247 = vmatpush.msra.mxu1 %v163_v25  ;;  %v152_v38 = vld [vmem:[#allocation13 + $0xd0] sm:$0xff]  ;;  %v153_v39 = vld [vmem:[#allocation13 + $0xd8] sm:$0xff]  ;;  %v146_v40 = vld [vmem:[#allocation13 + $0xa0] sm:$0xff] }
  0x27   :  { %288 = vmatpush.msra.mxu2 %v164_v26  ;;  %329 = vmatpush.msra.mxu3 %v165_v27  ;;  %v147_v41 = vld [vmem:[#allocation13 + $0xa8] sm:$0xff]  ;;  %v148_v42 = vld [vmem:[#allocation13 + $0xb0] sm:$0xff]  ;;  %v149_v43 = vld [vmem:[#allocation13 + $0xb8] sm:$0xff] }
  0x28   :  { %207 = vmatpush.msra.mxu0 %v158_v28  ;;  %248 = vmatpush.msra.mxu1 %v159_v29  ;;  %v142_v44 = vld [vmem:[#allocation13 + $0x80] sm:$0xff]  ;;  %v143_v45 = vld [vmem:[#allocation13 + $0x88] sm:$0xff]  ;;  %v144_v46 = vld [vmem:[#allocation13 + $0x90] sm:$0xff] }
  0x29   :  { %289 = vmatpush.msra.mxu2 %v160_v30  ;;  %330 = vmatpush.msra.mxu3 %v161_v31  ;;  %v145_v47 = vld [vmem:[#allocation13 + $0x98] sm:$0xff]  ;;  %v138_v48 = vld [vmem:[#allocation13 + $0x60] sm:$0xff]  ;;  %v139_v49 = vld [vmem:[#allocation13 + $0x68] sm:$0xff] }
  0x2a   :  { %208 = vmatpush.msra.mxu0 %v154_v32  ;;  %249 = vmatpush.msra.mxu1 %v155_v33  ;;  %v140_v50 = vld [vmem:[#allocation13 + $0x70] sm:$0xff]  ;;  %v141_v51 = vld [vmem:[#allocation13 + $0x78] sm:$0xff]  ;;  %v134_v52 = vld [vmem:[#allocation13 + $0x40] sm:$0xff] }
  0x2b   :  { %290 = vmatpush.msra.mxu2 %v156_v34  ;;  %331 = vmatpush.msra.mxu3 %v157_v35  ;;  %v135_v53 = vld [vmem:[#allocation13 + $0x48] sm:$0xff]  ;;  %v136_v54 = vld [vmem:[#allocation13 + $0x50] sm:$0xff]  ;;  %v137_v55 = vld [vmem:[#allocation13 + $0x58] sm:$0xff] }
  0x2c   :  { %209 = vmatpush.msra.mxu0 %v150_v36  ;;  %250 = vmatpush.msra.mxu1 %v151_v37  ;;  %v130_v56 = vld [vmem:[#allocation13 + $0x20] sm:$0xff]  ;;  %v131_v57 = vld [vmem:[#allocation13 + $0x28] sm:$0xff]  ;;  %v132_v58 = vld [vmem:[#allocation13 + $0x30] sm:$0xff] }
  0x2d   :  { %291 = vmatpush.msra.mxu2 %v152_v38  ;;  %332 = vmatpush.msra.mxu3 %v153_v39  ;;  %v133_v59 = vld [vmem:[#allocation13 + $0x38] sm:$0xff]  ;;  %v126_v60 = vld [vmem:[#allocation13] sm:$0xff]  ;;  %v127_v61 = vld [vmem:[#allocation13 + $0x8] sm:$0xff] }
  0x2e   :  { %210 = vmatpush.msra.mxu0 %v146_v40  ;;  %251 = vmatpush.msra.mxu1 %v147_v41  ;;  %v128_v62 = vld [vmem:[#allocation13 + $0x10] sm:$0xff]  ;;  %v129_v63 = vld [vmem:[#allocation13 + $0x18] sm:$0xff]  ;;  %v118_v0 = vld [vmem:[#allocation8] sm:$0xff] }
  0x2f   :  { %292 = vmatpush.msra.mxu2 %v148_v42  ;;  %333 = vmatpush.msra.mxu3 %v149_v43  ;;  %v465_v1 = vld [vmem:[#allocation13 + $0x3e0] sm:$0xff]  ;;  %v466_v2 = vld [vmem:[#allocation13 + $0x3e8] sm:$0xff]  ;;  %v467_v3 = vld [vmem:[#allocation13 + $0x3f0] sm:$0xff] }
  0x30   :  { %211 = vmatpush.msra.mxu0 %v142_v44  ;;  %252 = vmatpush.msra.mxu1 %v143_v45  ;;  %v468_v4 = vld [vmem:[#allocation13 + $0x3f8] sm:$0xff]  ;;  %v461_v5 = vld [vmem:[#allocation13 + $0x3c0] sm:$0xff]  ;;  %v462_v6 = vld [vmem:[#allocation13 + $0x3c8] sm:$0xff] }
  0x31   :  { %293 = vmatpush.msra.mxu2 %v144_v46  ;;  %334 = vmatpush.msra.mxu3 %v145_v47  ;;  %v463_v7 = vld [vmem:[#allocation13 + $0x3d0] sm:$0xff]  ;;  %v464_v8 = vld [vmem:[#allocation13 + $0x3d8] sm:$0xff]  ;;  %v457_v9 = vld [vmem:[#allocation13 + $0x3a0] sm:$0xff] }
  0x32   :  { %212 = vmatpush.msra.mxu0 %v138_v48  ;;  %253 = vmatpush.msra.mxu1 %v139_v49  ;;  %v458_v10 = vld [vmem:[#allocation13 + $0x3a8] sm:$0xff]  ;;  %v459_v11 = vld [vmem:[#allocation13 + $0x3b0] sm:$0xff]  ;;  %v460_v12 = vld [vmem:[#allocation13 + $0x3b8] sm:$0xff] }
  0x33   :  { %294 = vmatpush.msra.mxu2 %v140_v50  ;;  %335 = vmatpush.msra.mxu3 %v141_v51  ;;  %v119_v13 = vld [vmem:[#allocation8 + $0x8] sm:$0xff]  ;;  %v453_v14 = vld [vmem:[#allocation13 + $0x380] sm:$0xff]  ;;  %v455_v16 = vld [vmem:[#allocation13 + $0x390] sm:$0xff] }
  0x34   :  { %213 = vmatpush.msra.mxu0 %v134_v52  ;;  %254 = vmatpush.msra.mxu1 %v135_v53  ;;  %v454_v15 = vld [vmem:[#allocation13 + $0x388] sm:$0xff]  ;;  %v456_v17 = vld [vmem:[#allocation13 + $0x398] sm:$0xff]  ;;  %v449_v18 = vld [vmem:[#allocation13 + $0x360] sm:$0xff] }
  0x35   :  { %295 = vmatpush.msra.mxu2 %v136_v54  ;;  %336 = vmatpush.msra.mxu3 %v137_v55  ;;  %v450_v19 = vld [vmem:[#allocation13 + $0x368] sm:$0xff]  ;;  %v451_v20 = vld [vmem:[#allocation13 + $0x370] sm:$0xff]  ;;  %v452_v21 = vld [vmem:[#allocation13 + $0x378] sm:$0xff] }
  0x36   :  { %214 = vmatpush.msra.mxu0 %v130_v56  ;;  %255 = vmatpush.msra.mxu1 %v131_v57  ;;  %v445_v22 = vld [vmem:[#allocation13 + $0x340] sm:$0xff]  ;;  %v446_v23 = vld [vmem:[#allocation13 + $0x348] sm:$0xff]  ;;  %v447_v24 = vld [vmem:[#allocation13 + $0x350] sm:$0xff] }
  0x37   :  { %296 = vmatpush.msra.mxu2 %v132_v58  ;;  %337 = vmatpush.msra.mxu3 %v133_v59  ;;  %v448_v25 = vld [vmem:[#allocation13 + $0x358] sm:$0xff]  ;;  %v120_v26 = vld [vmem:[#allocation8 + $0x10] sm:$0xff]  ;;  %v441_v27 = vld [vmem:[#allocation13 + $0x320] sm:$0xff] }
  0x38   :  { %215 = vmatpush.msra.mxu0 %v126_v60  ;;  %256 = vmatpush.msra.mxu1 %v127_v61  ;;  %v442_v28 = vld [vmem:[#allocation13 + $0x328] sm:$0xff]  ;;  %v443_v29 = vld [vmem:[#allocation13 + $0x330] sm:$0xff]  ;;  %v444_v30 = vld [vmem:[#allocation13 + $0x338] sm:$0xff] }
  0x39   :  { %297 = vmatpush.msra.mxu2 %v128_v62  ;;  %338 = vmatpush.msra.mxu3 %v129_v63  ;;  %v437_v31 = vld [vmem:[#allocation13 + $0x300] sm:$0xff]  ;;  %v438_v32 = vld [vmem:[#allocation13 + $0x308] sm:$0xff]  ;;  %v439_v33 = vld [vmem:[#allocation13 + $0x310] sm:$0xff] }
  0x3a   :  { %216 = vmatmul.f32.vlgmr.msra.gmra.mxu0 %v118_v0  ;;  %257 = vmatmul.f32.vlgmr.msra.gmra.mxu1 %v118_v0  ;;  %v440_v34 = vld [vmem:[#allocation13 + $0x318] sm:$0xff]  ;;  %v433_v35 = vld [vmem:[#allocation13 + $0x2e0] sm:$0xff]  ;;  %v434_v36 = vld [vmem:[#allocation13 + $0x2e8] sm:$0xff] }
  0x3b   :  { %298 = vmatmul.f32.vlgmr.msra.gmra.mxu2 %v118_v0  ;;  %339 = vmatmul.f32.vlgmr.msra.gmra.mxu3 %v118_v0  ;;  %v435_v37 = vld [vmem:[#allocation13 + $0x2f0] sm:$0xff]  ;;  %v436_v38 = vld [vmem:[#allocation13 + $0x2f8] sm:$0xff]  ;;  %v429_v40 = vld [vmem:[#allocation13 + $0x2c0] sm:$0xff] }
  0x3c   :  { %480 = vmatpush.msrb.mxu0 %v465_v1  ;;  %521 = vmatpush.msrb.mxu1 %v466_v2  ;;  %v121_v39 = vld [vmem:[#allocation8 + $0x18] sm:$0xff]  ;;  %v430_v41 = vld [vmem:[#allocation13 + $0x2c8] sm:$0xff]  ;;  %v431_v42 = vld [vmem:[#allocation13 + $0x2d0] sm:$0xff] }
  0x3d   :  { %562 = vmatpush.msrb.mxu2 %v467_v3  ;;  %603 = vmatpush.msrb.mxu3 %v468_v4  ;;  %v432_v43 = vld [vmem:[#allocation13 + $0x2d8] sm:$0xff]  ;;  %v425_v44 = vld [vmem:[#allocation13 + $0x2a0] sm:$0xff]  ;;  %v426_v45 = vld [vmem:[#allocation13 + $0x2a8] sm:$0xff] }
  0x3e   :  { %481 = vmatpush.msrb.mxu0 %v461_v5  ;;  %522 = vmatpush.msrb.mxu1 %v462_v6  ;;  %v427_v46 = vld [vmem:[#allocation13 + $0x2b0] sm:$0xff]  ;;  %v428_v47 = vld [vmem:[#allocation13 + $0x2b8] sm:$0xff]  ;;  %v421_v48 = vld [vmem:[#allocation13 + $0x280] sm:$0xff] }
  0x3f   :  { %563 = vmatpush.msrb.mxu2 %v463_v7  ;;  %604 = vmatpush.msrb.mxu3 %v464_v8  ;;  %v422_v49 = vld [vmem:[#allocation13 + $0x288] sm:$0xff]  ;;  %v423_v50 = vld [vmem:[#allocation13 + $0x290] sm:$0xff]  ;;  %v424_v51 = vld [vmem:[#allocation13 + $0x298] sm:$0xff] }
  0x40   :  { %482 = vmatpush.msrb.mxu0 %v457_v9  ;;  %523 = vmatpush.msrb.mxu1 %v458_v10  ;;  %v122_v52 = vld [vmem:[#allocation8 + $0x20] sm:$0xff]  ;;  %v418_v54 = vld [vmem:[#allocation13 + $0x268] sm:$0xff]  ;;  %v419_v55 = vld [vmem:[#allocation13 + $0x270] sm:$0xff] }
  0x41   :  { %564 = vmatpush.msrb.mxu2 %v459_v11  ;;  %605 = vmatpush.msrb.mxu3 %v460_v12  ;;  %v417_v53 = vld [vmem:[#allocation13 + $0x260] sm:$0xff]  ;;  %v420_v56 = vld [vmem:[#allocation13 + $0x278] sm:$0xff]  ;;  %v414_v58 = vld [vmem:[#allocation13 + $0x248] sm:$0xff] }
  0x42   :  { %219 = vmatmul.f32.gmra.mxu0 %v119_v13  ;;  %260 = vmatmul.f32.gmra.mxu1 %v119_v13  ;;  %v413_v57 = vld [vmem:[#allocation13 + $0x240] sm:$0xff]  ;;  %v415_v59 = vld [vmem:[#allocation13 + $0x250] sm:$0xff]  ;;  %v416_v60 = vld [vmem:[#allocation13 + $0x258] sm:$0xff] }
  0x43   :  { %301 = vmatmul.f32.gmra.mxu2 %v119_v13  ;;  %342 = vmatmul.f32.gmra.mxu3 %v119_v13  ;;  %v409_v61 = vld [vmem:[#allocation13 + $0x220] sm:$0xff]  ;;  %v410_v62 = vld [vmem:[#allocation13 + $0x228] sm:$0xff]  ;;  %v411_v63 = vld [vmem:[#allocation13 + $0x230] sm:$0xff] }
  0x44   :  { %483 = vmatpush.msrb.mxu0 %v453_v14  ;;  %524 = vmatpush.msrb.mxu1 %v454_v15  ;;  %v412_v0 = vld [vmem:[#allocation13 + $0x238] sm:$0xff]  ;;  %v123_v1 = vld [vmem:[#allocation8 + $0x28] sm:$0xff]  ;;  %v405_v2 = vld [vmem:[#allocation13 + $0x200] sm:$0xff] }
  0x45   :  { %565 = vmatpush.msrb.mxu2 %v455_v16  ;;  %606 = vmatpush.msrb.mxu3 %v456_v17  ;;  %v406_v3 = vld [vmem:[#allocation13 + $0x208] sm:$0xff]  ;;  %v407_v4 = vld [vmem:[#allocation13 + $0x210] sm:$0xff]  ;;  %v408_v5 = vld [vmem:[#allocation13 + $0x218] sm:$0xff] }
  0x46   :  { %484 = vmatpush.msrb.mxu0 %v449_v18  ;;  %525 = vmatpush.msrb.mxu1 %v450_v19  ;;  %v3334_v6 = vld [vmem:[#allocation14 + $0x1e0] sm:$0xff]  ;;  %v3336_v7 = vld [vmem:[#allocation14 + $0x1e8] sm:$0xff]  ;;  %v3338_v8 = vld [vmem:[#allocation14 + $0x1f0] sm:$0xff] }
  0x47   :  { %566 = vmatpush.msrb.mxu2 %v451_v20  ;;  %607 = vmatpush.msrb.mxu3 %v452_v21  ;;  %v3340_v9 = vld [vmem:[#allocation14 + $0x1f8] sm:$0xff]  ;;  %v3342_v10 = vld [vmem:[#allocation14 + $0x1c0] sm:$0xff]  ;;  %v3344_v11 = vld [vmem:[#allocation14 + $0x1c8] sm:$0xff] }
  0x48   :  { %485 = vmatpush.msrb.mxu0 %v445_v22  ;;  %526 = vmatpush.msrb.mxu1 %v446_v23  ;;  %v3348_v12 = vld [vmem:[#allocation14 + $0x1d0] sm:$0xff]  ;;  %v3350_v13 = vld [vmem:[#allocation14 + $0x1d8] sm:$0xff]  ;;  %v3357_v15 = vld [vmem:[#allocation14 + $0x1a0] sm:$0xff] }
  0x49   :  { %567 = vmatpush.msrb.mxu2 %v447_v24  ;;  %608 = vmatpush.msrb.mxu3 %v448_v25  ;;  %v124_v14 = vld [vmem:[#allocation8 + $0x30] sm:$0xff]  ;;  %v3359_v16 = vld [vmem:[#allocation14 + $0x1a8] sm:$0xff]  ;;  %v3364_v18 = vld [vmem:[#allocation14 + $0x1b8] sm:$0xff] }
  0x4a   :  { %222 = vmatmul.f32.gmra.mxu0 %v120_v26  ;;  %263 = vmatmul.f32.gmra.mxu1 %v120_v26  ;;  %v3362_v17 = vld [vmem:[#allocation14 + $0x1b0] sm:$0xff]  ;;  %v3366_v19 = vld [vmem:[#allocation14 + $0x180] sm:$0xff]  ;;  %v3368_v20 = vld [vmem:[#allocation14 + $0x188] sm:$0xff] }
  0x4b   :  { %304 = vmatmul.f32.gmra.mxu2 %v120_v26  ;;  %345 = vmatmul.f32.gmra.mxu3 %v120_v26  ;;  %v3372_v21 = vld [vmem:[#allocation14 + $0x190] sm:$0xff]  ;;  %v3374_v22 = vld [vmem:[#allocation14 + $0x198] sm:$0xff]  ;;  %v3378_v23 = vld [vmem:[#allocation14 + $0x160] sm:$0xff] }
  0x4c   :  { %486 = vmatpush.msrb.mxu0 %v441_v27  ;;  %527 = vmatpush.msrb.mxu1 %v442_v28  ;;  %v3380_v24 = vld [vmem:[#allocation14 + $0x168] sm:$0xff]  ;;  %v3384_v25 = vld [vmem:[#allocation14 + $0x170] sm:$0xff]  ;;  %v3386_v26 = vld [vmem:[#allocation14 + $0x178] sm:$0xff] }
  0x4d   :  { %568 = vmatpush.msrb.mxu2 %v443_v29  ;;  %609 = vmatpush.msrb.mxu3 %v444_v30  ;;  %v125_v27 = vld [vmem:[#allocation8 + $0x38] sm:$0xff]  ;;  %v3394_v28 = vld [vmem:[#allocation14 + $0x140] sm:$0xff]  ;;  %v3396_v29 = vld [vmem:[#allocation14 + $0x148] sm:$0xff] }
  0x4e   :  { %487 = vmatpush.msrb.mxu0 %v437_v31  ;;  %528 = vmatpush.msrb.mxu1 %v438_v32  ;;  %v3398_v30 = vld [vmem:[#allocation14 + $0x150] sm:$0xff]  ;;  %v3400_v31 = vld [vmem:[#allocation14 + $0x158] sm:$0xff]  ;;  %v3402_v32 = vld [vmem:[#allocation14 + $0x120] sm:$0xff] }
  0x4f   :  { %569 = vmatpush.msrb.mxu2 %v439_v33  ;;  %610 = vmatpush.msrb.mxu3 %v440_v34  ;;  %v3404_v33 = vld [vmem:[#allocation14 + $0x128] sm:$0xff]  ;;  %v3408_v34 = vld [vmem:[#allocation14 + $0x130] sm:$0xff] }
  0x50   :  { %488 = vmatpush.msrb.mxu0 %v433_v35  ;;  %529 = vmatpush.msrb.mxu1 %v434_v36  ;;  %v3410_v35 = vld [vmem:[#allocation14 + $0x138] sm:$0xff]  ;;  %v3414_v36 = vld [vmem:[#allocation14 + $0x100] sm:$0xff] }
  0x51   :  { %570 = vmatpush.msrb.mxu2 %v435_v37  ;;  %611 = vmatpush.msrb.mxu3 %v436_v38  ;;  %v3416_v37 = vld [vmem:[#allocation14 + $0x108] sm:$0xff]  ;;  %v3420_v38 = vld [vmem:[#allocation14 + $0x110] sm:$0xff] }
  0x52   :  { %225 = vmatmul.f32.gmra.mxu0 %v121_v39  ;;  %266 = vmatmul.f32.gmra.mxu1 %v121_v39 }
  0x53   :  { %307 = vmatmul.f32.gmra.mxu2 %v121_v39  ;;  %348 = vmatmul.f32.gmra.mxu3 %v121_v39  ;;  %v3422_v39 = vld [vmem:[#allocation14 + $0x118] sm:$0xff] }
  0x54   :  { %489 = vmatpush.msrb.mxu0 %v429_v40  ;;  %530 = vmatpush.msrb.mxu1 %v430_v41  ;;  %v396_v40 = vld [vmem:[#allocation11] sm:$0xff] }
  0x55   :  { %571 = vmatpush.msrb.mxu2 %v431_v42  ;;  %612 = vmatpush.msrb.mxu3 %v432_v43  ;;  %v3430_v41 = vld [vmem:[#allocation14 + $0xe0] sm:$0xff]  ;;  %v3432_v42 = vld [vmem:[#allocation14 + $0xe8] sm:$0xff]  ;;  %v3434_v43 = vld [vmem:[#allocation14 + $0xf0] sm:$0xff] }
  0x56   :  { %490 = vmatpush.msrb.mxu0 %v425_v44  ;;  %531 = vmatpush.msrb.mxu1 %v426_v45  ;;  %v3436_v44 = vld [vmem:[#allocation14 + $0xf8] sm:$0xff]  ;;  %v3438_v45 = vld [vmem:[#allocation14 + $0xc0] sm:$0xff] }
  0x57   :  { %572 = vmatpush.msrb.mxu2 %v427_v46  ;;  %613 = vmatpush.msrb.mxu3 %v428_v47  ;;  %v3440_v46 = vld [vmem:[#allocation14 + $0xc8] sm:$0xff]  ;;  %v3444_v47 = vld [vmem:[#allocation14 + $0xd0] sm:$0xff] }
  0x58   :  { %491 = vmatpush.msrb.mxu0 %v421_v48  ;;  %532 = vmatpush.msrb.mxu1 %v422_v49  ;;  %v3446_v48 = vld [vmem:[#allocation14 + $0xd8] sm:$0xff]  ;;  %v3450_v49 = vld [vmem:[#allocation14 + $0xa0] sm:$0xff] }
  0x59   :  { %573 = vmatpush.msrb.mxu2 %v423_v50  ;;  %614 = vmatpush.msrb.mxu3 %v424_v51  ;;  %v3452_v50 = vld [vmem:[#allocation14 + $0xa8] sm:$0xff]  ;;  %v3456_v51 = vld [vmem:[#allocation14 + $0xb0] sm:$0xff] }
  0x5a   :  { %228 = vmatmul.f32.gmra.mxu0 %v122_v52  ;;  %269 = vmatmul.f32.gmra.mxu1 %v122_v52 }
  0x5b   :  { %310 = vmatmul.f32.gmra.mxu2 %v122_v52  ;;  %351 = vmatmul.f32.gmra.mxu3 %v122_v52  ;;  %v3458_v52 = vld [vmem:[#allocation14 + $0xb8] sm:$0xff] }
  0x5c   :  { %492 = vmatpush.msrb.mxu0 %v417_v53  ;;  %533 = vmatpush.msrb.mxu1 %v418_v54  ;;  %v397_v53 = vld [vmem:[#allocation11 + $0x8] sm:$0xff]  ;;  %v3466_v54 = vld [vmem:[#allocation14 + $0x80] sm:$0xff] }
  0x5d   :  { %574 = vmatpush.msrb.mxu2 %v419_v55  ;;  %615 = vmatpush.msrb.mxu3 %v420_v56  ;;  %v3468_v55 = vld [vmem:[#allocation14 + $0x88] sm:$0xff]  ;;  %v3470_v56 = vld [vmem:[#allocation14 + $0x90] sm:$0xff] }
  0x5e   :  { %493 = vmatpush.msrb.mxu0 %v413_v57  ;;  %534 = vmatpush.msrb.mxu1 %v414_v58  ;;  %v3472_v57 = vld [vmem:[#allocation14 + $0x98] sm:$0xff]  ;;  %v3474_v58 = vld [vmem:[#allocation14 + $0x60] sm:$0xff] }
  0x5f   :  { %575 = vmatpush.msrb.mxu2 %v415_v59  ;;  %616 = vmatpush.msrb.mxu3 %v416_v60  ;;  %v3476_v59 = vld [vmem:[#allocation14 + $0x68] sm:$0xff]  ;;  %v3480_v60 = vld [vmem:[#allocation14 + $0x70] sm:$0xff] }
  0x60   :  { %494 = vmatpush.msrb.mxu0 %v409_v61  ;;  %535 = vmatpush.msrb.mxu1 %v410_v62  ;;  %v3482_v61 = vld [vmem:[#allocation14 + $0x78] sm:$0xff]  ;;  %v3486_v62 = vld [vmem:[#allocation14 + $0x40] sm:$0xff] }
  0x61   :  { %576 = vmatpush.msrb.mxu2 %v411_v63  ;;  %617 = vmatpush.msrb.mxu3 %v412_v0  ;;  %5973 = vst [vmem:[#allocation25_spill] sm:$0xff] %v3486_v62  ;;  %v3488_v63 = vld [vmem:[#allocation14 + $0x48] sm:$0xff]  ;;  %v3492_v0 = vld [vmem:[#allocation14 + $0x50] sm:$0xff] }
  0x62   :  { %231 = vmatmul.f32.gmra.mxu0 %v123_v1  ;;  %272 = vmatmul.f32.gmra.mxu1 %v123_v1  ;;  %5974 = vst [vmem:[#allocation26_spill] sm:$0xff] %v3488_v63 }
  0x63   :  { %313 = vmatmul.f32.gmra.mxu2 %v123_v1  ;;  %354 = vmatmul.f32.gmra.mxu3 %v123_v1  ;;  %5975 = vst [vmem:[#allocation27_spill] sm:$0xff] %v3492_v0  ;;  %v3494_v1 = vld [vmem:[#allocation14 + $0x58] sm:$0xff] }
  0x64   :  { %495 = vmatpush.msrb.mxu0 %v405_v2  ;;  %536 = vmatpush.msrb.mxu1 %v406_v3  ;;  %5976 = vst [vmem:[#allocation28_spill] sm:$0xff] %v3494_v1  ;;  %v398_v2 = vld [vmem:[#allocation11 + $0x10] sm:$0xff]  ;;  %v3502_v3 = vld [vmem:[#allocation14 + $0x20] sm:$0xff] }
  0x65   :  { %577 = vmatpush.msrb.mxu2 %v407_v4  ;;  %618 = vmatpush.msrb.mxu3 %v408_v5  ;;  %5977 = vst [vmem:[#allocation29_spill] sm:$0xff] %v3502_v3  ;;  %v3504_v4 = vld [vmem:[#allocation14 + $0x28] sm:$0xff]  ;;  %v3506_v5 = vld [vmem:[#allocation14 + $0x30] sm:$0xff] }
  0x66   :  { %810 = vmatpush.msra.mxu0 %v3334_v6  ;;  %830 = vmatpush.msra.mxu1 %v3336_v7  ;;  %5978 = vst [vmem:[#allocation30_spill] sm:$0xff] %v3504_v4 }
  0x67   :  { %850 = vmatpush.msra.mxu2 %v3338_v8  ;;  %870 = vmatpush.msra.mxu3 %v3340_v9  ;;  %5979 = vst [vmem:[#allocation31_spill] sm:$0xff] %v3506_v5 }
  0x68   :  { %811 = vmatpush.msra.mxu0 %v3342_v10  ;;  %831 = vmatpush.msra.mxu1 %v3344_v11 }
  0x69   :  { %851 = vmatpush.msra.mxu2 %v3348_v12  ;;  %871 = vmatpush.msra.mxu3 %v3350_v13 }
  0x6a   :  { %234 = vmatmul.f32.gmra.mxu0 %v124_v14  ;;  %275 = vmatmul.f32.gmra.mxu1 %v124_v14 }
  0x6b   :  { %316 = vmatmul.f32.gmra.mxu2 %v124_v14  ;;  %357 = vmatmul.f32.gmra.mxu3 %v124_v14  ;;  %v3508_v14 = vld [vmem:[#allocation14 + $0x38] sm:$0xff] }
  0x6c   :  { %812 = vmatpush.msra.mxu0 %v3357_v15  ;;  %832 = vmatpush.msra.mxu1 %v3359_v16  ;;  %5980 = vst [vmem:[#allocation32_spill] sm:$0xff] %v3508_v14 }
  0x6d   :  { %852 = vmatpush.msra.mxu2 %v3362_v17  ;;  %872 = vmatpush.msra.mxu3 %v3364_v18 }
  0x6e   :  { %813 = vmatpush.msra.mxu0 %v3366_v19  ;;  %833 = vmatpush.msra.mxu1 %v3368_v20 }
  0x6f   :  { %853 = vmatpush.msra.mxu2 %v3372_v21  ;;  %873 = vmatpush.msra.mxu3 %v3374_v22 }
  0x70   :  { %814 = vmatpush.msra.mxu0 %v3378_v23  ;;  %834 = vmatpush.msra.mxu1 %v3380_v24 }
  0x71   :  { %854 = vmatpush.msra.mxu2 %v3384_v25  ;;  %874 = vmatpush.msra.mxu3 %v3386_v26 }
  0x72   :  { %237 = vmatmul.f32.gmra.mxu0 %v125_v27  ;;  %278 = vmatmul.f32.gmra.mxu1 %v125_v27 }
  0x73   :  { %319 = vmatmul.f32.gmra.mxu2 %v125_v27  ;;  %360 = vmatmul.f32.gmra.mxu3 %v125_v27  ;;  %v3510_v27 = vld [vmem:[#allocation14] sm:$0xff] }
  0x74   :  { %815 = vmatpush.msra.mxu0 %v3394_v28  ;;  %835 = vmatpush.msra.mxu1 %v3396_v29  ;;  %5981 = vst [vmem:[#allocation33_spill] sm:$0xff] %v3510_v27 }
  0x75   :  { %855 = vmatpush.msra.mxu2 %v3398_v30  ;;  %875 = vmatpush.msra.mxu3 %v3400_v31 }
  0x76   :  { %816 = vmatpush.msra.mxu0 %v3402_v32  ;;  %836 = vmatpush.msra.mxu1 %v3404_v33 }
  0x77   :  { %856 = vmatpush.msra.mxu2 %v3408_v34  ;;  %876 = vmatpush.msra.mxu3 %v3410_v35 }
  0x78   :  { %817 = vmatpush.msra.mxu0 %v3414_v36  ;;  %837 = vmatpush.msra.mxu1 %v3416_v37 }
  0x79   :  { %857 = vmatpush.msra.mxu2 %v3420_v38  ;;  %877 = vmatpush.msra.mxu3 %v3422_v39 }
  0x7a   :  { %496 = vmatmul.f32.vlgmr.msrb.gmra.mxu0 %v396_v40  ;;  %537 = vmatmul.f32.vlgmr.msrb.gmra.mxu1 %v396_v40 }
  0x7b   :  { %578 = vmatmul.f32.vlgmr.msrb.gmra.mxu2 %v396_v40  ;;  %619 = vmatmul.f32.vlgmr.msrb.gmra.mxu3 %v396_v40  ;;  %v3512_v40 = vld [vmem:[#allocation14 + $0x8] sm:$0xff] }
  0x7c   :  { %818 = vmatpush.msra.mxu0 %v3430_v41  ;;  %838 = vmatpush.msra.mxu1 %v3432_v42  ;;  %5982 = vst [vmem:[#allocation34_spill] sm:$0xff] %v3512_v40 }
  0x7d   :  { %858 = vmatpush.msra.mxu2 %v3434_v43  ;;  %878 = vmatpush.msra.mxu3 %v3436_v44 }
  0x7e   :  { %819 = vmatpush.msra.mxu0 %v3438_v45  ;;  %839 = vmatpush.msra.mxu1 %v3440_v46 }
  0x7f   :  { %859 = vmatpush.msra.mxu2 %v3444_v47  ;;  %879 = vmatpush.msra.mxu3 %v3446_v48 }
  0x80   :  { %820 = vmatpush.msra.mxu0 %v3450_v49  ;;  %840 = vmatpush.msra.mxu1 %v3452_v50 }
  0x81   :  { %860 = vmatpush.msra.mxu2 %v3456_v51  ;;  %880 = vmatpush.msra.mxu3 %v3458_v52 }
  0x82   :  { %499 = vmatmul.f32.gmra.mxu0 %v397_v53  ;;  %540 = vmatmul.f32.gmra.mxu1 %v397_v53 }
  0x83   :  { %581 = vmatmul.f32.gmra.mxu2 %v397_v53  ;;  %622 = vmatmul.f32.gmra.mxu3 %v397_v53  ;;  %v3516_v53 = vld [vmem:[#allocation14 + $0x10] sm:$0xff] }
  0x84   :  { %821 = vmatpush.msra.mxu0 %v3466_v54  ;;  %841 = vmatpush.msra.mxu1 %v3468_v55  ;;  %5983 = vst [vmem:[#allocation35_spill] sm:$0xff] %v3516_v53 }
  0x85   :  { %861 = vmatpush.msra.mxu2 %v3470_v56  ;;  %881 = vmatpush.msra.mxu3 %v3472_v57 }
  0x86   :  { %822 = vmatpush.msra.mxu0 %v3474_v58  ;;  %842 = vmatpush.msra.mxu1 %v3476_v59 }
  0x87   :  { %862 = vmatpush.msra.mxu2 %v3480_v60  ;;  %882 = vmatpush.msra.mxu3 %v3482_v61 }
  0x88   :  { %823 = vmatpush.msra.mxu0 %v3486_v62  ;;  %843 = vmatpush.msra.mxu1 %v3488_v63  ;;  %v3524_v63 = vld [vmem:[#allocation14 + $0x3e8] sm:$0xff] }
  0x89   :  { %863 = vmatpush.msra.mxu2 %v3492_v0  ;;  %883 = vmatpush.msra.mxu3 %v3494_v1  ;;  %v3518_v1 = vld [vmem:[#allocation14 + $0x18] sm:$0xff]  ;;  %v3522_v0 = vld [vmem:[#allocation14 + $0x3e0] sm:$0xff]  ;;  %5986 = vst [vmem:[#allocation38_spill] sm:$0xff] %v3524_v63 }
  0x8a   :  { %502 = vmatmul.f32.gmra.mxu0 %v398_v2  ;;  %543 = vmatmul.f32.gmra.mxu1 %v398_v2  ;;  %5984 = vst [vmem:[#allocation36_spill] sm:$0xff] %v3518_v1 }
  0x8b   :  { %584 = vmatmul.f32.gmra.mxu2 %v398_v2  ;;  %625 = vmatmul.f32.gmra.mxu3 %v398_v2  ;;  %5985 = vst [vmem:[#allocation37_spill] sm:$0xff] %v3522_v0  ;;  %v3528_v2 = vld [vmem:[#allocation14 + $0x3f0] sm:$0xff] }
  0x8c   :  { %824 = vmatpush.msra.mxu0 %v3502_v3  ;;  %844 = vmatpush.msra.mxu1 %v3504_v4  ;;  %5987 = vst [vmem:[#allocation39_spill] sm:$0xff] %v3528_v2  ;;  %v3530_v3 = vld [vmem:[#allocation14 + $0x3f8] sm:$0xff] }
  0x8d   :  { %864 = vmatpush.msra.mxu2 %v3506_v5  ;;  %884 = vmatpush.msra.mxu3 %v3508_v14  ;;  %5988 = vst [vmem:[#allocation40_spill] sm:$0xff] %v3530_v3  ;;  %v399_v4 = vld [vmem:[#allocation11 + $0x18] sm:$0xff]  ;;  %v3542_v14 = vld [vmem:[#allocation14 + $0x3d0] sm:$0xff] }
  0x8e   :  { %825 = vmatpush.msra.mxu0 %v3510_v27  ;;  %845 = vmatpush.msra.mxu1 %v3512_v40  ;;  %v3538_v27 = vld [vmem:[#allocation14 + $0x3c0] sm:$0xff]  ;;  %v3540_v40 = vld [vmem:[#allocation14 + $0x3c8] sm:$0xff]  ;;  %5991 = vst [vmem:[#allocation43_spill] sm:$0xff] %v3542_v14  ;;  %v3544_v5 = vld [vmem:[#allocation14 + $0x3d8] sm:$0xff] }
  0x8f   :  { %865 = vmatpush.msra.mxu2 %v3516_v53  ;;  %885 = vmatpush.msra.mxu3 %v3518_v1  ;;  %5989 = vst [vmem:[#allocation41_spill] sm:$0xff] %v3538_v27  ;;  %v3546_v1 = vld [vmem:[#allocation14 + $0x3a0] sm:$0xff]  ;;  %v3560_v53 = vld [vmem:[#allocation14 + $0x388] sm:$0xff] }
  0x90   :  { %900 = vmatpush.msrb.mxu0 %v3522_v0  ;;  %920 = vmatpush.msrb.mxu1 %v3524_v63  ;;  %5990 = vst [vmem:[#allocation42_spill] sm:$0xff] %v3540_v40  ;;  %v3548_v0 = vld [vmem:[#allocation14 + $0x3a8] sm:$0xff]  ;;  %v3558_v63 = vld [vmem:[#allocation14 + $0x380] sm:$0xff] }
  0x91   :  { %940 = vmatpush.msrb.mxu2 %v3528_v2  ;;  %960 = vmatpush.msrb.mxu3 %v3530_v3  ;;  %5992 = vst [vmem:[#allocation44_spill] sm:$0xff] %v3544_v5  ;;  %v3552_v3 = vld [vmem:[#allocation14 + $0x3b0] sm:$0xff]  ;;  %v3554_v2 = vld [vmem:[#allocation14 + $0x3b8] sm:$0xff] }
  0x92   :  { %505 = vmatmul.f32.gmra.mxu0 %v399_v4  ;;  %546 = vmatmul.f32.gmra.mxu1 %v399_v4  ;;  %5993 = vst [vmem:[#allocation45_spill] sm:$0xff] %v3546_v1 }
  0x93   :  { %587 = vmatmul.f32.gmra.mxu2 %v399_v4  ;;  %628 = vmatmul.f32.gmra.mxu3 %v399_v4  ;;  %5994 = vst [vmem:[#allocation46_spill] sm:$0xff] %v3548_v0  ;;  %v3564_v4 = vld [vmem:[#allocation14 + $0x390] sm:$0xff] }
  0x94   :  { %901 = vmatpush.msrb.mxu0 %v3538_v27  ;;  %921 = vmatpush.msrb.mxu1 %v3540_v40  ;;  %5995 = vst [vmem:[#allocation47_spill] sm:$0xff] %v3552_v3  ;;  %v3566_v27 = vld [vmem:[#allocation14 + $0x398] sm:$0xff]  ;;  %v400_v40 = vld [vmem:[#allocation11 + $0x20] sm:$0xff] }
  0x95   :  { %5996 = vst [vmem:[#allocation48_spill] sm:$0xff] %v3554_v2  ;;  %941 = vmatpush.msrb.mxu2 %v3542_v14  ;;  %961 = vmatpush.msrb.mxu3 %v3544_v5  ;;  %v3578_v5 = vld [vmem:[#allocation14 + $0x370] sm:$0xff]  ;;  %v3580_v14 = vld [vmem:[#allocation14 + $0x378] sm:$0xff] }
  0x96   :  { %5997 = vst [vmem:[#allocation49_spill] sm:$0xff] %v3558_v63  ;;  %902 = vmatpush.msrb.mxu0 %v3546_v1  ;;  %922 = vmatpush.msrb.mxu1 %v3548_v0  ;;  %v3574_v1 = vld [vmem:[#allocation14 + $0x360] sm:$0xff]  ;;  %v3576_v0 = vld [vmem:[#allocation14 + $0x368] sm:$0xff] }
  0x97   :  { %5998 = vst [vmem:[#allocation50_spill] sm:$0xff] %v3560_v53  ;;  %942 = vmatpush.msrb.mxu2 %v3552_v3  ;;  %962 = vmatpush.msrb.mxu3 %v3554_v2  ;;  %v3582_v2 = vld [vmem:[#allocation14 + $0x340] sm:$0xff]  ;;  %v3596_v3 = vld [vmem:[#allocation14 + $0x328] sm:$0xff] }
  0x98   :  { %5999 = vst [vmem:[#allocation51_spill] sm:$0xff] %v3564_v4  ;;  %903 = vmatpush.msrb.mxu0 %v3558_v63  ;;  %923 = vmatpush.msrb.mxu1 %v3560_v53  ;;  %v3584_v63 = vld [vmem:[#allocation14 + $0x348] sm:$0xff]  ;;  %v3594_v53 = vld [vmem:[#allocation14 + $0x320] sm:$0xff] }
  0x99   :  { %6000 = vst [vmem:[#allocation52_spill] sm:$0xff] %v3566_v27  ;;  %943 = vmatpush.msrb.mxu2 %v3564_v4  ;;  %963 = vmatpush.msrb.mxu3 %v3566_v27  ;;  %v3588_v27 = vld [vmem:[#allocation14 + $0x350] sm:$0xff]  ;;  %v3590_v4 = vld [vmem:[#allocation14 + $0x358] sm:$0xff] }
  0x9a   :  { %6001 = vst [vmem:[#allocation53_spill] sm:$0xff] %v3574_v1  ;;  %508 = vmatmul.f32.gmra.mxu0 %v400_v40  ;;  %549 = vmatmul.f32.gmra.mxu1 %v400_v40 }
  0x9b   :  { %6002 = vst [vmem:[#allocation54_spill] sm:$0xff] %v3576_v0  ;;  %590 = vmatmul.f32.gmra.mxu2 %v400_v40  ;;  %631 = vmatmul.f32.gmra.mxu3 %v400_v40  ;;  %v3600_v40 = vld [vmem:[#allocation14 + $0x330] sm:$0xff] }
  0x9c   :  { %6003 = vst [vmem:[#allocation55_spill] sm:$0xff] %v3578_v5  ;;  %904 = vmatpush.msrb.mxu0 %v3574_v1  ;;  %924 = vmatpush.msrb.mxu1 %v3576_v0  ;;  %v3602_v1 = vld [vmem:[#allocation14 + $0x338] sm:$0xff]  ;;  %v401_v0 = vld [vmem:[#allocation11 + $0x28] sm:$0xff] }
  0x9d   :  { %6004 = vst [vmem:[#allocation56_spill] sm:$0xff] %v3580_v14  ;;  %944 = vmatpush.msrb.mxu2 %v3578_v5  ;;  %964 = vmatpush.msrb.mxu3 %v3580_v14  ;;  %v3614_v14 = vld [vmem:[#allocation14 + $0x310] sm:$0xff]  ;;  %v3616_v5 = vld [vmem:[#allocation14 + $0x318] sm:$0xff] }
  0x9e   :  { %6005 = vst [vmem:[#allocation57_spill] sm:$0xff] %v3582_v2  ;;  %905 = vmatpush.msrb.mxu0 %v3582_v2  ;;  %925 = vmatpush.msrb.mxu1 %v3584_v63  ;;  %v3610_v2 = vld [vmem:[#allocation14 + $0x300] sm:$0xff] }
  0x9f   :  { %6006 = vst [vmem:[#allocation58_spill] sm:$0xff] %v3584_v63  ;;  %945 = vmatpush.msrb.mxu2 %v3588_v27  ;;  %965 = vmatpush.msrb.mxu3 %v3590_v4  ;;  %v3612_v63 = vld [vmem:[#allocation14 + $0x308] sm:$0xff] }
  0xa0   :  { %6007 = vst [vmem:[#allocation59_spill] sm:$0xff] %v3588_v27  ;;  %906 = vmatpush.msrb.mxu0 %v3594_v53  ;;  %926 = vmatpush.msrb.mxu1 %v3596_v3  ;;  %v3632_v27 = vld [vmem:[#allocation14 + $0x2c8] sm:$0xff] }
  0xa1   :  { %6008 = vst [vmem:[#allocation60_spill] sm:$0xff] %v3590_v4  ;;  %946 = vmatpush.msrb.mxu2 %v3600_v40  ;;  %966 = vmatpush.msrb.mxu3 %v3602_v1  ;;  %v3618_v4 = vld [vmem:[#allocation14 + $0x2e0] sm:$0xff] }
  0xa2   :  { %6009 = vst [vmem:[#allocation61_spill] sm:$0xff] %v3594_v53  ;;  %511 = vmatmul.f32.gmra.mxu0 %v401_v0  ;;  %552 = vmatmul.f32.gmra.mxu1 %v401_v0  ;;  %v3620_v53 = vld [vmem:[#allocation14 + $0x2e8] sm:$0xff] }
  0xa3   :  { %6010 = vst [vmem:[#allocation62_spill] sm:$0xff] %v3596_v3  ;;  %593 = vmatmul.f32.gmra.mxu2 %v401_v0  ;;  %634 = vmatmul.f32.gmra.mxu3 %v401_v0  ;;  %v3630_v3 = vld [vmem:[#allocation14 + $0x2c0] sm:$0xff]  ;;  %v3636_v0 = vld [vmem:[#allocation14 + $0x2d0] sm:$0xff] }
  0xa4   :  { %6011 = vst [vmem:[#allocation63_spill] sm:$0xff] %v3600_v40  ;;  %907 = vmatpush.msrb.mxu0 %v3610_v2  ;;  %927 = vmatpush.msrb.mxu1 %v3612_v63  ;;  %v3626_v40 = vld [vmem:[#allocation14 + $0x2f8] sm:$0xff] }
  0xa5   :  { %6012 = vst [vmem:[#allocation64_spill] sm:$0xff] %v3602_v1  ;;  %v3624_v1 = vld [vmem:[#allocation14 + $0x2f0] sm:$0xff]  ;;  %947 = vmatpush.msrb.mxu2 %v3614_v14  ;;  %967 = vmatpush.msrb.mxu3 %v3616_v5 }
  0xa6   :  { %6013 = vst [vmem:[#allocation65_spill] sm:$0xff] %v3610_v2  ;;  %908 = vmatpush.msrb.mxu0 %v3618_v4  ;;  %928 = vmatpush.msrb.mxu1 %v3620_v53  ;;  %v3638_v2 = vld [vmem:[#allocation14 + $0x2d8] sm:$0xff] }
  0xa7   :  { %6014 = vst [vmem:[#allocation66_spill] sm:$0xff] %v3612_v63  ;;  %v402_v63 = vld [vmem:[#allocation11 + $0x30] sm:$0xff]  ;;  %948 = vmatpush.msrb.mxu2 %v3624_v1  ;;  %968 = vmatpush.msrb.mxu3 %v3626_v40 }
  0xa8   :  { %6015 = vst [vmem:[#allocation67_spill] sm:$0xff] %v3614_v14  ;;  %909 = vmatpush.msrb.mxu0 %v3630_v3  ;;  %929 = vmatpush.msrb.mxu1 %v3632_v27  ;;  %v3652_v14 = vld [vmem:[#allocation14 + $0x2b8] sm:$0xff] }
  0xa9   :  { %6016 = vst [vmem:[#allocation68_spill] sm:$0xff] %v3616_v5  ;;  %949 = vmatpush.msrb.mxu2 %v3636_v0  ;;  %969 = vmatpush.msrb.mxu3 %v3638_v2  ;;  %v3650_v5 = vld [vmem:[#allocation14 + $0x2b0] sm:$0xff] }
  0xaa   :  { %6017 = vst [vmem:[#allocation69_spill] sm:$0xff] %v3618_v4  ;;  %v3646_v4 = vld [vmem:[#allocation14 + $0x2a0] sm:$0xff]  ;;  %514 = vmatmul.f32.gmra.mxu0 %v402_v63  ;;  %555 = vmatmul.f32.gmra.mxu1 %v402_v63 }
  0xab   :  { %6018 = vst [vmem:[#allocation70_spill] sm:$0xff] %v3620_v53  ;;  %v3648_v53 = vld [vmem:[#allocation14 + $0x2a8] sm:$0xff]  ;;  %596 = vmatmul.f32.gmra.mxu2 %v402_v63  ;;  %637 = vmatmul.f32.gmra.mxu3 %v402_v63  ;;  %v3672_v63 = vld [vmem:[#allocation14 + $0x270] sm:$0xff] }
  0xac   :  { %6019 = vst [vmem:[#allocation71_spill] sm:$0xff] %v3624_v1  ;;  %910 = vmatpush.msrb.mxu0 %v3646_v4  ;;  %930 = vmatpush.msrb.mxu1 %v3648_v53  ;;  %v3668_v1 = vld [vmem:[#allocation14 + $0x268] sm:$0xff] }
  0xad   :  { %6020 = vst [vmem:[#allocation72_spill] sm:$0xff] %v3626_v40  ;;  %v3654_v40 = vld [vmem:[#allocation14 + $0x280] sm:$0xff]  ;;  %950 = vmatpush.msrb.mxu2 %v3650_v5  ;;  %970 = vmatpush.msrb.mxu3 %v3652_v14 }
  0xae   :  { %6021 = vst [vmem:[#allocation73_spill] sm:$0xff] %v3630_v3  ;;  %v3656_v3 = vld [vmem:[#allocation14 + $0x288] sm:$0xff]  ;;  %911 = vmatpush.msrb.mxu0 %v3654_v40 }
  0xaf   :  { %6022 = vst [vmem:[#allocation74_spill] sm:$0xff] %v3632_v27  ;;  %v3666_v27 = vld [vmem:[#allocation14 + $0x260] sm:$0xff]  ;;  %931 = vmatpush.msrb.mxu1 %v3656_v3 }
  0xb0   :  { %6023 = vst [vmem:[#allocation75_spill] sm:$0xff] %v3636_v0  ;;  %v3662_v0 = vld [vmem:[#allocation14 + $0x298] sm:$0xff]  ;;  %912 = vmatpush.msrb.mxu0 %v3666_v27 }
  0xb1   :  { %6024 = vst [vmem:[#allocation76_spill] sm:$0xff] %v3638_v2  ;;  %v3660_v2 = vld [vmem:[#allocation14 + $0x290] sm:$0xff]  ;;  %971 = vmatpush.msrb.mxu3 %v3662_v0  ;;  %932 = vmatpush.msrb.mxu1 %v3668_v1 }
  0xb2   :  { %6025 = vst [vmem:[#allocation77_spill] sm:$0xff] %v3646_v4  ;;  %v3674_v4 = vld [vmem:[#allocation14 + $0x278] sm:$0xff]  ;;  %951 = vmatpush.msrb.mxu2 %v3660_v2 }
  0xb3   :  { %6026 = vst [vmem:[#allocation78_spill] sm:$0xff] %v3648_v53  ;;  %v403_v53 = vld [vmem:[#allocation11 + $0x38] sm:$0xff]  ;;  %972 = vmatpush.msrb.mxu3 %v3674_v4 }
  0xb4   :  { %6027 = vst [vmem:[#allocation79_spill] sm:$0xff] %v3650_v5  ;;  %952 = vmatpush.msrb.mxu2 %v3672_v63  ;;  %517 = vmatmul.f32.gmra.mxu0 %v403_v53  ;;  %v3688_v5 = vld [vmem:[#allocation14 + $0x258] sm:$0xff] }
  0xb5   :  { %6028 = vst [vmem:[#allocation80_spill] sm:$0xff] %v3652_v14  ;;  %558 = vmatmul.f32.gmra.mxu1 %v403_v53  ;;  %v3686_v14 = vld [vmem:[#allocation14 + $0x250] sm:$0xff]  ;;  %599 = vmatmul.f32.gmra.mxu2 %v403_v53 }
  0xb6   :  { %6029 = vst [vmem:[#allocation81_spill] sm:$0xff] %v3654_v40  ;;  %v3682_v40 = vld [vmem:[#allocation14 + $0x240] sm:$0xff]  ;;  %640 = vmatmul.f32.gmra.mxu3 %v403_v53  ;;  %953 = vmatpush.msrb.mxu2 %v3686_v14  ;;  %v3708_v53 = vld [vmem:[#allocation14 + $0x210] sm:$0xff] }
  0xb7   :  { %6030 = vst [vmem:[#allocation82_spill] sm:$0xff] %v3656_v3  ;;  %v3684_v3 = vld [vmem:[#allocation14 + $0x248] sm:$0xff]  ;;  %913 = vmatpush.msrb.mxu0 %v3682_v40  ;;  %973 = vmatpush.msrb.mxu3 %v3688_v5  ;;  %v3714_v62 = vpop.f32.mrf.mxu1 }
  0xb8   :  { %6031 = vst [vmem:[#allocation83_spill] sm:$0xff] %v3660_v2  ;;  %933 = vmatpush.msrb.mxu1 %v3684_v3  ;;  %v3704_v2 = vld [vmem:[#allocation14 + $0x208] sm:$0xff] }
  0xb9   :  { %6032 = vst [vmem:[#allocation84_spill] sm:$0xff] %v3662_v0  ;;  %v3690_v0 = vld [vmem:[#allocation14 + $0x220] sm:$0xff] }
  0xba   :  { %6033 = vst [vmem:[#allocation85_spill] sm:$0xff] %v3666_v27  ;;  %v3692_v27 = vld [vmem:[#allocation14 + $0x228] sm:$0xff]  ;;  %914 = vmatpush.msrb.mxu0 %v3690_v0 }
  0xbb   :  { %6034 = vst [vmem:[#allocation86_spill] sm:$0xff] %v3668_v1  ;;  %v3702_v1 = vld [vmem:[#allocation14 + $0x200] sm:$0xff]  ;;  %934 = vmatpush.msrb.mxu1 %v3692_v27 }
  0xbc   :  { %6035 = vst [vmem:[#allocation87_spill] sm:$0xff] %v3672_v63  ;;  %v3698_v63 = vld [vmem:[#allocation14 + $0x238] sm:$0xff]  ;;  %915 = vmatpush.msrb.mxu0 %v3702_v1 }
  0xbd   :  { %6036 = vst [vmem:[#allocation88_spill] sm:$0xff] %v3674_v4  ;;  %v3696_v4 = vld [vmem:[#allocation14 + $0x230] sm:$0xff]  ;;  %974 = vmatpush.msrb.mxu3 %v3698_v63  ;;  %935 = vmatpush.msrb.mxu1 %v3704_v2 }
  0xbe   :  { %6037 = vst [vmem:[#allocation89_spill] sm:$0xff] %v3682_v40  ;;  %v3710_v40 = vld [vmem:[#allocation14 + $0x218] sm:$0xff]  ;;  %954 = vmatpush.msrb.mxu2 %v3696_v4 }
  0xbf   :  { %6038 = vst [vmem:[#allocation90_spill] sm:$0xff] %v3684_v3  ;;  %v3712_v3 = vpop.f32.mrf.mxu0  ;;  %975 = vmatpush.msrb.mxu3 %v3710_v40 }
  0xc0   :  { %6039 = vst [vmem:[#allocation91_spill] sm:$0xff] %v3690_v0  ;;  %955 = vmatpush.msrb.mxu2 %v3708_v53 }
  0xc1   :  { %6040 = vst [vmem:[#allocation92_spill] sm:$0xff] %v3692_v27  ;;  %v3275_v27 = vmov 0.0  }
  0xc2   :  { %6041 = vst [vmem:[#allocation93_spill] sm:$0xff] %v3696_v4  ;;  %826 = vmatmul.f32.vlgmr.msra.gmra.mxu0 %v3275_v27  ;;  %846 = vmatmul.f32.vlgmr.msra.gmra.mxu1 %v3275_v27 }
  0xc3   :  { %6042 = vst [vmem:[#allocation94_spill] sm:$0xff] %v3698_v63  ;;  %866 = vmatmul.f32.vlgmr.msra.gmra.mxu2 %v3275_v27  ;;  %886 = vmatmul.f32.vlgmr.msra.gmra.mxu3 %v3275_v27 }
  0xc4   :  { %6043 = vst [vmem:[#allocation95_spill] sm:$0xff] %v3702_v1  ;;  %1035 = vmatpush.msra.mxu0 %v3334_v6  ;;  %1055 = vmatpush.msra.mxu1 %v3336_v7 }
  0xc5   :  { %6044 = vst [vmem:[#allocation96_spill] sm:$0xff] %v3704_v2  ;;  %1075 = vmatpush.msra.mxu2 %v3338_v8  ;;  %1095 = vmatpush.msra.mxu3 %v3340_v9 }
  0xc6   :  { %6045 = vst [vmem:[#allocation97_spill] sm:$0xff] %v3708_v53  ;;  %1036 = vmatpush.msra.mxu0 %v3342_v10  ;;  %1056 = vmatpush.msra.mxu1 %v3344_v11  ;;  %v3734_v53 = vpop.f32.mrf.mxu1 }
  0xc7   :  { %6046 = vst [vmem:[#allocation98_spill] sm:$0xff] %v3710_v40  ;;  %v3732_v40 = vpop.f32.mrf.mxu0  ;;  %1076 = vmatpush.msra.mxu2 %v3348_v12  ;;  %1096 = vmatpush.msra.mxu3 %v3350_v13 }
  0xc8   :  { %6047 = vst [vmem:[#allocation99_spill] sm:$0xff] %v3712_v3  ;;  %v3728_v3 = vpop.f32.mrf.mxu3  ;;  %1037 = vmatpush.msra.mxu0 %v3357_v15  ;;  %1057 = vmatpush.msra.mxu1 %v3359_v16 }
  0xc9   :  { %6048 = vst [vmem:[#allocation100_spill] sm:$0xff] %v3714_v62  ;;  %v3726_v62 = vpop.f32.mrf.mxu2  ;;  %1077 = vmatpush.msra.mxu2 %v3362_v17  ;;  %1097 = vmatpush.msra.mxu3 %v3364_v18 }
  0xca   :  { %6049 = vst [vmem:[#allocation101_spill] sm:$0xff] %v3732_v40  ;;  %916 = vmatmul.f32.vlgmr.msrb.gmra.mxu0 %v3275_v27  ;;  %936 = vmatmul.f32.vlgmr.msrb.gmra.mxu1 %v3275_v27 }
  0xcb   :  { %6050 = vst [vmem:[#allocation102_spill] sm:$0xff] %v3734_v53  ;;  %956 = vmatmul.f32.vlgmr.msrb.gmra.mxu2 %v3275_v27  ;;  %976 = vmatmul.f32.vlgmr.msrb.gmra.mxu3 %v3275_v27  ;;  %v6103_v27 = vld [vmem:[#allocation57_spill] sm:$0xff] }
  0xcc   :  { %1038 = vmatpush.msra.mxu0 %v3366_v19  ;;  %1058 = vmatpush.msra.mxu1 %v3368_v20  ;;  %v6063_v19 = vld [vmem:[#allocation25_spill] sm:$0xff]  ;;  %v6064_v20 = vld [vmem:[#allocation26_spill] sm:$0xff] }
  0xcd   :  { %1078 = vmatpush.msra.mxu2 %v3372_v21  ;;  %1098 = vmatpush.msra.mxu3 %v3374_v22  ;;  %v6065_v21 = vld [vmem:[#allocation27_spill] sm:$0xff]  ;;  %v6066_v22 = vld [vmem:[#allocation28_spill] sm:$0xff] }
  0xce   :  { %1039 = vmatpush.msra.mxu0 %v3378_v23  ;;  %1059 = vmatpush.msra.mxu1 %v3380_v24  ;;  %v3754_v9 = vpop.f32.mrf.mxu1  ;;  %v6067_v23 = vld [vmem:[#allocation29_spill] sm:$0xff]  ;;  %v6068_v24 = vld [vmem:[#allocation30_spill] sm:$0xff] }
  0xcf   :  { %v3752_v8 = vpop.f32.mrf.mxu0  ;;  %6054 = vst [vmem:[#allocation106_spill] sm:$0xff] %v3754_v9  ;;  %1079 = vmatpush.msra.mxu2 %v3384_v25  ;;  %1099 = vmatpush.msra.mxu3 %v3386_v26  ;;  %v6069_v25 = vld [vmem:[#allocation31_spill] sm:$0xff]  ;;  %v6070_v26 = vld [vmem:[#allocation32_spill] sm:$0xff] }
  0xd0   :  { %v3748_v7 = vpop.f32.mrf.mxu3  ;;  %6053 = vst [vmem:[#allocation105_spill] sm:$0xff] %v3752_v8  ;;  %1040 = vmatpush.msra.mxu0 %v3394_v28  ;;  %1060 = vmatpush.msra.mxu1 %v3396_v29  ;;  %v6071_v28 = vld [vmem:[#allocation33_spill] sm:$0xff]  ;;  %v6072_v29 = vld [vmem:[#allocation34_spill] sm:$0xff] }
  0xd1   :  { %v3746_v6 = vpop.f32.mrf.mxu2  ;;  %6052 = vst [vmem:[#allocation104_spill] sm:$0xff] %v3748_v7  ;;  %1080 = vmatpush.msra.mxu2 %v3398_v30  ;;  %1100 = vmatpush.msra.mxu3 %v3400_v31  ;;  %v6073_v30 = vld [vmem:[#allocation35_spill] sm:$0xff]  ;;  %v6074_v31 = vld [vmem:[#allocation36_spill] sm:$0xff] }
  0xd2   :  { %6051 = vst [vmem:[#allocation103_spill] sm:$0xff] %v3746_v6  ;;  %1041 = vmatpush.msra.mxu0 %v3402_v32  ;;  %1061 = vmatpush.msra.mxu1 %v3404_v33 }
  0xd3   :  { %1081 = vmatpush.msra.mxu2 %v3408_v34  ;;  %1101 = vmatpush.msra.mxu3 %v3410_v35  ;;  %v6077_v34 = vld [vmem:[#allocation37_spill] sm:$0xff]  ;;  %v6078_v35 = vld [vmem:[#allocation38_spill] sm:$0xff] }
  0xd4   :  { %1042 = vmatpush.msra.mxu0 %v3414_v36  ;;  %1062 = vmatpush.msra.mxu1 %v3416_v37 }
  0xd5   :  { %1082 = vmatpush.msra.mxu2 %v3420_v38  ;;  %1102 = vmatpush.msra.mxu3 %v3422_v39  ;;  %v6081_v38 = vld [vmem:[#allocation39_spill] sm:$0xff]  ;;  %v6082_v39 = vld [vmem:[#allocation40_spill] sm:$0xff] }
  0xd6   :  { %1043 = vmatpush.msra.mxu0 %v3430_v41  ;;  %1063 = vmatpush.msra.mxu1 %v3432_v42  ;;  %v3778_v13 = vpop.f32.mrf.mxu1  ;;  %v6083_v41 = vld [vmem:[#allocation41_spill] sm:$0xff]  ;;  %v6084_v42 = vld [vmem:[#allocation42_spill] sm:$0xff] }
  0xd7   :  { %v3776_v12 = vpop.f32.mrf.mxu0  ;;  %6058 = vst [vmem:[#allocation110_spill] sm:$0xff] %v3778_v13  ;;  %1083 = vmatpush.msra.mxu2 %v3434_v43  ;;  %1103 = vmatpush.msra.mxu3 %v3436_v44  ;;  %v6085_v43 = vld [vmem:[#allocation43_spill] sm:$0xff]  ;;  %v6086_v44 = vld [vmem:[#allocation44_spill] sm:$0xff] }
  0xd8   :  { %v3772_v11 = vpop.f32.mrf.mxu3  ;;  %6057 = vst [vmem:[#allocation109_spill] sm:$0xff] %v3776_v12  ;;  %1044 = vmatpush.msra.mxu0 %v3438_v45  ;;  %1064 = vmatpush.msra.mxu1 %v3440_v46  ;;  %v6087_v45 = vld [vmem:[#allocation45_spill] sm:$0xff]  ;;  %v6088_v46 = vld [vmem:[#allocation46_spill] sm:$0xff] }
  0xd9   :  { %v3770_v10 = vpop.f32.mrf.mxu2  ;;  %6056 = vst [vmem:[#allocation108_spill] sm:$0xff] %v3772_v11  ;;  %1084 = vmatpush.msra.mxu2 %v3444_v47  ;;  %1104 = vmatpush.msra.mxu3 %v3446_v48  ;;  %v6089_v47 = vld [vmem:[#allocation47_spill] sm:$0xff]  ;;  %v6090_v48 = vld [vmem:[#allocation48_spill] sm:$0xff] }
  0xda   :  { %6055 = vst [vmem:[#allocation107_spill] sm:$0xff] %v3770_v10  ;;  %1045 = vmatpush.msra.mxu0 %v3450_v49  ;;  %1065 = vmatpush.msra.mxu1 %v3452_v50  ;;  %v6091_v49 = vld [vmem:[#allocation49_spill] sm:$0xff]  ;;  %v6092_v50 = vld [vmem:[#allocation50_spill] sm:$0xff] }
  0xdb   :  { %1085 = vmatpush.msra.mxu2 %v3456_v51  ;;  %1105 = vmatpush.msra.mxu3 %v3458_v52  ;;  %v6093_v51 = vld [vmem:[#allocation51_spill] sm:$0xff]  ;;  %v6094_v52 = vld [vmem:[#allocation52_spill] sm:$0xff] }
  0xdc   :  { %1046 = vmatpush.msra.mxu0 %v3466_v54  ;;  %1066 = vmatpush.msra.mxu1 %v3468_v55 }
  0xdd   :  { %1086 = vmatpush.msra.mxu2 %v3470_v56  ;;  %1106 = vmatpush.msra.mxu3 %v3472_v57  ;;  %v6097_v56 = vld [vmem:[#allocation53_spill] sm:$0xff]  ;;  %v6098_v57 = vld [vmem:[#allocation54_spill] sm:$0xff] }
  0xde   :  { %1047 = vmatpush.msra.mxu0 %v3474_v58  ;;  %1067 = vmatpush.msra.mxu1 %v3476_v59  ;;  %v3802_v18 = vpop.f32.mrf.mxu1 }
  0xdf   :  { %v3800_v17 = vpop.f32.mrf.mxu0  ;;  %6062 = vst [vmem:[#allocation114_spill] sm:$0xff] %v3802_v18  ;;  %1087 = vmatpush.msra.mxu2 %v3480_v60  ;;  %1107 = vmatpush.msra.mxu3 %v3482_v61  ;;  %v6101_v60 = vld [vmem:[#allocation55_spill] sm:$0xff]  ;;  %v6102_v61 = vld [vmem:[#allocation56_spill] sm:$0xff]  ;;  %v6143_v18 = vld [vmem:[#allocation89_spill] sm:$0xff] }
  0xe0   :  { %v3796_v16 = vpop.f32.mrf.mxu3  ;;  %6061 = vst [vmem:[#allocation113_spill] sm:$0xff] %v3800_v17  ;;  %1048 = vmatpush.msra.mxu0 %v6063_v19  ;;  %1068 = vmatpush.msra.mxu1 %v6064_v20  ;;  %v6104_v19 = vld [vmem:[#allocation58_spill] sm:$0xff]  ;;  %v6105_v20 = vld [vmem:[#allocation59_spill] sm:$0xff] }
  0xe1   :  { %v3794_v15 = vpop.f32.mrf.mxu2  ;;  %6060 = vst [vmem:[#allocation112_spill] sm:$0xff] %v3796_v16  ;;  %1088 = vmatpush.msra.mxu2 %v6065_v21  ;;  %1108 = vmatpush.msra.mxu3 %v6066_v22  ;;  %v6106_v21 = vld [vmem:[#allocation60_spill] sm:$0xff]  ;;  %v6107_v22 = vld [vmem:[#allocation61_spill] sm:$0xff] }
  0xe2   :  { %6059 = vst [vmem:[#allocation111_spill] sm:$0xff] %v3794_v15  ;;  %1049 = vmatpush.msra.mxu0 %v6067_v23  ;;  %1069 = vmatpush.msra.mxu1 %v6068_v24  ;;  %v6108_v23 = vld [vmem:[#allocation62_spill] sm:$0xff]  ;;  %v6109_v24 = vld [vmem:[#allocation63_spill] sm:$0xff] }
  0xe3   :  { %1089 = vmatpush.msra.mxu2 %v6069_v25  ;;  %1109 = vmatpush.msra.mxu3 %v6070_v26  ;;  %v6110_v25 = vld [vmem:[#allocation64_spill] sm:$0xff]  ;;  %v6111_v26 = vld [vmem:[#allocation65_spill] sm:$0xff] }
  0xe4   :  { %1050 = vmatpush.msra.mxu0 %v6071_v28  ;;  %1070 = vmatpush.msra.mxu1 %v6072_v29  ;;  %v6112_v28 = vld [vmem:[#allocation66_spill] sm:$0xff]  ;;  %v6113_v29 = vld [vmem:[#allocation67_spill] sm:$0xff] }
  0xe5   :  { %1090 = vmatpush.msra.mxu2 %v6073_v30  ;;  %1110 = vmatpush.msra.mxu3 %v6074_v31  ;;  %v6114_v30 = vld [vmem:[#allocation68_spill] sm:$0xff] }
  0xe6   :  { %1125 = vmatpush.msrb.mxu0 %v6077_v34  ;;  %1145 = vmatpush.msrb.mxu1 %v6078_v35  ;;  %v3826_v37 = vpop.f32.mrf.mxu1  ;;  %v6117_v35 = vld [vmem:[#allocation69_spill] sm:$0xff] }
  0xe7   :  { %v3824_v36 = vpop.f32.mrf.mxu0  ;;  %6080 = vst [vmem:[#allocation28_spill] sm:$0xff] %v3826_v37  ;;  %1165 = vmatpush.msrb.mxu2 %v6081_v38  ;;  %1185 = vmatpush.msrb.mxu3 %v6082_v39  ;;  %v6118_v38 = vld [vmem:[#allocation70_spill] sm:$0xff]  ;;  %v6139_v37 = vld [vmem:[#allocation87_spill] sm:$0xff] }
  0xe8   :  { %v3820_v33 = vpop.f32.mrf.mxu3  ;;  %6079 = vst [vmem:[#allocation27_spill] sm:$0xff] %v3824_v36  ;;  %1126 = vmatpush.msrb.mxu0 %v6083_v41  ;;  %1146 = vmatpush.msrb.mxu1 %v6084_v42  ;;  %v6121_v42 = vld [vmem:[#allocation71_spill] sm:$0xff]  ;;  %v6140_v36 = vld [vmem:[#allocation88_spill] sm:$0xff] }
  0xe9   :  { %v3818_v32 = vpop.f32.mrf.mxu2  ;;  %6076 = vst [vmem:[#allocation26_spill] sm:$0xff] %v3820_v33  ;;  %1166 = vmatpush.msrb.mxu2 %v6085_v43  ;;  %1186 = vmatpush.msrb.mxu3 %v6086_v44  ;;  %v6122_v43 = vld [vmem:[#allocation72_spill] sm:$0xff]  ;;  %v6123_v44 = vld [vmem:[#allocation73_spill] sm:$0xff] }
  0xea   :  { %6075 = vst [vmem:[#allocation25_spill] sm:$0xff] %v3818_v32  ;;  %1127 = vmatpush.msrb.mxu0 %v6087_v45  ;;  %1147 = vmatpush.msrb.mxu1 %v6088_v46  ;;  %v6124_v45 = vld [vmem:[#allocation74_spill] sm:$0xff]  ;;  %v470_v46 = vld [vmem:[#allocation16 + $0x4] sm:$0xf] }
  0xeb   :  { %1167 = vmatpush.msrb.mxu2 %v6089_v47  ;;  %1187 = vmatpush.msrb.mxu3 %v6090_v48  ;;  %v6125_v47 = vld [vmem:[#allocation75_spill] sm:$0xff]  ;;  %v6126_v48 = vld [vmem:[#allocation76_spill] sm:$0xff]  ;;  %v3914_v17 = vperm.slane %v470_v46, 2  ;;  %v3916_v16 = vperm.slane %v470_v46, 3 }
  0xec   :  { %1128 = vmatpush.msrb.mxu0 %v6091_v49  ;;  %1148 = vmatpush.msrb.mxu1 %v6092_v50  ;;  %v6127_v49 = vld [vmem:[#allocation77_spill] sm:$0xff]  ;;  %v6128_v50 = vld [vmem:[#allocation78_spill] sm:$0xff] }
  0xed   :  { %1168 = vmatpush.msrb.mxu2 %v6093_v51  ;;  %1188 = vmatpush.msrb.mxu3 %v6094_v52  ;;  %v6129_v51 = vld [vmem:[#allocation79_spill] sm:$0xff]  ;;  %v6130_v52 = vld [vmem:[#allocation80_spill] sm:$0xff] }
  0xee   :  { %1129 = vmatpush.msrb.mxu0 %v6097_v56  ;;  %1149 = vmatpush.msrb.mxu1 %v6098_v57  ;;  %v3850_v59 = vpop.f32.mrf.mxu1  ;;  %v3886_v56 = vperm.slane %v470_v46, 0  ;;  %v3888_v57 = vperm.slane %v470_v46, 1 }
  0xef   :  { %v3848_v58 = vpop.f32.mrf.mxu0  ;;  %6100 = vst [vmem:[#allocation32_spill] sm:$0xff] %v3850_v59  ;;  %1169 = vmatpush.msrb.mxu2 %v6101_v60  ;;  %1189 = vmatpush.msrb.mxu3 %v6102_v61  ;;  %v6131_v60 = vld [vmem:[#allocation81_spill] sm:$0xff]  ;;  %v6132_v61 = vld [vmem:[#allocation82_spill] sm:$0xff] }
  0xf0   :  { %v3844_v55 = vpop.f32.mrf.mxu3  ;;  %6099 = vst [vmem:[#allocation31_spill] sm:$0xff] %v3848_v58  ;;  %1130 = vmatpush.msrb.mxu0 %v6103_v27  ;;  %1150 = vmatpush.msrb.mxu1 %v6104_v19  ;;  %v6137_v59 = vld [vmem:[#allocation85_spill] sm:$0xff]  ;;  %v6138_v58 = vld [vmem:[#allocation86_spill] sm:$0xff] }
  0xf1   :  { %v3842_v54 = vpop.f32.mrf.mxu2  ;;  %6096 = vst [vmem:[#allocation30_spill] sm:$0xff] %v3844_v55  ;;  %1170 = vmatpush.msrb.mxu2 %v6105_v20  ;;  %1190 = vmatpush.msrb.mxu3 %v6106_v21 }
  0xf2   :  { %6095 = vst [vmem:[#allocation29_spill] sm:$0xff] %v3842_v54  ;;  %1131 = vmatpush.msrb.mxu0 %v6107_v22  ;;  %1151 = vmatpush.msrb.mxu1 %v6108_v23 }
  0xf3   :  { %1171 = vmatpush.msrb.mxu2 %v6109_v24  ;;  %1191 = vmatpush.msrb.mxu3 %v6110_v25 }
  0xf4   :  { %1132 = vmatpush.msrb.mxu0 %v6111_v26  ;;  %1152 = vmatpush.msrb.mxu1 %v6112_v28 }
  0xf5   :  { %1172 = vmatpush.msrb.mxu2 %v6113_v29  ;;  %1192 = vmatpush.msrb.mxu3 %v6114_v30 }
  0xf6   :  { %1133 = vmatpush.msrb.mxu0 %v6117_v35  ;;  %1153 = vmatpush.msrb.mxu1 %v6118_v38  ;;  %v3874_v41 = vpop.f32.mrf.mxu1 }
  0xf7   :  { %v3872_v39 = vpop.f32.mrf.mxu0  ;;  %6120 = vst [vmem:[#allocation36_spill] sm:$0xff] %v3874_v41  ;;  %1173 = vmatpush.msrb.mxu2 %v6121_v42  ;;  %1193 = vmatpush.msrb.mxu3 %v6122_v43  ;;  %v6133_v41 = vld [vmem:[#allocation83_spill] sm:$0xff] }
  0xf8   :  { %v3868_v34 = vpop.f32.mrf.mxu3  ;;  %6119 = vst [vmem:[#allocation35_spill] sm:$0xff] %v3872_v39  ;;  %1134 = vmatpush.msrb.mxu0 %v6123_v44  ;;  %1154 = vmatpush.msrb.mxu1 %v6124_v45  ;;  %v6134_v39 = vld [vmem:[#allocation84_spill] sm:$0xff] }
  0xf9   :  { %v3866_v31 = vpop.f32.mrf.mxu2  ;;  %6116 = vst [vmem:[#allocation34_spill] sm:$0xff] %v3868_v34  ;;  %1174 = vmatpush.msrb.mxu2 %v6125_v47  ;;  %1194 = vmatpush.msrb.mxu3 %v6126_v48 }
  0xfa   :  { %6115 = vst [vmem:[#allocation33_spill] sm:$0xff] %v3866_v31  ;;  %1135 = vmatpush.msrb.mxu0 %v6127_v49  ;;  %1155 = vmatpush.msrb.mxu1 %v6128_v50 }
  0xfb   :  { %1175 = vmatpush.msrb.mxu2 %v6129_v51  ;;  %1195 = vmatpush.msrb.mxu3 %v6130_v52 }
  0xfc   :  { %1136 = vmatpush.msrb.mxu0 %v6131_v60  ;;  %1156 = vmatpush.msrb.mxu1 %v6132_v61 }
  0xfd   :  { %1176 = vmatpush.msrb.mxu2 %v6133_v41  ;;  %1196 = vmatpush.msrb.mxu3 %v6134_v39 }
  0xfe   :  { %1137 = vmatpush.msrb.mxu0 %v6137_v59  ;;  %1157 = vmatpush.msrb.mxu1 %v6138_v58  ;;  %v538_v54 = vpop.f32.mrf.mxu1 }
  0xff   :  { %v497_v55 = vpop.f32.mrf.mxu0  ;;  %1177 = vmatpush.msrb.mxu2 %v6139_v37  ;;  %1197 = vmatpush.msrb.mxu3 %v6140_v36  ;;  %v3906_v32 = vadd.f32 %v538_v54, %v3888_v57  ;;  %v6146_v54 = vld [vmem:[#allocation97_spill] sm:$0xff] }
 0x100   :  { %v3896_v31 = vpop.f32.mrf.mxu3  ;;  %v3903_v33 = vadd.f32 %v497_v55, %v3886_v56  ;;  %1138 = vmatpush.msrb.mxu0 %v6143_v18  ;;  %v6147_v55 = vld [vmem:[#allocation98_spill] sm:$0xff] }
 0x101   :  { %v3894_v34 = vpop.f32.mrf.mxu2  ;;  %6136 = vst [vmem:[#allocation38_spill] sm:$0xff] %v3896_v31  ;;  %1178 = vmatpush.msrb.mxu2 %v3686_v14  ;;  %1198 = vmatpush.msrb.mxu3 %v3688_v5  ;;  %v6145_v31 = vld [vmem:[#allocation92_spill] sm:$0xff] }
 0x102   :  { %6135 = vst [vmem:[#allocation37_spill] sm:$0xff] %v3894_v34  ;;  %v6144_v34 = vld [vmem:[#allocation90_spill] sm:$0xff]  ;;  %1139 = vmatpush.msrb.mxu0 %v3690_v0 }
 0x103   :  { %6141 = vst [vmem:[#allocation39_spill] sm:$0xff] %v3903_v33  ;;  %1158 = vmatpush.msrb.mxu1 %v6144_v34  ;;  %1179 = vmatpush.msrb.mxu2 %v3696_v4 }
 0x104   :  { %6142 = vst [vmem:[#allocation40_spill] sm:$0xff] %v3906_v32  ;;  %1199 = vmatpush.msrb.mxu3 %v3698_v63  ;;  %1140 = vmatpush.msrb.mxu0 %v3702_v1 }
 0x105   :  { %1159 = vmatpush.msrb.mxu1 %v6145_v31  ;;  %1180 = vmatpush.msrb.mxu2 %v6146_v54 }
 0x106   :  { %1200 = vmatpush.msrb.mxu3 %v6147_v55  ;;  %v541_v12 = vpop.f32.mrf.mxu1 }
 0x107   :  { %1160 = vmatpush.msrb.mxu1 %v3704_v2  ;;  %v500_v13 = vpop.f32.mrf.mxu0  ;;  %v3934_v10 = vadd.f32 %v541_v12, %v3888_v57 }
 0x108   :  { %v620_v33 = vpop.f32.mrf.mxu3  ;;  %v3931_v11 = vadd.f32 %v500_v13, %v3886_v56 }
 0x109   :  { %v579_v32 = vpop.f32.mrf.mxu2  ;;  %v3928_v46 = vadd.f32 %v620_v33, %v3916_v16  ;;  %6151 = vst [vmem:[#allocation44_spill] sm:$0xff] %v3934_v10 }
 0x10a   :  { %v3925_v15 = vadd.f32 %v579_v32, %v3914_v17  ;;  %6150 = vst [vmem:[#allocation43_spill] sm:$0xff] %v3931_v11 }
 0x10b   :  { %6149 = vst [vmem:[#allocation42_spill] sm:$0xff] %v3928_v46 }
 0x10c   :  { %6148 = vst [vmem:[#allocation41_spill] sm:$0xff] %v3925_v15 }
 0x10e   :  { %v544_v15 = vpop.f32.mrf.mxu1 }
 0x10f   :  { %v503_v32 = vpop.f32.mrf.mxu0  ;;  %v3946_v46 = vadd.f32 %v544_v15, %v3888_v57 }
 0x110   :  { %v623_v8 = vpop.f32.mrf.mxu3  ;;  %v3943_v33 = vadd.f32 %v503_v32, %v3886_v56 }
 0x111   :  { %v582_v9 = vpop.f32.mrf.mxu2  ;;  %v3940_v6 = vadd.f32 %v623_v8, %v3916_v16  ;;  %6155 = vst [vmem:[#allocation48_spill] sm:$0xff] %v3946_v46 }
 0x112   :  { %v3937_v7 = vadd.f32 %v582_v9, %v3914_v17  ;;  %6154 = vst [vmem:[#allocation47_spill] sm:$0xff] %v3943_v33 }
 0x113   :  { %6153 = vst [vmem:[#allocation46_spill] sm:$0xff] %v3940_v6 }
 0x114   :  { %6152 = vst [vmem:[#allocation45_spill] sm:$0xff] %v3937_v7 }
 0x116   :  { %v547_v7 = vpop.f32.mrf.mxu1 }
 0x117   :  { %v506_v9 = vpop.f32.mrf.mxu0  ;;  %v3958_v6 = vadd.f32 %v547_v7, %v3888_v57 }
 0x118   :  { %v626_v11 = vpop.f32.mrf.mxu3  ;;  %v3955_v8 = vadd.f32 %v506_v9, %v3886_v56 }
 0x119   :  { %v585_v13 = vpop.f32.mrf.mxu2  ;;  %v3952_v10 = vadd.f32 %v626_v11, %v3916_v16  ;;  %6159 = vst [vmem:[#allocation52_spill] sm:$0xff] %v3958_v6 }
 0x11a   :  { %v3949_v12 = vadd.f32 %v585_v13, %v3914_v17  ;;  %6158 = vst [vmem:[#allocation51_spill] sm:$0xff] %v3955_v8 }
 0x11b   :  { %6157 = vst [vmem:[#allocation50_spill] sm:$0xff] %v3952_v10 }
 0x11c   :  { %6156 = vst [vmem:[#allocation49_spill] sm:$0xff] %v3949_v12 }
 0x11e   :  { %v550_v12 = vpop.f32.mrf.mxu1 }
 0x11f   :  { %v509_v13 = vpop.f32.mrf.mxu0  ;;  %v3970_v10 = vadd.f32 %v550_v12, %v3888_v57 }
 0x120   :  { %v629_v33 = vpop.f32.mrf.mxu3  ;;  %v3967_v11 = vadd.f32 %v509_v13, %v3886_v56 }
 0x121   :  { %v588_v32 = vpop.f32.mrf.mxu2  ;;  %v3964_v46 = vadd.f32 %v629_v33, %v3916_v16  ;;  %6163 = vst [vmem:[#allocation56_spill] sm:$0xff] %v3970_v10 }
 0x122   :  { %v3961_v15 = vadd.f32 %v588_v32, %v3914_v17  ;;  %6162 = vst [vmem:[#allocation55_spill] sm:$0xff] %v3967_v11 }
 0x123   :  { %6161 = vst [vmem:[#allocation54_spill] sm:$0xff] %v3964_v46 }
 0x124   :  { %6160 = vst [vmem:[#allocation53_spill] sm:$0xff] %v3961_v15 }
 0x126   :  { %v553_v15 = vpop.f32.mrf.mxu1 }
 0x127   :  { %v512_v32 = vpop.f32.mrf.mxu0  ;;  %v3982_v46 = vadd.f32 %v553_v15, %v3888_v57  ;;  %v190_v15 = vld [vmem:[#allocation16] sm:$0xf] }
 0x128   :  { %v632_v8 = vpop.f32.mrf.mxu3  ;;  %v3979_v33 = vadd.f32 %v512_v32, %v3886_v56  ;;  %v4004_v53 = vperm.slane %v190_v15, 1 }
 0x129   :  { %v591_v9 = vpop.f32.mrf.mxu2  ;;  %v3976_v6 = vadd.f32 %v632_v8, %v3916_v16  ;;  %6167 = vst [vmem:[#allocation60_spill] sm:$0xff] %v3982_v46 }
 0x12a   :  { %v3973_v7 = vadd.f32 %v591_v9, %v3914_v17  ;;  %6166 = vst [vmem:[#allocation59_spill] sm:$0xff] %v3979_v33 }
 0x12b   :  { %6165 = vst [vmem:[#allocation58_spill] sm:$0xff] %v3976_v6 }
 0x12c   :  { %6164 = vst [vmem:[#allocation57_spill] sm:$0xff] %v3973_v7 }
 0x12d   :  { %6175 = vst [vmem:[#allocation68_spill] sm:$0xff] %v4004_v53 }
 0x12e   :  { %v556_v7 = vpop.f32.mrf.mxu1 }
 0x12f   :  { %v515_v9 = vpop.f32.mrf.mxu0  ;;  %v3994_v6 = vadd.f32 %v556_v7, %v3888_v57  ;;  %v6177_v7 = vld [vmem:[#allocation100_spill] sm:$0xff] }
 0x130   :  { %v635_v11 = vpop.f32.mrf.mxu3  ;;  %v3991_v8 = vadd.f32 %v515_v9, %v3886_v56  ;;  %v6176_v9 = vld [vmem:[#allocation99_spill] sm:$0xff] }
 0x131   :  { %v594_v13 = vpop.f32.mrf.mxu2  ;;  %v3988_v10 = vadd.f32 %v635_v11, %v3916_v16  ;;  %6171 = vst [vmem:[#allocation64_spill] sm:$0xff] %v3994_v6  ;;  %v259_v6 = vadd.f32 %v6177_v7, %v4004_v53 }
 0x132   :  { %v3985_v12 = vadd.f32 %v594_v13, %v3914_v17  ;;  %6170 = vst [vmem:[#allocation63_spill] sm:$0xff] %v3991_v8 }
 0x133   :  { %6169 = vst [vmem:[#allocation62_spill] sm:$0xff] %v3988_v10  ;;  %v4002_v10 = vperm.slane %v190_v15, 0 }
 0x134   :  { %6168 = vst [vmem:[#allocation61_spill] sm:$0xff] %v3985_v12 }
 0x135   :  { %6174 = vst [vmem:[#allocation67_spill] sm:$0xff] %v4002_v10  ;;  %v218_v8 = vadd.f32 %v6176_v9, %v4002_v10 }
 0x136   :  { %v559_v11 = vpop.f32.mrf.mxu1 }
 0x137   :  { %v518_v12 = vpop.f32.mrf.mxu0  ;;  %v560_v53 = vadd.f32 %v559_v11, %v3888_v57 }
 0x138   :  { %v638_v33 = vpop.f32.mrf.mxu3  ;;  %v519_v7 = vadd.f32 %v518_v12, %v3886_v56 }
 0x139   :  { %v597_v32 = vpop.f32.mrf.mxu2  ;;  %v4000_v13 = vadd.f32 %v638_v33, %v3916_v16  ;;  %v4010_v33 = vperm.slane %v190_v15, 2 }
 0x13a   :  { %v3997_v46 = vadd.f32 %v597_v32, %v3914_v17 }
 0x13b   :  { %6173 = vst [vmem:[#allocation66_spill] sm:$0xff] %v4000_v13  ;;  %v4012_v13 = vperm.slane %v190_v15, 3  ;;  %v300_v4 = vadd.f32 %v3726_v62, %v4010_v33 }
 0x13c   :  { %6172 = vst [vmem:[#allocation65_spill] sm:$0xff] %v3997_v46 }
 0x13d   :  { %6178 = vst [vmem:[#allocation69_spill] sm:$0xff] %v4010_v33  ;;  %v341_v9 = vadd.f32 %v3728_v3, %v4012_v13 }
 0x13e   :  { %6179 = vst [vmem:[#allocation70_spill] sm:$0xff] %v4012_v13 }
 0x13f   :  { %v827_v54 = vpop.f32.mrf.mxu0  ;;  %v847_v32 = vpop.f32.mrf.mxu1 }
 0x140   :  { %v641_v55 = vpop.f32.mrf.mxu3  ;;  %v890_v46 = vadd.f32 %v827_v54, %v218_v8  ;;  %v891_v2 = vadd.f32 %v847_v32, %v259_v6 }
 0x141   :  { %v600_v40 = vpop.f32.mrf.mxu2  ;;  %v642_v57 = vadd.f32 %v641_v55, %v3916_v16 }
 0x142   :  { %v984_v1 = vmul.f32 0.5, %v890_v46  ;;  %v992_v63 = vmul.f32 0.5, %v891_v2  ;;  %v601_v56 = vadd.f32 %v600_v40, %v3914_v17 }
 0x144   :  { %2670 = vtanh.f32 %v984_v1 }
 0x145   :  { %2672 = vtanh.f32 %v992_v63 }
 0x147   :  { %v917_v15 = vpop.f32.mrf.mxu0  ;;  %v937_v10 = vpop.f32.mrf.mxu1 }
 0x148   :  { %v887_v6 = vpop.f32.mrf.mxu3  ;;  %v980_v46 = vadd.f32 %v917_v15, %v519_v7  ;;  %v981_v2 = vadd.f32 %v937_v10, %v560_v53 }
 0x149   :  { %v867_v54 = vpop.f32.mrf.mxu2  ;;  %v893_v32 = vadd.f32 %v887_v6, %v341_v9 }
 0x14a   :  { %v892_v8 = vadd.f32 %v867_v54, %v300_v4  ;;  %v2671_v31 = vpop.eup %2670  ;;  %v988_v62 = vmul.f32 0.5, %v980_v46  ;;  %v996_v33 = vmul.f32 0.5, %v981_v2 }
 0x14b   :  { %v1002_v1 = vmul.f32 0.5, %v893_v32  ;;  %v2673_v0 = vpop.eup %2672  ;;  %v986_v3 = vmul.f32 0.5, %v2671_v31 }
 0x14c   :  { %2674 = vtanh.f32 %v892_v8  ;;  %v994_v63 = vmul.f32 0.5, %v2673_v0 }
 0x14d   :  { %2676 = vtanh.f32 %v1002_v1  ;;  %v987_v4 = vadd.f32 0.5, %v986_v3 }
 0x14e   :  { %2678 = vtanh.f32 %v988_v62  ;;  %v995_v12 = vadd.f32 0.5, %v994_v63 }
 0x14f   :  { %2680 = vtanh.f32 %v996_v33 }
 0x150   :  { %v977_v9 = vpop.f32.mrf.mxu3  ;;  %v1011_v54 = vmul.f32 0.0, %v995_v12  ;;  %v4028_v12 = vld [vmem:[#allocation14 + $0x1e0] sm:$0xff] }
 0x151   :  { %v957_v11 = vpop.f32.mrf.mxu2  ;;  %v983_v7 = vadd.f32 %v977_v9, %v642_v57  ;;  %v4034_v9 = vld [vmem:[#allocation14 + $0x1f0] sm:$0xff] }
 0x152   :  { %v2675_v53 = vpop.eup %2674  ;;  %v982_v10 = vadd.f32 %v957_v11, %v601_v56  ;;  %v4031_v11 = vld [vmem:[#allocation14 + $0x1e8] sm:$0xff] }
 0x153   :  { %v1012_v6 = vmul.f32 %v2675_v53, %v987_v4  ;;  %v2677_v8 = vpop.eup %2676  ;;  %v1006_v31 = vmul.f32 0.5, %v983_v7  ;;  %v4037_v53 = vld [vmem:[#allocation14 + $0x1f8] sm:$0xff]  ;;  %v4040_v7 = vld [vmem:[#allocation14 + $0x1c0] sm:$0xff] }
 0x154   :  { %2682 = vtanh.f32 %v982_v10  ;;  %v2679_v32 = vpop.eup %2678  ;;  %v1004_v17 = vmul.f32 0.5, %v2677_v8  ;;  %v4046_v8 = vld [vmem:[#allocation14 + $0x1d0] sm:$0xff] }
 0x155   :  { %v4022_v0 = vadd.f32 %v1012_v6, %v1011_v54  ;;  %v2681_v15 = vpop.eup %2680  ;;  %v990_v40 = vmul.f32 0.5, %v2679_v32  ;;  %2684 = vtanh.f32 %v1006_v31  ;;  %v4043_v54 = vld [vmem:[#allocation14 + $0x1c8] sm:$0xff]  ;;  %v4049_v31 = vld [vmem:[#allocation14 + $0x1d8] sm:$0xff] }
 0x156   :  { %v998_v16 = vmul.f32 0.5, %v2681_v15  ;;  %v1005_v3 = vadd.f32 0.5, %v1004_v17  ;;  %v4052_v15 = vld [vmem:[#allocation14 + $0x1a0] sm:$0xff]  ;;  %v4061_v17 = vld [vmem:[#allocation14 + $0x1b8] sm:$0xff] }
 0x157   :  { %2686 = vtanh.f32 %v4022_v0  ;;  %v991_v55 = vadd.f32 0.5, %v990_v40  ;;  %v4055_v40 = vld [vmem:[#allocation14 + $0x1a8] sm:$0xff] }
 0x158   :  { %v999_v33 = vadd.f32 0.5, %v998_v16  ;;  %v4058_v16 = vld [vmem:[#allocation14 + $0x1b0] sm:$0xff] }
 0x15a   :  { %v2683_v46 = vpop.eup %2682  ;;  %v1015_v2 = vmul.f32 0.0, %v999_v33  ;;  %v4067_v33 = vld [vmem:[#allocation14 + $0x188] sm:$0xff] }
 0x15b   :  { %v1016_v1 = vmul.f32 %v2683_v46, %v991_v55  ;;  %v2685_v62 = vpop.eup %2684  ;;  %v4064_v55 = vld [vmem:[#allocation14 + $0x180] sm:$0xff]  ;;  %v4070_v46 = vld [vmem:[#allocation14 + $0x190] sm:$0xff] }
 0x15c   :  { %v1008_v4 = vmul.f32 0.5, %v2685_v62  ;;  %v4079_v62 = vld [vmem:[#allocation14 + $0x168] sm:$0xff] }
 0x15d   :  { %v2687_v63 = vpop.eup %2686  ;;  %v4025_v56 = vadd.f32 %v1016_v1, %v1015_v2  ;;  %v4073_v2 = vld [vmem:[#allocation14 + $0x198] sm:$0xff]  ;;  %v4076_v1 = vld [vmem:[#allocation14 + $0x160] sm:$0xff] }
 0x15e   :  { %v1019_v57 = vmul.f32 %v2687_v63, %v1005_v3  ;;  %v1009_v10 = vadd.f32 0.5, %v1008_v4  ;;  %v4082_v3 = vld [vmem:[#allocation14 + $0x170] sm:$0xff]  ;;  %v4085_v63 = vld [vmem:[#allocation14 + $0x178] sm:$0xff]  ;;  %v4091_v4 = vld [vmem:[#allocation14 + $0x148] sm:$0xff] }
 0x15f   :  { %2688 = vtanh.f32 %v4025_v56  ;;  %6180 = vst [vmem:[#allocation71_spill] sm:$0xff] %v4085_v63 }
 0x160   :  { %1026 = vst [vmem:[#allocation17] sm:$0xff] %v1019_v57  ;;  %1051 = vmatmul.f32.vlgmr.msra.gmra.mxu0 %v1019_v57  ;;  %1071 = vmatmul.f32.vlgmr.msra.gmra.mxu1 %v1019_v57 }
 0x161   :  { %1091 = vmatmul.f32.vlgmr.msra.gmra.mxu2 %v1019_v57  ;;  %1111 = vmatmul.f32.vlgmr.msra.gmra.mxu3 %v1019_v57  ;;  %v4088_v57 = vld [vmem:[#allocation14 + $0x140] sm:$0xff]  ;;  %6182 = vst [vmem:[#allocation73_spill] sm:$0xff] %v4091_v4 }
 0x162   :  { %1261 = vmatpush.msra.mxu0 %v4028_v12  ;;  %1281 = vmatpush.msra.mxu1 %v4031_v11  ;;  %6181 = vst [vmem:[#allocation72_spill] sm:$0xff] %v4088_v57 }
 0x163   :  { %1301 = vmatpush.msra.mxu2 %v4034_v9  ;;  %1321 = vmatpush.msra.mxu3 %v4037_v53 }
 0x164   :  { %1262 = vmatpush.msra.mxu0 %v4040_v7  ;;  %1282 = vmatpush.msra.mxu1 %v4043_v54 }
 0x165   :  { %v2689_v6 = vpop.eup %2688  ;;  %1302 = vmatpush.msra.mxu2 %v4046_v8  ;;  %1322 = vmatpush.msra.mxu3 %v4049_v31 }
 0x166   :  { %v1021_v32 = vmul.f32 %v2689_v6, %v1009_v10  ;;  %1263 = vmatpush.msra.mxu0 %v4052_v15  ;;  %1283 = vmatpush.msra.mxu1 %v4055_v40  ;;  %v4094_v10 = vld [vmem:[#allocation14 + $0x150] sm:$0xff]  ;;  %v4097_v6 = vld [vmem:[#allocation14 + $0x158] sm:$0xff] }
 0x167   :  { %1303 = vmatpush.msra.mxu2 %v4058_v16  ;;  %1323 = vmatpush.msra.mxu3 %v4061_v17  ;;  %6183 = vst [vmem:[#allocation74_spill] sm:$0xff] %v4094_v10 }
 0x168   :  { %1028 = vst [vmem:[#allocation18 + $0x38] sm:$0xff] %v1021_v32  ;;  %1141 = vmatmul.f32.vlgmr.msrb.gmra.mxu0 %v1021_v32  ;;  %1161 = vmatmul.f32.vlgmr.msrb.gmra.mxu1 %v1021_v32 }
 0x169   :  { %1181 = vmatmul.f32.vlgmr.msrb.gmra.mxu2 %v1021_v32  ;;  %1201 = vmatmul.f32.vlgmr.msrb.gmra.mxu3 %v1021_v32  ;;  %6184 = vst [vmem:[#allocation75_spill] sm:$0xff] %v4097_v6  ;;  %v4100_v32 = vld [vmem:[#allocation14 + $0x120] sm:$0xff] }
 0x16a   :  { %1264 = vmatpush.msra.mxu0 %v4064_v55  ;;  %1284 = vmatpush.msra.mxu1 %v4067_v33  ;;  %6185 = vst [vmem:[#allocation76_spill] sm:$0xff] %v4100_v32 }
 0x16b   :  { %1304 = vmatpush.msra.mxu2 %v4070_v46  ;;  %1324 = vmatpush.msra.mxu3 %v4073_v2 }
 0x16c   :  { %1265 = vmatpush.msra.mxu0 %v4076_v1  ;;  %1285 = vmatpush.msra.mxu1 %v4079_v62 }
 0x16d   :  { %1305 = vmatpush.msra.mxu2 %v4082_v3  ;;  %1325 = vmatpush.msra.mxu3 %v4085_v63  ;;  %v4103_v63 = vld [vmem:[#allocation14 + $0x128] sm:$0xff] }
 0x16e   :  { %1266 = vmatpush.msra.mxu0 %v4088_v57  ;;  %1286 = vmatpush.msra.mxu1 %v4091_v4  ;;  %6186 = vst [vmem:[#allocation77_spill] sm:$0xff] %v4103_v63  ;;  %v4106_v57 = vld [vmem:[#allocation14 + $0x130] sm:$0xff]  ;;  %v4109_v4 = vld [vmem:[#allocation14 + $0x138] sm:$0xff] }
 0x16f   :  { %1306 = vmatpush.msra.mxu2 %v4094_v10  ;;  %1326 = vmatpush.msra.mxu3 %v4097_v6  ;;  %6187 = vst [vmem:[#allocation78_spill] sm:$0xff] %v4106_v57  ;;  %v4112_v10 = vld [vmem:[#allocation14 + $0x100] sm:$0xff]  ;;  %v4115_v6 = vld [vmem:[#allocation14 + $0x108] sm:$0xff] }
 0x170   :  { %1267 = vmatpush.msra.mxu0 %v4100_v32  ;;  %1287 = vmatpush.msra.mxu1 %v4103_v63  ;;  %6188 = vst [vmem:[#allocation79_spill] sm:$0xff] %v4109_v4  ;;  %v4118_v32 = vld [vmem:[#allocation14 + $0x110] sm:$0xff]  ;;  %v4121_v63 = vld [vmem:[#allocation14 + $0x118] sm:$0xff] }
 0x171   :  { %1307 = vmatpush.msra.mxu2 %v4106_v57  ;;  %1327 = vmatpush.msra.mxu3 %v4109_v4  ;;  %6189 = vst [vmem:[#allocation80_spill] sm:$0xff] %v4112_v10  ;;  %v4124_v57 = vld [vmem:[#allocation14 + $0xe0] sm:$0xff]  ;;  %v4127_v4 = vld [vmem:[#allocation14 + $0xe8] sm:$0xff] }
 0x172   :  { %1268 = vmatpush.msra.mxu0 %v4112_v10  ;;  %6190 = vst [vmem:[#allocation81_spill] sm:$0xff] %v4115_v6  ;;  %1288 = vmatpush.msra.mxu1 %v4115_v6  ;;  %v4130_v10 = vld [vmem:[#allocation14 + $0xf0] sm:$0xff]  ;;  %v4133_v6 = vld [vmem:[#allocation14 + $0xf8] sm:$0xff] }
 0x173   :  { %6191 = vst [vmem:[#allocation82_spill] sm:$0xff] %v4118_v32  ;;  %1308 = vmatpush.msra.mxu2 %v4118_v32  ;;  %1328 = vmatpush.msra.mxu3 %v4121_v63  ;;  %v4136_v32 = vld [vmem:[#allocation14 + $0xc0] sm:$0xff] }
 0x174   :  { %6192 = vst [vmem:[#allocation83_spill] sm:$0xff] %v4121_v63  ;;  %1269 = vmatpush.msra.mxu0 %v4124_v57  ;;  %1289 = vmatpush.msra.mxu1 %v4127_v4  ;;  %v4139_v63 = vld [vmem:[#allocation14 + $0xc8] sm:$0xff] }
 0x175   :  { %6193 = vst [vmem:[#allocation84_spill] sm:$0xff] %v4124_v57  ;;  %1309 = vmatpush.msra.mxu2 %v4130_v10  ;;  %1329 = vmatpush.msra.mxu3 %v4133_v6  ;;  %v4142_v57 = vld [vmem:[#allocation14 + $0xd0] sm:$0xff] }
 0x176   :  { %6194 = vst [vmem:[#allocation85_spill] sm:$0xff] %v4127_v4  ;;  %1270 = vmatpush.msra.mxu0 %v4136_v32  ;;  %1290 = vmatpush.msra.mxu1 %v4139_v63  ;;  %v4145_v4 = vld [vmem:[#allocation14 + $0xd8] sm:$0xff] }
 0x177   :  { %6195 = vst [vmem:[#allocation86_spill] sm:$0xff] %v4130_v10  ;;  %1310 = vmatpush.msra.mxu2 %v4142_v57  ;;  %1330 = vmatpush.msra.mxu3 %v4145_v4  ;;  %v4148_v10 = vld [vmem:[#allocation14 + $0xa0] sm:$0xff] }
 0x178   :  { %6196 = vst [vmem:[#allocation87_spill] sm:$0xff] %v4133_v6  ;;  %1271 = vmatpush.msra.mxu0 %v4148_v10  ;;  %v4151_v6 = vld [vmem:[#allocation14 + $0xa8] sm:$0xff] }
 0x179   :  { %6197 = vst [vmem:[#allocation88_spill] sm:$0xff] %v4136_v32  ;;  %1291 = vmatpush.msra.mxu1 %v4151_v6  ;;  %v4154_v32 = vld [vmem:[#allocation14 + $0xb0] sm:$0xff] }
 0x17a   :  { %6198 = vst [vmem:[#allocation89_spill] sm:$0xff] %v4139_v63  ;;  %1311 = vmatpush.msra.mxu2 %v4154_v32  ;;  %v4157_v63 = vld [vmem:[#allocation14 + $0xb8] sm:$0xff] }
 0x17b   :  { %6199 = vst [vmem:[#allocation90_spill] sm:$0xff] %v4142_v57  ;;  %1331 = vmatpush.msra.mxu3 %v4157_v63  ;;  %v4160_v57 = vld [vmem:[#allocation14 + $0x80] sm:$0xff] }
 0x17c   :  { %6200 = vst [vmem:[#allocation99_spill] sm:$0xff] %v4145_v4  ;;  %1272 = vmatpush.msra.mxu0 %v4160_v57  ;;  %v4163_v4 = vld [vmem:[#allocation14 + $0x88] sm:$0xff] }
 0x17d   :  { %6201 = vst [vmem:[#allocation100_spill] sm:$0xff] %v4148_v10  ;;  %1292 = vmatpush.msra.mxu1 %v4163_v4  ;;  %v4166_v10 = vld [vmem:[#allocation14 + $0x90] sm:$0xff] }
 0x17e   :  { %6202 = vst [vmem:[#allocation115_spill] sm:$0xff] %v4151_v6  ;;  %1312 = vmatpush.msra.mxu2 %v4166_v10  ;;  %v4169_v6 = vld [vmem:[#allocation14 + $0x98] sm:$0xff] }
 0x17f   :  { %6203 = vst [vmem:[#allocation116_spill] sm:$0xff] %v4154_v32  ;;  %1332 = vmatpush.msra.mxu3 %v4169_v6  ;;  %v4172_v32 = vld [vmem:[#allocation14 + $0x60] sm:$0xff] }
 0x180   :  { %6204 = vst [vmem:[#allocation117_spill] sm:$0xff] %v4157_v63  ;;  %1273 = vmatpush.msra.mxu0 %v4172_v32  ;;  %v4175_v63 = vld [vmem:[#allocation14 + $0x68] sm:$0xff] }
 0x181   :  { %6205 = vst [vmem:[#allocation118_spill] sm:$0xff] %v4160_v57  ;;  %1293 = vmatpush.msra.mxu1 %v4175_v63  ;;  %v4178_v57 = vld [vmem:[#allocation14 + $0x70] sm:$0xff] }
 0x182   :  { %6206 = vst [vmem:[#allocation119_spill] sm:$0xff] %v4163_v4  ;;  %1313 = vmatpush.msra.mxu2 %v4178_v57  ;;  %v4181_v4 = vld [vmem:[#allocation14 + $0x78] sm:$0xff] }
 0x183   :  { %6207 = vst [vmem:[#allocation120_spill] sm:$0xff] %v4166_v10  ;;  %1333 = vmatpush.msra.mxu3 %v4181_v4  ;;  %v4184_v10 = vld [vmem:[#allocation14 + $0x40] sm:$0xff] }
 0x184   :  { %6208 = vst [vmem:[#allocation121_spill] sm:$0xff] %v4169_v6  ;;  %1274 = vmatpush.msra.mxu0 %v4184_v10  ;;  %v4187_v6 = vld [vmem:[#allocation14 + $0x48] sm:$0xff] }
 0x185   :  { %6209 = vst [vmem:[#allocation122_spill] sm:$0xff] %v4172_v32  ;;  %1294 = vmatpush.msra.mxu1 %v4187_v6  ;;  %v4190_v32 = vld [vmem:[#allocation14 + $0x50] sm:$0xff] }
 0x186   :  { %6210 = vst [vmem:[#allocation123_spill] sm:$0xff] %v4175_v63  ;;  %1314 = vmatpush.msra.mxu2 %v4190_v32  ;;  %v4193_v63 = vld [vmem:[#allocation14 + $0x58] sm:$0xff] }
 0x187   :  { %6211 = vst [vmem:[#allocation124_spill] sm:$0xff] %v4178_v57  ;;  %1334 = vmatpush.msra.mxu3 %v4193_v63  ;;  %v4196_v57 = vld [vmem:[#allocation14 + $0x20] sm:$0xff] }
 0x188   :  { %6212 = vst [vmem:[#allocation125_spill] sm:$0xff] %v4181_v4  ;;  %1275 = vmatpush.msra.mxu0 %v4196_v57  ;;  %v4199_v4 = vld [vmem:[#allocation14 + $0x28] sm:$0xff] }
 0x189   :  { %6213 = vst [vmem:[#allocation126_spill] sm:$0xff] %v4184_v10  ;;  %1295 = vmatpush.msra.mxu1 %v4199_v4  ;;  %v4202_v10 = vld [vmem:[#allocation14 + $0x30] sm:$0xff] }
 0x18a   :  { %6214 = vst [vmem:[#allocation127_spill] sm:$0xff] %v4187_v6  ;;  %1315 = vmatpush.msra.mxu2 %v4202_v10  ;;  %v4205_v6 = vld [vmem:[#allocation14 + $0x38] sm:$0xff] }
 0x18b   :  { %6215 = vst [vmem:[#allocation128_spill] sm:$0xff] %v4190_v32  ;;  %1335 = vmatpush.msra.mxu3 %v4205_v6  ;;  %v4208_v32 = vld [vmem:[#allocation14] sm:$0xff] }
 0x18c   :  { %6216 = vst [vmem:[#allocation129_spill] sm:$0xff] %v4193_v63  ;;  %1276 = vmatpush.msra.mxu0 %v4208_v32  ;;  %v4211_v63 = vld [vmem:[#allocation14 + $0x8] sm:$0xff] }
 0x18d   :  { %6217 = vst [vmem:[#allocation130_spill] sm:$0xff] %v4196_v57  ;;  %1296 = vmatpush.msra.mxu1 %v4211_v63  ;;  %v4214_v57 = vld [vmem:[#allocation14 + $0x10] sm:$0xff] }
 0x18e   :  { %6218 = vst [vmem:[#allocation131_spill] sm:$0xff] %v4199_v4  ;;  %1316 = vmatpush.msra.mxu2 %v4214_v57  ;;  %v4217_v4 = vld [vmem:[#allocation14 + $0x18] sm:$0xff] }
 0x18f   :  { %6219 = vst [vmem:[#allocation132_spill] sm:$0xff] %v4202_v10  ;;  %1336 = vmatpush.msra.mxu3 %v4217_v4  ;;  %v4220_v10 = vld [vmem:[#allocation14 + $0x3e0] sm:$0xff] }
 0x190   :  { %6220 = vst [vmem:[#allocation133_spill] sm:$0xff] %v4205_v6  ;;  %1351 = vmatpush.msrb.mxu0 %v4220_v10  ;;  %v4223_v6 = vld [vmem:[#allocation14 + $0x3e8] sm:$0xff] }
 0x191   :  { %6221 = vst [vmem:[#allocation134_spill] sm:$0xff] %v4208_v32  ;;  %1371 = vmatpush.msrb.mxu1 %v4223_v6  ;;  %v4226_v32 = vld [vmem:[#allocation14 + $0x3f0] sm:$0xff] }
 0x192   :  { %6222 = vst [vmem:[#allocation135_spill] sm:$0xff] %v4211_v63  ;;  %1391 = vmatpush.msrb.mxu2 %v4226_v32  ;;  %v4229_v63 = vld [vmem:[#allocation14 + $0x3f8] sm:$0xff] }
 0x193   :  { %6223 = vst [vmem:[#allocation136_spill] sm:$0xff] %v4214_v57  ;;  %1411 = vmatpush.msrb.mxu3 %v4229_v63  ;;  %v4232_v57 = vld [vmem:[#allocation14 + $0x3c0] sm:$0xff] }
 0x194   :  { %6224 = vst [vmem:[#allocation137_spill] sm:$0xff] %v4217_v4  ;;  %1352 = vmatpush.msrb.mxu0 %v4232_v57  ;;  %v4235_v4 = vld [vmem:[#allocation14 + $0x3c8] sm:$0xff] }
 0x195   :  { %6225 = vst [vmem:[#allocation138_spill] sm:$0xff] %v4220_v10  ;;  %1372 = vmatpush.msrb.mxu1 %v4235_v4  ;;  %v4238_v10 = vld [vmem:[#allocation14 + $0x3d0] sm:$0xff] }
 0x196   :  { %6226 = vst [vmem:[#allocation139_spill] sm:$0xff] %v4223_v6  ;;  %1392 = vmatpush.msrb.mxu2 %v4238_v10  ;;  %v4241_v6 = vld [vmem:[#allocation14 + $0x3d8] sm:$0xff] }
 0x197   :  { %6227 = vst [vmem:[#allocation140_spill] sm:$0xff] %v4226_v32  ;;  %1412 = vmatpush.msrb.mxu3 %v4241_v6  ;;  %v4244_v32 = vld [vmem:[#allocation14 + $0x3a0] sm:$0xff] }
 0x198   :  { %6228 = vst [vmem:[#allocation141_spill] sm:$0xff] %v4229_v63  ;;  %1353 = vmatpush.msrb.mxu0 %v4244_v32  ;;  %v4247_v63 = vld [vmem:[#allocation14 + $0x3a8] sm:$0xff] }
 0x199   :  { %6229 = vst [vmem:[#allocation142_spill] sm:$0xff] %v4232_v57  ;;  %1373 = vmatpush.msrb.mxu1 %v4247_v63  ;;  %v4250_v57 = vld [vmem:[#allocation14 + $0x3b0] sm:$0xff] }
 0x19a   :  { %6230 = vst [vmem:[#allocation143_spill] sm:$0xff] %v4235_v4  ;;  %1393 = vmatpush.msrb.mxu2 %v4250_v57  ;;  %v4253_v4 = vld [vmem:[#allocation14 + $0x3b8] sm:$0xff] }
 0x19b   :  { %6231 = vst [vmem:[#allocation144_spill] sm:$0xff] %v4238_v10  ;;  %1413 = vmatpush.msrb.mxu3 %v4253_v4  ;;  %v4256_v10 = vld [vmem:[#allocation14 + $0x380] sm:$0xff] }
 0x19c   :  { %6232 = vst [vmem:[#allocation145_spill] sm:$0xff] %v4241_v6  ;;  %1354 = vmatpush.msrb.mxu0 %v4256_v10  ;;  %v4259_v6 = vld [vmem:[#allocation14 + $0x388] sm:$0xff] }
 0x19d   :  { %6233 = vst [vmem:[#allocation146_spill] sm:$0xff] %v4244_v32  ;;  %1374 = vmatpush.msrb.mxu1 %v4259_v6  ;;  %v4262_v32 = vld [vmem:[#allocation14 + $0x390] sm:$0xff] }
 0x19e   :  { %6234 = vst [vmem:[#allocation147_spill] sm:$0xff] %v4247_v63  ;;  %1394 = vmatpush.msrb.mxu2 %v4262_v32  ;;  %v4265_v63 = vld [vmem:[#allocation14 + $0x398] sm:$0xff] }
 0x19f   :  { %6235 = vst [vmem:[#allocation148_spill] sm:$0xff] %v4250_v57  ;;  %1414 = vmatpush.msrb.mxu3 %v4265_v63  ;;  %v4268_v57 = vld [vmem:[#allocation14 + $0x360] sm:$0xff] }
 0x1a0   :  { %6236 = vst [vmem:[#allocation149_spill] sm:$0xff] %v4253_v4  ;;  %1355 = vmatpush.msrb.mxu0 %v4268_v57  ;;  %v4271_v4 = vld [vmem:[#allocation14 + $0x368] sm:$0xff] }
 0x1a1   :  { %6237 = vst [vmem:[#allocation150_spill] sm:$0xff] %v4256_v10  ;;  %1375 = vmatpush.msrb.mxu1 %v4271_v4  ;;  %v4274_v10 = vld [vmem:[#allocation14 + $0x370] sm:$0xff] }
 0x1a2   :  { %6238 = vst [vmem:[#allocation151_spill] sm:$0xff] %v4259_v6  ;;  %1395 = vmatpush.msrb.mxu2 %v4274_v10  ;;  %v4277_v6 = vld [vmem:[#allocation14 + $0x378] sm:$0xff]  ;;  %1356 = vmatpush.msrb.mxu0 %v6103_v27 }
 0x1a3   :  { %6239 = vst [vmem:[#allocation152_spill] sm:$0xff] %v4262_v32  ;;  %1415 = vmatpush.msrb.mxu3 %v4277_v6  ;;  %1376 = vmatpush.msrb.mxu1 %v6104_v19  ;;  %v6245_v27 = vld [vmem:[#allocation91_spill] sm:$0xff]  ;;  %v6246_v19 = vld [vmem:[#allocation92_spill] sm:$0xff] }
 0x1a4   :  { %6240 = vst [vmem:[#allocation153_spill] sm:$0xff] %v4265_v63  ;;  %1396 = vmatpush.msrb.mxu2 %v6105_v20  ;;  %1357 = vmatpush.msrb.mxu0 %v6107_v22  ;;  %v6247_v20 = vld [vmem:[#allocation93_spill] sm:$0xff] }
 0x1a5   :  { %6241 = vst [vmem:[#allocation154_spill] sm:$0xff] %v4268_v57  ;;  %1416 = vmatpush.msrb.mxu3 %v6106_v21  ;;  %1377 = vmatpush.msrb.mxu1 %v6108_v23  ;;  %v6253_v21 = vld [vmem:[#allocation67_spill] sm:$0xff]  ;;  %v6256_v23 = vld [vmem:[#allocation102_spill] sm:$0xff] }
 0x1a6   :  { %6242 = vst [vmem:[#allocation155_spill] sm:$0xff] %v4271_v4  ;;  %1397 = vmatpush.msrb.mxu2 %v6109_v24  ;;  %1358 = vmatpush.msrb.mxu0 %v6111_v26 }
 0x1a7   :  { %6243 = vst [vmem:[#allocation156_spill] sm:$0xff] %v4274_v10  ;;  %1417 = vmatpush.msrb.mxu3 %v6110_v25  ;;  %1378 = vmatpush.msrb.mxu1 %v6112_v28 }
 0x1a8   :  { %6244 = vst [vmem:[#allocation157_spill] sm:$0xff] %v4277_v6  ;;  %1398 = vmatpush.msrb.mxu2 %v6113_v29  ;;  %1359 = vmatpush.msrb.mxu0 %v6117_v35  ;;  %v6257_v35 = vld [vmem:[#allocation69_spill] sm:$0xff] }
 0x1a9   :  { %1418 = vmatpush.msrb.mxu3 %v6114_v30  ;;  %1379 = vmatpush.msrb.mxu1 %v6118_v38  ;;  %v6258_v38 = vld [vmem:[#allocation103_spill] sm:$0xff] }
 0x1aa   :  { %1399 = vmatpush.msrb.mxu2 %v6121_v42  ;;  %1360 = vmatpush.msrb.mxu0 %v6123_v44 }
 0x1ab   :  { %1419 = vmatpush.msrb.mxu3 %v6122_v43  ;;  %1380 = vmatpush.msrb.mxu1 %v6124_v45 }
 0x1ac   :  { %1400 = vmatpush.msrb.mxu2 %v6125_v47  ;;  %1361 = vmatpush.msrb.mxu0 %v6127_v49 }
 0x1ad   :  { %1420 = vmatpush.msrb.mxu3 %v6126_v48  ;;  %1381 = vmatpush.msrb.mxu1 %v6128_v50  ;;  %v6260_v50 = vld [vmem:[#allocation63_spill] sm:$0xff] }
 0x1ae   :  { %1401 = vmatpush.msrb.mxu2 %v6129_v51  ;;  %1362 = vmatpush.msrb.mxu0 %v6131_v60 }
 0x1af   :  { %1421 = vmatpush.msrb.mxu3 %v6130_v52  ;;  %1382 = vmatpush.msrb.mxu1 %v6132_v61  ;;  %v6261_v52 = vld [vmem:[#allocation64_spill] sm:$0xff] }
 0x1b0   :  { %1402 = vmatpush.msrb.mxu2 %v6133_v41  ;;  %1363 = vmatpush.msrb.mxu0 %v6137_v59  ;;  %v6248_v59 = vld [vmem:[#allocation94_spill] sm:$0xff]  ;;  %v6259_v41 = vld [vmem:[#allocation104_spill] sm:$0xff] }
 0x1b1   :  { %1422 = vmatpush.msrb.mxu3 %v6134_v39  ;;  %1383 = vmatpush.msrb.mxu1 %v6138_v58  ;;  %v6249_v58 = vld [vmem:[#allocation95_spill] sm:$0xff]  ;;  %v303_v39 = vadd.f32 %v6258_v38, %v6257_v35  ;;  %v344_v42 = vadd.f32 %v6259_v41, %v4012_v13 }
 0x1b2   :  { %1403 = vmatpush.msrb.mxu2 %v6139_v37  ;;  %1364 = vmatpush.msrb.mxu0 %v6143_v18  ;;  %v6250_v37 = vld [vmem:[#allocation96_spill] sm:$0xff]  ;;  %v6252_v18 = vld [vmem:[#allocation98_spill] sm:$0xff] }
 0x1b3   :  { %1423 = vmatpush.msrb.mxu3 %v6140_v36  ;;  %1384 = vmatpush.msrb.mxu1 %v6144_v34  ;;  %v6251_v36 = vld [vmem:[#allocation97_spill] sm:$0xff] }
 0x1b4   :  { %1404 = vmatpush.msrb.mxu2 %v3686_v14  ;;  %1365 = vmatpush.msrb.mxu0 %v6245_v27  ;;  %v6254_v14 = vld [vmem:[#allocation101_spill] sm:$0xff] }
 0x1b5   :  { %1424 = vmatpush.msrb.mxu3 %v3688_v5  ;;  %1385 = vmatpush.msrb.mxu1 %v6246_v19  ;;  %v221_v22 = vadd.f32 %v6254_v14, %v6253_v21  ;;  %v6255_v5 = vld [vmem:[#allocation68_spill] sm:$0xff] }
 0x1b6   :  { %1405 = vmatpush.msrb.mxu2 %v6247_v20  ;;  %1366 = vmatpush.msrb.mxu0 %v6249_v58  ;;  %v262_v24 = vadd.f32 %v6256_v23, %v6255_v5 }
 0x1b7   :  { %1425 = vmatpush.msrb.mxu3 %v6248_v59  ;;  %1386 = vmatpush.msrb.mxu1 %v6250_v37 }
 0x1b8   :  { %1406 = vmatpush.msrb.mxu2 %v6251_v36 }
 0x1b9   :  { %1426 = vmatpush.msrb.mxu3 %v6252_v18 }
 0x1dd   :  { %v1052_v25 = vpop.f32.mrf.mxu0  ;;  %v1072_v26 = vpop.f32.mrf.mxu1 }
 0x1de   :  { %v1115_v28 = vadd.f32 %v1052_v25, %v221_v22  ;;  %v1116_v29 = vadd.f32 %v1072_v26, %v262_v24  ;;  %v6262_v24 = vld [vmem:[#allocation65_spill] sm:$0xff]  ;;  %v6263_v26 = vld [vmem:[#allocation66_spill] sm:$0xff] }
 0x1e0   :  { %v1209_v30 = vmul.f32 0.5, %v1115_v28  ;;  %v1217_v34 = vmul.f32 0.5, %v1116_v29 }
 0x1e2   :  { %2690 = vtanh.f32 %v1209_v30 }
 0x1e3   :  { %2692 = vtanh.f32 %v1217_v34 }
 0x1e4   :  { %v1092_v43 = vpop.f32.mrf.mxu2  ;;  %v1112_v44 = vpop.f32.mrf.mxu3 }
 0x1e5   :  { %v1117_v45 = vadd.f32 %v1092_v43, %v303_v39  ;;  %v1118_v47 = vadd.f32 %v1112_v44, %v344_v42  ;;  %v1142_v48 = vpop.f32.mrf.mxu0  ;;  %v1162_v49 = vpop.f32.mrf.mxu1 }
 0x1e6   :  { %v1205_v51 = vadd.f32 %v1142_v48, %v6260_v50  ;;  %v1206_v60 = vadd.f32 %v1162_v49, %v6261_v52 }
 0x1e7   :  { %2694 = vtanh.f32 %v1117_v45  ;;  %v1227_v61 = vmul.f32 0.5, %v1118_v47 }
 0x1e8   :  { %v2691_v27 = vpop.eup %2690  ;;  %v1213_v19 = vmul.f32 0.5, %v1205_v51  ;;  %v1221_v20 = vmul.f32 0.5, %v1206_v60 }
 0x1e9   :  { %v2693_v59 = vpop.eup %2692  ;;  %v1211_v58 = vmul.f32 0.5, %v2691_v27  ;;  %2696 = vtanh.f32 %v1227_v61 }
 0x1ea   :  { %v1219_v37 = vmul.f32 0.5, %v2693_v59  ;;  %2698 = vtanh.f32 %v1213_v19 }
 0x1eb   :  { %v1212_v36 = vadd.f32 0.5, %v1211_v58  ;;  %2700 = vtanh.f32 %v1221_v20  ;;  %v6264_v58 = vld [vmem:[#allocation71_spill] sm:$0xff] }
 0x1ec   :  { %v1220_v18 = vadd.f32 0.5, %v1219_v37  ;;  %v1182_v14 = vpop.f32.mrf.mxu2  ;;  %v1202_v22 = vpop.f32.mrf.mxu3  ;;  %v6265_v37 = vld [vmem:[#allocation72_spill] sm:$0xff] }
 0x1ed   :  { %v2695_v23 = vpop.eup %2694  ;;  %v1207_v25 = vadd.f32 %v1182_v14, %v6262_v24  ;;  %v1208_v28 = vadd.f32 %v1202_v22, %v6263_v26  ;;  %v6268_v14 = vld [vmem:[#allocation75_spill] sm:$0xff]  ;;  %v6269_v22 = vld [vmem:[#allocation76_spill] sm:$0xff]  ;;  %v6271_v24 = vld [vmem:[#allocation78_spill] sm:$0xff] }
 0x1ee   :  { %v1236_v29 = vmul.f32 %v1220_v18, %v4022_v0  ;;  %v1237_v30 = vmul.f32 %v2695_v23, %v1212_v36  ;;  %v6266_v36 = vld [vmem:[#allocation73_spill] sm:$0xff]  ;;  %v6267_v18 = vld [vmem:[#allocation74_spill] sm:$0xff]  ;;  %v6273_v26 = vld [vmem:[#allocation80_spill] sm:$0xff] }
 0x1ef   :  { %v2697_v34 = vpop.eup %2696  ;;  %2702 = vtanh.f32 %v1207_v25  ;;  %v1231_v38 = vmul.f32 0.5, %v1208_v28  ;;  %v6270_v23 = vld [vmem:[#allocation77_spill] sm:$0xff]  ;;  %v6272_v25 = vld [vmem:[#allocation79_spill] sm:$0xff] }
 0x1f0   :  { %v2699_v39 = vpop.eup %2698  ;;  %v4337_v41 = vadd.f32 %v1237_v30, %v1236_v29  ;;  %v1229_v45 = vmul.f32 0.5, %v2697_v34  ;;  %v6274_v28 = vld [vmem:[#allocation81_spill] sm:$0xff]  ;;  %v6275_v29 = vld [vmem:[#allocation82_spill] sm:$0xff]  ;;  %v6276_v30 = vld [vmem:[#allocation83_spill] sm:$0xff] }
 0x1f1   :  { %v2701_v42 = vpop.eup %2700  ;;  %v1215_v43 = vmul.f32 0.5, %v2699_v39  ;;  %2704 = vtanh.f32 %v1231_v38  ;;  %v6277_v34 = vld [vmem:[#allocation84_spill] sm:$0xff]  ;;  %v6278_v38 = vld [vmem:[#allocation85_spill] sm:$0xff]  ;;  %v6279_v39 = vld [vmem:[#allocation86_spill] sm:$0xff] }
 0x1f2   :  { %2706 = vtanh.f32 %v4337_v41  ;;  %v1223_v44 = vmul.f32 0.5, %v2701_v42  ;;  %v1230_v52 = vadd.f32 0.5, %v1229_v45  ;;  %v6280_v42 = vld [vmem:[#allocation87_spill] sm:$0xff]  ;;  %v6283_v45 = vld [vmem:[#allocation90_spill] sm:$0xff] }
 0x1f3   :  { %v1216_v47 = vadd.f32 0.5, %v1215_v43  ;;  %v6281_v43 = vld [vmem:[#allocation88_spill] sm:$0xff] }
 0x1f4   :  { %v1224_v48 = vadd.f32 0.5, %v1223_v44  ;;  %v6282_v44 = vld [vmem:[#allocation89_spill] sm:$0xff] }
 0x1f5   :  { %v2703_v49 = vpop.eup %2702 }
 0x1f6   :  { %v1240_v50 = vmul.f32 %v1224_v48, %v4025_v56  ;;  %v1241_v0 = vmul.f32 %v2703_v49, %v1216_v47  ;;  %v6284_v47 = vld [vmem:[#allocation99_spill] sm:$0xff]  ;;  %v6285_v48 = vld [vmem:[#allocation100_spill] sm:$0xff] }
 0x1f7   :  { %v2705_v51 = vpop.eup %2704  ;;  %v6286_v49 = vld [vmem:[#allocation115_spill] sm:$0xff] }
 0x1f8   :  { %v2707_v60 = vpop.eup %2706  ;;  %v4341_v61 = vadd.f32 %v1241_v0, %v1240_v50  ;;  %v1233_v19 = vmul.f32 0.5, %v2705_v51  ;;  %v6287_v50 = vld [vmem:[#allocation116_spill] sm:$0xff]  ;;  %v6288_v0 = vld [vmem:[#allocation117_spill] sm:$0xff]  ;;  %v6289_v51 = vld [vmem:[#allocation118_spill] sm:$0xff] }
 0x1f9   :  { %v1244_v27 = vmul.f32 %v2707_v60, %v1230_v52  ;;  %v6290_v52 = vld [vmem:[#allocation119_spill] sm:$0xff]  ;;  %v6291_v60 = vld [vmem:[#allocation120_spill] sm:$0xff] }
 0x1fa   :  { %2708 = vtanh.f32 %v4341_v61  ;;  %v1234_v56 = vadd.f32 0.5, %v1233_v19  ;;  %v6293_v19 = vld [vmem:[#allocation122_spill] sm:$0xff] }
 0x1fb   :  { %1252 = vst [vmem:[#allocation17 + $0x8] sm:$0xff] %v1244_v27  ;;  %1277 = vmatmul.f32.vlgmr.msra.gmra.mxu0 %v1244_v27  ;;  %1297 = vmatmul.f32.vlgmr.msra.gmra.mxu1 %v1244_v27 }
 0x1fc   :  { %1317 = vmatmul.f32.vlgmr.msra.gmra.mxu2 %v1244_v27  ;;  %1337 = vmatmul.f32.vlgmr.msra.gmra.mxu3 %v1244_v27  ;;  %v6292_v27 = vld [vmem:[#allocation121_spill] sm:$0xff] }
 0x1fd   :  { %1487 = vmatpush.msra.mxu0 %v4028_v12  ;;  %1507 = vmatpush.msra.mxu1 %v4031_v11 }
 0x1fe   :  { %1527 = vmatpush.msra.mxu2 %v4034_v9  ;;  %1547 = vmatpush.msra.mxu3 %v4037_v53 }
 0x1ff   :  { %1488 = vmatpush.msra.mxu0 %v4040_v7  ;;  %1508 = vmatpush.msra.mxu1 %v4043_v54 }
 0x200   :  { %v2709_v20 = vpop.eup %2708  ;;  %1528 = vmatpush.msra.mxu2 %v4046_v8  ;;  %1548 = vmatpush.msra.mxu3 %v4049_v31 }
 0x201   :  { %v1246_v59 = vmul.f32 %v2709_v20, %v1234_v56  ;;  %1489 = vmatpush.msra.mxu0 %v4052_v15  ;;  %1509 = vmatpush.msra.mxu1 %v4055_v40  ;;  %v6294_v56 = vld [vmem:[#allocation123_spill] sm:$0xff]  ;;  %v6295_v20 = vld [vmem:[#allocation124_spill] sm:$0xff] }
 0x202   :  { %1529 = vmatpush.msra.mxu2 %v4058_v16  ;;  %1549 = vmatpush.msra.mxu3 %v4061_v17 }
 0x203   :  { %1254 = vst [vmem:[#allocation18 + $0x30] sm:$0xff] %v1246_v59  ;;  %1367 = vmatmul.f32.vlgmr.msrb.gmra.mxu0 %v1246_v59  ;;  %1387 = vmatmul.f32.vlgmr.msrb.gmra.mxu1 %v1246_v59 }
 0x204   :  { %1407 = vmatmul.f32.vlgmr.msrb.gmra.mxu2 %v1246_v59  ;;  %1427 = vmatmul.f32.vlgmr.msrb.gmra.mxu3 %v1246_v59  ;;  %v6296_v59 = vld [vmem:[#allocation125_spill] sm:$0xff] }
 0x205   :  { %1490 = vmatpush.msra.mxu0 %v4064_v55  ;;  %1510 = vmatpush.msra.mxu1 %v4067_v33 }
 0x206   :  { %1530 = vmatpush.msra.mxu2 %v4070_v46  ;;  %1550 = vmatpush.msra.mxu3 %v4073_v2 }
 0x207   :  { %1491 = vmatpush.msra.mxu0 %v4076_v1  ;;  %1511 = vmatpush.msra.mxu1 %v4079_v62 }
 0x208   :  { %1531 = vmatpush.msra.mxu2 %v4082_v3  ;;  %1551 = vmatpush.msra.mxu3 %v6264_v58 }
 0x209   :  { %1492 = vmatpush.msra.mxu0 %v6265_v37  ;;  %1512 = vmatpush.msra.mxu1 %v6266_v36 }
 0x20a   :  { %1532 = vmatpush.msra.mxu2 %v6267_v18  ;;  %1552 = vmatpush.msra.mxu3 %v6268_v14 }
 0x20b   :  { %1493 = vmatpush.msra.mxu0 %v6269_v22  ;;  %1513 = vmatpush.msra.mxu1 %v6270_v23 }
 0x20c   :  { %1533 = vmatpush.msra.mxu2 %v6271_v24  ;;  %1553 = vmatpush.msra.mxu3 %v6272_v25 }
 0x20d   :  { %1494 = vmatpush.msra.mxu0 %v6273_v26  ;;  %1514 = vmatpush.msra.mxu1 %v6274_v28 }
 0x20e   :  { %1534 = vmatpush.msra.mxu2 %v6275_v29  ;;  %1554 = vmatpush.msra.mxu3 %v6276_v30 }
 0x20f   :  { %1495 = vmatpush.msra.mxu0 %v6277_v34  ;;  %1515 = vmatpush.msra.mxu1 %v6278_v38 }
 0x210   :  { %1535 = vmatpush.msra.mxu2 %v6279_v39  ;;  %1555 = vmatpush.msra.mxu3 %v6280_v42 }
 0x211   :  { %1496 = vmatpush.msra.mxu0 %v6281_v43  ;;  %1516 = vmatpush.msra.mxu1 %v6282_v44 }
 0x212   :  { %1536 = vmatpush.msra.mxu2 %v6283_v45  ;;  %1556 = vmatpush.msra.mxu3 %v6284_v47 }
 0x213   :  { %1497 = vmatpush.msra.mxu0 %v6285_v48  ;;  %1517 = vmatpush.msra.mxu1 %v6286_v49  ;;  %v6297_v49 = vld [vmem:[#allocation126_spill] sm:$0xff] }
 0x214   :  { %1537 = vmatpush.msra.mxu2 %v6287_v50  ;;  %1557 = vmatpush.msra.mxu3 %v6288_v0  ;;  %v6298_v50 = vld [vmem:[#allocation127_spill] sm:$0xff]  ;;  %v6299_v0 = vld [vmem:[#allocation128_spill] sm:$0xff] }
 0x215   :  { %1498 = vmatpush.msra.mxu0 %v6289_v51  ;;  %1518 = vmatpush.msra.mxu1 %v6290_v52  ;;  %v6300_v51 = vld [vmem:[#allocation129_spill] sm:$0xff]  ;;  %v6301_v52 = vld [vmem:[#allocation130_spill] sm:$0xff] }
 0x216   :  { %1538 = vmatpush.msra.mxu2 %v6291_v60  ;;  %1558 = vmatpush.msra.mxu3 %v6292_v27  ;;  %v6302_v60 = vld [vmem:[#allocation131_spill] sm:$0xff]  ;;  %v6303_v27 = vld [vmem:[#allocation132_spill] sm:$0xff] }
 0x217   :  { %1499 = vmatpush.msra.mxu0 %v6293_v19  ;;  %1519 = vmatpush.msra.mxu1 %v6294_v56  ;;  %v6304_v19 = vld [vmem:[#allocation133_spill] sm:$0xff]  ;;  %v6305_v56 = vld [vmem:[#allocation134_spill] sm:$0xff] }
 0x218   :  { %1539 = vmatpush.msra.mxu2 %v6295_v20  ;;  %1559 = vmatpush.msra.mxu3 %v6296_v59  ;;  %v6306_v20 = vld [vmem:[#allocation135_spill] sm:$0xff]  ;;  %v6307_v59 = vld [vmem:[#allocation136_spill] sm:$0xff] }
 0x219   :  { %1500 = vmatpush.msra.mxu0 %v6297_v49  ;;  %1520 = vmatpush.msra.mxu1 %v6298_v50  ;;  %v6308_v49 = vld [vmem:[#allocation137_spill] sm:$0xff]  ;;  %v6309_v50 = vld [vmem:[#allocation138_spill] sm:$0xff] }
 0x21a   :  { %1540 = vmatpush.msra.mxu2 %v6299_v0  ;;  %1560 = vmatpush.msra.mxu3 %v6300_v51  ;;  %v6310_v0 = vld [vmem:[#allocation139_spill] sm:$0xff]  ;;  %v6311_v51 = vld [vmem:[#allocation140_spill] sm:$0xff] }
 0x21b   :  { %1501 = vmatpush.msra.mxu0 %v6301_v52  ;;  %1521 = vmatpush.msra.mxu1 %v6302_v60  ;;  %v6312_v52 = vld [vmem:[#allocation141_spill] sm:$0xff]  ;;  %v6313_v60 = vld [vmem:[#allocation142_spill] sm:$0xff] }
 0x21c   :  { %1541 = vmatpush.msra.mxu2 %v6303_v27  ;;  %1561 = vmatpush.msra.mxu3 %v6304_v19  ;;  %v6314_v27 = vld [vmem:[#allocation143_spill] sm:$0xff]  ;;  %v6315_v19 = vld [vmem:[#allocation144_spill] sm:$0xff] }
 0x21d   :  { %1502 = vmatpush.msra.mxu0 %v6305_v56  ;;  %1522 = vmatpush.msra.mxu1 %v6306_v20  ;;  %v6316_v56 = vld [vmem:[#allocation145_spill] sm:$0xff]  ;;  %v6317_v20 = vld [vmem:[#allocation146_spill] sm:$0xff] }
 0x21e   :  { %1542 = vmatpush.msra.mxu2 %v6307_v59  ;;  %1562 = vmatpush.msra.mxu3 %v6308_v49  ;;  %v6318_v59 = vld [vmem:[#allocation147_spill] sm:$0xff]  ;;  %v6319_v49 = vld [vmem:[#allocation148_spill] sm:$0xff] }
 0x21f   :  { %1577 = vmatpush.msrb.mxu0 %v6309_v50  ;;  %1597 = vmatpush.msrb.mxu1 %v6310_v0  ;;  %v6320_v50 = vld [vmem:[#allocation149_spill] sm:$0xff]  ;;  %v6321_v0 = vld [vmem:[#allocation150_spill] sm:$0xff] }
 0x220   :  { %1617 = vmatpush.msrb.mxu2 %v6311_v51  ;;  %1637 = vmatpush.msrb.mxu3 %v6312_v52  ;;  %v6322_v51 = vld [vmem:[#allocation151_spill] sm:$0xff] }
 0x221   :  { %1578 = vmatpush.msrb.mxu0 %v6313_v60  ;;  %1598 = vmatpush.msrb.mxu1 %v6314_v27 }
 0x222   :  { %1618 = vmatpush.msrb.mxu2 %v6315_v19  ;;  %1638 = vmatpush.msrb.mxu3 %v6316_v56  ;;  %v6369_v56 = vld [vmem:[#allocation107_spill] sm:$0xff]  ;;  %v6370_v19 = vld [vmem:[#allocation108_spill] sm:$0xff] }
 0x223   :  { %1579 = vmatpush.msrb.mxu0 %v6317_v20  ;;  %1599 = vmatpush.msrb.mxu1 %v6318_v59  ;;  %v4428_v59 = vld [vmem:[#allocation14 + $0x340] sm:$0xff]  ;;  %v347_v27 = vadd.f32 %v6370_v19, %v4012_v13  ;;  %v6373_v13 = vld [vmem:[#allocation61_spill] sm:$0xff] }
 0x224   :  { %1619 = vmatpush.msrb.mxu2 %v6319_v49  ;;  %1639 = vmatpush.msrb.mxu3 %v6320_v50  ;;  %6323 = vst [vmem:[#allocation91_spill] sm:$0xff] %v4428_v59  ;;  %v4431_v50 = vld [vmem:[#allocation14 + $0x348] sm:$0xff] }
 0x225   :  { %1580 = vmatpush.msrb.mxu0 %v6321_v0  ;;  %1600 = vmatpush.msrb.mxu1 %v6322_v51  ;;  %6324 = vst [vmem:[#allocation92_spill] sm:$0xff] %v4431_v50  ;;  %v4434_v51 = vld [vmem:[#allocation14 + $0x350] sm:$0xff] }
 0x226   :  { %1620 = vmatpush.msrb.mxu2 %v4262_v32  ;;  %1640 = vmatpush.msrb.mxu3 %v4265_v63  ;;  %6325 = vst [vmem:[#allocation93_spill] sm:$0xff] %v4434_v51  ;;  %v4437_v63 = vld [vmem:[#allocation14 + $0x358] sm:$0xff] }
 0x227   :  { %1581 = vmatpush.msrb.mxu0 %v4268_v57  ;;  %1601 = vmatpush.msrb.mxu1 %v4271_v4  ;;  %6326 = vst [vmem:[#allocation94_spill] sm:$0xff] %v4437_v63  ;;  %v4440_v4 = vld [vmem:[#allocation14 + $0x320] sm:$0xff] }
 0x228   :  { %1621 = vmatpush.msrb.mxu2 %v4274_v10  ;;  %1641 = vmatpush.msrb.mxu3 %v4277_v6  ;;  %6327 = vst [vmem:[#allocation95_spill] sm:$0xff] %v4440_v4  ;;  %v4443_v6 = vld [vmem:[#allocation14 + $0x328] sm:$0xff] }
 0x229   :  { %1582 = vmatpush.msrb.mxu0 %v4428_v59  ;;  %1602 = vmatpush.msrb.mxu1 %v4431_v50  ;;  %6328 = vst [vmem:[#allocation96_spill] sm:$0xff] %v4443_v6  ;;  %v4446_v59 = vld [vmem:[#allocation14 + $0x330] sm:$0xff]  ;;  %v4449_v50 = vld [vmem:[#allocation14 + $0x338] sm:$0xff] }
 0x22a   :  { %1622 = vmatpush.msrb.mxu2 %v4434_v51  ;;  %1642 = vmatpush.msrb.mxu3 %v4437_v63  ;;  %6329 = vst [vmem:[#allocation97_spill] sm:$0xff] %v4446_v59  ;;  %v4452_v51 = vld [vmem:[#allocation14 + $0x300] sm:$0xff]  ;;  %v4455_v63 = vld [vmem:[#allocation14 + $0x308] sm:$0xff] }
 0x22b   :  { %1583 = vmatpush.msrb.mxu0 %v4440_v4  ;;  %1603 = vmatpush.msrb.mxu1 %v4443_v6  ;;  %6330 = vst [vmem:[#allocation98_spill] sm:$0xff] %v4449_v50  ;;  %v4458_v4 = vld [vmem:[#allocation14 + $0x310] sm:$0xff]  ;;  %v4461_v6 = vld [vmem:[#allocation14 + $0x318] sm:$0xff] }
 0x22c   :  { %1623 = vmatpush.msrb.mxu2 %v4446_v59  ;;  %1643 = vmatpush.msrb.mxu3 %v4449_v50  ;;  %6331 = vst [vmem:[#allocation101_spill] sm:$0xff] %v4452_v51  ;;  %v4464_v59 = vld [vmem:[#allocation14 + $0x2e0] sm:$0xff]  ;;  %v4467_v50 = vld [vmem:[#allocation14 + $0x2e8] sm:$0xff] }
 0x22d   :  { %1584 = vmatpush.msrb.mxu0 %v4452_v51  ;;  %6332 = vst [vmem:[#allocation102_spill] sm:$0xff] %v4455_v63  ;;  %1604 = vmatpush.msrb.mxu1 %v4455_v63  ;;  %v4470_v51 = vld [vmem:[#allocation14 + $0x2f0] sm:$0xff]  ;;  %v4473_v63 = vld [vmem:[#allocation14 + $0x2f8] sm:$0xff] }
 0x22e   :  { %6333 = vst [vmem:[#allocation69_spill] sm:$0xff] %v4458_v4  ;;  %1624 = vmatpush.msrb.mxu2 %v4458_v4  ;;  %1644 = vmatpush.msrb.mxu3 %v4461_v6  ;;  %v4476_v4 = vld [vmem:[#allocation14 + $0x2c0] sm:$0xff] }
 0x22f   :  { %6334 = vst [vmem:[#allocation103_spill] sm:$0xff] %v4461_v6  ;;  %1585 = vmatpush.msrb.mxu0 %v4464_v59  ;;  %1605 = vmatpush.msrb.mxu1 %v4467_v50  ;;  %v4479_v6 = vld [vmem:[#allocation14 + $0x2c8] sm:$0xff] }
 0x230   :  { %6335 = vst [vmem:[#allocation104_spill] sm:$0xff] %v4464_v59  ;;  %1625 = vmatpush.msrb.mxu2 %v4470_v51  ;;  %1645 = vmatpush.msrb.mxu3 %v4473_v63  ;;  %v4482_v59 = vld [vmem:[#allocation14 + $0x2d0] sm:$0xff] }
 0x231   :  { %6336 = vst [vmem:[#allocation63_spill] sm:$0xff] %v4467_v50  ;;  %1586 = vmatpush.msrb.mxu0 %v4476_v4  ;;  %1606 = vmatpush.msrb.mxu1 %v4479_v6  ;;  %v4485_v50 = vld [vmem:[#allocation14 + $0x2d8] sm:$0xff] }
 0x232   :  { %6337 = vst [vmem:[#allocation64_spill] sm:$0xff] %v4470_v51  ;;  %1626 = vmatpush.msrb.mxu2 %v4482_v59  ;;  %1646 = vmatpush.msrb.mxu3 %v4485_v50  ;;  %v4488_v51 = vld [vmem:[#allocation14 + $0x2a0] sm:$0xff] }
 0x233   :  { %6338 = vst [vmem:[#allocation65_spill] sm:$0xff] %v4473_v63  ;;  %1587 = vmatpush.msrb.mxu0 %v4488_v51  ;;  %v4491_v63 = vld [vmem:[#allocation14 + $0x2a8] sm:$0xff] }
 0x234   :  { %6339 = vst [vmem:[#allocation66_spill] sm:$0xff] %v4476_v4  ;;  %1607 = vmatpush.msrb.mxu1 %v4491_v63  ;;  %v4494_v4 = vld [vmem:[#allocation14 + $0x2b0] sm:$0xff] }
 0x235   :  { %6340 = vst [vmem:[#allocation71_spill] sm:$0xff] %v4479_v6  ;;  %1627 = vmatpush.msrb.mxu2 %v4494_v4  ;;  %v4497_v6 = vld [vmem:[#allocation14 + $0x2b8] sm:$0xff] }
 0x236   :  { %6341 = vst [vmem:[#allocation72_spill] sm:$0xff] %v4482_v59  ;;  %1647 = vmatpush.msrb.mxu3 %v4497_v6  ;;  %v4500_v59 = vld [vmem:[#allocation14 + $0x280] sm:$0xff] }
 0x237   :  { %6342 = vst [vmem:[#allocation73_spill] sm:$0xff] %v4485_v50  ;;  %1588 = vmatpush.msrb.mxu0 %v4500_v59  ;;  %v4503_v50 = vld [vmem:[#allocation14 + $0x288] sm:$0xff] }
 0x238   :  { %6343 = vst [vmem:[#allocation74_spill] sm:$0xff] %v4488_v51  ;;  %1608 = vmatpush.msrb.mxu1 %v4503_v50  ;;  %v4506_v51 = vld [vmem:[#allocation14 + $0x290] sm:$0xff] }
 0x239   :  { %6344 = vst [vmem:[#allocation75_spill] sm:$0xff] %v4491_v63  ;;  %1628 = vmatpush.msrb.mxu2 %v4506_v51  ;;  %v4509_v63 = vld [vmem:[#allocation14 + $0x298] sm:$0xff] }
 0x23a   :  { %6345 = vst [vmem:[#allocation76_spill] sm:$0xff] %v4494_v4  ;;  %1648 = vmatpush.msrb.mxu3 %v4509_v63  ;;  %v4512_v4 = vld [vmem:[#allocation14 + $0x260] sm:$0xff] }
 0x23b   :  { %6346 = vst [vmem:[#allocation77_spill] sm:$0xff] %v4497_v6  ;;  %1589 = vmatpush.msrb.mxu0 %v4512_v4  ;;  %v4515_v6 = vld [vmem:[#allocation14 + $0x268] sm:$0xff] }
 0x23c   :  { %6347 = vst [vmem:[#allocation78_spill] sm:$0xff] %v4500_v59  ;;  %1609 = vmatpush.msrb.mxu1 %v4515_v6  ;;  %v4518_v59 = vld [vmem:[#allocation14 + $0x270] sm:$0xff] }
 0x23d   :  { %6348 = vst [vmem:[#allocation79_spill] sm:$0xff] %v4503_v50  ;;  %1629 = vmatpush.msrb.mxu2 %v4518_v59  ;;  %v4521_v50 = vld [vmem:[#allocation14 + $0x278] sm:$0xff] }
 0x23e   :  { %6349 = vst [vmem:[#allocation80_spill] sm:$0xff] %v4506_v51  ;;  %1649 = vmatpush.msrb.mxu3 %v4521_v50  ;;  %v4524_v51 = vld [vmem:[#allocation14 + $0x240] sm:$0xff] }
 0x23f   :  { %6350 = vst [vmem:[#allocation81_spill] sm:$0xff] %v4509_v63  ;;  %1590 = vmatpush.msrb.mxu0 %v4524_v51  ;;  %v4527_v63 = vld [vmem:[#allocation14 + $0x248] sm:$0xff] }
 0x240   :  { %6351 = vst [vmem:[#allocation82_spill] sm:$0xff] %v4512_v4  ;;  %1610 = vmatpush.msrb.mxu1 %v4527_v63  ;;  %v4530_v4 = vld [vmem:[#allocation14 + $0x250] sm:$0xff] }
 0x241   :  { %6352 = vst [vmem:[#allocation83_spill] sm:$0xff] %v4515_v6  ;;  %1630 = vmatpush.msrb.mxu2 %v4530_v4  ;;  %v4533_v6 = vld [vmem:[#allocation14 + $0x258] sm:$0xff] }
 0x242   :  { %6353 = vst [vmem:[#allocation84_spill] sm:$0xff] %v4518_v59  ;;  %1650 = vmatpush.msrb.mxu3 %v4533_v6  ;;  %v4536_v59 = vld [vmem:[#allocation14 + $0x220] sm:$0xff] }
 0x243   :  { %6354 = vst [vmem:[#allocation85_spill] sm:$0xff] %v4521_v50  ;;  %1591 = vmatpush.msrb.mxu0 %v4536_v59  ;;  %v4539_v50 = vld [vmem:[#allocation14 + $0x228] sm:$0xff] }
 0x244   :  { %6355 = vst [vmem:[#allocation86_spill] sm:$0xff] %v4524_v51  ;;  %1611 = vmatpush.msrb.mxu1 %v4539_v50  ;;  %v4542_v51 = vld [vmem:[#allocation14 + $0x230] sm:$0xff] }
 0x245   :  { %6356 = vst [vmem:[#allocation87_spill] sm:$0xff] %v4527_v63  ;;  %1631 = vmatpush.msrb.mxu2 %v4542_v51  ;;  %v4545_v63 = vld [vmem:[#allocation14 + $0x238] sm:$0xff] }
 0x246   :  { %6357 = vst [vmem:[#allocation88_spill] sm:$0xff] %v4530_v4  ;;  %1651 = vmatpush.msrb.mxu3 %v4545_v63  ;;  %v4548_v4 = vld [vmem:[#allocation14 + $0x200] sm:$0xff] }
 0x247   :  { %6358 = vst [vmem:[#allocation89_spill] sm:$0xff] %v4533_v6  ;;  %1592 = vmatpush.msrb.mxu0 %v4548_v4  ;;  %v4551_v6 = vld [vmem:[#allocation14 + $0x208] sm:$0xff] }
 0x248   :  { %6359 = vst [vmem:[#allocation90_spill] sm:$0xff] %v4536_v59  ;;  %1612 = vmatpush.msrb.mxu1 %v4551_v6  ;;  %v4554_v59 = vld [vmem:[#allocation14 + $0x210] sm:$0xff] }
 0x249   :  { %6360 = vst [vmem:[#allocation99_spill] sm:$0xff] %v4539_v50  ;;  %1632 = vmatpush.msrb.mxu2 %v4554_v59  ;;  %v4557_v50 = vld [vmem:[#allocation14 + $0x218] sm:$0xff] }
 0x24a   :  { %6361 = vst [vmem:[#allocation158_spill] sm:$0xff] %v4542_v51  ;;  %1652 = vmatpush.msrb.mxu3 %v4557_v50  ;;  %v6367_v51 = vld [vmem:[#allocation105_spill] sm:$0xff] }
 0x24b   :  { %6362 = vst [vmem:[#allocation159_spill] sm:$0xff] %v4545_v63  ;;  %v224_v10 = vadd.f32 %v6367_v51, %v6253_v21  ;;  %v6368_v63 = vld [vmem:[#allocation106_spill] sm:$0xff] }
 0x24c   :  { %6363 = vst [vmem:[#allocation160_spill] sm:$0xff] %v4548_v4  ;;  %v265_v57 = vadd.f32 %v6368_v63, %v6255_v5  ;;  %v6371_v5 = vld [vmem:[#allocation59_spill] sm:$0xff] }
 0x24d   :  { %6364 = vst [vmem:[#allocation161_spill] sm:$0xff] %v4551_v6 }
 0x24e   :  { %6365 = vst [vmem:[#allocation162_spill] sm:$0xff] %v4554_v59  ;;  %v306_v59 = vadd.f32 %v6369_v56, %v6257_v35 }
 0x24f   :  { %6366 = vst [vmem:[#allocation163_spill] sm:$0xff] %v4557_v50 }
 0x278   :  { %v1278_v32 = vpop.f32.mrf.mxu0  ;;  %v1298_v4 = vpop.f32.mrf.mxu1 }
 0x279   :  { %v1341_v0 = vadd.f32 %v1278_v32, %v224_v10  ;;  %v1342_v49 = vadd.f32 %v1298_v4, %v265_v57  ;;  %v6372_v10 = vld [vmem:[#allocation60_spill] sm:$0xff] }
 0x27b   :  { %v1435_v20 = vmul.f32 0.5, %v1341_v0  ;;  %v1443_v6 = vmul.f32 0.5, %v1342_v49 }
 0x27d   :  { %2710 = vtanh.f32 %v1435_v20 }
 0x27e   :  { %2712 = vtanh.f32 %v1443_v6 }
 0x27f   :  { %v1318_v50 = vpop.f32.mrf.mxu2  ;;  %v1338_v60 = vpop.f32.mrf.mxu3 }
 0x280   :  { %v1343_v51 = vadd.f32 %v1318_v50, %v306_v59  ;;  %v1344_v21 = vadd.f32 %v1338_v60, %v347_v27  ;;  %v1368_v52 = vpop.f32.mrf.mxu0  ;;  %v1388_v63 = vpop.f32.mrf.mxu1 }
 0x281   :  { %v1431_v48 = vadd.f32 %v1368_v52, %v6371_v5  ;;  %v1432_v57 = vadd.f32 %v1388_v63, %v6372_v10  ;;  %v6374_v52 = vld [vmem:[#allocation62_spill] sm:$0xff] }
 0x282   :  { %2714 = vtanh.f32 %v1343_v51  ;;  %v1453_v4 = vmul.f32 0.5, %v1344_v21 }
 0x283   :  { %v2711_v32 = vpop.eup %2710  ;;  %v1439_v49 = vmul.f32 0.5, %v1431_v48  ;;  %v1447_v0 = vmul.f32 0.5, %v1432_v57 }
 0x284   :  { %v2713_v56 = vpop.eup %2712  ;;  %v1437_v20 = vmul.f32 0.5, %v2711_v32  ;;  %2716 = vtanh.f32 %v1453_v4 }
 0x285   :  { %v1445_v19 = vmul.f32 0.5, %v2713_v56  ;;  %2718 = vtanh.f32 %v1439_v49 }
 0x286   :  { %v1438_v6 = vadd.f32 0.5, %v1437_v20  ;;  %2720 = vtanh.f32 %v1447_v0 }
 0x287   :  { %v1446_v50 = vadd.f32 0.5, %v1445_v19  ;;  %v1408_v60 = vpop.f32.mrf.mxu2  ;;  %v1428_v27 = vpop.f32.mrf.mxu3 }
 0x288   :  { %v2715_v59 = vpop.eup %2714  ;;  %v1433_v5 = vadd.f32 %v1408_v60, %v6373_v13  ;;  %v1434_v63 = vadd.f32 %v1428_v27, %v6374_v52 }
 0x289   :  { %v1462_v21 = vmul.f32 %v1446_v50, %v4337_v41  ;;  %v1463_v51 = vmul.f32 %v2715_v59, %v1438_v6 }
 0x28a   :  { %v2717_v48 = vpop.eup %2716  ;;  %2722 = vtanh.f32 %v1433_v5  ;;  %v1457_v10 = vmul.f32 0.5, %v1434_v63 }
 0x28b   :  { %v2719_v57 = vpop.eup %2718  ;;  %v4573_v4 = vadd.f32 %v1463_v51, %v1462_v21  ;;  %v1455_v56 = vmul.f32 0.5, %v2717_v48  ;;  %v6415_v51 = vld [vmem:[#allocation154_spill] sm:$0xff]  ;;  %v6416_v48 = vld [vmem:[#allocation155_spill] sm:$0xff] }
 0x28c   :  { %v2721_v32 = vpop.eup %2720  ;;  %v1441_v49 = vmul.f32 0.5, %v2719_v57  ;;  %2724 = vtanh.f32 %v1457_v10  ;;  %v6417_v10 = vld [vmem:[#allocation156_spill] sm:$0xff]  ;;  %v6418_v57 = vld [vmem:[#allocation157_spill] sm:$0xff] }
 0x28d   :  { %2726 = vtanh.f32 %v4573_v4  ;;  %v1449_v0 = vmul.f32 0.5, %v2721_v32  ;;  %v1456_v50 = vadd.f32 0.5, %v1455_v56  ;;  %v6419_v32 = vld [vmem:[#allocation91_spill] sm:$0xff]  ;;  %v6422_v56 = vld [vmem:[#allocation94_spill] sm:$0xff] }
 0x28e   :  { %v1442_v20 = vadd.f32 0.5, %v1441_v49  ;;  %v6420_v49 = vld [vmem:[#allocation92_spill] sm:$0xff] }
 0x28f   :  { %v1450_v13 = vadd.f32 0.5, %v1449_v0  ;;  %v6421_v0 = vld [vmem:[#allocation93_spill] sm:$0xff] }
 0x290   :  { %v2723_v19 = vpop.eup %2722 }
 0x291   :  { %v1466_v60 = vmul.f32 %v1450_v13, %v4341_v61  ;;  %v1467_v41 = vmul.f32 %v2723_v19, %v1442_v20  ;;  %v6423_v20 = vld [vmem:[#allocation95_spill] sm:$0xff]  ;;  %v6424_v13 = vld [vmem:[#allocation96_spill] sm:$0xff]  ;;  %v6425_v19 = vld [vmem:[#allocation97_spill] sm:$0xff] }
 0x292   :  { %v2725_v6 = vpop.eup %2724 }
 0x293   :  { %v2727_v27 = vpop.eup %2726  ;;  %v4577_v59 = vadd.f32 %v1467_v41, %v1466_v60  ;;  %v1459_v52 = vmul.f32 0.5, %v2725_v6  ;;  %v6426_v60 = vld [vmem:[#allocation98_spill] sm:$0xff]  ;;  %v6427_v41 = vld [vmem:[#allocation101_spill] sm:$0xff] }
 0x294   :  { %v1470_v5 = vmul.f32 %v2727_v27, %v1456_v50  ;;  %v6428_v6 = vld [vmem:[#allocation102_spill] sm:$0xff]  ;;  %v6429_v50 = vld [vmem:[#allocation69_spill] sm:$0xff]  ;;  %v6430_v27 = vld [vmem:[#allocation103_spill] sm:$0xff] }
 0x295   :  { %2728 = vtanh.f32 %v4577_v59  ;;  %v1460_v61 = vadd.f32 0.5, %v1459_v52  ;;  %v6432_v52 = vld [vmem:[#allocation63_spill] sm:$0xff] }
 0x296   :  { %1478 = vst [vmem:[#allocation17 + $0x10] sm:$0xff] %v1470_v5  ;;  %1503 = vmatmul.f32.vlgmr.msra.gmra.mxu0 %v1470_v5  ;;  %1523 = vmatmul.f32.vlgmr.msra.gmra.mxu1 %v1470_v5 }
 0x297   :  { %1543 = vmatmul.f32.vlgmr.msra.gmra.mxu2 %v1470_v5  ;;  %1563 = vmatmul.f32.vlgmr.msra.gmra.mxu3 %v1470_v5  ;;  %v6431_v5 = vld [vmem:[#allocation104_spill] sm:$0xff] }
 0x298   :  { %1713 = vmatpush.msra.mxu0 %v4028_v12  ;;  %1733 = vmatpush.msra.mxu1 %v4031_v11  ;;  %v6375_v12 = vld [vmem:[#allocation100_spill] sm:$0xff]  ;;  %v6376_v11 = vld [vmem:[#allocation115_spill] sm:$0xff] }
 0x299   :  { %1753 = vmatpush.msra.mxu2 %v4034_v9  ;;  %1773 = vmatpush.msra.mxu3 %v4037_v53  ;;  %v6377_v9 = vld [vmem:[#allocation116_spill] sm:$0xff]  ;;  %v6378_v53 = vld [vmem:[#allocation117_spill] sm:$0xff] }
 0x29a   :  { %1714 = vmatpush.msra.mxu0 %v4040_v7  ;;  %1734 = vmatpush.msra.mxu1 %v4043_v54  ;;  %v6379_v7 = vld [vmem:[#allocation118_spill] sm:$0xff]  ;;  %v6380_v54 = vld [vmem:[#allocation119_spill] sm:$0xff] }
 0x29b   :  { %v2729_v63 = vpop.eup %2728  ;;  %1754 = vmatpush.msra.mxu2 %v4046_v8  ;;  %1774 = vmatpush.msra.mxu3 %v4049_v31  ;;  %v6381_v8 = vld [vmem:[#allocation120_spill] sm:$0xff]  ;;  %v6382_v31 = vld [vmem:[#allocation121_spill] sm:$0xff] }
 0x29c   :  { %v1472_v21 = vmul.f32 %v2729_v63, %v1460_v61  ;;  %1715 = vmatpush.msra.mxu0 %v4052_v15  ;;  %1735 = vmatpush.msra.mxu1 %v4055_v40  ;;  %v6383_v15 = vld [vmem:[#allocation122_spill] sm:$0xff]  ;;  %v6384_v40 = vld [vmem:[#allocation123_spill] sm:$0xff]  ;;  %v6433_v61 = vld [vmem:[#allocation64_spill] sm:$0xff] }
 0x29d   :  { %1755 = vmatpush.msra.mxu2 %v4058_v16  ;;  %1775 = vmatpush.msra.mxu3 %v4061_v17  ;;  %v6385_v16 = vld [vmem:[#allocation124_spill] sm:$0xff]  ;;  %v6386_v17 = vld [vmem:[#allocation125_spill] sm:$0xff] }
 0x29e   :  { %1480 = vst [vmem:[#allocation18 + $0x28] sm:$0xff] %v1472_v21  ;;  %1593 = vmatmul.f32.vlgmr.msrb.gmra.mxu0 %v1472_v21  ;;  %1613 = vmatmul.f32.vlgmr.msrb.gmra.mxu1 %v1472_v21  ;;  %v6434_v63 = vld [vmem:[#allocation65_spill] sm:$0xff] }
 0x29f   :  { %1633 = vmatmul.f32.vlgmr.msrb.gmra.mxu2 %v1472_v21  ;;  %1653 = vmatmul.f32.vlgmr.msrb.gmra.mxu3 %v1472_v21  ;;  %v6435_v21 = vld [vmem:[#allocation66_spill] sm:$0xff] }
 0x2a0   :  { %1716 = vmatpush.msra.mxu0 %v4064_v55  ;;  %1736 = vmatpush.msra.mxu1 %v4067_v33  ;;  %v6387_v55 = vld [vmem:[#allocation126_spill] sm:$0xff]  ;;  %v6388_v33 = vld [vmem:[#allocation127_spill] sm:$0xff] }
 0x2a1   :  { %1756 = vmatpush.msra.mxu2 %v4070_v46  ;;  %1776 = vmatpush.msra.mxu3 %v4073_v2  ;;  %v6389_v46 = vld [vmem:[#allocation128_spill] sm:$0xff]  ;;  %v6390_v2 = vld [vmem:[#allocation129_spill] sm:$0xff] }
 0x2a2   :  { %1717 = vmatpush.msra.mxu0 %v4076_v1  ;;  %1737 = vmatpush.msra.mxu1 %v4079_v62  ;;  %v6391_v1 = vld [vmem:[#allocation130_spill] sm:$0xff]  ;;  %v6392_v62 = vld [vmem:[#allocation131_spill] sm:$0xff] }
 0x2a3   :  { %1757 = vmatpush.msra.mxu2 %v4082_v3  ;;  %1777 = vmatpush.msra.mxu3 %v6264_v58  ;;  %v6393_v3 = vld [vmem:[#allocation132_spill] sm:$0xff]  ;;  %v6394_v58 = vld [vmem:[#allocation133_spill] sm:$0xff] }
 0x2a4   :  { %1718 = vmatpush.msra.mxu0 %v6265_v37  ;;  %1738 = vmatpush.msra.mxu1 %v6266_v36  ;;  %v6395_v37 = vld [vmem:[#allocation134_spill] sm:$0xff]  ;;  %v6396_v36 = vld [vmem:[#allocation135_spill] sm:$0xff] }
 0x2a5   :  { %1758 = vmatpush.msra.mxu2 %v6267_v18  ;;  %1778 = vmatpush.msra.mxu3 %v6268_v14  ;;  %v6397_v18 = vld [vmem:[#allocation136_spill] sm:$0xff]  ;;  %v6398_v14 = vld [vmem:[#allocation137_spill] sm:$0xff] }
 0x2a6   :  { %1719 = vmatpush.msra.mxu0 %v6269_v22  ;;  %1739 = vmatpush.msra.mxu1 %v6270_v23  ;;  %v6399_v22 = vld [vmem:[#allocation138_spill] sm:$0xff]  ;;  %v6400_v23 = vld [vmem:[#allocation139_spill] sm:$0xff] }
 0x2a7   :  { %1759 = vmatpush.msra.mxu2 %v6271_v24  ;;  %1779 = vmatpush.msra.mxu3 %v6272_v25  ;;  %v6401_v24 = vld [vmem:[#allocation140_spill] sm:$0xff]  ;;  %v6402_v25 = vld [vmem:[#allocation141_spill] sm:$0xff] }
 0x2a8   :  { %1720 = vmatpush.msra.mxu0 %v6273_v26  ;;  %1740 = vmatpush.msra.mxu1 %v6274_v28  ;;  %v6403_v26 = vld [vmem:[#allocation142_spill] sm:$0xff]  ;;  %v6404_v28 = vld [vmem:[#allocation143_spill] sm:$0xff] }
 0x2a9   :  { %1760 = vmatpush.msra.mxu2 %v6275_v29  ;;  %1780 = vmatpush.msra.mxu3 %v6276_v30  ;;  %v6405_v29 = vld [vmem:[#allocation144_spill] sm:$0xff]  ;;  %v6406_v30 = vld [vmem:[#allocation145_spill] sm:$0xff] }
 0x2aa   :  { %1721 = vmatpush.msra.mxu0 %v6277_v34  ;;  %1741 = vmatpush.msra.mxu1 %v6278_v38  ;;  %v6407_v34 = vld [vmem:[#allocation146_spill] sm:$0xff]  ;;  %v6408_v38 = vld [vmem:[#allocation147_spill] sm:$0xff] }
 0x2ab   :  { %1761 = vmatpush.msra.mxu2 %v6279_v39  ;;  %1781 = vmatpush.msra.mxu3 %v6280_v42  ;;  %v6409_v39 = vld [vmem:[#allocation148_spill] sm:$0xff]  ;;  %v6410_v42 = vld [vmem:[#allocation149_spill] sm:$0xff] }
 0x2ac   :  { %1722 = vmatpush.msra.mxu0 %v6281_v43  ;;  %1742 = vmatpush.msra.mxu1 %v6282_v44  ;;  %v6411_v43 = vld [vmem:[#allocation150_spill] sm:$0xff]  ;;  %v6412_v44 = vld [vmem:[#allocation151_spill] sm:$0xff] }
 0x2ad   :  { %1762 = vmatpush.msra.mxu2 %v6283_v45  ;;  %1782 = vmatpush.msra.mxu3 %v6284_v47  ;;  %v6413_v45 = vld [vmem:[#allocation152_spill] sm:$0xff]  ;;  %v6414_v47 = vld [vmem:[#allocation153_spill] sm:$0xff] }
 0x2ae   :  { %1723 = vmatpush.msra.mxu0 %v6375_v12  ;;  %1743 = vmatpush.msra.mxu1 %v6376_v11  ;;  %v6436_v12 = vld [vmem:[#allocation71_spill] sm:$0xff]  ;;  %v6437_v11 = vld [vmem:[#allocation72_spill] sm:$0xff] }
 0x2af   :  { %1763 = vmatpush.msra.mxu2 %v6377_v9  ;;  %1783 = vmatpush.msra.mxu3 %v6378_v53  ;;  %v6438_v9 = vld [vmem:[#allocation73_spill] sm:$0xff]  ;;  %v6439_v53 = vld [vmem:[#allocation74_spill] sm:$0xff] }
 0x2b0   :  { %1724 = vmatpush.msra.mxu0 %v6379_v7  ;;  %1744 = vmatpush.msra.mxu1 %v6380_v54  ;;  %v6440_v7 = vld [vmem:[#allocation75_spill] sm:$0xff]  ;;  %v6441_v54 = vld [vmem:[#allocation76_spill] sm:$0xff] }
 0x2b1   :  { %1764 = vmatpush.msra.mxu2 %v6381_v8  ;;  %1784 = vmatpush.msra.mxu3 %v6382_v31  ;;  %v6442_v8 = vld [vmem:[#allocation77_spill] sm:$0xff]  ;;  %v6443_v31 = vld [vmem:[#allocation78_spill] sm:$0xff] }
 0x2b2   :  { %1725 = vmatpush.msra.mxu0 %v6383_v15  ;;  %1745 = vmatpush.msra.mxu1 %v6384_v40  ;;  %v6444_v15 = vld [vmem:[#allocation79_spill] sm:$0xff]  ;;  %v6445_v40 = vld [vmem:[#allocation80_spill] sm:$0xff] }
 0x2b3   :  { %1765 = vmatpush.msra.mxu2 %v6385_v16  ;;  %1785 = vmatpush.msra.mxu3 %v6386_v17  ;;  %v6446_v16 = vld [vmem:[#allocation81_spill] sm:$0xff]  ;;  %v6447_v17 = vld [vmem:[#allocation82_spill] sm:$0xff] }
 0x2b4   :  { %1726 = vmatpush.msra.mxu0 %v6387_v55  ;;  %1746 = vmatpush.msra.mxu1 %v6388_v33  ;;  %v6448_v55 = vld [vmem:[#allocation83_spill] sm:$0xff]  ;;  %v6449_v33 = vld [vmem:[#allocation84_spill] sm:$0xff] }
 0x2b5   :  { %1766 = vmatpush.msra.mxu2 %v6389_v46  ;;  %1786 = vmatpush.msra.mxu3 %v6390_v2  ;;  %v6450_v46 = vld [vmem:[#allocation85_spill] sm:$0xff]  ;;  %v6451_v2 = vld [vmem:[#allocation86_spill] sm:$0xff] }
 0x2b6   :  { %1727 = vmatpush.msra.mxu0 %v6391_v1  ;;  %1747 = vmatpush.msra.mxu1 %v6392_v62  ;;  %v6452_v1 = vld [vmem:[#allocation87_spill] sm:$0xff]  ;;  %v6453_v62 = vld [vmem:[#allocation88_spill] sm:$0xff] }
 0x2b7   :  { %1767 = vmatpush.msra.mxu2 %v6393_v3  ;;  %1787 = vmatpush.msra.mxu3 %v6394_v58  ;;  %v6454_v3 = vld [vmem:[#allocation89_spill] sm:$0xff]  ;;  %v6455_v58 = vld [vmem:[#allocation90_spill] sm:$0xff] }
 0x2b8   :  { %1728 = vmatpush.msra.mxu0 %v6395_v37  ;;  %1748 = vmatpush.msra.mxu1 %v6396_v36  ;;  %v6456_v37 = vld [vmem:[#allocation99_spill] sm:$0xff]  ;;  %v6457_v36 = vld [vmem:[#allocation158_spill] sm:$0xff] }
 0x2b9   :  { %1768 = vmatpush.msra.mxu2 %v6397_v18  ;;  %1788 = vmatpush.msra.mxu3 %v6398_v14  ;;  %v6458_v18 = vld [vmem:[#allocation159_spill] sm:$0xff]  ;;  %v6459_v14 = vld [vmem:[#allocation160_spill] sm:$0xff] }
 0x2ba   :  { %1803 = vmatpush.msrb.mxu0 %v6399_v22  ;;  %1823 = vmatpush.msrb.mxu1 %v6400_v23  ;;  %v6460_v22 = vld [vmem:[#allocation161_spill] sm:$0xff]  ;;  %v6461_v23 = vld [vmem:[#allocation162_spill] sm:$0xff] }
 0x2bb   :  { %1843 = vmatpush.msrb.mxu2 %v6401_v24  ;;  %1863 = vmatpush.msrb.mxu3 %v6402_v25  ;;  %v6462_v24 = vld [vmem:[#allocation163_spill] sm:$0xff] }
 0x2bc   :  { %1804 = vmatpush.msrb.mxu0 %v6403_v26  ;;  %1824 = vmatpush.msrb.mxu1 %v6404_v28  ;;  %v6463_v25 = vld [vmem:[#allocation67_spill] sm:$0xff]  ;;  %v6464_v26 = vld [vmem:[#allocation109_spill] sm:$0xff] }
 0x2bd   :  { %1844 = vmatpush.msrb.mxu2 %v6405_v29  ;;  %1864 = vmatpush.msrb.mxu3 %v6406_v30  ;;  %v227_v28 = vadd.f32 %v6464_v26, %v6463_v25  ;;  %v6465_v29 = vld [vmem:[#allocation68_spill] sm:$0xff]  ;;  %v6466_v30 = vld [vmem:[#allocation110_spill] sm:$0xff] }
 0x2be   :  { %1805 = vmatpush.msrb.mxu0 %v6407_v34  ;;  %1825 = vmatpush.msrb.mxu1 %v6408_v38  ;;  %v268_v34 = vadd.f32 %v6466_v30, %v6465_v29  ;;  %v6470_v29 = vld [vmem:[#allocation55_spill] sm:$0xff] }
 0x2bf   :  { %1845 = vmatpush.msrb.mxu2 %v6409_v39  ;;  %1865 = vmatpush.msrb.mxu3 %v6410_v42 }
 0x2c0   :  { %1806 = vmatpush.msrb.mxu0 %v6411_v43  ;;  %1826 = vmatpush.msrb.mxu1 %v6412_v44 }
 0x2c1   :  { %1846 = vmatpush.msrb.mxu2 %v6413_v45  ;;  %1866 = vmatpush.msrb.mxu3 %v6414_v47  ;;  %v6467_v47 = vld [vmem:[#allocation111_spill] sm:$0xff] }
 0x2c2   :  { %1807 = vmatpush.msrb.mxu0 %v6415_v51  ;;  %1827 = vmatpush.msrb.mxu1 %v6416_v48  ;;  %v309_v51 = vadd.f32 %v6467_v47, %v6257_v35  ;;  %v6468_v48 = vld [vmem:[#allocation70_spill] sm:$0xff] }
 0x2c3   :  { %1847 = vmatpush.msrb.mxu2 %v6417_v10  ;;  %1867 = vmatpush.msrb.mxu3 %v6418_v57  ;;  %v6469_v10 = vld [vmem:[#allocation112_spill] sm:$0xff] }
 0x2c4   :  { %1808 = vmatpush.msrb.mxu0 %v6419_v32  ;;  %1828 = vmatpush.msrb.mxu1 %v6420_v49  ;;  %v350_v57 = vadd.f32 %v6469_v10, %v6468_v48  ;;  %v6472_v48 = vld [vmem:[#allocation57_spill] sm:$0xff] }
 0x2c5   :  { %1848 = vmatpush.msrb.mxu2 %v6421_v0  ;;  %1868 = vmatpush.msrb.mxu3 %v6422_v56 }
 0x2c6   :  { %1809 = vmatpush.msrb.mxu0 %v6423_v20  ;;  %1829 = vmatpush.msrb.mxu1 %v6424_v13 }
 0x2c7   :  { %1849 = vmatpush.msrb.mxu2 %v6425_v19  ;;  %1869 = vmatpush.msrb.mxu3 %v6426_v60 }
 0x2c8   :  { %1810 = vmatpush.msrb.mxu0 %v6427_v41  ;;  %1830 = vmatpush.msrb.mxu1 %v6428_v6 }
 0x2c9   :  { %1850 = vmatpush.msrb.mxu2 %v6429_v50  ;;  %1870 = vmatpush.msrb.mxu3 %v6430_v27 }
 0x2ca   :  { %1811 = vmatpush.msrb.mxu0 %v6431_v5  ;;  %1831 = vmatpush.msrb.mxu1 %v6432_v52 }
 0x2cb   :  { %1851 = vmatpush.msrb.mxu2 %v6433_v61  ;;  %1871 = vmatpush.msrb.mxu3 %v6434_v63 }
 0x2cc   :  { %1812 = vmatpush.msrb.mxu0 %v6435_v21  ;;  %1832 = vmatpush.msrb.mxu1 %v6436_v12 }
 0x2cd   :  { %1852 = vmatpush.msrb.mxu2 %v6437_v11  ;;  %1872 = vmatpush.msrb.mxu3 %v6438_v9 }
 0x2ce   :  { %1813 = vmatpush.msrb.mxu0 %v6439_v53  ;;  %1833 = vmatpush.msrb.mxu1 %v6440_v7 }
 0x2cf   :  { %1853 = vmatpush.msrb.mxu2 %v6441_v54  ;;  %1873 = vmatpush.msrb.mxu3 %v6442_v8 }
 0x2d0   :  { %1814 = vmatpush.msrb.mxu0 %v6443_v31  ;;  %1834 = vmatpush.msrb.mxu1 %v6444_v15 }
 0x2d1   :  { %1854 = vmatpush.msrb.mxu2 %v6445_v40  ;;  %1874 = vmatpush.msrb.mxu3 %v6446_v16 }
 0x2d2   :  { %1815 = vmatpush.msrb.mxu0 %v6447_v17  ;;  %1835 = vmatpush.msrb.mxu1 %v6448_v55 }
 0x2d3   :  { %1855 = vmatpush.msrb.mxu2 %v6449_v33  ;;  %1875 = vmatpush.msrb.mxu3 %v6450_v46 }
 0x2d4   :  { %1816 = vmatpush.msrb.mxu0 %v6451_v2  ;;  %1836 = vmatpush.msrb.mxu1 %v6452_v1 }
 0x2d5   :  { %1856 = vmatpush.msrb.mxu2 %v6453_v62  ;;  %1876 = vmatpush.msrb.mxu3 %v6454_v3 }
 0x2d6   :  { %1817 = vmatpush.msrb.mxu0 %v6455_v58  ;;  %1837 = vmatpush.msrb.mxu1 %v6456_v37 }
 0x2d7   :  { %1857 = vmatpush.msrb.mxu2 %v6457_v36  ;;  %1877 = vmatpush.msrb.mxu3 %v6458_v18 }
 0x2d8   :  { %1818 = vmatpush.msrb.mxu0 %v6459_v14  ;;  %1838 = vmatpush.msrb.mxu1 %v6460_v22 }
 0x2d9   :  { %1858 = vmatpush.msrb.mxu2 %v6461_v23  ;;  %1878 = vmatpush.msrb.mxu3 %v6462_v24 }
 0x313   :  { %v1504_v38 = vpop.f32.mrf.mxu0  ;;  %v1524_v39 = vpop.f32.mrf.mxu1 }
 0x314   :  { %v1567_v42 = vadd.f32 %v1504_v38, %v227_v28  ;;  %v1568_v43 = vadd.f32 %v1524_v39, %v268_v34  ;;  %v6471_v28 = vld [vmem:[#allocation56_spill] sm:$0xff] }
 0x316   :  { %v1661_v44 = vmul.f32 0.5, %v1567_v42  ;;  %v1669_v45 = vmul.f32 0.5, %v1568_v43 }
 0x318   :  { %2730 = vtanh.f32 %v1661_v44 }
 0x319   :  { %2732 = vtanh.f32 %v1669_v45 }
 0x31a   :  { %v1544_v24 = vpop.f32.mrf.mxu2  ;;  %v1564_v23 = vpop.f32.mrf.mxu3 }
 0x31b   :  { %v1569_v26 = vadd.f32 %v1544_v24, %v309_v51  ;;  %v1570_v25 = vadd.f32 %v1564_v23, %v350_v57  ;;  %v1594_v22 = vpop.f32.mrf.mxu0  ;;  %v1614_v30 = vpop.f32.mrf.mxu1 }
 0x31c   :  { %v1657_v14 = vadd.f32 %v1594_v22, %v6470_v29  ;;  %v1658_v34 = vadd.f32 %v1614_v30, %v6471_v28  ;;  %v6473_v29 = vld [vmem:[#allocation58_spill] sm:$0xff] }
 0x31d   :  { %2734 = vtanh.f32 %v1569_v26  ;;  %v1679_v38 = vmul.f32 0.5, %v1570_v25 }
 0x31e   :  { %v2731_v39 = vpop.eup %2730  ;;  %v1665_v42 = vmul.f32 0.5, %v1657_v14  ;;  %v1673_v43 = vmul.f32 0.5, %v1658_v34 }
 0x31f   :  { %v2733_v44 = vpop.eup %2732  ;;  %v1663_v47 = vmul.f32 0.5, %v2731_v39  ;;  %2736 = vtanh.f32 %v1679_v38 }
 0x320   :  { %v1671_v10 = vmul.f32 0.5, %v2733_v44  ;;  %2738 = vtanh.f32 %v1665_v42 }
 0x321   :  { %v1664_v45 = vadd.f32 0.5, %v1663_v47  ;;  %2740 = vtanh.f32 %v1673_v43 }
 0x322   :  { %v1672_v24 = vadd.f32 0.5, %v1671_v10  ;;  %v1634_v23 = vpop.f32.mrf.mxu2  ;;  %v1654_v51 = vpop.f32.mrf.mxu3 }
 0x323   :  { %v2735_v57 = vpop.eup %2734  ;;  %v1659_v22 = vadd.f32 %v1634_v23, %v6472_v48  ;;  %v1660_v30 = vadd.f32 %v1654_v51, %v6473_v29 }
 0x324   :  { %v1688_v25 = vmul.f32 %v1672_v24, %v4573_v4  ;;  %v1689_v26 = vmul.f32 %v2735_v57, %v1664_v45 }
 0x325   :  { %v2737_v14 = vpop.eup %2736  ;;  %2742 = vtanh.f32 %v1659_v22  ;;  %v1683_v28 = vmul.f32 0.5, %v1660_v30  ;;  %v4728_v30 = vld [vmem:[#allocation14 + $0x1e0] sm:$0xff] }
 0x326   :  { %v2739_v34 = vpop.eup %2738  ;;  %v4721_v38 = vadd.f32 %v1689_v26, %v1688_v25  ;;  %v1681_v44 = vmul.f32 0.5, %v2737_v14  ;;  %v4734_v25 = vld [vmem:[#allocation14 + $0x1f0] sm:$0xff]  ;;  %v4737_v26 = vld [vmem:[#allocation14 + $0x1f8] sm:$0xff] }
 0x327   :  { %v2741_v39 = vpop.eup %2740  ;;  %v1667_v42 = vmul.f32 0.5, %v2739_v34  ;;  %2744 = vtanh.f32 %v1683_v28  ;;  %v4740_v28 = vld [vmem:[#allocation14 + $0x1c0] sm:$0xff]  ;;  %v4743_v34 = vld [vmem:[#allocation14 + $0x1c8] sm:$0xff] }
 0x328   :  { %2746 = vtanh.f32 %v4721_v38  ;;  %v1675_v43 = vmul.f32 0.5, %v2741_v39  ;;  %v1682_v24 = vadd.f32 0.5, %v1681_v44 }
 0x329   :  { %v1668_v47 = vadd.f32 0.5, %v1667_v42  ;;  %v4746_v42 = vld [vmem:[#allocation14 + $0x1d0] sm:$0xff] }
 0x32a   :  { %v1676_v48 = vadd.f32 0.5, %v1675_v43  ;;  %v4749_v43 = vld [vmem:[#allocation14 + $0x1d8] sm:$0xff] }
 0x32b   :  { %v2743_v10 = vpop.eup %2742 }
 0x32c   :  { %v1692_v23 = vmul.f32 %v1676_v48, %v4577_v59  ;;  %v1693_v4 = vmul.f32 %v2743_v10, %v1668_v47  ;;  %v4731_v59 = vld [vmem:[#allocation14 + $0x1e8] sm:$0xff]  ;;  %v4752_v47 = vld [vmem:[#allocation14 + $0x1a0] sm:$0xff]  ;;  %v4758_v10 = vld [vmem:[#allocation14 + $0x1b0] sm:$0xff] }
 0x32d   :  { %v2745_v45 = vpop.eup %2744  ;;  %v4755_v48 = vld [vmem:[#allocation14 + $0x1a8] sm:$0xff] }
 0x32e   :  { %v2747_v51 = vpop.eup %2746  ;;  %v4725_v57 = vadd.f32 %v1693_v4, %v1692_v23  ;;  %v1685_v29 = vmul.f32 0.5, %v2745_v45  ;;  %v4761_v23 = vld [vmem:[#allocation14 + $0x1b8] sm:$0xff]  ;;  %v4764_v4 = vld [vmem:[#allocation14 + $0x180] sm:$0xff]  ;;  %v4767_v45 = vld [vmem:[#allocation14 + $0x188] sm:$0xff] }
 0x32f   :  { %v1696_v22 = vmul.f32 %v2747_v51, %v1682_v24  ;;  %v4770_v24 = vld [vmem:[#allocation14 + $0x190] sm:$0xff]  ;;  %v4773_v51 = vld [vmem:[#allocation14 + $0x198] sm:$0xff] }
 0x330   :  { %2748 = vtanh.f32 %v4725_v57  ;;  %v1686_v14 = vadd.f32 0.5, %v1685_v29  ;;  %6474 = vst [vmem:[#allocation105_spill] sm:$0xff] %v4773_v51  ;;  %v4779_v29 = vld [vmem:[#allocation14 + $0x168] sm:$0xff] }
 0x331   :  { %1704 = vst [vmem:[#allocation17 + $0x18] sm:$0xff] %v1696_v22  ;;  %1729 = vmatmul.f32.vlgmr.msra.gmra.mxu0 %v1696_v22  ;;  %1749 = vmatmul.f32.vlgmr.msra.gmra.mxu1 %v1696_v22 }
 0x332   :  { %1769 = vmatmul.f32.vlgmr.msra.gmra.mxu2 %v1696_v22  ;;  %1789 = vmatmul.f32.vlgmr.msra.gmra.mxu3 %v1696_v22  ;;  %v4776_v22 = vld [vmem:[#allocation14 + $0x160] sm:$0xff]  ;;  %6476 = vst [vmem:[#allocation107_spill] sm:$0xff] %v4779_v29 }
 0x333   :  { %1939 = vmatpush.msra.mxu0 %v4728_v30  ;;  %1959 = vmatpush.msra.mxu1 %v4731_v59  ;;  %6475 = vst [vmem:[#allocation106_spill] sm:$0xff] %v4776_v22 }
 0x334   :  { %1979 = vmatpush.msra.mxu2 %v4734_v25  ;;  %1999 = vmatpush.msra.mxu3 %v4737_v26 }
 0x335   :  { %1940 = vmatpush.msra.mxu0 %v4740_v28  ;;  %1960 = vmatpush.msra.mxu1 %v4743_v34 }
 0x336   :  { %v2749_v39 = vpop.eup %2748  ;;  %1980 = vmatpush.msra.mxu2 %v4746_v42  ;;  %2000 = vmatpush.msra.mxu3 %v4749_v43 }
 0x337   :  { %v1698_v44 = vmul.f32 %v2749_v39, %v1686_v14  ;;  %1941 = vmatpush.msra.mxu0 %v4752_v47  ;;  %1961 = vmatpush.msra.mxu1 %v4755_v48  ;;  %v4782_v14 = vld [vmem:[#allocation14 + $0x170] sm:$0xff]  ;;  %v4785_v39 = vld [vmem:[#allocation14 + $0x178] sm:$0xff] }
 0x338   :  { %1981 = vmatpush.msra.mxu2 %v4758_v10  ;;  %2001 = vmatpush.msra.mxu3 %v4761_v23  ;;  %6477 = vst [vmem:[#allocation108_spill] sm:$0xff] %v4782_v14 }
 0x339   :  { %1706 = vst [vmem:[#allocation18 + $0x20] sm:$0xff] %v1698_v44  ;;  %1819 = vmatmul.f32.vlgmr.msrb.gmra.mxu0 %v1698_v44  ;;  %1839 = vmatmul.f32.vlgmr.msrb.gmra.mxu1 %v1698_v44 }
 0x33a   :  { %1859 = vmatmul.f32.vlgmr.msrb.gmra.mxu2 %v1698_v44  ;;  %1879 = vmatmul.f32.vlgmr.msrb.gmra.mxu3 %v1698_v44  ;;  %6478 = vst [vmem:[#allocation59_spill] sm:$0xff] %v4785_v39  ;;  %v4788_v44 = vld [vmem:[#allocation14 + $0x140] sm:$0xff] }
 0x33b   :  { %1942 = vmatpush.msra.mxu0 %v4764_v4  ;;  %1962 = vmatpush.msra.mxu1 %v4767_v45  ;;  %6479 = vst [vmem:[#allocation60_spill] sm:$0xff] %v4788_v44 }
 0x33c   :  { %1982 = vmatpush.msra.mxu2 %v4770_v24  ;;  %2002 = vmatpush.msra.mxu3 %v4773_v51  ;;  %v4791_v51 = vld [vmem:[#allocation14 + $0x148] sm:$0xff] }
 0x33d   :  { %1943 = vmatpush.msra.mxu0 %v4776_v22  ;;  %1963 = vmatpush.msra.mxu1 %v4779_v29  ;;  %6480 = vst [vmem:[#allocation61_spill] sm:$0xff] %v4791_v51  ;;  %v4794_v22 = vld [vmem:[#allocation14 + $0x150] sm:$0xff]  ;;  %v4797_v29 = vld [vmem:[#allocation14 + $0x158] sm:$0xff] }
 0x33e   :  { %1983 = vmatpush.msra.mxu2 %v4782_v14  ;;  %2003 = vmatpush.msra.mxu3 %v4785_v39  ;;  %6481 = vst [vmem:[#allocation62_spill] sm:$0xff] %v4794_v22  ;;  %v4800_v14 = vld [vmem:[#allocation14 + $0x120] sm:$0xff]  ;;  %v4803_v39 = vld [vmem:[#allocation14 + $0x128] sm:$0xff] }
 0x33f   :  { %1944 = vmatpush.msra.mxu0 %v4788_v44  ;;  %1964 = vmatpush.msra.mxu1 %v4791_v51  ;;  %6482 = vst [vmem:[#allocation100_spill] sm:$0xff] %v4797_v29  ;;  %v4806_v44 = vld [vmem:[#allocation14 + $0x130] sm:$0xff]  ;;  %v4809_v51 = vld [vmem:[#allocation14 + $0x138] sm:$0xff] }
 0x340   :  { %1984 = vmatpush.msra.mxu2 %v4794_v22  ;;  %2004 = vmatpush.msra.mxu3 %v4797_v29  ;;  %6483 = vst [vmem:[#allocation115_spill] sm:$0xff] %v4800_v14  ;;  %v4812_v22 = vld [vmem:[#allocation14 + $0x100] sm:$0xff]  ;;  %v4815_v29 = vld [vmem:[#allocation14 + $0x108] sm:$0xff] }
 0x341   :  { %1945 = vmatpush.msra.mxu0 %v4800_v14  ;;  %6484 = vst [vmem:[#allocation116_spill] sm:$0xff] %v4803_v39  ;;  %1965 = vmatpush.msra.mxu1 %v4803_v39  ;;  %v4818_v14 = vld [vmem:[#allocation14 + $0x110] sm:$0xff]  ;;  %v4821_v39 = vld [vmem:[#allocation14 + $0x118] sm:$0xff] }
 0x342   :  { %6485 = vst [vmem:[#allocation117_spill] sm:$0xff] %v4806_v44  ;;  %1985 = vmatpush.msra.mxu2 %v4806_v44  ;;  %2005 = vmatpush.msra.mxu3 %v4809_v51  ;;  %v4824_v44 = vld [vmem:[#allocation14 + $0xe0] sm:$0xff] }
 0x343   :  { %6486 = vst [vmem:[#allocation118_spill] sm:$0xff] %v4809_v51  ;;  %1946 = vmatpush.msra.mxu0 %v4812_v22  ;;  %1966 = vmatpush.msra.mxu1 %v4815_v29  ;;  %v4827_v51 = vld [vmem:[#allocation14 + $0xe8] sm:$0xff] }
 0x344   :  { %6487 = vst [vmem:[#allocation119_spill] sm:$0xff] %v4812_v22  ;;  %1986 = vmatpush.msra.mxu2 %v4818_v14  ;;  %2006 = vmatpush.msra.mxu3 %v4821_v39  ;;  %v4830_v22 = vld [vmem:[#allocation14 + $0xf0] sm:$0xff] }
 0x345   :  { %6488 = vst [vmem:[#allocation120_spill] sm:$0xff] %v4815_v29  ;;  %1947 = vmatpush.msra.mxu0 %v4824_v44  ;;  %1967 = vmatpush.msra.mxu1 %v4827_v51  ;;  %v4833_v29 = vld [vmem:[#allocation14 + $0xf8] sm:$0xff] }
 0x346   :  { %6489 = vst [vmem:[#allocation121_spill] sm:$0xff] %v4818_v14  ;;  %1987 = vmatpush.msra.mxu2 %v4830_v22  ;;  %2007 = vmatpush.msra.mxu3 %v4833_v29  ;;  %v4836_v14 = vld [vmem:[#allocation14 + $0xc0] sm:$0xff] }
 0x347   :  { %6490 = vst [vmem:[#allocation122_spill] sm:$0xff] %v4821_v39  ;;  %1948 = vmatpush.msra.mxu0 %v4836_v14  ;;  %v4839_v39 = vld [vmem:[#allocation14 + $0xc8] sm:$0xff] }
 0x348   :  { %6491 = vst [vmem:[#allocation123_spill] sm:$0xff] %v4824_v44  ;;  %1968 = vmatpush.msra.mxu1 %v4839_v39  ;;  %v4842_v44 = vld [vmem:[#allocation14 + $0xd0] sm:$0xff] }
 0x349   :  { %6492 = vst [vmem:[#allocation124_spill] sm:$0xff] %v4827_v51  ;;  %1988 = vmatpush.msra.mxu2 %v4842_v44  ;;  %v4845_v51 = vld [vmem:[#allocation14 + $0xd8] sm:$0xff] }
 0x34a   :  { %6493 = vst [vmem:[#allocation125_spill] sm:$0xff] %v4830_v22  ;;  %2008 = vmatpush.msra.mxu3 %v4845_v51  ;;  %v4848_v22 = vld [vmem:[#allocation14 + $0xa0] sm:$0xff] }
 0x34b   :  { %6494 = vst [vmem:[#allocation126_spill] sm:$0xff] %v4833_v29  ;;  %1949 = vmatpush.msra.mxu0 %v4848_v22  ;;  %v4851_v29 = vld [vmem:[#allocation14 + $0xa8] sm:$0xff] }
 0x34c   :  { %6495 = vst [vmem:[#allocation127_spill] sm:$0xff] %v4836_v14  ;;  %1969 = vmatpush.msra.mxu1 %v4851_v29  ;;  %v4854_v14 = vld [vmem:[#allocation14 + $0xb0] sm:$0xff] }
 0x34d   :  { %6496 = vst [vmem:[#allocation128_spill] sm:$0xff] %v4839_v39  ;;  %1989 = vmatpush.msra.mxu2 %v4854_v14  ;;  %v4857_v39 = vld [vmem:[#allocation14 + $0xb8] sm:$0xff] }
 0x34e   :  { %6497 = vst [vmem:[#allocation129_spill] sm:$0xff] %v4842_v44  ;;  %2009 = vmatpush.msra.mxu3 %v4857_v39  ;;  %v4860_v44 = vld [vmem:[#allocation14 + $0x80] sm:$0xff] }
 0x34f   :  { %6498 = vst [vmem:[#allocation130_spill] sm:$0xff] %v4845_v51  ;;  %1950 = vmatpush.msra.mxu0 %v4860_v44  ;;  %v4863_v51 = vld [vmem:[#allocation14 + $0x88] sm:$0xff] }
 0x350   :  { %6499 = vst [vmem:[#allocation131_spill] sm:$0xff] %v4848_v22  ;;  %1970 = vmatpush.msra.mxu1 %v4863_v51  ;;  %v4866_v22 = vld [vmem:[#allocation14 + $0x90] sm:$0xff] }
 0x351   :  { %6500 = vst [vmem:[#allocation132_spill] sm:$0xff] %v4851_v29  ;;  %1990 = vmatpush.msra.mxu2 %v4866_v22  ;;  %v4869_v29 = vld [vmem:[#allocation14 + $0x98] sm:$0xff] }
 0x352   :  { %6501 = vst [vmem:[#allocation133_spill] sm:$0xff] %v4854_v14  ;;  %2010 = vmatpush.msra.mxu3 %v4869_v29  ;;  %v4872_v14 = vld [vmem:[#allocation14 + $0x60] sm:$0xff] }
 0x353   :  { %6502 = vst [vmem:[#allocation134_spill] sm:$0xff] %v4857_v39  ;;  %1951 = vmatpush.msra.mxu0 %v4872_v14  ;;  %v4875_v39 = vld [vmem:[#allocation14 + $0x68] sm:$0xff] }
 0x354   :  { %6503 = vst [vmem:[#allocation135_spill] sm:$0xff] %v4860_v44  ;;  %1971 = vmatpush.msra.mxu1 %v4875_v39  ;;  %v4878_v44 = vld [vmem:[#allocation14 + $0x70] sm:$0xff] }
 0x355   :  { %6504 = vst [vmem:[#allocation136_spill] sm:$0xff] %v4863_v51  ;;  %1991 = vmatpush.msra.mxu2 %v4878_v44  ;;  %v4881_v51 = vld [vmem:[#allocation14 + $0x78] sm:$0xff] }
 0x356   :  { %6505 = vst [vmem:[#allocation137_spill] sm:$0xff] %v4866_v22  ;;  %2011 = vmatpush.msra.mxu3 %v4881_v51  ;;  %v4884_v22 = vld [vmem:[#allocation14 + $0x40] sm:$0xff] }
 0x357   :  { %6506 = vst [vmem:[#allocation138_spill] sm:$0xff] %v4869_v29  ;;  %1952 = vmatpush.msra.mxu0 %v4884_v22  ;;  %v4887_v29 = vld [vmem:[#allocation14 + $0x48] sm:$0xff] }
 0x358   :  { %6507 = vst [vmem:[#allocation139_spill] sm:$0xff] %v4872_v14  ;;  %1972 = vmatpush.msra.mxu1 %v4887_v29  ;;  %v4890_v14 = vld [vmem:[#allocation14 + $0x50] sm:$0xff] }
 0x359   :  { %6508 = vst [vmem:[#allocation140_spill] sm:$0xff] %v4875_v39  ;;  %1992 = vmatpush.msra.mxu2 %v4890_v14  ;;  %v4893_v39 = vld [vmem:[#allocation14 + $0x58] sm:$0xff] }
 0x35a   :  { %6509 = vst [vmem:[#allocation141_spill] sm:$0xff] %v4878_v44  ;;  %2012 = vmatpush.msra.mxu3 %v4893_v39  ;;  %v4896_v44 = vld [vmem:[#allocation14 + $0x20] sm:$0xff] }
 0x35b   :  { %6510 = vst [vmem:[#allocation142_spill] sm:$0xff] %v4881_v51  ;;  %1953 = vmatpush.msra.mxu0 %v4896_v44  ;;  %v4899_v51 = vld [vmem:[#allocation14 + $0x28] sm:$0xff] }
 0x35c   :  { %6511 = vst [vmem:[#allocation143_spill] sm:$0xff] %v4884_v22  ;;  %1973 = vmatpush.msra.mxu1 %v4899_v51  ;;  %v4902_v22 = vld [vmem:[#allocation14 + $0x30] sm:$0xff] }
 0x35d   :  { %6512 = vst [vmem:[#allocation144_spill] sm:$0xff] %v4887_v29  ;;  %1993 = vmatpush.msra.mxu2 %v4902_v22  ;;  %v4905_v29 = vld [vmem:[#allocation14 + $0x38] sm:$0xff] }
 0x35e   :  { %6513 = vst [vmem:[#allocation145_spill] sm:$0xff] %v4890_v14  ;;  %2013 = vmatpush.msra.mxu3 %v4905_v29  ;;  %v4908_v14 = vld [vmem:[#allocation14] sm:$0xff] }
 0x35f   :  { %6514 = vst [vmem:[#allocation146_spill] sm:$0xff] %v4893_v39  ;;  %1954 = vmatpush.msra.mxu0 %v4908_v14  ;;  %v4911_v39 = vld [vmem:[#allocation14 + $0x8] sm:$0xff] }
 0x360   :  { %6515 = vst [vmem:[#allocation147_spill] sm:$0xff] %v4896_v44  ;;  %1974 = vmatpush.msra.mxu1 %v4911_v39  ;;  %v4914_v44 = vld [vmem:[#allocation14 + $0x10] sm:$0xff] }
 0x361   :  { %6516 = vst [vmem:[#allocation148_spill] sm:$0xff] %v4899_v51  ;;  %1994 = vmatpush.msra.mxu2 %v4914_v44  ;;  %v4917_v51 = vld [vmem:[#allocation14 + $0x18] sm:$0xff] }
 0x362   :  { %6517 = vst [vmem:[#allocation149_spill] sm:$0xff] %v4902_v22  ;;  %2014 = vmatpush.msra.mxu3 %v4917_v51  ;;  %v4920_v22 = vld [vmem:[#allocation14 + $0x3e0] sm:$0xff] }
 0x363   :  { %6518 = vst [vmem:[#allocation150_spill] sm:$0xff] %v4905_v29  ;;  %2029 = vmatpush.msrb.mxu0 %v4920_v22  ;;  %v4923_v29 = vld [vmem:[#allocation14 + $0x3e8] sm:$0xff] }
 0x364   :  { %6519 = vst [vmem:[#allocation151_spill] sm:$0xff] %v4908_v14  ;;  %2049 = vmatpush.msrb.mxu1 %v4923_v29  ;;  %v4926_v14 = vld [vmem:[#allocation14 + $0x3f0] sm:$0xff] }
 0x365   :  { %6520 = vst [vmem:[#allocation152_spill] sm:$0xff] %v4911_v39  ;;  %2069 = vmatpush.msrb.mxu2 %v4926_v14  ;;  %v4929_v39 = vld [vmem:[#allocation14 + $0x3f8] sm:$0xff] }
 0x366   :  { %6521 = vst [vmem:[#allocation153_spill] sm:$0xff] %v4914_v44  ;;  %2089 = vmatpush.msrb.mxu3 %v4929_v39  ;;  %v4932_v44 = vld [vmem:[#allocation14 + $0x3c0] sm:$0xff] }
 0x367   :  { %6522 = vst [vmem:[#allocation154_spill] sm:$0xff] %v4917_v51  ;;  %2030 = vmatpush.msrb.mxu0 %v4932_v44  ;;  %v4935_v51 = vld [vmem:[#allocation14 + $0x3c8] sm:$0xff] }
 0x368   :  { %6523 = vst [vmem:[#allocation155_spill] sm:$0xff] %v4920_v22  ;;  %2050 = vmatpush.msrb.mxu1 %v4935_v51  ;;  %v4938_v22 = vld [vmem:[#allocation14 + $0x3d0] sm:$0xff] }
 0x369   :  { %6524 = vst [vmem:[#allocation156_spill] sm:$0xff] %v4923_v29  ;;  %2070 = vmatpush.msrb.mxu2 %v4938_v22  ;;  %v4941_v29 = vld [vmem:[#allocation14 + $0x3d8] sm:$0xff] }
 0x36a   :  { %6525 = vst [vmem:[#allocation157_spill] sm:$0xff] %v4926_v14  ;;  %2090 = vmatpush.msrb.mxu3 %v4941_v29  ;;  %v4944_v14 = vld [vmem:[#allocation14 + $0x3a0] sm:$0xff] }
 0x36b   :  { %6526 = vst [vmem:[#allocation91_spill] sm:$0xff] %v4929_v39  ;;  %2031 = vmatpush.msrb.mxu0 %v4944_v14  ;;  %v4947_v39 = vld [vmem:[#allocation14 + $0x3a8] sm:$0xff] }
 0x36c   :  { %6527 = vst [vmem:[#allocation92_spill] sm:$0xff] %v4932_v44  ;;  %2051 = vmatpush.msrb.mxu1 %v4947_v39  ;;  %v4950_v44 = vld [vmem:[#allocation14 + $0x3b0] sm:$0xff] }
 0x36d   :  { %6528 = vst [vmem:[#allocation93_spill] sm:$0xff] %v4935_v51  ;;  %2071 = vmatpush.msrb.mxu2 %v4950_v44  ;;  %v4953_v51 = vld [vmem:[#allocation14 + $0x3b8] sm:$0xff] }
 0x36e   :  { %6529 = vst [vmem:[#allocation94_spill] sm:$0xff] %v4938_v22  ;;  %2091 = vmatpush.msrb.mxu3 %v4953_v51  ;;  %v4956_v22 = vld [vmem:[#allocation14 + $0x380] sm:$0xff] }
 0x36f   :  { %6530 = vst [vmem:[#allocation95_spill] sm:$0xff] %v4941_v29  ;;  %2032 = vmatpush.msrb.mxu0 %v4956_v22  ;;  %v4959_v29 = vld [vmem:[#allocation14 + $0x388] sm:$0xff] }
 0x370   :  { %6531 = vst [vmem:[#allocation96_spill] sm:$0xff] %v4944_v14  ;;  %2052 = vmatpush.msrb.mxu1 %v4959_v29  ;;  %v4962_v14 = vld [vmem:[#allocation14 + $0x390] sm:$0xff] }
 0x371   :  { %6532 = vst [vmem:[#allocation97_spill] sm:$0xff] %v4947_v39  ;;  %2072 = vmatpush.msrb.mxu2 %v4962_v14  ;;  %v4965_v39 = vld [vmem:[#allocation14 + $0x398] sm:$0xff] }
 0x372   :  { %6533 = vst [vmem:[#allocation98_spill] sm:$0xff] %v4950_v44  ;;  %2092 = vmatpush.msrb.mxu3 %v4965_v39  ;;  %v4968_v44 = vld [vmem:[#allocation14 + $0x360] sm:$0xff] }
 0x373   :  { %6534 = vst [vmem:[#allocation101_spill] sm:$0xff] %v4953_v51  ;;  %2033 = vmatpush.msrb.mxu0 %v4968_v44  ;;  %v4971_v51 = vld [vmem:[#allocation14 + $0x368] sm:$0xff] }
 0x374   :  { %6535 = vst [vmem:[#allocation102_spill] sm:$0xff] %v4956_v22  ;;  %2053 = vmatpush.msrb.mxu1 %v4971_v51  ;;  %v4974_v22 = vld [vmem:[#allocation14 + $0x370] sm:$0xff] }
 0x375   :  { %6536 = vst [vmem:[#allocation69_spill] sm:$0xff] %v4959_v29  ;;  %2073 = vmatpush.msrb.mxu2 %v4974_v22  ;;  %v4977_v29 = vld [vmem:[#allocation14 + $0x378] sm:$0xff]  ;;  %2034 = vmatpush.msrb.mxu0 %v6419_v32  ;;  %v6543_v32 = vld [vmem:[#allocation160_spill] sm:$0xff] }
 0x376   :  { %6537 = vst [vmem:[#allocation103_spill] sm:$0xff] %v4962_v14  ;;  %2093 = vmatpush.msrb.mxu3 %v4977_v29  ;;  %2054 = vmatpush.msrb.mxu1 %v6420_v49  ;;  %v6544_v49 = vld [vmem:[#allocation161_spill] sm:$0xff] }
 0x377   :  { %6538 = vst [vmem:[#allocation104_spill] sm:$0xff] %v4965_v39  ;;  %2074 = vmatpush.msrb.mxu2 %v6421_v0  ;;  %2035 = vmatpush.msrb.mxu0 %v6423_v20  ;;  %v6545_v0 = vld [vmem:[#allocation162_spill] sm:$0xff]  ;;  %v6547_v20 = vld [vmem:[#allocation67_spill] sm:$0xff] }
 0x378   :  { %6539 = vst [vmem:[#allocation63_spill] sm:$0xff] %v4968_v44  ;;  %2094 = vmatpush.msrb.mxu3 %v6422_v56  ;;  %2055 = vmatpush.msrb.mxu1 %v6424_v13  ;;  %v6546_v56 = vld [vmem:[#allocation163_spill] sm:$0xff]  ;;  %v6548_v13 = vld [vmem:[#allocation113_spill] sm:$0xff] }
 0x379   :  { %6540 = vst [vmem:[#allocation64_spill] sm:$0xff] %v4971_v51  ;;  %2075 = vmatpush.msrb.mxu2 %v6425_v19  ;;  %2036 = vmatpush.msrb.mxu0 %v6427_v41  ;;  %v230_v19 = vadd.f32 %v6548_v13, %v6547_v20  ;;  %v6550_v41 = vld [vmem:[#allocation114_spill] sm:$0xff] }
 0x37a   :  { %6541 = vst [vmem:[#allocation65_spill] sm:$0xff] %v4974_v22  ;;  %2095 = vmatpush.msrb.mxu3 %v6426_v60  ;;  %2056 = vmatpush.msrb.mxu1 %v6428_v6  ;;  %v6549_v60 = vld [vmem:[#allocation68_spill] sm:$0xff] }
 0x37b   :  { %6542 = vst [vmem:[#allocation66_spill] sm:$0xff] %v4977_v29  ;;  %2076 = vmatpush.msrb.mxu2 %v6429_v50  ;;  %2037 = vmatpush.msrb.mxu0 %v6431_v5  ;;  %v271_v6 = vadd.f32 %v6550_v41, %v6549_v60 }
 0x37c   :  { %2096 = vmatpush.msrb.mxu3 %v6430_v27  ;;  %2057 = vmatpush.msrb.mxu1 %v6432_v52 }
 0x37d   :  { %2077 = vmatpush.msrb.mxu2 %v6433_v61  ;;  %2038 = vmatpush.msrb.mxu0 %v6435_v21  ;;  %v6551_v21 = vld [vmem:[#allocation25_spill] sm:$0xff] }
 0x37e   :  { %2097 = vmatpush.msrb.mxu3 %v6434_v63  ;;  %2058 = vmatpush.msrb.mxu1 %v6436_v12  ;;  %v312_v12 = vadd.f32 %v6551_v21, %v6257_v35 }
 0x37f   :  { %2078 = vmatpush.msrb.mxu2 %v6437_v11  ;;  %2039 = vmatpush.msrb.mxu0 %v6439_v53  ;;  %v6552_v11 = vld [vmem:[#allocation70_spill] sm:$0xff] }
 0x380   :  { %2098 = vmatpush.msrb.mxu3 %v6438_v9  ;;  %2059 = vmatpush.msrb.mxu1 %v6440_v7  ;;  %v6553_v9 = vld [vmem:[#allocation26_spill] sm:$0xff] }
 0x381   :  { %2079 = vmatpush.msrb.mxu2 %v6441_v54  ;;  %2040 = vmatpush.msrb.mxu0 %v6443_v31  ;;  %v353_v53 = vadd.f32 %v6553_v9, %v6552_v11 }
 0x382   :  { %2099 = vmatpush.msrb.mxu3 %v6442_v8  ;;  %2060 = vmatpush.msrb.mxu1 %v6444_v15 }
 0x383   :  { %2080 = vmatpush.msrb.mxu2 %v6445_v40  ;;  %2041 = vmatpush.msrb.mxu0 %v6447_v17 }
 0x384   :  { %2100 = vmatpush.msrb.mxu3 %v6446_v16  ;;  %2061 = vmatpush.msrb.mxu1 %v6448_v55  ;;  %v6554_v16 = vld [vmem:[#allocation51_spill] sm:$0xff]  ;;  %v6555_v55 = vld [vmem:[#allocation52_spill] sm:$0xff] }
 0x385   :  { %2081 = vmatpush.msrb.mxu2 %v6449_v33  ;;  %2042 = vmatpush.msrb.mxu0 %v6451_v2 }
 0x386   :  { %2101 = vmatpush.msrb.mxu3 %v6450_v46  ;;  %2062 = vmatpush.msrb.mxu1 %v6452_v1 }
 0x387   :  { %2082 = vmatpush.msrb.mxu2 %v6453_v62  ;;  %2043 = vmatpush.msrb.mxu0 %v6455_v58 }
 0x388   :  { %2102 = vmatpush.msrb.mxu3 %v6454_v3  ;;  %2063 = vmatpush.msrb.mxu1 %v6456_v37 }
 0x389   :  { %2083 = vmatpush.msrb.mxu2 %v6457_v36  ;;  %2044 = vmatpush.msrb.mxu0 %v6543_v32 }
 0x38a   :  { %2103 = vmatpush.msrb.mxu3 %v6458_v18  ;;  %2064 = vmatpush.msrb.mxu1 %v6544_v49 }
 0x38b   :  { %2084 = vmatpush.msrb.mxu2 %v6545_v0 }
 0x38c   :  { %2104 = vmatpush.msrb.mxu3 %v6546_v56  ;;  %v6556_v56 = vld [vmem:[#allocation53_spill] sm:$0xff] }
 0x3ae   :  { %v1730_v50 = vpop.f32.mrf.mxu0  ;;  %v1750_v27 = vpop.f32.mrf.mxu1 }
 0x3af   :  { %v1793_v5 = vadd.f32 %v1730_v50, %v230_v19  ;;  %v1794_v52 = vadd.f32 %v1750_v27, %v271_v6  ;;  %v6557_v19 = vld [vmem:[#allocation54_spill] sm:$0xff] }
 0x3b1   :  { %v1887_v61 = vmul.f32 0.5, %v1793_v5  ;;  %v1895_v63 = vmul.f32 0.5, %v1794_v52 }
 0x3b3   :  { %2750 = vtanh.f32 %v1887_v61 }
 0x3b4   :  { %2752 = vtanh.f32 %v1895_v63 }
 0x3b5   :  { %v1770_v7 = vpop.f32.mrf.mxu2  ;;  %v1790_v54 = vpop.f32.mrf.mxu3 }
 0x3b6   :  { %v1795_v8 = vadd.f32 %v1770_v7, %v312_v12  ;;  %v1796_v31 = vadd.f32 %v1790_v54, %v353_v53  ;;  %v1820_v15 = vpop.f32.mrf.mxu0  ;;  %v1840_v40 = vpop.f32.mrf.mxu1 }
 0x3b7   :  { %v1883_v17 = vadd.f32 %v1820_v15, %v6554_v16  ;;  %v1884_v33 = vadd.f32 %v1840_v40, %v6555_v55 }
 0x3b8   :  { %2754 = vtanh.f32 %v1795_v8  ;;  %v1905_v46 = vmul.f32 0.5, %v1796_v31 }
 0x3b9   :  { %v2751_v2 = vpop.eup %2750  ;;  %v1891_v1 = vmul.f32 0.5, %v1883_v17  ;;  %v1899_v62 = vmul.f32 0.5, %v1884_v33 }
 0x3ba   :  { %v2753_v3 = vpop.eup %2752  ;;  %v1889_v58 = vmul.f32 0.5, %v2751_v2  ;;  %2756 = vtanh.f32 %v1905_v46  ;;  %v6558_v2 = vld [vmem:[#allocation105_spill] sm:$0xff] }
 0x3bb   :  { %v1897_v37 = vmul.f32 0.5, %v2753_v3  ;;  %2758 = vtanh.f32 %v1891_v1  ;;  %v6559_v1 = vld [vmem:[#allocation106_spill] sm:$0xff]  ;;  %v6561_v3 = vld [vmem:[#allocation108_spill] sm:$0xff] }
 0x3bc   :  { %v1890_v36 = vadd.f32 0.5, %v1889_v58  ;;  %2760 = vtanh.f32 %v1899_v62  ;;  %v6560_v62 = vld [vmem:[#allocation107_spill] sm:$0xff] }
 0x3bd   :  { %v1898_v18 = vadd.f32 0.5, %v1897_v37  ;;  %v1860_v32 = vpop.f32.mrf.mxu2  ;;  %v1880_v49 = vpop.f32.mrf.mxu3  ;;  %v6562_v58 = vld [vmem:[#allocation59_spill] sm:$0xff]  ;;  %v6563_v37 = vld [vmem:[#allocation60_spill] sm:$0xff] }
 0x3be   :  { %v2755_v0 = vpop.eup %2754  ;;  %v1885_v13 = vadd.f32 %v1860_v32, %v6556_v56  ;;  %v1886_v41 = vadd.f32 %v1880_v49, %v6557_v19  ;;  %v6566_v32 = vld [vmem:[#allocation100_spill] sm:$0xff]  ;;  %v6567_v49 = vld [vmem:[#allocation115_spill] sm:$0xff]  ;;  %v6569_v56 = vld [vmem:[#allocation117_spill] sm:$0xff] }
 0x3bf   :  { %v1914_v6 = vmul.f32 %v1898_v18, %v4721_v38  ;;  %v1915_v50 = vmul.f32 %v2755_v0, %v1890_v36  ;;  %v6564_v36 = vld [vmem:[#allocation61_spill] sm:$0xff]  ;;  %v6565_v18 = vld [vmem:[#allocation62_spill] sm:$0xff]  ;;  %v6568_v0 = vld [vmem:[#allocation116_spill] sm:$0xff] }
 0x3c0   :  { %v2757_v27 = vpop.eup %2756  ;;  %2762 = vtanh.f32 %v1885_v13  ;;  %v1909_v5 = vmul.f32 0.5, %v1886_v41  ;;  %v6570_v13 = vld [vmem:[#allocation118_spill] sm:$0xff]  ;;  %v6571_v19 = vld [vmem:[#allocation119_spill] sm:$0xff]  ;;  %v6572_v41 = vld [vmem:[#allocation120_spill] sm:$0xff] }
 0x3c1   :  { %v2759_v52 = vpop.eup %2758  ;;  %v5037_v61 = vadd.f32 %v1915_v50, %v1914_v6  ;;  %v1907_v9 = vmul.f32 0.5, %v2757_v27  ;;  %v6573_v6 = vld [vmem:[#allocation121_spill] sm:$0xff]  ;;  %v6574_v50 = vld [vmem:[#allocation122_spill] sm:$0xff]  ;;  %v6575_v27 = vld [vmem:[#allocation123_spill] sm:$0xff] }
 0x3c2   :  { %v2761_v63 = vpop.eup %2760  ;;  %v1893_v21 = vmul.f32 0.5, %v2759_v52  ;;  %2764 = vtanh.f32 %v1909_v5  ;;  %v6576_v5 = vld [vmem:[#allocation124_spill] sm:$0xff]  ;;  %v6577_v52 = vld [vmem:[#allocation125_spill] sm:$0xff] }
 0x3c3   :  { %2766 = vtanh.f32 %v5037_v61  ;;  %v1901_v12 = vmul.f32 0.5, %v2761_v63  ;;  %v1908_v15 = vadd.f32 0.5, %v1907_v9  ;;  %v6578_v63 = vld [vmem:[#allocation126_spill] sm:$0xff]  ;;  %v6581_v9 = vld [vmem:[#allocation129_spill] sm:$0xff] }
 0x3c4   :  { %v1894_v53 = vadd.f32 0.5, %v1893_v21  ;;  %v6579_v21 = vld [vmem:[#allocation127_spill] sm:$0xff] }
 0x3c5   :  { %v1902_v7 = vadd.f32 0.5, %v1901_v12  ;;  %v6580_v12 = vld [vmem:[#allocation128_spill] sm:$0xff] }
 0x3c6   :  { %v2763_v54 = vpop.eup %2762 }
 0x3c7   :  { %v1918_v8 = vmul.f32 %v1902_v7, %v4725_v57  ;;  %v1919_v38 = vmul.f32 %v2763_v54, %v1894_v53  ;;  %v6582_v53 = vld [vmem:[#allocation130_spill] sm:$0xff]  ;;  %v6583_v7 = vld [vmem:[#allocation131_spill] sm:$0xff]  ;;  %v6584_v54 = vld [vmem:[#allocation132_spill] sm:$0xff] }
 0x3c8   :  { %v2765_v31 = vpop.eup %2764 }
 0x3c9   :  { %v2767_v40 = vpop.eup %2766  ;;  %v5041_v16 = vadd.f32 %v1919_v38, %v1918_v8  ;;  %v1911_v55 = vmul.f32 0.5, %v2765_v31  ;;  %v6585_v8 = vld [vmem:[#allocation133_spill] sm:$0xff]  ;;  %v6586_v38 = vld [vmem:[#allocation134_spill] sm:$0xff]  ;;  %v6587_v31 = vld [vmem:[#allocation135_spill] sm:$0xff] }
 0x3ca   :  { %v1922_v17 = vmul.f32 %v2767_v40, %v1908_v15  ;;  %v6588_v15 = vld [vmem:[#allocation136_spill] sm:$0xff]  ;;  %v6589_v40 = vld [vmem:[#allocation137_spill] sm:$0xff] }
 0x3cb   :  { %2768 = vtanh.f32 %v5041_v16  ;;  %v1912_v57 = vadd.f32 0.5, %v1911_v55  ;;  %v6591_v55 = vld [vmem:[#allocation139_spill] sm:$0xff] }
 0x3cc   :  { %1930 = vst [vmem:[#allocation17 + $0x20] sm:$0xff] %v1922_v17  ;;  %1955 = vmatmul.f32.vlgmr.msra.gmra.mxu0 %v1922_v17  ;;  %1975 = vmatmul.f32.vlgmr.msra.gmra.mxu1 %v1922_v17 }
 0x3cd   :  { %1995 = vmatmul.f32.vlgmr.msra.gmra.mxu2 %v1922_v17  ;;  %2015 = vmatmul.f32.vlgmr.msra.gmra.mxu3 %v1922_v17  ;;  %v6590_v17 = vld [vmem:[#allocation138_spill] sm:$0xff] }
 0x3ce   :  { %2165 = vmatpush.msra.mxu0 %v4728_v30  ;;  %2185 = vmatpush.msra.mxu1 %v4731_v59 }
 0x3cf   :  { %2205 = vmatpush.msra.mxu2 %v4734_v25  ;;  %2225 = vmatpush.msra.mxu3 %v4737_v26 }
 0x3d0   :  { %2166 = vmatpush.msra.mxu0 %v4740_v28  ;;  %2186 = vmatpush.msra.mxu1 %v4743_v34 }
 0x3d1   :  { %v2769_v33 = vpop.eup %2768  ;;  %2206 = vmatpush.msra.mxu2 %v4746_v42  ;;  %2226 = vmatpush.msra.mxu3 %v4749_v43 }
 0x3d2   :  { %v1924_v46 = vmul.f32 %v2769_v33, %v1912_v57  ;;  %2167 = vmatpush.msra.mxu0 %v4752_v47  ;;  %2187 = vmatpush.msra.mxu1 %v4755_v48  ;;  %v6592_v57 = vld [vmem:[#allocation140_spill] sm:$0xff]  ;;  %v6593_v33 = vld [vmem:[#allocation141_spill] sm:$0xff] }
 0x3d3   :  { %2207 = vmatpush.msra.mxu2 %v4758_v10  ;;  %2227 = vmatpush.msra.mxu3 %v4761_v23 }
 0x3d4   :  { %1932 = vst [vmem:[#allocation18 + $0x18] sm:$0xff] %v1924_v46  ;;  %2045 = vmatmul.f32.vlgmr.msrb.gmra.mxu0 %v1924_v46  ;;  %2065 = vmatmul.f32.vlgmr.msrb.gmra.mxu1 %v1924_v46 }
 0x3d5   :  { %2085 = vmatmul.f32.vlgmr.msrb.gmra.mxu2 %v1924_v46  ;;  %2105 = vmatmul.f32.vlgmr.msrb.gmra.mxu3 %v1924_v46  ;;  %v6594_v46 = vld [vmem:[#allocation142_spill] sm:$0xff] }
 0x3d6   :  { %2168 = vmatpush.msra.mxu0 %v4764_v4  ;;  %2188 = vmatpush.msra.mxu1 %v4767_v45 }
 0x3d7   :  { %2208 = vmatpush.msra.mxu2 %v4770_v24  ;;  %2228 = vmatpush.msra.mxu3 %v6558_v2 }
 0x3d8   :  { %2169 = vmatpush.msra.mxu0 %v6559_v1  ;;  %2189 = vmatpush.msra.mxu1 %v6560_v62 }
 0x3d9   :  { %2209 = vmatpush.msra.mxu2 %v6561_v3  ;;  %2229 = vmatpush.msra.mxu3 %v6562_v58 }
 0x3da   :  { %2170 = vmatpush.msra.mxu0 %v6563_v37  ;;  %2190 = vmatpush.msra.mxu1 %v6564_v36 }
 0x3db   :  { %2210 = vmatpush.msra.mxu2 %v6565_v18  ;;  %2230 = vmatpush.msra.mxu3 %v6566_v32 }
 0x3dc   :  { %2171 = vmatpush.msra.mxu0 %v6567_v49  ;;  %2191 = vmatpush.msra.mxu1 %v6568_v0 }
 0x3dd   :  { %2211 = vmatpush.msra.mxu2 %v6569_v56  ;;  %2231 = vmatpush.msra.mxu3 %v6570_v13 }
 0x3de   :  { %2172 = vmatpush.msra.mxu0 %v6571_v19  ;;  %2192 = vmatpush.msra.mxu1 %v6572_v41 }
 0x3df   :  { %2212 = vmatpush.msra.mxu2 %v6573_v6  ;;  %2232 = vmatpush.msra.mxu3 %v6574_v50 }
 0x3e0   :  { %2173 = vmatpush.msra.mxu0 %v6575_v27  ;;  %2193 = vmatpush.msra.mxu1 %v6576_v5 }
 0x3e1   :  { %2213 = vmatpush.msra.mxu2 %v6577_v52  ;;  %2233 = vmatpush.msra.mxu3 %v6578_v63 }
 0x3e2   :  { %2174 = vmatpush.msra.mxu0 %v6579_v21  ;;  %2194 = vmatpush.msra.mxu1 %v6580_v12 }
 0x3e3   :  { %2214 = vmatpush.msra.mxu2 %v6581_v9  ;;  %2234 = vmatpush.msra.mxu3 %v6582_v53 }
 0x3e4   :  { %2175 = vmatpush.msra.mxu0 %v6583_v7  ;;  %2195 = vmatpush.msra.mxu1 %v6584_v54  ;;  %v6595_v54 = vld [vmem:[#allocation143_spill] sm:$0xff] }
 0x3e5   :  { %2215 = vmatpush.msra.mxu2 %v6585_v8  ;;  %2235 = vmatpush.msra.mxu3 %v6586_v38  ;;  %v6596_v8 = vld [vmem:[#allocation144_spill] sm:$0xff]  ;;  %v6597_v38 = vld [vmem:[#allocation145_spill] sm:$0xff] }
 0x3e6   :  { %2176 = vmatpush.msra.mxu0 %v6587_v31  ;;  %2196 = vmatpush.msra.mxu1 %v6588_v15  ;;  %v6598_v31 = vld [vmem:[#allocation146_spill] sm:$0xff]  ;;  %v6599_v15 = vld [vmem:[#allocation147_spill] sm:$0xff] }
 0x3e7   :  { %2216 = vmatpush.msra.mxu2 %v6589_v40  ;;  %2236 = vmatpush.msra.mxu3 %v6590_v17  ;;  %v6600_v40 = vld [vmem:[#allocation148_spill] sm:$0xff]  ;;  %v6601_v17 = vld [vmem:[#allocation149_spill] sm:$0xff] }
 0x3e8   :  { %2177 = vmatpush.msra.mxu0 %v6591_v55  ;;  %2197 = vmatpush.msra.mxu1 %v6592_v57  ;;  %v6602_v55 = vld [vmem:[#allocation150_spill] sm:$0xff]  ;;  %v6603_v57 = vld [vmem:[#allocation151_spill] sm:$0xff] }
 0x3e9   :  { %2217 = vmatpush.msra.mxu2 %v6593_v33  ;;  %2237 = vmatpush.msra.mxu3 %v6594_v46  ;;  %v6604_v33 = vld [vmem:[#allocation152_spill] sm:$0xff]  ;;  %v6605_v46 = vld [vmem:[#allocation153_spill] sm:$0xff] }
 0x3ea   :  { %2178 = vmatpush.msra.mxu0 %v6595_v54  ;;  %2198 = vmatpush.msra.mxu1 %v6596_v8  ;;  %v6606_v54 = vld [vmem:[#allocation154_spill] sm:$0xff]  ;;  %v6607_v8 = vld [vmem:[#allocation155_spill] sm:$0xff] }
 0x3eb   :  { %2218 = vmatpush.msra.mxu2 %v6597_v38  ;;  %2238 = vmatpush.msra.mxu3 %v6598_v31  ;;  %v6608_v38 = vld [vmem:[#allocation156_spill] sm:$0xff]  ;;  %v6609_v31 = vld [vmem:[#allocation157_spill] sm:$0xff] }
 0x3ec   :  { %2179 = vmatpush.msra.mxu0 %v6599_v15  ;;  %2199 = vmatpush.msra.mxu1 %v6600_v40  ;;  %v6610_v15 = vld [vmem:[#allocation91_spill] sm:$0xff]  ;;  %v6611_v40 = vld [vmem:[#allocation92_spill] sm:$0xff] }
 0x3ed   :  { %2219 = vmatpush.msra.mxu2 %v6601_v17  ;;  %2239 = vmatpush.msra.mxu3 %v6602_v55  ;;  %v6612_v17 = vld [vmem:[#allocation93_spill] sm:$0xff]  ;;  %v6613_v55 = vld [vmem:[#allocation94_spill] sm:$0xff] }
 0x3ee   :  { %2180 = vmatpush.msra.mxu0 %v6603_v57  ;;  %2200 = vmatpush.msra.mxu1 %v6604_v33  ;;  %v6614_v57 = vld [vmem:[#allocation95_spill] sm:$0xff]  ;;  %v6615_v33 = vld [vmem:[#allocation96_spill] sm:$0xff] }
 0x3ef   :  { %2220 = vmatpush.msra.mxu2 %v6605_v46  ;;  %2240 = vmatpush.msra.mxu3 %v6606_v54  ;;  %v6616_v46 = vld [vmem:[#allocation97_spill] sm:$0xff]  ;;  %v6617_v54 = vld [vmem:[#allocation98_spill] sm:$0xff] }
 0x3f0   :  { %2255 = vmatpush.msrb.mxu0 %v6607_v8  ;;  %2275 = vmatpush.msrb.mxu1 %v6608_v38  ;;  %v6618_v8 = vld [vmem:[#allocation101_spill] sm:$0xff]  ;;  %v6619_v38 = vld [vmem:[#allocation102_spill] sm:$0xff] }
 0x3f1   :  { %2295 = vmatpush.msrb.mxu2 %v6609_v31  ;;  %2315 = vmatpush.msrb.mxu3 %v6610_v15  ;;  %v6620_v31 = vld [vmem:[#allocation69_spill] sm:$0xff] }
 0x3f2   :  { %2256 = vmatpush.msrb.mxu0 %v6611_v40  ;;  %2276 = vmatpush.msrb.mxu1 %v6612_v17 }
 0x3f3   :  { %2296 = vmatpush.msrb.mxu2 %v6613_v55  ;;  %2316 = vmatpush.msrb.mxu3 %v6614_v57  ;;  %v6667_v57 = vld [vmem:[#allocation29_spill] sm:$0xff]  ;;  %v6668_v55 = vld [vmem:[#allocation30_spill] sm:$0xff] }
 0x3f4   :  { %2257 = vmatpush.msrb.mxu0 %v6615_v33  ;;  %2277 = vmatpush.msrb.mxu1 %v6616_v46  ;;  %v5128_v46 = vld [vmem:[#allocation14 + $0x340] sm:$0xff]  ;;  %v356_v17 = vadd.f32 %v6668_v55, %v6552_v11  ;;  %v6671_v11 = vld [vmem:[#allocation49_spill] sm:$0xff] }
 0x3f5   :  { %2297 = vmatpush.msrb.mxu2 %v6617_v54  ;;  %2317 = vmatpush.msrb.mxu3 %v6618_v8  ;;  %6621 = vst [vmem:[#allocation71_spill] sm:$0xff] %v5128_v46  ;;  %v5131_v8 = vld [vmem:[#allocation14 + $0x348] sm:$0xff] }
 0x3f6   :  { %2258 = vmatpush.msrb.mxu0 %v6619_v38  ;;  %2278 = vmatpush.msrb.mxu1 %v6620_v31  ;;  %6622 = vst [vmem:[#allocation72_spill] sm:$0xff] %v5131_v8  ;;  %v5134_v31 = vld [vmem:[#allocation14 + $0x350] sm:$0xff] }
 0x3f7   :  { %2298 = vmatpush.msrb.mxu2 %v4962_v14  ;;  %2318 = vmatpush.msrb.mxu3 %v4965_v39  ;;  %6623 = vst [vmem:[#allocation73_spill] sm:$0xff] %v5134_v31  ;;  %v5137_v39 = vld [vmem:[#allocation14 + $0x358] sm:$0xff] }
 0x3f8   :  { %2259 = vmatpush.msrb.mxu0 %v4968_v44  ;;  %2279 = vmatpush.msrb.mxu1 %v4971_v51  ;;  %6624 = vst [vmem:[#allocation74_spill] sm:$0xff] %v5137_v39  ;;  %v5140_v51 = vld [vmem:[#allocation14 + $0x320] sm:$0xff] }
 0x3f9   :  { %2299 = vmatpush.msrb.mxu2 %v4974_v22  ;;  %2319 = vmatpush.msrb.mxu3 %v4977_v29  ;;  %6625 = vst [vmem:[#allocation75_spill] sm:$0xff] %v5140_v51  ;;  %v5143_v29 = vld [vmem:[#allocation14 + $0x328] sm:$0xff] }
 0x3fa   :  { %2260 = vmatpush.msrb.mxu0 %v5128_v46  ;;  %2280 = vmatpush.msrb.mxu1 %v5131_v8  ;;  %6626 = vst [vmem:[#allocation76_spill] sm:$0xff] %v5143_v29  ;;  %v5146_v46 = vld [vmem:[#allocation14 + $0x330] sm:$0xff]  ;;  %v5149_v8 = vld [vmem:[#allocation14 + $0x338] sm:$0xff] }
 0x3fb   :  { %2300 = vmatpush.msrb.mxu2 %v5134_v31  ;;  %2320 = vmatpush.msrb.mxu3 %v5137_v39  ;;  %6627 = vst [vmem:[#allocation77_spill] sm:$0xff] %v5146_v46  ;;  %v5152_v31 = vld [vmem:[#allocation14 + $0x300] sm:$0xff]  ;;  %v5155_v39 = vld [vmem:[#allocation14 + $0x308] sm:$0xff] }
 0x3fc   :  { %2261 = vmatpush.msrb.mxu0 %v5140_v51  ;;  %2281 = vmatpush.msrb.mxu1 %v5143_v29  ;;  %6628 = vst [vmem:[#allocation78_spill] sm:$0xff] %v5149_v8  ;;  %v5158_v51 = vld [vmem:[#allocation14 + $0x310] sm:$0xff]  ;;  %v5161_v29 = vld [vmem:[#allocation14 + $0x318] sm:$0xff] }
 0x3fd   :  { %2301 = vmatpush.msrb.mxu2 %v5146_v46  ;;  %2321 = vmatpush.msrb.mxu3 %v5149_v8  ;;  %6629 = vst [vmem:[#allocation79_spill] sm:$0xff] %v5152_v31  ;;  %v5164_v46 = vld [vmem:[#allocation14 + $0x2e0] sm:$0xff]  ;;  %v5167_v8 = vld [vmem:[#allocation14 + $0x2e8] sm:$0xff] }
 0x3fe   :  { %2262 = vmatpush.msrb.mxu0 %v5152_v31  ;;  %6630 = vst [vmem:[#allocation80_spill] sm:$0xff] %v5155_v39  ;;  %2282 = vmatpush.msrb.mxu1 %v5155_v39  ;;  %v5170_v31 = vld [vmem:[#allocation14 + $0x2f0] sm:$0xff]  ;;  %v5173_v39 = vld [vmem:[#allocation14 + $0x2f8] sm:$0xff] }
 0x3ff   :  { %6631 = vst [vmem:[#allocation81_spill] sm:$0xff] %v5158_v51  ;;  %2302 = vmatpush.msrb.mxu2 %v5158_v51  ;;  %2322 = vmatpush.msrb.mxu3 %v5161_v29  ;;  %v5176_v51 = vld [vmem:[#allocation14 + $0x2c0] sm:$0xff] }
 0x400   :  { %6632 = vst [vmem:[#allocation82_spill] sm:$0xff] %v5161_v29  ;;  %2263 = vmatpush.msrb.mxu0 %v5164_v46  ;;  %2283 = vmatpush.msrb.mxu1 %v5167_v8  ;;  %v5179_v29 = vld [vmem:[#allocation14 + $0x2c8] sm:$0xff] }
 0x401   :  { %6633 = vst [vmem:[#allocation83_spill] sm:$0xff] %v5164_v46  ;;  %2303 = vmatpush.msrb.mxu2 %v5170_v31  ;;  %2323 = vmatpush.msrb.mxu3 %v5173_v39  ;;  %v5182_v46 = vld [vmem:[#allocation14 + $0x2d0] sm:$0xff] }
 0x402   :  { %6634 = vst [vmem:[#allocation84_spill] sm:$0xff] %v5167_v8  ;;  %2264 = vmatpush.msrb.mxu0 %v5176_v51  ;;  %2284 = vmatpush.msrb.mxu1 %v5179_v29  ;;  %v5185_v8 = vld [vmem:[#allocation14 + $0x2d8] sm:$0xff] }
 0x403   :  { %6635 = vst [vmem:[#allocation85_spill] sm:$0xff] %v5170_v31  ;;  %2304 = vmatpush.msrb.mxu2 %v5182_v46  ;;  %2324 = vmatpush.msrb.mxu3 %v5185_v8  ;;  %v5188_v31 = vld [vmem:[#allocation14 + $0x2a0] sm:$0xff] }
 0x404   :  { %6636 = vst [vmem:[#allocation86_spill] sm:$0xff] %v5173_v39  ;;  %2265 = vmatpush.msrb.mxu0 %v5188_v31  ;;  %v5191_v39 = vld [vmem:[#allocation14 + $0x2a8] sm:$0xff] }
 0x405   :  { %6637 = vst [vmem:[#allocation87_spill] sm:$0xff] %v5176_v51  ;;  %2285 = vmatpush.msrb.mxu1 %v5191_v39  ;;  %v5194_v51 = vld [vmem:[#allocation14 + $0x2b0] sm:$0xff] }
 0x406   :  { %6638 = vst [vmem:[#allocation88_spill] sm:$0xff] %v5179_v29  ;;  %2305 = vmatpush.msrb.mxu2 %v5194_v51  ;;  %v5197_v29 = vld [vmem:[#allocation14 + $0x2b8] sm:$0xff] }
 0x407   :  { %6639 = vst [vmem:[#allocation89_spill] sm:$0xff] %v5182_v46  ;;  %2325 = vmatpush.msrb.mxu3 %v5197_v29  ;;  %v5200_v46 = vld [vmem:[#allocation14 + $0x280] sm:$0xff] }
 0x408   :  { %6640 = vst [vmem:[#allocation90_spill] sm:$0xff] %v5185_v8  ;;  %2266 = vmatpush.msrb.mxu0 %v5200_v46  ;;  %v5203_v8 = vld [vmem:[#allocation14 + $0x288] sm:$0xff] }
 0x409   :  { %6641 = vst [vmem:[#allocation99_spill] sm:$0xff] %v5188_v31  ;;  %2286 = vmatpush.msrb.mxu1 %v5203_v8  ;;  %v5206_v31 = vld [vmem:[#allocation14 + $0x290] sm:$0xff] }
 0x40a   :  { %6642 = vst [vmem:[#allocation158_spill] sm:$0xff] %v5191_v39  ;;  %2306 = vmatpush.msrb.mxu2 %v5206_v31  ;;  %v5209_v39 = vld [vmem:[#allocation14 + $0x298] sm:$0xff] }
 0x40b   :  { %6643 = vst [vmem:[#allocation159_spill] sm:$0xff] %v5194_v51  ;;  %2326 = vmatpush.msrb.mxu3 %v5209_v39  ;;  %v5212_v51 = vld [vmem:[#allocation14 + $0x260] sm:$0xff] }
 0x40c   :  { %6644 = vst [vmem:[#allocation109_spill] sm:$0xff] %v5197_v29  ;;  %2267 = vmatpush.msrb.mxu0 %v5212_v51  ;;  %v5215_v29 = vld [vmem:[#allocation14 + $0x268] sm:$0xff] }
 0x40d   :  { %6645 = vst [vmem:[#allocation110_spill] sm:$0xff] %v5200_v46  ;;  %2287 = vmatpush.msrb.mxu1 %v5215_v29  ;;  %v5218_v46 = vld [vmem:[#allocation14 + $0x270] sm:$0xff] }
 0x40e   :  { %6646 = vst [vmem:[#allocation111_spill] sm:$0xff] %v5203_v8  ;;  %2307 = vmatpush.msrb.mxu2 %v5218_v46  ;;  %v5221_v8 = vld [vmem:[#allocation14 + $0x278] sm:$0xff] }
 0x40f   :  { %6647 = vst [vmem:[#allocation112_spill] sm:$0xff] %v5206_v31  ;;  %2327 = vmatpush.msrb.mxu3 %v5221_v8  ;;  %v5224_v31 = vld [vmem:[#allocation14 + $0x240] sm:$0xff] }
 0x410   :  { %6648 = vst [vmem:[#allocation55_spill] sm:$0xff] %v5209_v39  ;;  %2268 = vmatpush.msrb.mxu0 %v5224_v31  ;;  %v5227_v39 = vld [vmem:[#allocation14 + $0x248] sm:$0xff] }
 0x411   :  { %6649 = vst [vmem:[#allocation56_spill] sm:$0xff] %v5212_v51  ;;  %2288 = vmatpush.msrb.mxu1 %v5227_v39  ;;  %v5230_v51 = vld [vmem:[#allocation14 + $0x250] sm:$0xff] }
 0x412   :  { %6650 = vst [vmem:[#allocation57_spill] sm:$0xff] %v5215_v29  ;;  %2308 = vmatpush.msrb.mxu2 %v5230_v51  ;;  %v5233_v29 = vld [vmem:[#allocation14 + $0x258] sm:$0xff] }
 0x413   :  { %6651 = vst [vmem:[#allocation58_spill] sm:$0xff] %v5218_v46  ;;  %2328 = vmatpush.msrb.mxu3 %v5233_v29  ;;  %v5236_v46 = vld [vmem:[#allocation14 + $0x220] sm:$0xff] }
 0x414   :  { %6652 = vst [vmem:[#allocation160_spill] sm:$0xff] %v5221_v8  ;;  %2269 = vmatpush.msrb.mxu0 %v5236_v46  ;;  %v5239_v8 = vld [vmem:[#allocation14 + $0x228] sm:$0xff] }
 0x415   :  { %6653 = vst [vmem:[#allocation161_spill] sm:$0xff] %v5224_v31  ;;  %2289 = vmatpush.msrb.mxu1 %v5239_v8  ;;  %v5242_v31 = vld [vmem:[#allocation14 + $0x230] sm:$0xff] }
 0x416   :  { %6654 = vst [vmem:[#allocation162_spill] sm:$0xff] %v5227_v39  ;;  %2309 = vmatpush.msrb.mxu2 %v5242_v31  ;;  %v5245_v39 = vld [vmem:[#allocation14 + $0x238] sm:$0xff] }
 0x417   :  { %6655 = vst [vmem:[#allocation163_spill] sm:$0xff] %v5230_v51  ;;  %2329 = vmatpush.msrb.mxu3 %v5245_v39  ;;  %v5248_v51 = vld [vmem:[#allocation14 + $0x200] sm:$0xff] }
 0x418   :  { %6656 = vst [vmem:[#allocation113_spill] sm:$0xff] %v5233_v29  ;;  %2270 = vmatpush.msrb.mxu0 %v5248_v51  ;;  %v5251_v29 = vld [vmem:[#allocation14 + $0x208] sm:$0xff] }
 0x419   :  { %6657 = vst [vmem:[#allocation114_spill] sm:$0xff] %v5236_v46  ;;  %2290 = vmatpush.msrb.mxu1 %v5251_v29  ;;  %v5254_v46 = vld [vmem:[#allocation14 + $0x210] sm:$0xff] }
 0x41a   :  { %6658 = vst [vmem:[#allocation25_spill] sm:$0xff] %v5239_v8  ;;  %2310 = vmatpush.msrb.mxu2 %v5254_v46  ;;  %v5257_v8 = vld [vmem:[#allocation14 + $0x218] sm:$0xff] }
 0x41b   :  { %6659 = vst [vmem:[#allocation26_spill] sm:$0xff] %v5242_v31  ;;  %2330 = vmatpush.msrb.mxu3 %v5257_v8  ;;  %v6665_v31 = vld [vmem:[#allocation27_spill] sm:$0xff] }
 0x41c   :  { %6660 = vst [vmem:[#allocation51_spill] sm:$0xff] %v5245_v39  ;;  %v233_v22 = vadd.f32 %v6665_v31, %v6547_v20  ;;  %v6666_v39 = vld [vmem:[#allocation28_spill] sm:$0xff] }
 0x41d   :  { %6661 = vst [vmem:[#allocation52_spill] sm:$0xff] %v5248_v51  ;;  %v274_v44 = vadd.f32 %v6666_v39, %v6549_v60  ;;  %v6669_v60 = vld [vmem:[#allocation47_spill] sm:$0xff] }
 0x41e   :  { %6662 = vst [vmem:[#allocation53_spill] sm:$0xff] %v5251_v29 }
 0x41f   :  { %6663 = vst [vmem:[#allocation54_spill] sm:$0xff] %v5254_v46  ;;  %v315_v46 = vadd.f32 %v6667_v57, %v6257_v35 }
 0x420   :  { %6664 = vst [vmem:[#allocation105_spill] sm:$0xff] %v5257_v8 }
 0x449   :  { %v1956_v14 = vpop.f32.mrf.mxu0  ;;  %v1976_v51 = vpop.f32.mrf.mxu1 }
 0x44a   :  { %v2019_v38 = vadd.f32 %v1956_v14, %v233_v22  ;;  %v2020_v54 = vadd.f32 %v1976_v51, %v274_v44  ;;  %v6670_v22 = vld [vmem:[#allocation48_spill] sm:$0xff] }
 0x44c   :  { %v2113_v33 = vmul.f32 0.5, %v2019_v38  ;;  %v2121_v29 = vmul.f32 0.5, %v2020_v54 }
 0x44e   :  { %2770 = vtanh.f32 %v2113_v33 }
 0x44f   :  { %2772 = vtanh.f32 %v2121_v29 }
 0x450   :  { %v1996_v8 = vpop.f32.mrf.mxu2  ;;  %v2016_v40 = vpop.f32.mrf.mxu3 }
 0x451   :  { %v2021_v31 = vadd.f32 %v1996_v8, %v315_v46  ;;  %v2022_v20 = vadd.f32 %v2016_v40, %v356_v17  ;;  %v2046_v15 = vpop.f32.mrf.mxu0  ;;  %v2066_v39 = vpop.f32.mrf.mxu1 }
 0x452   :  { %v2109_v7 = vadd.f32 %v2046_v15, %v6669_v60  ;;  %v2110_v51 = vadd.f32 %v2066_v39, %v6670_v22  ;;  %v6672_v15 = vld [vmem:[#allocation50_spill] sm:$0xff] }
 0x453   :  { %2774 = vtanh.f32 %v2021_v31  ;;  %v2131_v14 = vmul.f32 0.5, %v2022_v20 }
 0x454   :  { %v2771_v44 = vpop.eup %2770  ;;  %v2117_v54 = vmul.f32 0.5, %v2109_v7  ;;  %v2125_v38 = vmul.f32 0.5, %v2110_v51 }
 0x455   :  { %v2773_v57 = vpop.eup %2772  ;;  %v2115_v33 = vmul.f32 0.5, %v2771_v44  ;;  %2776 = vtanh.f32 %v2131_v14 }
 0x456   :  { %v2123_v55 = vmul.f32 0.5, %v2773_v57  ;;  %2778 = vtanh.f32 %v2117_v54 }
 0x457   :  { %v2116_v29 = vadd.f32 0.5, %v2115_v33  ;;  %2780 = vtanh.f32 %v2125_v38 }
 0x458   :  { %v2124_v8 = vadd.f32 0.5, %v2123_v55  ;;  %v2086_v40 = vpop.f32.mrf.mxu2  ;;  %v2106_v17 = vpop.f32.mrf.mxu3 }
 0x459   :  { %v2775_v46 = vpop.eup %2774  ;;  %v2111_v60 = vadd.f32 %v2086_v40, %v6671_v11  ;;  %v2112_v39 = vadd.f32 %v2106_v17, %v6672_v15 }
 0x45a   :  { %v2140_v20 = vmul.f32 %v2124_v8, %v5037_v61  ;;  %v2141_v31 = vmul.f32 %v2775_v46, %v2116_v29 }
 0x45b   :  { %v2777_v7 = vpop.eup %2776  ;;  %2782 = vtanh.f32 %v2111_v60  ;;  %v2135_v22 = vmul.f32 0.5, %v2112_v39 }
 0x45c   :  { %v2779_v51 = vpop.eup %2778  ;;  %v5273_v14 = vadd.f32 %v2141_v31, %v2140_v20  ;;  %v2133_v57 = vmul.f32 0.5, %v2777_v7  ;;  %v6713_v31 = vld [vmem:[#allocation63_spill] sm:$0xff]  ;;  %v6714_v7 = vld [vmem:[#allocation64_spill] sm:$0xff] }
 0x45d   :  { %v2781_v44 = vpop.eup %2780  ;;  %v2119_v54 = vmul.f32 0.5, %v2779_v51  ;;  %2784 = vtanh.f32 %v2135_v22  ;;  %v6715_v22 = vld [vmem:[#allocation65_spill] sm:$0xff]  ;;  %v6716_v51 = vld [vmem:[#allocation66_spill] sm:$0xff] }
 0x45e   :  { %2786 = vtanh.f32 %v5273_v14  ;;  %v2127_v38 = vmul.f32 0.5, %v2781_v44  ;;  %v2134_v8 = vadd.f32 0.5, %v2133_v57  ;;  %v6717_v44 = vld [vmem:[#allocation71_spill] sm:$0xff]  ;;  %v6720_v57 = vld [vmem:[#allocation74_spill] sm:$0xff] }
 0x45f   :  { %v2120_v33 = vadd.f32 0.5, %v2119_v54  ;;  %v6718_v54 = vld [vmem:[#allocation72_spill] sm:$0xff] }
 0x460   :  { %v2128_v11 = vadd.f32 0.5, %v2127_v38  ;;  %v6719_v38 = vld [vmem:[#allocation73_spill] sm:$0xff] }
 0x461   :  { %v2783_v55 = vpop.eup %2782 }
 0x462   :  { %v2144_v40 = vmul.f32 %v2128_v11, %v5041_v16  ;;  %v2145_v61 = vmul.f32 %v2783_v55, %v2120_v33  ;;  %v6721_v33 = vld [vmem:[#allocation75_spill] sm:$0xff]  ;;  %v6722_v11 = vld [vmem:[#allocation76_spill] sm:$0xff]  ;;  %v6723_v55 = vld [vmem:[#allocation77_spill] sm:$0xff] }
 0x463   :  { %v2785_v29 = vpop.eup %2784 }
 0x464   :  { %v2787_v17 = vpop.eup %2786  ;;  %v5277_v46 = vadd.f32 %v2145_v61, %v2144_v40  ;;  %v2137_v15 = vmul.f32 0.5, %v2785_v29  ;;  %v6724_v40 = vld [vmem:[#allocation78_spill] sm:$0xff]  ;;  %v6725_v61 = vld [vmem:[#allocation79_spill] sm:$0xff]  ;;  %v6726_v29 = vld [vmem:[#allocation80_spill] sm:$0xff] }
 0x465   :  { %v2148_v60 = vmul.f32 %v2787_v17, %v2134_v8  ;;  %v6727_v8 = vld [vmem:[#allocation81_spill] sm:$0xff]  ;;  %v6728_v17 = vld [vmem:[#allocation82_spill] sm:$0xff] }
 0x466   :  { %2788 = vtanh.f32 %v5277_v46  ;;  %v2138_v16 = vadd.f32 0.5, %v2137_v15  ;;  %v6730_v15 = vld [vmem:[#allocation84_spill] sm:$0xff] }
 0x467   :  { %2156 = vst [vmem:[#allocation17 + $0x28] sm:$0xff] %v2148_v60  ;;  %2181 = vmatmul.f32.vlgmr.msra.gmra.mxu0 %v2148_v60  ;;  %2201 = vmatmul.f32.vlgmr.msra.gmra.mxu1 %v2148_v60 }
 0x468   :  { %2221 = vmatmul.f32.vlgmr.msra.gmra.mxu2 %v2148_v60  ;;  %2241 = vmatmul.f32.vlgmr.msra.gmra.mxu3 %v2148_v60  ;;  %v6729_v60 = vld [vmem:[#allocation83_spill] sm:$0xff] }
 0x469   :  { %2391 = vmatpush.msra.mxu0 %v4728_v30  ;;  %2411 = vmatpush.msra.mxu1 %v4731_v59  ;;  %v6673_v30 = vld [vmem:[#allocation131_spill] sm:$0xff]  ;;  %v6674_v59 = vld [vmem:[#allocation132_spill] sm:$0xff] }
 0x46a   :  { %2431 = vmatpush.msra.mxu2 %v4734_v25  ;;  %2451 = vmatpush.msra.mxu3 %v4737_v26  ;;  %v6675_v25 = vld [vmem:[#allocation133_spill] sm:$0xff]  ;;  %v6676_v26 = vld [vmem:[#allocation134_spill] sm:$0xff] }
 0x46b   :  { %2392 = vmatpush.msra.mxu0 %v4740_v28  ;;  %2412 = vmatpush.msra.mxu1 %v4743_v34  ;;  %v6677_v28 = vld [vmem:[#allocation135_spill] sm:$0xff]  ;;  %v6678_v34 = vld [vmem:[#allocation136_spill] sm:$0xff] }
 0x46c   :  { %v2789_v39 = vpop.eup %2788  ;;  %2432 = vmatpush.msra.mxu2 %v4746_v42  ;;  %2452 = vmatpush.msra.mxu3 %v4749_v43  ;;  %v6679_v42 = vld [vmem:[#allocation137_spill] sm:$0xff]  ;;  %v6680_v43 = vld [vmem:[#allocation138_spill] sm:$0xff] }
 0x46d   :  { %v2150_v20 = vmul.f32 %v2789_v39, %v2138_v16  ;;  %2393 = vmatpush.msra.mxu0 %v4752_v47  ;;  %2413 = vmatpush.msra.mxu1 %v4755_v48  ;;  %v6681_v47 = vld [vmem:[#allocation139_spill] sm:$0xff]  ;;  %v6682_v48 = vld [vmem:[#allocation140_spill] sm:$0xff]  ;;  %v6731_v16 = vld [vmem:[#allocation85_spill] sm:$0xff] }
 0x46e   :  { %2433 = vmatpush.msra.mxu2 %v4758_v10  ;;  %2453 = vmatpush.msra.mxu3 %v4761_v23  ;;  %v6683_v10 = vld [vmem:[#allocation141_spill] sm:$0xff]  ;;  %v6684_v23 = vld [vmem:[#allocation142_spill] sm:$0xff] }
 0x46f   :  { %2158 = vst [vmem:[#allocation18 + $0x10] sm:$0xff] %v2150_v20  ;;  %2271 = vmatmul.f32.vlgmr.msrb.gmra.mxu0 %v2150_v20  ;;  %2291 = vmatmul.f32.vlgmr.msrb.gmra.mxu1 %v2150_v20  ;;  %v6732_v39 = vld [vmem:[#allocation86_spill] sm:$0xff] }
 0x470   :  { %2311 = vmatmul.f32.vlgmr.msrb.gmra.mxu2 %v2150_v20  ;;  %2331 = vmatmul.f32.vlgmr.msrb.gmra.mxu3 %v2150_v20  ;;  %v6733_v20 = vld [vmem:[#allocation87_spill] sm:$0xff] }
 0x471   :  { %2394 = vmatpush.msra.mxu0 %v4764_v4  ;;  %2414 = vmatpush.msra.mxu1 %v4767_v45  ;;  %v6685_v4 = vld [vmem:[#allocation143_spill] sm:$0xff]  ;;  %v6686_v45 = vld [vmem:[#allocation144_spill] sm:$0xff] }
 0x472   :  { %2434 = vmatpush.msra.mxu2 %v4770_v24  ;;  %2454 = vmatpush.msra.mxu3 %v6558_v2  ;;  %v6687_v24 = vld [vmem:[#allocation145_spill] sm:$0xff]  ;;  %v6688_v2 = vld [vmem:[#allocation146_spill] sm:$0xff] }
 0x473   :  { %2395 = vmatpush.msra.mxu0 %v6559_v1  ;;  %2415 = vmatpush.msra.mxu1 %v6560_v62  ;;  %v6689_v1 = vld [vmem:[#allocation147_spill] sm:$0xff]  ;;  %v6690_v62 = vld [vmem:[#allocation148_spill] sm:$0xff] }
 0x474   :  { %2435 = vmatpush.msra.mxu2 %v6561_v3  ;;  %2455 = vmatpush.msra.mxu3 %v6562_v58  ;;  %v6691_v3 = vld [vmem:[#allocation149_spill] sm:$0xff]  ;;  %v6692_v58 = vld [vmem:[#allocation150_spill] sm:$0xff] }
 0x475   :  { %2396 = vmatpush.msra.mxu0 %v6563_v37  ;;  %2416 = vmatpush.msra.mxu1 %v6564_v36  ;;  %v6693_v37 = vld [vmem:[#allocation151_spill] sm:$0xff]  ;;  %v6694_v36 = vld [vmem:[#allocation152_spill] sm:$0xff] }
 0x476   :  { %2436 = vmatpush.msra.mxu2 %v6565_v18  ;;  %2456 = vmatpush.msra.mxu3 %v6566_v32  ;;  %v6695_v18 = vld [vmem:[#allocation153_spill] sm:$0xff]  ;;  %v6696_v32 = vld [vmem:[#allocation154_spill] sm:$0xff] }
 0x477   :  { %2397 = vmatpush.msra.mxu0 %v6567_v49  ;;  %2417 = vmatpush.msra.mxu1 %v6568_v0  ;;  %v6697_v49 = vld [vmem:[#allocation155_spill] sm:$0xff]  ;;  %v6698_v0 = vld [vmem:[#allocation156_spill] sm:$0xff] }
 0x478   :  { %2437 = vmatpush.msra.mxu2 %v6569_v56  ;;  %2457 = vmatpush.msra.mxu3 %v6570_v13  ;;  %v6699_v56 = vld [vmem:[#allocation157_spill] sm:$0xff]  ;;  %v6700_v13 = vld [vmem:[#allocation91_spill] sm:$0xff] }
 0x479   :  { %2398 = vmatpush.msra.mxu0 %v6571_v19  ;;  %2418 = vmatpush.msra.mxu1 %v6572_v41  ;;  %v6701_v19 = vld [vmem:[#allocation92_spill] sm:$0xff]  ;;  %v6702_v41 = vld [vmem:[#allocation93_spill] sm:$0xff] }
 0x47a   :  { %2438 = vmatpush.msra.mxu2 %v6573_v6  ;;  %2458 = vmatpush.msra.mxu3 %v6574_v50  ;;  %v6703_v6 = vld [vmem:[#allocation94_spill] sm:$0xff]  ;;  %v6704_v50 = vld [vmem:[#allocation95_spill] sm:$0xff] }
 0x47b   :  { %2399 = vmatpush.msra.mxu0 %v6575_v27  ;;  %2419 = vmatpush.msra.mxu1 %v6576_v5  ;;  %v6705_v27 = vld [vmem:[#allocation96_spill] sm:$0xff]  ;;  %v6706_v5 = vld [vmem:[#allocation97_spill] sm:$0xff] }
 0x47c   :  { %2439 = vmatpush.msra.mxu2 %v6577_v52  ;;  %2459 = vmatpush.msra.mxu3 %v6578_v63  ;;  %v6707_v52 = vld [vmem:[#allocation98_spill] sm:$0xff]  ;;  %v6708_v63 = vld [vmem:[#allocation101_spill] sm:$0xff] }
 0x47d   :  { %2400 = vmatpush.msra.mxu0 %v6579_v21  ;;  %2420 = vmatpush.msra.mxu1 %v6580_v12  ;;  %v6709_v21 = vld [vmem:[#allocation102_spill] sm:$0xff]  ;;  %v6710_v12 = vld [vmem:[#allocation69_spill] sm:$0xff] }
 0x47e   :  { %2440 = vmatpush.msra.mxu2 %v6581_v9  ;;  %2460 = vmatpush.msra.mxu3 %v6582_v53  ;;  %v6711_v9 = vld [vmem:[#allocation103_spill] sm:$0xff]  ;;  %v6712_v53 = vld [vmem:[#allocation104_spill] sm:$0xff] }
 0x47f   :  { %2401 = vmatpush.msra.mxu0 %v6673_v30  ;;  %2421 = vmatpush.msra.mxu1 %v6674_v59  ;;  %v6734_v30 = vld [vmem:[#allocation88_spill] sm:$0xff]  ;;  %v6735_v59 = vld [vmem:[#allocation89_spill] sm:$0xff] }
 0x480   :  { %2441 = vmatpush.msra.mxu2 %v6675_v25  ;;  %2461 = vmatpush.msra.mxu3 %v6676_v26  ;;  %v6736_v25 = vld [vmem:[#allocation90_spill] sm:$0xff]  ;;  %v6737_v26 = vld [vmem:[#allocation99_spill] sm:$0xff] }
 0x481   :  { %2402 = vmatpush.msra.mxu0 %v6677_v28  ;;  %2422 = vmatpush.msra.mxu1 %v6678_v34  ;;  %v6738_v28 = vld [vmem:[#allocation158_spill] sm:$0xff]  ;;  %v6739_v34 = vld [vmem:[#allocation159_spill] sm:$0xff] }
 0x482   :  { %2442 = vmatpush.msra.mxu2 %v6679_v42  ;;  %2462 = vmatpush.msra.mxu3 %v6680_v43  ;;  %v6740_v42 = vld [vmem:[#allocation109_spill] sm:$0xff]  ;;  %v6741_v43 = vld [vmem:[#allocation110_spill] sm:$0xff] }
 0x483   :  { %2403 = vmatpush.msra.mxu0 %v6681_v47  ;;  %2423 = vmatpush.msra.mxu1 %v6682_v48  ;;  %v6742_v47 = vld [vmem:[#allocation111_spill] sm:$0xff]  ;;  %v6743_v48 = vld [vmem:[#allocation112_spill] sm:$0xff] }
 0x484   :  { %2443 = vmatpush.msra.mxu2 %v6683_v10  ;;  %2463 = vmatpush.msra.mxu3 %v6684_v23  ;;  %v6744_v10 = vld [vmem:[#allocation55_spill] sm:$0xff]  ;;  %v6745_v23 = vld [vmem:[#allocation56_spill] sm:$0xff] }
 0x485   :  { %2404 = vmatpush.msra.mxu0 %v6685_v4  ;;  %2424 = vmatpush.msra.mxu1 %v6686_v45  ;;  %v6746_v4 = vld [vmem:[#allocation57_spill] sm:$0xff]  ;;  %v6747_v45 = vld [vmem:[#allocation58_spill] sm:$0xff] }
 0x486   :  { %2444 = vmatpush.msra.mxu2 %v6687_v24  ;;  %2464 = vmatpush.msra.mxu3 %v6688_v2  ;;  %v6748_v24 = vld [vmem:[#allocation160_spill] sm:$0xff]  ;;  %v6749_v2 = vld [vmem:[#allocation161_spill] sm:$0xff] }
 0x487   :  { %2405 = vmatpush.msra.mxu0 %v6689_v1  ;;  %2425 = vmatpush.msra.mxu1 %v6690_v62  ;;  %v6750_v1 = vld [vmem:[#allocation162_spill] sm:$0xff]  ;;  %v6751_v62 = vld [vmem:[#allocation163_spill] sm:$0xff] }
 0x488   :  { %2445 = vmatpush.msra.mxu2 %v6691_v3  ;;  %2465 = vmatpush.msra.mxu3 %v6692_v58  ;;  %v6752_v3 = vld [vmem:[#allocation113_spill] sm:$0xff]  ;;  %v6753_v58 = vld [vmem:[#allocation114_spill] sm:$0xff] }
 0x489   :  { %2406 = vmatpush.msra.mxu0 %v6693_v37  ;;  %2426 = vmatpush.msra.mxu1 %v6694_v36  ;;  %v6754_v37 = vld [vmem:[#allocation25_spill] sm:$0xff]  ;;  %v6755_v36 = vld [vmem:[#allocation26_spill] sm:$0xff] }
 0x48a   :  { %2446 = vmatpush.msra.mxu2 %v6695_v18  ;;  %2466 = vmatpush.msra.mxu3 %v6696_v32  ;;  %v6756_v18 = vld [vmem:[#allocation51_spill] sm:$0xff]  ;;  %v6757_v32 = vld [vmem:[#allocation52_spill] sm:$0xff] }
 0x48b   :  { %2480 = vmatpush.msrb.mxu0 %v6697_v49  ;;  %2500 = vmatpush.msrb.mxu1 %v6698_v0  ;;  %v6758_v49 = vld [vmem:[#allocation53_spill] sm:$0xff]  ;;  %v6759_v0 = vld [vmem:[#allocation54_spill] sm:$0xff] }
 0x48c   :  { %2520 = vmatpush.msrb.mxu2 %v6699_v56  ;;  %2540 = vmatpush.msrb.mxu3 %v6700_v13  ;;  %v6760_v56 = vld [vmem:[#allocation105_spill] sm:$0xff]  ;;  %v6761_v13 = vld [vmem:[#allocation67_spill] sm:$0xff] }
 0x48d   :  { %2481 = vmatpush.msrb.mxu0 %v6701_v19  ;;  %2501 = vmatpush.msrb.mxu1 %v6702_v41  ;;  %v6762_v19 = vld [vmem:[#allocation31_spill] sm:$0xff] }
 0x48e   :  { %2521 = vmatpush.msrb.mxu2 %v6703_v6  ;;  %2541 = vmatpush.msrb.mxu3 %v6704_v50  ;;  %v236_v41 = vadd.f32 %v6762_v19, %v6761_v13  ;;  %v6763_v6 = vld [vmem:[#allocation68_spill] sm:$0xff] }
 0x48f   :  { %2482 = vmatpush.msrb.mxu0 %v6705_v27  ;;  %2502 = vmatpush.msrb.mxu1 %v6706_v5  ;;  %v6764_v50 = vld [vmem:[#allocation32_spill] sm:$0xff] }
 0x490   :  { %2522 = vmatpush.msrb.mxu2 %v6707_v52  ;;  %2542 = vmatpush.msrb.mxu3 %v6708_v63  ;;  %v277_v27 = vadd.f32 %v6764_v50, %v6763_v6 }
 0x491   :  { %2483 = vmatpush.msrb.mxu0 %v6709_v21  ;;  %2503 = vmatpush.msrb.mxu1 %v6710_v12 }
 0x492   :  { %2523 = vmatpush.msrb.mxu2 %v6711_v9  ;;  %2543 = vmatpush.msrb.mxu3 %v6712_v53  ;;  %v6765_v53 = vld [vmem:[#allocation33_spill] sm:$0xff] }
 0x493   :  { %2484 = vmatpush.msrb.mxu0 %v6713_v31  ;;  %2504 = vmatpush.msrb.mxu1 %v6714_v7  ;;  %v318_v31 = vadd.f32 %v6765_v53, %v6257_v35  ;;  %v6766_v7 = vld [vmem:[#allocation70_spill] sm:$0xff] }
 0x494   :  { %2524 = vmatpush.msrb.mxu2 %v6715_v22  ;;  %2544 = vmatpush.msrb.mxu3 %v6716_v51  ;;  %v6767_v22 = vld [vmem:[#allocation34_spill] sm:$0xff] }
 0x495   :  { %2485 = vmatpush.msrb.mxu0 %v6717_v44  ;;  %2505 = vmatpush.msrb.mxu1 %v6718_v54  ;;  %v359_v51 = vadd.f32 %v6767_v22, %v6766_v7 }
 0x496   :  { %2525 = vmatpush.msrb.mxu2 %v6719_v38  ;;  %2545 = vmatpush.msrb.mxu3 %v6720_v57 }
 0x497   :  { %2486 = vmatpush.msrb.mxu0 %v6721_v33  ;;  %2506 = vmatpush.msrb.mxu1 %v6722_v11 }
 0x498   :  { %2526 = vmatpush.msrb.mxu2 %v6723_v55  ;;  %2546 = vmatpush.msrb.mxu3 %v6724_v40  ;;  %v6768_v55 = vld [vmem:[#allocation43_spill] sm:$0xff] }
 0x499   :  { %2487 = vmatpush.msrb.mxu0 %v6725_v61  ;;  %2507 = vmatpush.msrb.mxu1 %v6726_v29  ;;  %v6769_v61 = vld [vmem:[#allocation44_spill] sm:$0xff] }
 0x49a   :  { %2527 = vmatpush.msrb.mxu2 %v6727_v8  ;;  %2547 = vmatpush.msrb.mxu3 %v6728_v17 }
 0x49b   :  { %2488 = vmatpush.msrb.mxu0 %v6729_v60  ;;  %2508 = vmatpush.msrb.mxu1 %v6730_v15 }
 0x49c   :  { %2528 = vmatpush.msrb.mxu2 %v6731_v16  ;;  %2548 = vmatpush.msrb.mxu3 %v6732_v39 }
 0x49d   :  { %2489 = vmatpush.msrb.mxu0 %v6733_v20  ;;  %2509 = vmatpush.msrb.mxu1 %v6734_v30 }
 0x49e   :  { %2529 = vmatpush.msrb.mxu2 %v6735_v59  ;;  %2549 = vmatpush.msrb.mxu3 %v6736_v25 }
 0x49f   :  { %2490 = vmatpush.msrb.mxu0 %v6737_v26  ;;  %2510 = vmatpush.msrb.mxu1 %v6738_v28 }
 0x4a0   :  { %2530 = vmatpush.msrb.mxu2 %v6739_v34  ;;  %2550 = vmatpush.msrb.mxu3 %v6740_v42  ;;  %v6770_v34 = vld [vmem:[#allocation45_spill] sm:$0xff] }
 0x4a1   :  { %2491 = vmatpush.msrb.mxu0 %v6741_v43  ;;  %2511 = vmatpush.msrb.mxu1 %v6742_v47  ;;  %v6771_v43 = vld [vmem:[#allocation46_spill] sm:$0xff] }
 0x4a2   :  { %2531 = vmatpush.msrb.mxu2 %v6743_v48  ;;  %2551 = vmatpush.msrb.mxu3 %v6744_v10 }
 0x4a3   :  { %2492 = vmatpush.msrb.mxu0 %v6745_v23  ;;  %2512 = vmatpush.msrb.mxu1 %v6746_v4 }
 0x4a4   :  { %2532 = vmatpush.msrb.mxu2 %v6747_v45  ;;  %2552 = vmatpush.msrb.mxu3 %v6748_v24 }
 0x4a5   :  { %2493 = vmatpush.msrb.mxu0 %v6749_v2  ;;  %2513 = vmatpush.msrb.mxu1 %v6750_v1 }
 0x4a6   :  { %2533 = vmatpush.msrb.mxu2 %v6751_v62  ;;  %2553 = vmatpush.msrb.mxu3 %v6752_v3 }
 0x4a7   :  { %2494 = vmatpush.msrb.mxu0 %v6753_v58  ;;  %2514 = vmatpush.msrb.mxu1 %v6754_v37 }
 0x4a8   :  { %2534 = vmatpush.msrb.mxu2 %v6755_v36  ;;  %2554 = vmatpush.msrb.mxu3 %v6756_v18 }
 0x4a9   :  { %2495 = vmatpush.msrb.mxu0 %v6757_v32  ;;  %2515 = vmatpush.msrb.mxu1 %v6758_v49 }
 0x4aa   :  { %2535 = vmatpush.msrb.mxu2 %v6759_v0  ;;  %2555 = vmatpush.msrb.mxu3 %v6760_v56 }
 0x4e4   :  { %v2182_v5 = vpop.f32.mrf.mxu0  ;;  %v2202_v52 = vpop.f32.mrf.mxu1 }
 0x4e5   :  { %v2245_v63 = vadd.f32 %v2182_v5, %v236_v41  ;;  %v2246_v21 = vadd.f32 %v2202_v52, %v277_v27 }
 0x4e7   :  { %v2339_v12 = vmul.f32 0.5, %v2245_v63  ;;  %v2347_v9 = vmul.f32 0.5, %v2246_v21  ;;  %v6773_v63 = vld [vmem:[#allocation36_spill] sm:$0xff] }
 0x4e8   :  { %v280_v21 = vadd.f32 %v6773_v63, %v6763_v6 }
 0x4e9   :  { %2790 = vtanh.f32 %v2339_v12 }
 0x4ea   :  { %2792 = vtanh.f32 %v2347_v9 }
 0x4eb   :  { %v2222_v44 = vpop.f32.mrf.mxu2  ;;  %v2242_v54 = vpop.f32.mrf.mxu3 }
 0x4ec   :  { %v2247_v38 = vadd.f32 %v2222_v44, %v318_v31  ;;  %v2248_v57 = vadd.f32 %v2242_v54, %v359_v51  ;;  %v2272_v33 = vpop.f32.mrf.mxu0  ;;  %v2292_v11 = vpop.f32.mrf.mxu1  ;;  %v6774_v44 = vld [vmem:[#allocation37_spill] sm:$0xff] }
 0x4ed   :  { %v2335_v40 = vadd.f32 %v2272_v33, %v6768_v55  ;;  %v2336_v29 = vadd.f32 %v2292_v11, %v6769_v61  ;;  %v321_v54 = vadd.f32 %v6774_v44, %v6257_v35  ;;  %v6776_v61 = vld [vmem:[#allocation39_spill] sm:$0xff] }
 0x4ee   :  { %2794 = vtanh.f32 %v2247_v38  ;;  %v2357_v8 = vmul.f32 0.5, %v2248_v57  ;;  %v6775_v38 = vld [vmem:[#allocation38_spill] sm:$0xff] }
 0x4ef   :  { %v2791_v17 = vpop.eup %2790  ;;  %v2343_v60 = vmul.f32 0.5, %v2335_v40  ;;  %v2351_v15 = vmul.f32 0.5, %v2336_v29  ;;  %v362_v57 = vadd.f32 %v6775_v38, %v6766_v7 }
 0x4f0   :  { %v2793_v16 = vpop.eup %2792  ;;  %v2341_v39 = vmul.f32 0.5, %v2791_v17  ;;  %2796 = vtanh.f32 %v2357_v8  ;;  %v6777_v8 = vld [vmem:[#allocation40_spill] sm:$0xff] }
 0x4f1   :  { %v2349_v20 = vmul.f32 0.5, %v2793_v16  ;;  %2798 = vtanh.f32 %v2343_v60 }
 0x4f2   :  { %v2342_v30 = vadd.f32 0.5, %v2341_v39  ;;  %2800 = vtanh.f32 %v2351_v15 }
 0x4f3   :  { %v2350_v59 = vadd.f32 0.5, %v2349_v20  ;;  %v2312_v25 = vpop.f32.mrf.mxu2  ;;  %v2332_v26 = vpop.f32.mrf.mxu3 }
 0x4f4   :  { %v2795_v28 = vpop.eup %2794  ;;  %v2337_v42 = vadd.f32 %v2312_v25, %v6770_v34  ;;  %v2338_v47 = vadd.f32 %v2332_v26, %v6771_v43  ;;  %v6778_v34 = vld [vmem:[#allocation41_spill] sm:$0xff]  ;;  %v6779_v43 = vld [vmem:[#allocation42_spill] sm:$0xff] }
 0x4f5   :  { %v2366_v48 = vmul.f32 %v2350_v59, %v5273_v14  ;;  %v2367_v10 = vmul.f32 %v2795_v28, %v2342_v30 }
 0x4f6   :  { %v2797_v23 = vpop.eup %2796  ;;  %2802 = vtanh.f32 %v2337_v42  ;;  %v2361_v4 = vmul.f32 0.5, %v2338_v47 }
 0x4f7   :  { %v2799_v45 = vpop.eup %2798  ;;  %v5421_v24 = vadd.f32 %v2367_v10, %v2366_v48  ;;  %v2359_v3 = vmul.f32 0.5, %v2797_v23 }
 0x4f8   :  { %v2801_v2 = vpop.eup %2800  ;;  %v2345_v1 = vmul.f32 0.5, %v2799_v45  ;;  %2804 = vtanh.f32 %v2361_v4 }
 0x4f9   :  { %2806 = vtanh.f32 %v5421_v24  ;;  %v2353_v62 = vmul.f32 0.5, %v2801_v2  ;;  %v2360_v49 = vadd.f32 0.5, %v2359_v3 }
 0x4fa   :  { %v2346_v58 = vadd.f32 0.5, %v2345_v1 }
 0x4fb   :  { %v2354_v37 = vadd.f32 0.5, %v2353_v62 }
 0x4fc   :  { %v2803_v36 = vpop.eup %2802 }
 0x4fd   :  { %v2370_v18 = vmul.f32 %v2354_v37, %v5277_v46  ;;  %v2371_v14 = vmul.f32 %v2803_v36, %v2346_v58  ;;  %v6772_v46 = vld [vmem:[#allocation35_spill] sm:$0xff] }
 0x4fe   :  { %v2805_v32 = vpop.eup %2804  ;;  %v239_v52 = vadd.f32 %v6772_v46, %v6761_v13 }
 0x4ff   :  { %v2807_v0 = vpop.eup %2806  ;;  %v5425_v56 = vadd.f32 %v2371_v14, %v2370_v18  ;;  %v2363_v41 = vmul.f32 0.5, %v2805_v32 }
 0x500   :  { %v2374_v19 = vmul.f32 %v2807_v0, %v2360_v49 }
 0x501   :  { %2808 = vtanh.f32 %v5425_v56  ;;  %v2364_v50 = vadd.f32 0.5, %v2363_v41 }
 0x502   :  { %2382 = vst [vmem:[#allocation17 + $0x30] sm:$0xff] %v2374_v19  ;;  %2407 = vmatmul.f32.vlgmr.msra.gmra.mxu0 %v2374_v19  ;;  %2427 = vmatmul.f32.vlgmr.msra.gmra.mxu1 %v2374_v19 }
 0x503   :  { %2447 = vmatmul.f32.vlgmr.msra.gmra.mxu2 %v2374_v19  ;;  %2467 = vmatmul.f32.vlgmr.msra.gmra.mxu3 %v2374_v19 }
 0x507   :  { %v2809_v27 = vpop.eup %2808 }
 0x508   :  { %v2376_v5 = vmul.f32 %v2809_v27, %v2364_v50 }
 0x50a   :  { %2384 = vst [vmem:[#allocation18 + $0x8] sm:$0xff] %v2376_v5  ;;  %2496 = vmatmul.f32.vlgmr.msrb.gmra.mxu0 %v2376_v5  ;;  %2516 = vmatmul.f32.vlgmr.msrb.gmra.mxu1 %v2376_v5 }
 0x50b   :  { %2536 = vmatmul.f32.vlgmr.msrb.gmra.mxu2 %v2376_v5  ;;  %2556 = vmatmul.f32.vlgmr.msrb.gmra.mxu3 %v2376_v5 }
 0x57f   :  { %v2408_v12 = vpop.f32.mrf.mxu0  ;;  %v2428_v9 = vpop.f32.mrf.mxu1 }
 0x580   :  { %v2471_v53 = vadd.f32 %v2408_v12, %v239_v52  ;;  %v2472_v31 = vadd.f32 %v2428_v9, %v280_v21 }
 0x582   :  { %v2564_v22 = vmul.f32 0.5, %v2471_v53  ;;  %v2572_v51 = vmul.f32 0.5, %v2472_v31 }
 0x584   :  { %2810 = vtanh.f32 %v2564_v22 }
 0x585   :  { %2812 = vtanh.f32 %v2572_v51 }
 0x586   :  { %v2448_v33 = vpop.f32.mrf.mxu2  ;;  %v2468_v11 = vpop.f32.mrf.mxu3 }
 0x587   :  { %v2473_v13 = vadd.f32 %v2448_v33, %v321_v54  ;;  %v2474_v55 = vadd.f32 %v2468_v11, %v362_v57  ;;  %v2497_v40 = vpop.f32.mrf.mxu0  ;;  %v2517_v6 = vpop.f32.mrf.mxu1 }
 0x588   :  { %v2560_v29 = vadd.f32 %v2497_v40, %v6776_v61  ;;  %v2561_v17 = vadd.f32 %v2517_v6, %v6777_v8 }
 0x589   :  { %2814 = vtanh.f32 %v2473_v13  ;;  %v2582_v60 = vmul.f32 0.5, %v2474_v55 }
 0x58a   :  { %v2811_v15 = vpop.eup %2810  ;;  %v2568_v16 = vmul.f32 0.5, %v2560_v29  ;;  %v2576_v39 = vmul.f32 0.5, %v2561_v17 }
 0x58b   :  { %v2813_v35 = vpop.eup %2812  ;;  %v2566_v20 = vmul.f32 0.5, %v2811_v15  ;;  %2816 = vtanh.f32 %v2582_v60 }
 0x58c   :  { %v2574_v7 = vmul.f32 0.5, %v2813_v35  ;;  %2818 = vtanh.f32 %v2568_v16 }
 0x58d   :  { %v2567_v30 = vadd.f32 0.5, %v2566_v20  ;;  %2820 = vtanh.f32 %v2576_v39 }
 0x58e   :  { %v2575_v59 = vadd.f32 0.5, %v2574_v7  ;;  %v2537_v25 = vpop.f32.mrf.mxu2  ;;  %v2557_v26 = vpop.f32.mrf.mxu3 }
 0x58f   :  { %v2815_v28 = vpop.eup %2814  ;;  %v2562_v42 = vadd.f32 %v2537_v25, %v6778_v34  ;;  %v2563_v47 = vadd.f32 %v2557_v26, %v6779_v43 }
 0x590   :  { %v2591_v48 = vmul.f32 %v2575_v59, %v5421_v24  ;;  %v2592_v10 = vmul.f32 %v2815_v28, %v2567_v30 }
 0x591   :  { %v2817_v23 = vpop.eup %2816  ;;  %2822 = vtanh.f32 %v2562_v42  ;;  %v2586_v4 = vmul.f32 0.5, %v2563_v47 }
 0x592   :  { %v2819_v45 = vpop.eup %2818  ;;  %v2593_v2 = vadd.f32 %v2592_v10, %v2591_v48  ;;  %v2584_v58 = vmul.f32 0.5, %v2817_v23 }
 0x593   :  { %v2821_v1 = vpop.eup %2820  ;;  %v2570_v62 = vmul.f32 0.5, %v2819_v45  ;;  %2824 = vtanh.f32 %v2586_v4 }
 0x594   :  { %2826 = vtanh.f32 %v2593_v2  ;;  %v2578_v3 = vmul.f32 0.5, %v2821_v1  ;;  %v2585_v49 = vadd.f32 0.5, %v2584_v58 }
 0x595   :  { %v2571_v37 = vadd.f32 0.5, %v2570_v62 }
 0x596   :  { %v2579_v36 = vadd.f32 0.5, %v2578_v3 }
 0x597   :  { %v2823_v18 = vpop.eup %2822 }
 0x598   :  { %v2595_v14 = vmul.f32 %v2579_v36, %v5425_v56  ;;  %v2596_v32 = vmul.f32 %v2823_v18, %v2571_v37 }
 0x599   :  { %v2825_v24 = vpop.eup %2824 }
 0x59a   :  { %v2827_v0 = vpop.eup %2826  ;;  %v2597_v19 = vadd.f32 %v2596_v32, %v2595_v14  ;;  %v2588_v50 = vmul.f32 0.5, %v2825_v24 }
 0x59b   :  { %v2599_v41 = vmul.f32 %v2827_v0, %v2585_v49 }
 0x59c   :  { %2828 = vtanh.f32 %v2597_v19  ;;  %v2589_v56 = vadd.f32 0.5, %v2588_v50 }
 0x59d   :  { %2607 = vst [vmem:[#allocation17 + $0x38] sm:$0xff] %v2599_v41 }
 0x59e   :  { %2621 = dma.vmem_to_hbm [thread:$0]  %s2614_s24, 1024, %s2616_s29, [#allocation10], %s3265_s26, %s3265_s26, %s3266_s27  }
 0x5a2   :  { %v2829_v27 = vpop.eup %2828 }
 0x5a3   :  { %v2601_v5 = vmul.f32 %v2829_v27, %v2589_v56 }
 0x5a5   :  { %2608 = vst [vmem:[#allocation18] sm:$0xff] %v2601_v5 }
 0x5a6   :  { %2638 = dma.vmem_to_hbm [thread:$0]  %s2631_s7, 1024, %s2633_s5, [#allocation19], %s3265_s26, %s3265_s26, %s3266_s27  }
 0x5a7   :  { %3260 = dma.done.wait [#allocation10], 1024  }
 0x5a8   :  { %3261 = vsyncadd [#allocation10], 4294966272 }
 0x5a9   :  { %3262 = dma.done.wait [#allocation19], 1024  }
 0x5aa   :  { %3263 = vsyncadd [#allocation19], 4294966272 }
 0x5ab   :  { %2647 = vsyncpa [#allocation9], 1 }
 0x5ac   :  { %2648 = vsyncpa [#allocation12], 1 }
 0x5ad   :  { %2649 = vsyncpa [#allocation15], 1 }
 0x5ae   :  { %2650 = vsyncpa [#allocation10], 1 }
 0x5af   :  { %2651 = vsyncpa [#allocation19], 1 }

</bundles_post_ra>
